<compile_context>
chip_gen: v6e
topology: v6e:2x2x1
jax: 0.10.0
libtpu: 0.0.40
codegen_flags: <defaults>
</compile_context>

<pallas_src>
import jax
import jax.numpy as jnp
from jax import lax
from jax.experimental import pallas as pl
from jax.experimental.pallas import tpu as pltpu


# ---------------------------------------------------------------------------
# Fused forward kernel
# ---------------------------------------------------------------------------
def _net_fused_kernel(x_ref,                    # (B, 28, 28)
                      l1_ref, r1_ref, b1_ref,   # (5,240,28) (5,28,24) (240,1)
                      sr1_ref, sc1_ref,         # (120,239)  (23,12)
                      l2_ref, r2_ref, b2_ref,   # (5,160,120) (5,12,8) (160,1)
                      sr2_ref, sc2_ref,         # (80,159)   (7,4)
                      wf1_ref, bf1_ref,         # (4,50,80)  (50,1)
                      wf2_ref, bf2_ref,         # (2,50)     (2,1)
                      o_ref):                   # (B, 1)
    f32 = jnp.float32

    def mm(a, b):
        return jnp.dot(a, b, preferred_element_type=f32)

    batch = x_ref.shape[0]
    for b in range(batch):                      # B = 2, unrolled
        xb = x_ref[b]                           # (28, 28)

        # ---- conv1 (1->10, k=5): rows = co*24 + i, cols = j ---------------
        c1 = jnp.zeros((240, 24), f32)
        for dx in range(5):
            c1 = c1 + mm(mm(l1_ref[dx], xb), r1_ref[dx])
        c1 = c1 + b1_ref[...]

        # ---- MaxPool(2) + ReLU  ->  (120, 12) ------------------------------
        hm = jnp.maximum(c1[:-1, :], c1[1:, :])          # adjacent-row max
        hv = jnp.maximum(hm[:, :-1], hm[:, 1:])          # adjacent-col max
        a1 = mm(mm(sr1_ref[...], hv), sc1_ref[...])      # 2x down-select
        a1 = jnp.maximum(a1, 0.0)

        # ---- conv2 (10->20, k=5): rows = co*8 + i, cols = j ----------------
        # TODO(synk): nn.Dropout layers run in eval mode (identity) here.
        c2 = jnp.zeros((160, 8), f32)
        for dx in range(5):
            c2 = c2 + mm(mm(l2_ref[dx], a1), r2_ref[dx])
        c2 = c2 + b2_ref[...]

        # ---- MaxPool(2) + ReLU  ->  (80, 4) --------------------------------
        hm2 = jnp.maximum(c2[:-1, :], c2[1:, :])
        hv2 = jnp.maximum(hm2[:, :-1], hm2[:, 1:])
        a2 = jnp.maximum(mm(mm(sr2_ref[...], hv2), sc2_ref[...]), 0.0)

        # ---- fc1(320,50) + ReLU  (view(-1,320) == row-major of a2) ---------
        h = bf1_ref[...]                                  # (50, 1)
        for w in range(4):
            h = h + mm(wf1_ref[w], a2[:, w:w + 1])
        h = jnp.maximum(h, 0.0)

        # ---- fc2(50,2) + softmax(dim=1) + entropy (log-softmax, NaN-free) --
        logits = mm(wf2_ref[...], h) + bf2_ref[...]       # (2, 1)
        l0, l1v = logits[0:1, :], logits[1:2, :]
        m = jnp.maximum(l0, l1v)
        z0, z1 = l0 - m, l1v - m
        logs = jnp.log(jnp.exp(z0) + jnp.exp(z1))
        lp0, lp1 = z0 - logs, z1 - logs
        ent = -(jnp.exp(lp0) * lp0 + jnp.exp(lp1) * lp1)  # (1, 1)

        o_ref[pl.ds(b, 1), :] = ent.astype(o_ref.dtype)


# ---------------------------------------------------------------------------
# Wrapper: single pallas_call, everything whole-array in VMEM
# ---------------------------------------------------------------------------
def _full_spec(shape):
    nd = len(shape)
    return pl.BlockSpec(shape, lambda i, _nd=nd: (0,) * _nd)


def net_forward(x, kp):
    """x: (B, 1, 28, 28) NCHW; kp: dict from prepare_params()."""
    B = x.shape[0]
    x3 = x.reshape(B, x.shape[2], x.shape[3])   # drop Cin=1 (free reshape)
    ops = (x3, kp["L1"], kp["R1"], kp["b1"], kp["Sr1"], kp["Sc1"],
           kp["L2"], kp["R2"], kp["b2"], kp["Sr2"], kp["Sc2"],
           kp["Wf1"], kp["bf1"], kp["Wf2"], kp["bf2"])
    return pl.pallas_call(
        _net_fused_kernel,
        out_shape=jax.ShapeDtypeStruct((B, 1), jnp.float32),
        grid=(1,),
        in_specs=[_full_spec(o.shape) for o in ops],
        out_specs=pl.BlockSpec((B, 1), lambda i: (0, 0)),
        compiler_params=pltpu.CompilerParams(
            dimension_semantics=("arbitrary",)),
    )(*ops)


# ---------------------------------------------------------------------------
# One-time parameter prep (off the hot path): banded conv matrices, pooling
# selectors, channel-major biases, lane-regrouped fc1 weight.
# ---------------------------------------------------------------------------
def prepare_params(params):
    f32 = jnp.float32
    w1 = params["conv1_w"].astype(f32)          # (10, 1, 5, 5)
    w2 = params["conv2_w"].astype(f32)          # (20, 10, 5, 5)

    # conv1: L1[dx][co*24+i, r] = w1[co,0,r-i,dx];  R1[dx][c, j] = (c == j+dx)
    p1 = (jnp.arange(28)[None, :, None]
          == jnp.arange(24)[:, None, None] + jnp.arange(5)[None, None, :])
    L1 = jnp.einsum('cyx,iry->xcir', w1[:, 0], p1.astype(f32)).reshape(5, 240, 28)
    R1 = (jnp.arange(28)[None, :, None]
          == jnp.arange(24)[None, None, :] + jnp.arange(5)[:, None, None]).astype(f32)

    # conv2: L2[dx][co*8+i, ci*12+r] = w2[co,ci,r-i,dx]; R2[dx][c,j] = (c==j+dx)
    p2 = (jnp.arange(12)[None, :, None]
          == jnp.arange(8)[:, None, None] + jnp.arange(5)[None, None, :])
    L2 = jnp.einsum('ocyx,iry->xoicr', w2, p2.astype(f32)).reshape(5, 160, 120)
    R2 = (jnp.arange(12)[None, :, None]
          == jnp.arange(8)[None, None, :] + jnp.arange(5)[:, None, None]).astype(f32)

    # 2x2 max-pool down-selectors (even rows within each channel block / even cols).
    q1 = jnp.arange(120)
    Sr1 = (jnp.arange(239)[None, :]
           == (24 * (q1 // 12) + 2 * (q1 % 12))[:, None]).astype(f32)
    Sc1 = (jnp.arange(23)[:, None] == 2 * jnp.arange(12)[None, :]).astype(f32)
    q2 = jnp.arange(80)
    Sr2 = (jnp.arange(159)[None, :]
           == (8 * (q2 // 4) + 2 * (q2 % 4))[:, None]).astype(f32)
    Sc2 = (jnp.arange(7)[:, None] == 2 * jnp.arange(4)[None, :]).astype(f32)

    # fc1 regrouped so the contraction matches a2's (row=c*4+h, col=w) layout:
    # Wf1[w, n, r] = fc1_w[n, r*4 + w]
    Wf1 = params["fc1_w"].astype(f32).reshape(50, 80, 4).transpose(2, 0, 1)

    return {
        "L1": L1, "R1": R1,
        "b1": jnp.repeat(params["conv1_b"].astype(f32), 24)[:, None],
        "Sr1": Sr1, "Sc1": Sc1,
        "L2": L2, "R2": R2,
        "b2": jnp.repeat(params["conv2_b"].astype(f32), 8)[:, None],
        "Sr2": Sr2, "Sc2": Sc2,
        "Wf1": Wf1, "bf1": params["fc1_b"].astype(f32)[:, None],
        "Wf2": params["fc2_w"].astype(f32),
        "bf2": params["fc2_b"].astype(f32)[:, None],
    }


# ---------------------------------------------------------------------------
# Pure-XLA reference (PyTorch eval-mode semantics) for a correctness check
# ---------------------------------------------------------------------------
def _maxpool2d(x):
    b, c, h, w = x.shape
    return x.reshape(b, c, h // 2, 2, w // 2, 2).max(axis=(3, 5))


def reference_forward(x, params):
    dn = ('NCHW', 'OIHW', 'NCHW')
    prec = lax.Precision.HIGHEST
    h = lax.conv_general_dilated(x, params["conv1_w"], (1, 1), 'VALID',
                                 dimension_numbers=dn, precision=prec)
    h = h + params["conv1_b"][None, :, None, None]
    h = jnp.maximum(_maxpool2d(h), 0.0)
    h = lax.conv_general_dilated(h, params["conv2_w"], (1, 1), 'VALID',
                                 dimension_numbers=dn, precision=prec)
    h = h + params["conv2_b"][None, :, None, None]
    h = jnp.maximum(_maxpool2d(h), 0.0)
    h = h.reshape(-1, 320)
    h = jnp.maximum(jnp.dot(h, params["fc1_w"].T, precision=prec)
                    + params["fc1_b"], 0.0)
    logits = jnp.dot(h, params["fc2_w"].T, precision=prec) + params["fc2_b"]
    logp = jax.nn.log_softmax(logits, axis=1)
    p = jnp.exp(logp)
    return -jnp.sum(p * logp, axis=1, keepdims=True)


def init_params(key):
    ks = jax.random.split(key, 8)
    f32 = jnp.float32
    return {
        "conv1_w": 0.1 * jax.random.normal(ks[0], (10, 1, 5, 5), f32),
        "conv1_b": 0.1 * jax.random.normal(ks[1], (10,), f32),
        "conv2_w": 0.05 * jax.random.normal(ks[2], (20, 10, 5, 5), f32),
        "conv2_b": 0.05 * jax.random.normal(ks[3], (20,), f32),
        "fc1_w": 0.05 * jax.random.normal(ks[4], (50, 320), f32),
        "fc1_b": 0.05 * jax.random.normal(ks[5], (50,), f32),
        "fc2_w": 0.1 * jax.random.normal(ks[6], (2, 50), f32),
        "fc2_b": 0.1 * jax.random.normal(ks[7], (2,), f32),
    }


if __name__ == "__main__":
    key = jax.random.PRNGKey(0)
    k_param, k_x = jax.random.split(key)
    params = init_params(k_param)
    # MNIST-style input: batch=2, 1 channel, 28x28 (required by view(-1, 320)).
    x = jax.random.normal(k_x, (2, 1, 28, 28), jnp.float32)

    kparams = prepare_params(params)            # one-time layout prep
    fwd = jax.jit(net_forward)

    out = jax.block_until_ready(fwd(x, kparams))
    assert out.shape == (2, 1), out.shape
    assert bool(jnp.all(jnp.isfinite(out))), "non-finite output"

    # Correctness check against a pure-XLA reference of the PyTorch module.
    ref = jax.block_until_ready(reference_forward(x, params))
    max_err = float(jnp.max(jnp.abs(out - ref)))
    assert max_err < 5e-3, f"mismatch vs reference: {max_err}"

    print("KERNEL_OK")
</pallas_src>

<mosaic_0001>
module attributes {stable_mosaic.version = 11 : i64} {
  func.func @_net_fused_kernel(%arg0: i32, %arg1: memref<2x28x28xf32, #tpu.memory_space<vmem>>, %arg2: memref<5x240x28xf32, #tpu.memory_space<vmem>>, %arg3: memref<5x28x24xf32, #tpu.memory_space<vmem>>, %arg4: memref<240x1xf32, #tpu.memory_space<vmem>>, %arg5: memref<120x239xf32, #tpu.memory_space<vmem>>, %arg6: memref<23x12xf32, #tpu.memory_space<vmem>>, %arg7: memref<5x160x120xf32, #tpu.memory_space<vmem>>, %arg8: memref<5x12x8xf32, #tpu.memory_space<vmem>>, %arg9: memref<160x1xf32, #tpu.memory_space<vmem>>, %arg10: memref<80x159xf32, #tpu.memory_space<vmem>>, %arg11: memref<7x4xf32, #tpu.memory_space<vmem>>, %arg12: memref<4x50x80xf32, #tpu.memory_space<vmem>>, %arg13: memref<50x1xf32, #tpu.memory_space<vmem>>, %arg14: memref<2x50xf32, #tpu.memory_space<vmem>>, %arg15: memref<2x1xf32, #tpu.memory_space<vmem>>, %arg16: memref<2x1xf32, #tpu.memory_space<vmem>>) attributes {dimension_semantics = [#tpu.dimension_semantics<arbitrary>], iteration_bounds = array<i64: 1>, scalar_prefetch = 0 : i64, scratch_operands = 0 : i64, tpu.core_type = #tpu.core_type<tc>, window_params = [{pipeline_mode = #tpu.pipeline_mode<synchronous>, transform_indices = @transform_0, window_bounds = array<i64: 2, 28, 28>}, {pipeline_mode = #tpu.pipeline_mode<synchronous>, transform_indices = @transform_1, window_bounds = array<i64: 5, 240, 28>}, {pipeline_mode = #tpu.pipeline_mode<synchronous>, transform_indices = @transform_2, window_bounds = array<i64: 5, 28, 24>}, {pipeline_mode = #tpu.pipeline_mode<synchronous>, transform_indices = @transform_3, window_bounds = array<i64: 240, 1>}, {pipeline_mode = #tpu.pipeline_mode<synchronous>, transform_indices = @transform_4, window_bounds = array<i64: 120, 239>}, {pipeline_mode = #tpu.pipeline_mode<synchronous>, transform_indices = @transform_5, window_bounds = array<i64: 23, 12>}, {pipeline_mode = #tpu.pipeline_mode<synchronous>, transform_indices = @transform_6, window_bounds = array<i64: 5, 160, 120>}, {pipeline_mode = #tpu.pipeline_mode<synchronous>, transform_indices = @transform_7, window_bounds = array<i64: 5, 12, 8>}, {pipeline_mode = #tpu.pipeline_mode<synchronous>, transform_indices = @transform_8, window_bounds = array<i64: 160, 1>}, {pipeline_mode = #tpu.pipeline_mode<synchronous>, transform_indices = @transform_9, window_bounds = array<i64: 80, 159>}, {pipeline_mode = #tpu.pipeline_mode<synchronous>, transform_indices = @transform_10, window_bounds = array<i64: 7, 4>}, {pipeline_mode = #tpu.pipeline_mode<synchronous>, transform_indices = @transform_11, window_bounds = array<i64: 4, 50, 80>}, {pipeline_mode = #tpu.pipeline_mode<synchronous>, transform_indices = @transform_12, window_bounds = array<i64: 50, 1>}, {pipeline_mode = #tpu.pipeline_mode<synchronous>, transform_indices = @transform_13, window_bounds = array<i64: 2, 50>}, {pipeline_mode = #tpu.pipeline_mode<synchronous>, transform_indices = @transform_14, window_bounds = array<i64: 2, 1>}, {pipeline_mode = #tpu.pipeline_mode<synchronous>, transform_indices = @transform_15, window_bounds = array<i64: 2, 1>}]} {
    %c0 = arith.constant 0 : index
    %c0_0 = arith.constant 0 : index
    %c0_1 = arith.constant 0 : index
    %0 = vector.load %arg1[%c0, %c0_0, %c0_1] : memref<2x28x28xf32, #tpu.memory_space<vmem>>, vector<1x28x28xf32>
    %1 = vector.shape_cast %0 : vector<1x28x28xf32> to vector<28x28xf32>
    %cst = arith.constant 0.000000e+00 : f32
    %2 = vector.broadcast %cst : f32 to vector<240x24xf32>
    %c0_2 = arith.constant 0 : index
    %c0_3 = arith.constant 0 : index
    %c0_4 = arith.constant 0 : index
    %3 = vector.load %arg2[%c0_2, %c0_3, %c0_4] : memref<5x240x28xf32, #tpu.memory_space<vmem>>, vector<1x240x28xf32>
    %4 = vector.shape_cast %3 : vector<1x240x28xf32> to vector<240x28xf32>
    %cst_5 = arith.constant dense<0.000000e+00> : vector<240x28xf32>
    %5 = tpu.matmul %4, %1, %cst_5 {dimension_numbers = #tpu.dot_dimension_numbers<[1], [0], [0], [1], [0, 0, 1, 1], [], []>} : vector<240x28xf32>, vector<28x28xf32>, vector<240x28xf32> -> vector<240x28xf32>
    %c0_6 = arith.constant 0 : index
    %c0_7 = arith.constant 0 : index
    %c0_8 = arith.constant 0 : index
    %6 = vector.load %arg3[%c0_6, %c0_7, %c0_8] : memref<5x28x24xf32, #tpu.memory_space<vmem>>, vector<1x28x24xf32>
    %7 = vector.shape_cast %6 : vector<1x28x24xf32> to vector<28x24xf32>
    %cst_9 = arith.constant dense<0.000000e+00> : vector<240x24xf32>
    %8 = tpu.matmul %5, %7, %cst_9 {dimension_numbers = #tpu.dot_dimension_numbers<[1], [0], [0], [1], [0, 0, 1, 1], [], []>} : vector<240x28xf32>, vector<28x24xf32>, vector<240x24xf32> -> vector<240x24xf32>
    %9 = arith.addf %2, %8 : vector<240x24xf32>
    %c1 = arith.constant 1 : index
    %c0_10 = arith.constant 0 : index
    %c0_11 = arith.constant 0 : index
    %10 = vector.load %arg2[%c1, %c0_10, %c0_11] : memref<5x240x28xf32, #tpu.memory_space<vmem>>, vector<1x240x28xf32>
    %11 = vector.shape_cast %10 : vector<1x240x28xf32> to vector<240x28xf32>
    %cst_12 = arith.constant dense<0.000000e+00> : vector<240x28xf32>
    %12 = tpu.matmul %11, %1, %cst_12 {dimension_numbers = #tpu.dot_dimension_numbers<[1], [0], [0], [1], [0, 0, 1, 1], [], []>} : vector<240x28xf32>, vector<28x28xf32>, vector<240x28xf32> -> vector<240x28xf32>
    %c1_13 = arith.constant 1 : index
    %c0_14 = arith.constant 0 : index
    %c0_15 = arith.constant 0 : index
    %13 = vector.load %arg3[%c1_13, %c0_14, %c0_15] : memref<5x28x24xf32, #tpu.memory_space<vmem>>, vector<1x28x24xf32>
    %14 = vector.shape_cast %13 : vector<1x28x24xf32> to vector<28x24xf32>
    %cst_16 = arith.constant dense<0.000000e+00> : vector<240x24xf32>
    %15 = tpu.matmul %12, %14, %cst_16 {dimension_numbers = #tpu.dot_dimension_numbers<[1], [0], [0], [1], [0, 0, 1, 1], [], []>} : vector<240x28xf32>, vector<28x24xf32>, vector<240x24xf32> -> vector<240x24xf32>
    %16 = arith.addf %9, %15 : vector<240x24xf32>
    %c2 = arith.constant 2 : index
    %c0_17 = arith.constant 0 : index
    %c0_18 = arith.constant 0 : index
    %17 = vector.load %arg2[%c2, %c0_17, %c0_18] : memref<5x240x28xf32, #tpu.memory_space<vmem>>, vector<1x240x28xf32>
    %18 = vector.shape_cast %17 : vector<1x240x28xf32> to vector<240x28xf32>
    %cst_19 = arith.constant dense<0.000000e+00> : vector<240x28xf32>
    %19 = tpu.matmul %18, %1, %cst_19 {dimension_numbers = #tpu.dot_dimension_numbers<[1], [0], [0], [1], [0, 0, 1, 1], [], []>} : vector<240x28xf32>, vector<28x28xf32>, vector<240x28xf32> -> vector<240x28xf32>
    %c2_20 = arith.constant 2 : index
    %c0_21 = arith.constant 0 : index
    %c0_22 = arith.constant 0 : index
    %20 = vector.load %arg3[%c2_20, %c0_21, %c0_22] : memref<5x28x24xf32, #tpu.memory_space<vmem>>, vector<1x28x24xf32>
    %21 = vector.shape_cast %20 : vector<1x28x24xf32> to vector<28x24xf32>
    %cst_23 = arith.constant dense<0.000000e+00> : vector<240x24xf32>
    %22 = tpu.matmul %19, %21, %cst_23 {dimension_numbers = #tpu.dot_dimension_numbers<[1], [0], [0], [1], [0, 0, 1, 1], [], []>} : vector<240x28xf32>, vector<28x24xf32>, vector<240x24xf32> -> vector<240x24xf32>
    %23 = arith.addf %16, %22 : vector<240x24xf32>
    %c3 = arith.constant 3 : index
    %c0_24 = arith.constant 0 : index
    %c0_25 = arith.constant 0 : index
    %24 = vector.load %arg2[%c3, %c0_24, %c0_25] : memref<5x240x28xf32, #tpu.memory_space<vmem>>, vector<1x240x28xf32>
    %25 = vector.shape_cast %24 : vector<1x240x28xf32> to vector<240x28xf32>
    %cst_26 = arith.constant dense<0.000000e+00> : vector<240x28xf32>
    %26 = tpu.matmul %25, %1, %cst_26 {dimension_numbers = #tpu.dot_dimension_numbers<[1], [0], [0], [1], [0, 0, 1, 1], [], []>} : vector<240x28xf32>, vector<28x28xf32>, vector<240x28xf32> -> vector<240x28xf32>
    %c3_27 = arith.constant 3 : index
    %c0_28 = arith.constant 0 : index
    %c0_29 = arith.constant 0 : index
    %27 = vector.load %arg3[%c3_27, %c0_28, %c0_29] : memref<5x28x24xf32, #tpu.memory_space<vmem>>, vector<1x28x24xf32>
    %28 = vector.shape_cast %27 : vector<1x28x24xf32> to vector<28x24xf32>
    %cst_30 = arith.constant dense<0.000000e+00> : vector<240x24xf32>
    %29 = tpu.matmul %26, %28, %cst_30 {dimension_numbers = #tpu.dot_dimension_numbers<[1], [0], [0], [1], [0, 0, 1, 1], [], []>} : vector<240x28xf32>, vector<28x24xf32>, vector<240x24xf32> -> vector<240x24xf32>
    %30 = arith.addf %23, %29 : vector<240x24xf32>
    %c4 = arith.constant 4 : index
    %c0_31 = arith.constant 0 : index
    %c0_32 = arith.constant 0 : index
    %31 = vector.load %arg2[%c4, %c0_31, %c0_32] : memref<5x240x28xf32, #tpu.memory_space<vmem>>, vector<1x240x28xf32>
    %32 = vector.shape_cast %31 : vector<1x240x28xf32> to vector<240x28xf32>
    %cst_33 = arith.constant dense<0.000000e+00> : vector<240x28xf32>
    %33 = tpu.matmul %32, %1, %cst_33 {dimension_numbers = #tpu.dot_dimension_numbers<[1], [0], [0], [1], [0, 0, 1, 1], [], []>} : vector<240x28xf32>, vector<28x28xf32>, vector<240x28xf32> -> vector<240x28xf32>
    %c4_34 = arith.constant 4 : index
    %c0_35 = arith.constant 0 : index
    %c0_36 = arith.constant 0 : index
    %34 = vector.load %arg3[%c4_34, %c0_35, %c0_36] : memref<5x28x24xf32, #tpu.memory_space<vmem>>, vector<1x28x24xf32>
    %35 = vector.shape_cast %34 : vector<1x28x24xf32> to vector<28x24xf32>
    %cst_37 = arith.constant dense<0.000000e+00> : vector<240x24xf32>
    %36 = tpu.matmul %33, %35, %cst_37 {dimension_numbers = #tpu.dot_dimension_numbers<[1], [0], [0], [1], [0, 0, 1, 1], [], []>} : vector<240x28xf32>, vector<28x24xf32>, vector<240x24xf32> -> vector<240x24xf32>
    %37 = arith.addf %30, %36 : vector<240x24xf32>
    %c0_38 = arith.constant 0 : index
    %c0_39 = arith.constant 0 : index
    %38 = vector.load %arg4[%c0_38, %c0_39] : memref<240x1xf32, #tpu.memory_space<vmem>>, vector<240x1xf32>
    %39 = vector.broadcast %38 : vector<240x1xf32> to vector<240x24xf32>
    %40 = arith.addf %37, %39 : vector<240x24xf32>
    %41 = vector.extract_strided_slice %40 {offsets = [0, 0], sizes = [239, 24], strides = [1, 1]} : vector<240x24xf32> to vector<239x24xf32>
    %42 = vector.extract_strided_slice %40 {offsets = [1, 0], sizes = [239, 24], strides = [1, 1]} : vector<240x24xf32> to vector<239x24xf32>
    %43 = arith.maximumf %41, %42 : vector<239x24xf32>
    %44 = vector.extract_strided_slice %43 {offsets = [0, 0], sizes = [239, 23], strides = [1, 1]} : vector<239x24xf32> to vector<239x23xf32>
    %45 = vector.extract_strided_slice %43 {offsets = [0, 1], sizes = [239, 23], strides = [1, 1]} : vector<239x24xf32> to vector<239x23xf32>
    %46 = arith.maximumf %44, %45 : vector<239x23xf32>
    %c0_40 = arith.constant 0 : index
    %c0_41 = arith.constant 0 : index
    %47 = vector.load %arg5[%c0_40, %c0_41] : memref<120x239xf32, #tpu.memory_space<vmem>>, vector<120x239xf32>
    %cst_42 = arith.constant dense<0.000000e+00> : vector<120x23xf32>
    %48 = tpu.matmul %47, %46, %cst_42 {dimension_numbers = #tpu.dot_dimension_numbers<[1], [0], [0], [1], [0, 0, 1, 1], [], []>} : vector<120x239xf32>, vector<239x23xf32>, vector<120x23xf32> -> vector<120x23xf32>
    %c0_43 = arith.constant 0 : index
    %c0_44 = arith.constant 0 : index
    %49 = vector.load %arg6[%c0_43, %c0_44] : memref<23x12xf32, #tpu.memory_space<vmem>>, vector<23x12xf32>
    %cst_45 = arith.constant dense<0.000000e+00> : vector<120x12xf32>
    %50 = tpu.matmul %48, %49, %cst_45 {dimension_numbers = #tpu.dot_dimension_numbers<[1], [0], [0], [1], [0, 0, 1, 1], [], []>} : vector<120x23xf32>, vector<23x12xf32>, vector<120x12xf32> -> vector<120x12xf32>
    %cst_46 = arith.constant 0.000000e+00 : f32
    %51 = vector.broadcast %cst_46 : f32 to vector<120x12xf32>
    %52 = arith.maximumf %50, %51 : vector<120x12xf32>
    %cst_47 = arith.constant 0.000000e+00 : f32
    %53 = vector.broadcast %cst_47 : f32 to vector<160x8xf32>
    %c0_48 = arith.constant 0 : index
    %c0_49 = arith.constant 0 : index
    %c0_50 = arith.constant 0 : index
    %54 = vector.load %arg7[%c0_48, %c0_49, %c0_50] : memref<5x160x120xf32, #tpu.memory_space<vmem>>, vector<1x160x120xf32>
    %55 = vector.shape_cast %54 : vector<1x160x120xf32> to vector<160x120xf32>
    %cst_51 = arith.constant dense<0.000000e+00> : vector<160x12xf32>
    %56 = tpu.matmul %55, %52, %cst_51 {dimension_numbers = #tpu.dot_dimension_numbers<[1], [0], [0], [1], [0, 0, 1, 1], [], []>} : vector<160x120xf32>, vector<120x12xf32>, vector<160x12xf32> -> vector<160x12xf32>
    %c0_52 = arith.constant 0 : index
    %c0_53 = arith.constant 0 : index
    %c0_54 = arith.constant 0 : index
    %57 = vector.load %arg8[%c0_52, %c0_53, %c0_54] : memref<5x12x8xf32, #tpu.memory_space<vmem>>, vector<1x12x8xf32>
    %58 = vector.shape_cast %57 : vector<1x12x8xf32> to vector<12x8xf32>
    %cst_55 = arith.constant dense<0.000000e+00> : vector<160x8xf32>
    %59 = tpu.matmul %56, %58, %cst_55 {dimension_numbers = #tpu.dot_dimension_numbers<[1], [0], [0], [1], [0, 0, 1, 1], [], []>} : vector<160x12xf32>, vector<12x8xf32>, vector<160x8xf32> -> vector<160x8xf32>
    %60 = arith.addf %53, %59 : vector<160x8xf32>
    %c1_56 = arith.constant 1 : index
    %c0_57 = arith.constant 0 : index
    %c0_58 = arith.constant 0 : index
    %61 = vector.load %arg7[%c1_56, %c0_57, %c0_58] : memref<5x160x120xf32, #tpu.memory_space<vmem>>, vector<1x160x120xf32>
    %62 = vector.shape_cast %61 : vector<1x160x120xf32> to vector<160x120xf32>
    %cst_59 = arith.constant dense<0.000000e+00> : vector<160x12xf32>
    %63 = tpu.matmul %62, %52, %cst_59 {dimension_numbers = #tpu.dot_dimension_numbers<[1], [0], [0], [1], [0, 0, 1, 1], [], []>} : vector<160x120xf32>, vector<120x12xf32>, vector<160x12xf32> -> vector<160x12xf32>
    %c1_60 = arith.constant 1 : index
    %c0_61 = arith.constant 0 : index
    %c0_62 = arith.constant 0 : index
    %64 = vector.load %arg8[%c1_60, %c0_61, %c0_62] : memref<5x12x8xf32, #tpu.memory_space<vmem>>, vector<1x12x8xf32>
    %65 = vector.shape_cast %64 : vector<1x12x8xf32> to vector<12x8xf32>
    %cst_63 = arith.constant dense<0.000000e+00> : vector<160x8xf32>
    %66 = tpu.matmul %63, %65, %cst_63 {dimension_numbers = #tpu.dot_dimension_numbers<[1], [0], [0], [1], [0, 0, 1, 1], [], []>} : vector<160x12xf32>, vector<12x8xf32>, vector<160x8xf32> -> vector<160x8xf32>
    %67 = arith.addf %60, %66 : vector<160x8xf32>
    %c2_64 = arith.constant 2 : index
    %c0_65 = arith.constant 0 : index
    %c0_66 = arith.constant 0 : index
    %68 = vector.load %arg7[%c2_64, %c0_65, %c0_66] : memref<5x160x120xf32, #tpu.memory_space<vmem>>, vector<1x160x120xf32>
    %69 = vector.shape_cast %68 : vector<1x160x120xf32> to vector<160x120xf32>
    %cst_67 = arith.constant dense<0.000000e+00> : vector<160x12xf32>
    %70 = tpu.matmul %69, %52, %cst_67 {dimension_numbers = #tpu.dot_dimension_numbers<[1], [0], [0], [1], [0, 0, 1, 1], [], []>} : vector<160x120xf32>, vector<120x12xf32>, vector<160x12xf32> -> vector<160x12xf32>
    %c2_68 = arith.constant 2 : index
    %c0_69 = arith.constant 0 : index
    %c0_70 = arith.constant 0 : index
    %71 = vector.load %arg8[%c2_68, %c0_69, %c0_70] : memref<5x12x8xf32, #tpu.memory_space<vmem>>, vector<1x12x8xf32>
    %72 = vector.shape_cast %71 : vector<1x12x8xf32> to vector<12x8xf32>
    %cst_71 = arith.constant dense<0.000000e+00> : vector<160x8xf32>
    %73 = tpu.matmul %70, %72, %cst_71 {dimension_numbers = #tpu.dot_dimension_numbers<[1], [0], [0], [1], [0, 0, 1, 1], [], []>} : vector<160x12xf32>, vector<12x8xf32>, vector<160x8xf32> -> vector<160x8xf32>
    %74 = arith.addf %67, %73 : vector<160x8xf32>
    %c3_72 = arith.constant 3 : index
    %c0_73 = arith.constant 0 : index
    %c0_74 = arith.constant 0 : index
    %75 = vector.load %arg7[%c3_72, %c0_73, %c0_74] : memref<5x160x120xf32, #tpu.memory_space<vmem>>, vector<1x160x120xf32>
    %76 = vector.shape_cast %75 : vector<1x160x120xf32> to vector<160x120xf32>
    %cst_75 = arith.constant dense<0.000000e+00> : vector<160x12xf32>
    %77 = tpu.matmul %76, %52, %cst_75 {dimension_numbers = #tpu.dot_dimension_numbers<[1], [0], [0], [1], [0, 0, 1, 1], [], []>} : vector<160x120xf32>, vector<120x12xf32>, vector<160x12xf32> -> vector<160x12xf32>
    %c3_76 = arith.constant 3 : index
    %c0_77 = arith.constant 0 : index
    %c0_78 = arith.constant 0 : index
    %78 = vector.load %arg8[%c3_76, %c0_77, %c0_78] : memref<5x12x8xf32, #tpu.memory_space<vmem>>, vector<1x12x8xf32>
    %79 = vector.shape_cast %78 : vector<1x12x8xf32> to vector<12x8xf32>
    %cst_79 = arith.constant dense<0.000000e+00> : vector<160x8xf32>
    %80 = tpu.matmul %77, %79, %cst_79 {dimension_numbers = #tpu.dot_dimension_numbers<[1], [0], [0], [1], [0, 0, 1, 1], [], []>} : vector<160x12xf32>, vector<12x8xf32>, vector<160x8xf32> -> vector<160x8xf32>
    %81 = arith.addf %74, %80 : vector<160x8xf32>
    %c4_80 = arith.constant 4 : index
    %c0_81 = arith.constant 0 : index
    %c0_82 = arith.constant 0 : index
    %82 = vector.load %arg7[%c4_80, %c0_81, %c0_82] : memref<5x160x120xf32, #tpu.memory_space<vmem>>, vector<1x160x120xf32>
    %83 = vector.shape_cast %82 : vector<1x160x120xf32> to vector<160x120xf32>
    %cst_83 = arith.constant dense<0.000000e+00> : vector<160x12xf32>
    %84 = tpu.matmul %83, %52, %cst_83 {dimension_numbers = #tpu.dot_dimension_numbers<[1], [0], [0], [1], [0, 0, 1, 1], [], []>} : vector<160x120xf32>, vector<120x12xf32>, vector<160x12xf32> -> vector<160x12xf32>
    %c4_84 = arith.constant 4 : index
    %c0_85 = arith.constant 0 : index
    %c0_86 = arith.constant 0 : index
    %85 = vector.load %arg8[%c4_84, %c0_85, %c0_86] : memref<5x12x8xf32, #tpu.memory_space<vmem>>, vector<1x12x8xf32>
    %86 = vector.shape_cast %85 : vector<1x12x8xf32> to vector<12x8xf32>
    %cst_87 = arith.constant dense<0.000000e+00> : vector<160x8xf32>
    %87 = tpu.matmul %84, %86, %cst_87 {dimension_numbers = #tpu.dot_dimension_numbers<[1], [0], [0], [1], [0, 0, 1, 1], [], []>} : vector<160x12xf32>, vector<12x8xf32>, vector<160x8xf32> -> vector<160x8xf32>
    %88 = arith.addf %81, %87 : vector<160x8xf32>
    %c0_88 = arith.constant 0 : index
    %c0_89 = arith.constant 0 : index
    %89 = vector.load %arg9[%c0_88, %c0_89] : memref<160x1xf32, #tpu.memory_space<vmem>>, vector<160x1xf32>
    %90 = vector.broadcast %89 : vector<160x1xf32> to vector<160x8xf32>
    %91 = arith.addf %88, %90 : vector<160x8xf32>
    %92 = vector.extract_strided_slice %91 {offsets = [0, 0], sizes = [159, 8], strides = [1, 1]} : vector<160x8xf32> to vector<159x8xf32>
    %93 = vector.extract_strided_slice %91 {offsets = [1, 0], sizes = [159, 8], strides = [1, 1]} : vector<160x8xf32> to vector<159x8xf32>
    %94 = arith.maximumf %92, %93 : vector<159x8xf32>
    %95 = vector.extract_strided_slice %94 {offsets = [0, 0], sizes = [159, 7], strides = [1, 1]} : vector<159x8xf32> to vector<159x7xf32>
    %96 = vector.extract_strided_slice %94 {offsets = [0, 1], sizes = [159, 7], strides = [1, 1]} : vector<159x8xf32> to vector<159x7xf32>
    %97 = arith.maximumf %95, %96 : vector<159x7xf32>
    %c0_90 = arith.constant 0 : index
    %c0_91 = arith.constant 0 : index
    %98 = vector.load %arg10[%c0_90, %c0_91] : memref<80x159xf32, #tpu.memory_space<vmem>>, vector<80x159xf32>
    %cst_92 = arith.constant dense<0.000000e+00> : vector<80x7xf32>
    %99 = tpu.matmul %98, %97, %cst_92 {dimension_numbers = #tpu.dot_dimension_numbers<[1], [0], [0], [1], [0, 0, 1, 1], [], []>} : vector<80x159xf32>, vector<159x7xf32>, vector<80x7xf32> -> vector<80x7xf32>
    %c0_93 = arith.constant 0 : index
    %c0_94 = arith.constant 0 : index
    %100 = vector.load %arg11[%c0_93, %c0_94] : memref<7x4xf32, #tpu.memory_space<vmem>>, vector<7x4xf32>
    %cst_95 = arith.constant dense<0.000000e+00> : vector<80x4xf32>
    %101 = tpu.matmul %99, %100, %cst_95 {dimension_numbers = #tpu.dot_dimension_numbers<[1], [0], [0], [1], [0, 0, 1, 1], [], []>} : vector<80x7xf32>, vector<7x4xf32>, vector<80x4xf32> -> vector<80x4xf32>
    %cst_96 = arith.constant 0.000000e+00 : f32
    %102 = vector.broadcast %cst_96 : f32 to vector<80x4xf32>
    %103 = arith.maximumf %101, %102 : vector<80x4xf32>
    %c0_97 = arith.constant 0 : index
    %c0_98 = arith.constant 0 : index
    %104 = vector.load %arg13[%c0_97, %c0_98] : memref<50x1xf32, #tpu.memory_space<vmem>>, vector<50x1xf32>
    %c0_99 = arith.constant 0 : index
    %c0_100 = arith.constant 0 : index
    %c0_101 = arith.constant 0 : index
    %105 = vector.load %arg12[%c0_99, %c0_100, %c0_101] : memref<4x50x80xf32, #tpu.memory_space<vmem>>, vector<1x50x80xf32>
    %106 = vector.shape_cast %105 : vector<1x50x80xf32> to vector<50x80xf32>
    %107 = vector.extract_strided_slice %103 {offsets = [0, 0], sizes = [80, 1], strides = [1, 1]} : vector<80x4xf32> to vector<80x1xf32>
    %cst_102 = arith.constant dense<0.000000e+00> : vector<50x1xf32>
    %108 = tpu.matmul %106, %107, %cst_102 {dimension_numbers = #tpu.dot_dimension_numbers<[1], [0], [0], [1], [0, 0, 1, 1], [], []>} : vector<50x80xf32>, vector<80x1xf32>, vector<50x1xf32> -> vector<50x1xf32>
    %109 = arith.addf %104, %108 : vector<50x1xf32>
    %c1_103 = arith.constant 1 : index
    %c0_104 = arith.constant 0 : index
    %c0_105 = arith.constant 0 : index
    %110 = vector.load %arg12[%c1_103, %c0_104, %c0_105] : memref<4x50x80xf32, #tpu.memory_space<vmem>>, vector<1x50x80xf32>
    %111 = vector.shape_cast %110 : vector<1x50x80xf32> to vector<50x80xf32>
    %112 = vector.extract_strided_slice %103 {offsets = [0, 1], sizes = [80, 1], strides = [1, 1]} : vector<80x4xf32> to vector<80x1xf32>
    %cst_106 = arith.constant dense<0.000000e+00> : vector<50x1xf32>
    %113 = tpu.matmul %111, %112, %cst_106 {dimension_numbers = #tpu.dot_dimension_numbers<[1], [0], [0], [1], [0, 0, 1, 1], [], []>} : vector<50x80xf32>, vector<80x1xf32>, vector<50x1xf32> -> vector<50x1xf32>
    %114 = arith.addf %109, %113 : vector<50x1xf32>
    %c2_107 = arith.constant 2 : index
    %c0_108 = arith.constant 0 : index
    %c0_109 = arith.constant 0 : index
    %115 = vector.load %arg12[%c2_107, %c0_108, %c0_109] : memref<4x50x80xf32, #tpu.memory_space<vmem>>, vector<1x50x80xf32>
    %116 = vector.shape_cast %115 : vector<1x50x80xf32> to vector<50x80xf32>
    %117 = vector.extract_strided_slice %103 {offsets = [0, 2], sizes = [80, 1], strides = [1, 1]} : vector<80x4xf32> to vector<80x1xf32>
    %cst_110 = arith.constant dense<0.000000e+00> : vector<50x1xf32>
    %118 = tpu.matmul %116, %117, %cst_110 {dimension_numbers = #tpu.dot_dimension_numbers<[1], [0], [0], [1], [0, 0, 1, 1], [], []>} : vector<50x80xf32>, vector<80x1xf32>, vector<50x1xf32> -> vector<50x1xf32>
    %119 = arith.addf %114, %118 : vector<50x1xf32>
    %c3_111 = arith.constant 3 : index
    %c0_112 = arith.constant 0 : index
    %c0_113 = arith.constant 0 : index
    %120 = vector.load %arg12[%c3_111, %c0_112, %c0_113] : memref<4x50x80xf32, #tpu.memory_space<vmem>>, vector<1x50x80xf32>
    %121 = vector.shape_cast %120 : vector<1x50x80xf32> to vector<50x80xf32>
    %122 = vector.extract_strided_slice %103 {offsets = [0, 3], sizes = [80, 1], strides = [1, 1]} : vector<80x4xf32> to vector<80x1xf32>
    %cst_114 = arith.constant dense<0.000000e+00> : vector<50x1xf32>
    %123 = tpu.matmul %121, %122, %cst_114 {dimension_numbers = #tpu.dot_dimension_numbers<[1], [0], [0], [1], [0, 0, 1, 1], [], []>} : vector<50x80xf32>, vector<80x1xf32>, vector<50x1xf32> -> vector<50x1xf32>
    %124 = arith.addf %119, %123 : vector<50x1xf32>
    %cst_115 = arith.constant 0.000000e+00 : f32
    %125 = vector.broadcast %cst_115 : f32 to vector<50x1xf32>
    %126 = arith.maximumf %124, %125 : vector<50x1xf32>
    %c0_116 = arith.constant 0 : index
    %c0_117 = arith.constant 0 : index
    %127 = vector.load %arg14[%c0_116, %c0_117] : memref<2x50xf32, #tpu.memory_space<vmem>>, vector<2x50xf32>
    %cst_118 = arith.constant dense<0.000000e+00> : vector<2x1xf32>
    %128 = tpu.matmul %127, %126, %cst_118 {dimension_numbers = #tpu.dot_dimension_numbers<[1], [0], [0], [1], [0, 0, 1, 1], [], []>} : vector<2x50xf32>, vector<50x1xf32>, vector<2x1xf32> -> vector<2x1xf32>
    %c0_119 = arith.constant 0 : index
    %c0_120 = arith.constant 0 : index
    %129 = vector.load %arg15[%c0_119, %c0_120] : memref<2x1xf32, #tpu.memory_space<vmem>>, vector<2x1xf32>
    %130 = arith.addf %128, %129 : vector<2x1xf32>
    %131 = vector.extract_strided_slice %130 {offsets = [0, 0], sizes = [1, 1], strides = [1, 1]} : vector<2x1xf32> to vector<1x1xf32>
    %132 = vector.extract_strided_slice %130 {offsets = [1, 0], sizes = [1, 1], strides = [1, 1]} : vector<2x1xf32> to vector<1x1xf32>
    %133 = arith.maximumf %131, %132 : vector<1x1xf32>
    %134 = arith.subf %131, %133 : vector<1x1xf32>
    %135 = arith.subf %132, %133 : vector<1x1xf32>
    %136 = math.exp %134 : vector<1x1xf32>
    %137 = math.exp %135 : vector<1x1xf32>
    %138 = arith.addf %136, %137 : vector<1x1xf32>
    %139 = math.log %138 : vector<1x1xf32>
    %140 = arith.subf %134, %139 : vector<1x1xf32>
    %141 = arith.subf %135, %139 : vector<1x1xf32>
    %142 = math.exp %140 : vector<1x1xf32>
    %143 = arith.mulf %142, %140 : vector<1x1xf32>
    %144 = math.exp %141 : vector<1x1xf32>
    %145 = arith.mulf %144, %141 : vector<1x1xf32>
    %146 = arith.addf %143, %145 : vector<1x1xf32>
    %cst_121 = arith.constant 0.000000e+00 : f32
    %147 = vector.broadcast %cst_121 : f32 to vector<1x1xf32>
    %148 = arith.subf %147, %146 : vector<1x1xf32>
    %c0_122 = arith.constant 0 : index
    %c0_123 = arith.constant 0 : index
    %149 = vector.load %arg16[%c0_122, %c0_123] : memref<2x1xf32, #tpu.memory_space<vmem>>, vector<1x1xf32>
    tpu.vector_store %arg16[%c0_122, %c0_123], %148 {strides = array<i32>} : memref<2x1xf32, #tpu.memory_space<vmem>>, vector<1x1xf32>,
    %c1_124 = arith.constant 1 : index
    %c0_125 = arith.constant 0 : index
    %c0_126 = arith.constant 0 : index
    %150 = vector.load %arg1[%c1_124, %c0_125, %c0_126] : memref<2x28x28xf32, #tpu.memory_space<vmem>>, vector<1x28x28xf32>
    %151 = vector.shape_cast %150 : vector<1x28x28xf32> to vector<28x28xf32>
    %cst_127 = arith.constant 0.000000e+00 : f32
    %152 = vector.broadcast %cst_127 : f32 to vector<240x24xf32>
    %c0_128 = arith.constant 0 : index
    %c0_129 = arith.constant 0 : index
    %c0_130 = arith.constant 0 : index
    %153 = vector.load %arg2[%c0_128, %c0_129, %c0_130] : memref<5x240x28xf32, #tpu.memory_space<vmem>>, vector<1x240x28xf32>
    %154 = vector.shape_cast %153 : vector<1x240x28xf32> to vector<240x28xf32>
    %cst_131 = arith.constant dense<0.000000e+00> : vector<240x28xf32>
    %155 = tpu.matmul %154, %151, %cst_131 {dimension_numbers = #tpu.dot_dimension_numbers<[1], [0], [0], [1], [0, 0, 1, 1], [], []>} : vector<240x28xf32>, vector<28x28xf32>, vector<240x28xf32> -> vector<240x28xf32>
    %c0_132 = arith.constant 0 : index
    %c0_133 = arith.constant 0 : index
    %c0_134 = arith.constant 0 : index
    %156 = vector.load %arg3[%c0_132, %c0_133, %c0_134] : memref<5x28x24xf32, #tpu.memory_space<vmem>>, vector<1x28x24xf32>
    %157 = vector.shape_cast %156 : vector<1x28x24xf32> to vector<28x24xf32>
    %cst_135 = arith.constant dense<0.000000e+00> : vector<240x24xf32>
    %158 = tpu.matmul %155, %157, %cst_135 {dimension_numbers = #tpu.dot_dimension_numbers<[1], [0], [0], [1], [0, 0, 1, 1], [], []>} : vector<240x28xf32>, vector<28x24xf32>, vector<240x24xf32> -> vector<240x24xf32>
    %159 = arith.addf %152, %158 : vector<240x24xf32>
    %c1_136 = arith.constant 1 : index
    %c0_137 = arith.constant 0 : index
    %c0_138 = arith.constant 0 : index
    %160 = vector.load %arg2[%c1_136, %c0_137, %c0_138] : memref<5x240x28xf32, #tpu.memory_space<vmem>>, vector<1x240x28xf32>
    %161 = vector.shape_cast %160 : vector<1x240x28xf32> to vector<240x28xf32>
    %cst_139 = arith.constant dense<0.000000e+00> : vector<240x28xf32>
    %162 = tpu.matmul %161, %151, %cst_139 {dimension_numbers = #tpu.dot_dimension_numbers<[1], [0], [0], [1], [0, 0, 1, 1], [], []>} : vector<240x28xf32>, vector<28x28xf32>, vector<240x28xf32> -> vector<240x28xf32>
    %c1_140 = arith.constant 1 : index
    %c0_141 = arith.constant 0 : index
    %c0_142 = arith.constant 0 : index
    %163 = vector.load %arg3[%c1_140, %c0_141, %c0_142] : memref<5x28x24xf32, #tpu.memory_space<vmem>>, vector<1x28x24xf32>
    %164 = vector.shape_cast %163 : vector<1x28x24xf32> to vector<28x24xf32>
    %cst_143 = arith.constant dense<0.000000e+00> : vector<240x24xf32>
    %165 = tpu.matmul %162, %164, %cst_143 {dimension_numbers = #tpu.dot_dimension_numbers<[1], [0], [0], [1], [0, 0, 1, 1], [], []>} : vector<240x28xf32>, vector<28x24xf32>, vector<240x24xf32> -> vector<240x24xf32>
    %166 = arith.addf %159, %165 : vector<240x24xf32>
    %c2_144 = arith.constant 2 : index
    %c0_145 = arith.constant 0 : index
    %c0_146 = arith.constant 0 : index
    %167 = vector.load %arg2[%c2_144, %c0_145, %c0_146] : memref<5x240x28xf32, #tpu.memory_space<vmem>>, vector<1x240x28xf32>
    %168 = vector.shape_cast %167 : vector<1x240x28xf32> to vector<240x28xf32>
    %cst_147 = arith.constant dense<0.000000e+00> : vector<240x28xf32>
    %169 = tpu.matmul %168, %151, %cst_147 {dimension_numbers = #tpu.dot_dimension_numbers<[1], [0], [0], [1], [0, 0, 1, 1], [], []>} : vector<240x28xf32>, vector<28x28xf32>, vector<240x28xf32> -> vector<240x28xf32>
    %c2_148 = arith.constant 2 : index
    %c0_149 = arith.constant 0 : index
    %c0_150 = arith.constant 0 : index
    %170 = vector.load %arg3[%c2_148, %c0_149, %c0_150] : memref<5x28x24xf32, #tpu.memory_space<vmem>>, vector<1x28x24xf32>
    %171 = vector.shape_cast %170 : vector<1x28x24xf32> to vector<28x24xf32>
    %cst_151 = arith.constant dense<0.000000e+00> : vector<240x24xf32>
    %172 = tpu.matmul %169, %171, %cst_151 {dimension_numbers = #tpu.dot_dimension_numbers<[1], [0], [0], [1], [0, 0, 1, 1], [], []>} : vector<240x28xf32>, vector<28x24xf32>, vector<240x24xf32> -> vector<240x24xf32>
    %173 = arith.addf %166, %172 : vector<240x24xf32>
    %c3_152 = arith.constant 3 : index
    %c0_153 = arith.constant 0 : index
    %c0_154 = arith.constant 0 : index
    %174 = vector.load %arg2[%c3_152, %c0_153, %c0_154] : memref<5x240x28xf32, #tpu.memory_space<vmem>>, vector<1x240x28xf32>
    %175 = vector.shape_cast %174 : vector<1x240x28xf32> to vector<240x28xf32>
    %cst_155 = arith.constant dense<0.000000e+00> : vector<240x28xf32>
    %176 = tpu.matmul %175, %151, %cst_155 {dimension_numbers = #tpu.dot_dimension_numbers<[1], [0], [0], [1], [0, 0, 1, 1], [], []>} : vector<240x28xf32>, vector<28x28xf32>, vector<240x28xf32> -> vector<240x28xf32>
    %c3_156 = arith.constant 3 : index
    %c0_157 = arith.constant 0 : index
    %c0_158 = arith.constant 0 : index
    %177 = vector.load %arg3[%c3_156, %c0_157, %c0_158] : memref<5x28x24xf32, #tpu.memory_space<vmem>>, vector<1x28x24xf32>
    %178 = vector.shape_cast %177 : vector<1x28x24xf32> to vector<28x24xf32>
    %cst_159 = arith.constant dense<0.000000e+00> : vector<240x24xf32>
    %179 = tpu.matmul %176, %178, %cst_159 {dimension_numbers = #tpu.dot_dimension_numbers<[1], [0], [0], [1], [0, 0, 1, 1], [], []>} : vector<240x28xf32>, vector<28x24xf32>, vector<240x24xf32> -> vector<240x24xf32>
    %180 = arith.addf %173, %179 : vector<240x24xf32>
    %c4_160 = arith.constant 4 : index
    %c0_161 = arith.constant 0 : index
    %c0_162 = arith.constant 0 : index
    %181 = vector.load %arg2[%c4_160, %c0_161, %c0_162] : memref<5x240x28xf32, #tpu.memory_space<vmem>>, vector<1x240x28xf32>
    %182 = vector.shape_cast %181 : vector<1x240x28xf32> to vector<240x28xf32>
    %cst_163 = arith.constant dense<0.000000e+00> : vector<240x28xf32>
    %183 = tpu.matmul %182, %151, %cst_163 {dimension_numbers = #tpu.dot_dimension_numbers<[1], [0], [0], [1], [0, 0, 1, 1], [], []>} : vector<240x28xf32>, vector<28x28xf32>, vector<240x28xf32> -> vector<240x28xf32>
    %c4_164 = arith.constant 4 : index
    %c0_165 = arith.constant 0 : index
    %c0_166 = arith.constant 0 : index
    %184 = vector.load %arg3[%c4_164, %c0_165, %c0_166] : memref<5x28x24xf32, #tpu.memory_space<vmem>>, vector<1x28x24xf32>
    %185 = vector.shape_cast %184 : vector<1x28x24xf32> to vector<28x24xf32>
    %cst_167 = arith.constant dense<0.000000e+00> : vector<240x24xf32>
    %186 = tpu.matmul %183, %185, %cst_167 {dimension_numbers = #tpu.dot_dimension_numbers<[1], [0], [0], [1], [0, 0, 1, 1], [], []>} : vector<240x28xf32>, vector<28x24xf32>, vector<240x24xf32> -> vector<240x24xf32>
    %187 = arith.addf %180, %186 : vector<240x24xf32>
    %c0_168 = arith.constant 0 : index
    %c0_169 = arith.constant 0 : index
    %188 = vector.load %arg4[%c0_168, %c0_169] : memref<240x1xf32, #tpu.memory_space<vmem>>, vector<240x1xf32>
    %189 = vector.broadcast %188 : vector<240x1xf32> to vector<240x24xf32>
    %190 = arith.addf %187, %189 : vector<240x24xf32>
    %191 = vector.extract_strided_slice %190 {offsets = [0, 0], sizes = [239, 24], strides = [1, 1]} : vector<240x24xf32> to vector<239x24xf32>
    %192 = vector.extract_strided_slice %190 {offsets = [1, 0], sizes = [239, 24], strides = [1, 1]} : vector<240x24xf32> to vector<239x24xf32>
    %193 = arith.maximumf %191, %192 : vector<239x24xf32>
    %194 = vector.extract_strided_slice %193 {offsets = [0, 0], sizes = [239, 23], strides = [1, 1]} : vector<239x24xf32> to vector<239x23xf32>
    %195 = vector.extract_strided_slice %193 {offsets = [0, 1], sizes = [239, 23], strides = [1, 1]} : vector<239x24xf32> to vector<239x23xf32>
    %196 = arith.maximumf %194, %195 : vector<239x23xf32>
    %c0_170 = arith.constant 0 : index
    %c0_171 = arith.constant 0 : index
    %197 = vector.load %arg5[%c0_170, %c0_171] : memref<120x239xf32, #tpu.memory_space<vmem>>, vector<120x239xf32>
    %cst_172 = arith.constant dense<0.000000e+00> : vector<120x23xf32>
    %198 = tpu.matmul %197, %196, %cst_172 {dimension_numbers = #tpu.dot_dimension_numbers<[1], [0], [0], [1], [0, 0, 1, 1], [], []>} : vector<120x239xf32>, vector<239x23xf32>, vector<120x23xf32> -> vector<120x23xf32>
    %c0_173 = arith.constant 0 : index
    %c0_174 = arith.constant 0 : index
    %199 = vector.load %arg6[%c0_173, %c0_174] : memref<23x12xf32, #tpu.memory_space<vmem>>, vector<23x12xf32>
    %cst_175 = arith.constant dense<0.000000e+00> : vector<120x12xf32>
    %200 = tpu.matmul %198, %199, %cst_175 {dimension_numbers = #tpu.dot_dimension_numbers<[1], [0], [0], [1], [0, 0, 1, 1], [], []>} : vector<120x23xf32>, vector<23x12xf32>, vector<120x12xf32> -> vector<120x12xf32>
    %cst_176 = arith.constant 0.000000e+00 : f32
    %201 = vector.broadcast %cst_176 : f32 to vector<120x12xf32>
    %202 = arith.maximumf %200, %201 : vector<120x12xf32>
    %cst_177 = arith.constant 0.000000e+00 : f32
    %203 = vector.broadcast %cst_177 : f32 to vector<160x8xf32>
    %c0_178 = arith.constant 0 : index
    %c0_179 = arith.constant 0 : index
    %c0_180 = arith.constant 0 : index
    %204 = vector.load %arg7[%c0_178, %c0_179, %c0_180] : memref<5x160x120xf32, #tpu.memory_space<vmem>>, vector<1x160x120xf32>
    %205 = vector.shape_cast %204 : vector<1x160x120xf32> to vector<160x120xf32>
    %cst_181 = arith.constant dense<0.000000e+00> : vector<160x12xf32>
    %206 = tpu.matmul %205, %202, %cst_181 {dimension_numbers = #tpu.dot_dimension_numbers<[1], [0], [0], [1], [0, 0, 1, 1], [], []>} : vector<160x120xf32>, vector<120x12xf32>, vector<160x12xf32> -> vector<160x12xf32>
    %c0_182 = arith.constant 0 : index
    %c0_183 = arith.constant 0 : index
    %c0_184 = arith.constant 0 : index
    %207 = vector.load %arg8[%c0_182, %c0_183, %c0_184] : memref<5x12x8xf32, #tpu.memory_space<vmem>>, vector<1x12x8xf32>
    %208 = vector.shape_cast %207 : vector<1x12x8xf32> to vector<12x8xf32>
    %cst_185 = arith.constant dense<0.000000e+00> : vector<160x8xf32>
    %209 = tpu.matmul %206, %208, %cst_185 {dimension_numbers = #tpu.dot_dimension_numbers<[1], [0], [0], [1], [0, 0, 1, 1], [], []>} : vector<160x12xf32>, vector<12x8xf32>, vector<160x8xf32> -> vector<160x8xf32>
    %210 = arith.addf %203, %209 : vector<160x8xf32>
    %c1_186 = arith.constant 1 : index
    %c0_187 = arith.constant 0 : index
    %c0_188 = arith.constant 0 : index
    %211 = vector.load %arg7[%c1_186, %c0_187, %c0_188] : memref<5x160x120xf32, #tpu.memory_space<vmem>>, vector<1x160x120xf32>
    %212 = vector.shape_cast %211 : vector<1x160x120xf32> to vector<160x120xf32>
    %cst_189 = arith.constant dense<0.000000e+00> : vector<160x12xf32>
    %213 = tpu.matmul %212, %202, %cst_189 {dimension_numbers = #tpu.dot_dimension_numbers<[1], [0], [0], [1], [0, 0, 1, 1], [], []>} : vector<160x120xf32>, vector<120x12xf32>, vector<160x12xf32> -> vector<160x12xf32>
    %c1_190 = arith.constant 1 : index
    %c0_191 = arith.constant 0 : index
    %c0_192 = arith.constant 0 : index
    %214 = vector.load %arg8[%c1_190, %c0_191, %c0_192] : memref<5x12x8xf32, #tpu.memory_space<vmem>>, vector<1x12x8xf32>
    %215 = vector.shape_cast %214 : vector<1x12x8xf32> to vector<12x8xf32>
    %cst_193 = arith.constant dense<0.000000e+00> : vector<160x8xf32>
    %216 = tpu.matmul %213, %215, %cst_193 {dimension_numbers = #tpu.dot_dimension_numbers<[1], [0], [0], [1], [0, 0, 1, 1], [], []>} : vector<160x12xf32>, vector<12x8xf32>, vector<160x8xf32> -> vector<160x8xf32>
    %217 = arith.addf %210, %216 : vector<160x8xf32>
    %c2_194 = arith.constant 2 : index
    %c0_195 = arith.constant 0 : index
    %c0_196 = arith.constant 0 : index
    %218 = vector.load %arg7[%c2_194, %c0_195, %c0_196] : memref<5x160x120xf32, #tpu.memory_space<vmem>>, vector<1x160x120xf32>
    %219 = vector.shape_cast %218 : vector<1x160x120xf32> to vector<160x120xf32>
    %cst_197 = arith.constant dense<0.000000e+00> : vector<160x12xf32>
    %220 = tpu.matmul %219, %202, %cst_197 {dimension_numbers = #tpu.dot_dimension_numbers<[1], [0], [0], [1], [0, 0, 1, 1], [], []>} : vector<160x120xf32>, vector<120x12xf32>, vector<160x12xf32> -> vector<160x12xf32>
    %c2_198 = arith.constant 2 : index
    %c0_199 = arith.constant 0 : index
    %c0_200 = arith.constant 0 : index
    %221 = vector.load %arg8[%c2_198, %c0_199, %c0_200] : memref<5x12x8xf32, #tpu.memory_space<vmem>>, vector<1x12x8xf32>
    %222 = vector.shape_cast %221 : vector<1x12x8xf32> to vector<12x8xf32>
    %cst_201 = arith.constant dense<0.000000e+00> : vector<160x8xf32>
    %223 = tpu.matmul %220, %222, %cst_201 {dimension_numbers = #tpu.dot_dimension_numbers<[1], [0], [0], [1], [0, 0, 1, 1], [], []>} : vector<160x12xf32>, vector<12x8xf32>, vector<160x8xf32> -> vector<160x8xf32>
    %224 = arith.addf %217, %223 : vector<160x8xf32>
    %c3_202 = arith.constant 3 : index
    %c0_203 = arith.constant 0 : index
    %c0_204 = arith.constant 0 : index
    %225 = vector.load %arg7[%c3_202, %c0_203, %c0_204] : memref<5x160x120xf32, #tpu.memory_space<vmem>>, vector<1x160x120xf32>
    %226 = vector.shape_cast %225 : vector<1x160x120xf32> to vector<160x120xf32>
    %cst_205 = arith.constant dense<0.000000e+00> : vector<160x12xf32>
    %227 = tpu.matmul %226, %202, %cst_205 {dimension_numbers = #tpu.dot_dimension_numbers<[1], [0], [0], [1], [0, 0, 1, 1], [], []>} : vector<160x120xf32>, vector<120x12xf32>, vector<160x12xf32> -> vector<160x12xf32>
    %c3_206 = arith.constant 3 : index
    %c0_207 = arith.constant 0 : index
    %c0_208 = arith.constant 0 : index
    %228 = vector.load %arg8[%c3_206, %c0_207, %c0_208] : memref<5x12x8xf32, #tpu.memory_space<vmem>>, vector<1x12x8xf32>
    %229 = vector.shape_cast %228 : vector<1x12x8xf32> to vector<12x8xf32>
    %cst_209 = arith.constant dense<0.000000e+00> : vector<160x8xf32>
    %230 = tpu.matmul %227, %229, %cst_209 {dimension_numbers = #tpu.dot_dimension_numbers<[1], [0], [0], [1], [0, 0, 1, 1], [], []>} : vector<160x12xf32>, vector<12x8xf32>, vector<160x8xf32> -> vector<160x8xf32>
    %231 = arith.addf %224, %230 : vector<160x8xf32>
    %c4_210 = arith.constant 4 : index
    %c0_211 = arith.constant 0 : index
    %c0_212 = arith.constant 0 : index
    %232 = vector.load %arg7[%c4_210, %c0_211, %c0_212] : memref<5x160x120xf32, #tpu.memory_space<vmem>>, vector<1x160x120xf32>
    %233 = vector.shape_cast %232 : vector<1x160x120xf32> to vector<160x120xf32>
    %cst_213 = arith.constant dense<0.000000e+00> : vector<160x12xf32>
    %234 = tpu.matmul %233, %202, %cst_213 {dimension_numbers = #tpu.dot_dimension_numbers<[1], [0], [0], [1], [0, 0, 1, 1], [], []>} : vector<160x120xf32>, vector<120x12xf32>, vector<160x12xf32> -> vector<160x12xf32>
    %c4_214 = arith.constant 4 : index
    %c0_215 = arith.constant 0 : index
    %c0_216 = arith.constant 0 : index
    %235 = vector.load %arg8[%c4_214, %c0_215, %c0_216] : memref<5x12x8xf32, #tpu.memory_space<vmem>>, vector<1x12x8xf32>
    %236 = vector.shape_cast %235 : vector<1x12x8xf32> to vector<12x8xf32>
    %cst_217 = arith.constant dense<0.000000e+00> : vector<160x8xf32>
    %237 = tpu.matmul %234, %236, %cst_217 {dimension_numbers = #tpu.dot_dimension_numbers<[1], [0], [0], [1], [0, 0, 1, 1], [], []>} : vector<160x12xf32>, vector<12x8xf32>, vector<160x8xf32> -> vector<160x8xf32>
    %238 = arith.addf %231, %237 : vector<160x8xf32>
    %c0_218 = arith.constant 0 : index
    %c0_219 = arith.constant 0 : index
    %239 = vector.load %arg9[%c0_218, %c0_219] : memref<160x1xf32, #tpu.memory_space<vmem>>, vector<160x1xf32>
    %240 = vector.broadcast %239 : vector<160x1xf32> to vector<160x8xf32>
    %241 = arith.addf %238, %240 : vector<160x8xf32>
    %242 = vector.extract_strided_slice %241 {offsets = [0, 0], sizes = [159, 8], strides = [1, 1]} : vector<160x8xf32> to vector<159x8xf32>
    %243 = vector.extract_strided_slice %241 {offsets = [1, 0], sizes = [159, 8], strides = [1, 1]} : vector<160x8xf32> to vector<159x8xf32>
    %244 = arith.maximumf %242, %243 : vector<159x8xf32>
    %245 = vector.extract_strided_slice %244 {offsets = [0, 0], sizes = [159, 7], strides = [1, 1]} : vector<159x8xf32> to vector<159x7xf32>
    %246 = vector.extract_strided_slice %244 {offsets = [0, 1], sizes = [159, 7], strides = [1, 1]} : vector<159x8xf32> to vector<159x7xf32>
    %247 = arith.maximumf %245, %246 : vector<159x7xf32>
    %c0_220 = arith.constant 0 : index
    %c0_221 = arith.constant 0 : index
    %248 = vector.load %arg10[%c0_220, %c0_221] : memref<80x159xf32, #tpu.memory_space<vmem>>, vector<80x159xf32>
    %cst_222 = arith.constant dense<0.000000e+00> : vector<80x7xf32>
    %249 = tpu.matmul %248, %247, %cst_222 {dimension_numbers = #tpu.dot_dimension_numbers<[1], [0], [0], [1], [0, 0, 1, 1], [], []>} : vector<80x159xf32>, vector<159x7xf32>, vector<80x7xf32> -> vector<80x7xf32>
    %c0_223 = arith.constant 0 : index
    %c0_224 = arith.constant 0 : index
    %250 = vector.load %arg11[%c0_223, %c0_224] : memref<7x4xf32, #tpu.memory_space<vmem>>, vector<7x4xf32>
    %cst_225 = arith.constant dense<0.000000e+00> : vector<80x4xf32>
    %251 = tpu.matmul %249, %250, %cst_225 {dimension_numbers = #tpu.dot_dimension_numbers<[1], [0], [0], [1], [0, 0, 1, 1], [], []>} : vector<80x7xf32>, vector<7x4xf32>, vector<80x4xf32> -> vector<80x4xf32>
    %cst_226 = arith.constant 0.000000e+00 : f32
    %252 = vector.broadcast %cst_226 : f32 to vector<80x4xf32>
    %253 = arith.maximumf %251, %252 : vector<80x4xf32>
    %c0_227 = arith.constant 0 : index
    %c0_228 = arith.constant 0 : index
    %254 = vector.load %arg13[%c0_227, %c0_228] : memref<50x1xf32, #tpu.memory_space<vmem>>, vector<50x1xf32>
    %c0_229 = arith.constant 0 : index
    %c0_230 = arith.constant 0 : index
    %c0_231 = arith.constant 0 : index
    %255 = vector.load %arg12[%c0_229, %c0_230, %c0_231] : memref<4x50x80xf32, #tpu.memory_space<vmem>>, vector<1x50x80xf32>
    %256 = vector.shape_cast %255 : vector<1x50x80xf32> to vector<50x80xf32>
    %257 = vector.extract_strided_slice %253 {offsets = [0, 0], sizes = [80, 1], strides = [1, 1]} : vector<80x4xf32> to vector<80x1xf32>
    %cst_232 = arith.constant dense<0.000000e+00> : vector<50x1xf32>
    %258 = tpu.matmul %256, %257, %cst_232 {dimension_numbers = #tpu.dot_dimension_numbers<[1], [0], [0], [1], [0, 0, 1, 1], [], []>} : vector<50x80xf32>, vector<80x1xf32>, vector<50x1xf32> -> vector<50x1xf32>
    %259 = arith.addf %254, %258 : vector<50x1xf32>
    %c1_233 = arith.constant 1 : index
    %c0_234 = arith.constant 0 : index
    %c0_235 = arith.constant 0 : index
    %260 = vector.load %arg12[%c1_233, %c0_234, %c0_235] : memref<4x50x80xf32, #tpu.memory_space<vmem>>, vector<1x50x80xf32>
    %261 = vector.shape_cast %260 : vector<1x50x80xf32> to vector<50x80xf32>
    %262 = vector.extract_strided_slice %253 {offsets = [0, 1], sizes = [80, 1], strides = [1, 1]} : vector<80x4xf32> to vector<80x1xf32>
    %cst_236 = arith.constant dense<0.000000e+00> : vector<50x1xf32>
    %263 = tpu.matmul %261, %262, %cst_236 {dimension_numbers = #tpu.dot_dimension_numbers<[1], [0], [0], [1], [0, 0, 1, 1], [], []>} : vector<50x80xf32>, vector<80x1xf32>, vector<50x1xf32> -> vector<50x1xf32>
    %264 = arith.addf %259, %263 : vector<50x1xf32>
    %c2_237 = arith.constant 2 : index
    %c0_238 = arith.constant 0 : index
    %c0_239 = arith.constant 0 : index
    %265 = vector.load %arg12[%c2_237, %c0_238, %c0_239] : memref<4x50x80xf32, #tpu.memory_space<vmem>>, vector<1x50x80xf32>
    %266 = vector.shape_cast %265 : vector<1x50x80xf32> to vector<50x80xf32>
    %267 = vector.extract_strided_slice %253 {offsets = [0, 2], sizes = [80, 1], strides = [1, 1]} : vector<80x4xf32> to vector<80x1xf32>
    %cst_240 = arith.constant dense<0.000000e+00> : vector<50x1xf32>
    %268 = tpu.matmul %266, %267, %cst_240 {dimension_numbers = #tpu.dot_dimension_numbers<[1], [0], [0], [1], [0, 0, 1, 1], [], []>} : vector<50x80xf32>, vector<80x1xf32>, vector<50x1xf32> -> vector<50x1xf32>
    %269 = arith.addf %264, %268 : vector<50x1xf32>
    %c3_241 = arith.constant 3 : index
    %c0_242 = arith.constant 0 : index
    %c0_243 = arith.constant 0 : index
    %270 = vector.load %arg12[%c3_241, %c0_242, %c0_243] : memref<4x50x80xf32, #tpu.memory_space<vmem>>, vector<1x50x80xf32>
    %271 = vector.shape_cast %270 : vector<1x50x80xf32> to vector<50x80xf32>
    %272 = vector.extract_strided_slice %253 {offsets = [0, 3], sizes = [80, 1], strides = [1, 1]} : vector<80x4xf32> to vector<80x1xf32>
    %cst_244 = arith.constant dense<0.000000e+00> : vector<50x1xf32>
    %273 = tpu.matmul %271, %272, %cst_244 {dimension_numbers = #tpu.dot_dimension_numbers<[1], [0], [0], [1], [0, 0, 1, 1], [], []>} : vector<50x80xf32>, vector<80x1xf32>, vector<50x1xf32> -> vector<50x1xf32>
    %274 = arith.addf %269, %273 : vector<50x1xf32>
    %cst_245 = arith.constant 0.000000e+00 : f32
    %275 = vector.broadcast %cst_245 : f32 to vector<50x1xf32>
    %276 = arith.maximumf %274, %275 : vector<50x1xf32>
    %c0_246 = arith.constant 0 : index
    %c0_247 = arith.constant 0 : index
    %277 = vector.load %arg14[%c0_246, %c0_247] : memref<2x50xf32, #tpu.memory_space<vmem>>, vector<2x50xf32>
    %cst_248 = arith.constant dense<0.000000e+00> : vector<2x1xf32>
    %278 = tpu.matmul %277, %276, %cst_248 {dimension_numbers = #tpu.dot_dimension_numbers<[1], [0], [0], [1], [0, 0, 1, 1], [], []>} : vector<2x50xf32>, vector<50x1xf32>, vector<2x1xf32> -> vector<2x1xf32>
    %c0_249 = arith.constant 0 : index
    %c0_250 = arith.constant 0 : index
    %279 = vector.load %arg15[%c0_249, %c0_250] : memref<2x1xf32, #tpu.memory_space<vmem>>, vector<2x1xf32>
    %280 = arith.addf %278, %279 : vector<2x1xf32>
    %281 = vector.extract_strided_slice %280 {offsets = [0, 0], sizes = [1, 1], strides = [1, 1]} : vector<2x1xf32> to vector<1x1xf32>
    %282 = vector.extract_strided_slice %280 {offsets = [1, 0], sizes = [1, 1], strides = [1, 1]} : vector<2x1xf32> to vector<1x1xf32>
    %283 = arith.maximumf %281, %282 : vector<1x1xf32>
    %284 = arith.subf %281, %283 : vector<1x1xf32>
    %285 = arith.subf %282, %283 : vector<1x1xf32>
    %286 = math.exp %284 : vector<1x1xf32>
    %287 = math.exp %285 : vector<1x1xf32>
    %288 = arith.addf %286, %287 : vector<1x1xf32>
    %289 = math.log %288 : vector<1x1xf32>
    %290 = arith.subf %284, %289 : vector<1x1xf32>
    %291 = arith.subf %285, %289 : vector<1x1xf32>
    %292 = math.exp %290 : vector<1x1xf32>
    %293 = arith.mulf %292, %290 : vector<1x1xf32>
    %294 = math.exp %291 : vector<1x1xf32>
    %295 = arith.mulf %294, %291 : vector<1x1xf32>
    %296 = arith.addf %293, %295 : vector<1x1xf32>
    %cst_251 = arith.constant 0.000000e+00 : f32
    %297 = vector.broadcast %cst_251 : f32 to vector<1x1xf32>
    %298 = arith.subf %297, %296 : vector<1x1xf32>
    %c1_252 = arith.constant 1 : index
    %c0_253 = arith.constant 0 : index
    %299 = vector.load %arg16[%c1_252, %c0_253] : memref<2x1xf32, #tpu.memory_space<vmem>>, vector<1x1xf32>
    tpu.vector_store %arg16[%c1_252, %c0_253], %298 {strides = array<i32>} : memref<2x1xf32, #tpu.memory_space<vmem>>, vector<1x1xf32>,
    return
  }
  func.func @transform_0(%arg0: i32) -> (i32, i32, i32) {
    %c0_i32 = arith.constant 0 : i32
    %c0_i32_0 = arith.constant 0 : i32
    %c0_i32_1 = arith.constant 0 : i32
    %c0_i32_2 = arith.constant 0 : i32
    return %c0_i32, %c0_i32_0, %c0_i32_1 : i32, i32, i32
  }
  func.func @transform_1(%arg0: i32) -> (i32, i32, i32) {
    %c0_i32 = arith.constant 0 : i32
    %c0_i32_0 = arith.constant 0 : i32
    %c0_i32_1 = arith.constant 0 : i32
    %c0_i32_2 = arith.constant 0 : i32
    return %c0_i32, %c0_i32_0, %c0_i32_1 : i32, i32, i32
  }
  func.func @transform_2(%arg0: i32) -> (i32, i32, i32) {
    %c0_i32 = arith.constant 0 : i32
    %c0_i32_0 = arith.constant 0 : i32
    %c0_i32_1 = arith.constant 0 : i32
    %c0_i32_2 = arith.constant 0 : i32
    return %c0_i32, %c0_i32_0, %c0_i32_1 : i32, i32, i32
  }
  func.func @transform_3(%arg0: i32) -> (i32, i32) {
    %c0_i32 = arith.constant 0 : i32
    %c0_i32_0 = arith.constant 0 : i32
    %c0_i32_1 = arith.constant 0 : i32
    return %c0_i32, %c0_i32_0 : i32, i32
  }
  func.func @transform_4(%arg0: i32) -> (i32, i32) {
    %c0_i32 = arith.constant 0 : i32
    %c0_i32_0 = arith.constant 0 : i32
    %c0_i32_1 = arith.constant 0 : i32
    return %c0_i32, %c0_i32_0 : i32, i32
  }
  func.func @transform_5(%arg0: i32) -> (i32, i32) {
    %c0_i32 = arith.constant 0 : i32
    %c0_i32_0 = arith.constant 0 : i32
    %c0_i32_1 = arith.constant 0 : i32
    return %c0_i32, %c0_i32_0 : i32, i32
  }
  func.func @transform_6(%arg0: i32) -> (i32, i32, i32) {
    %c0_i32 = arith.constant 0 : i32
    %c0_i32_0 = arith.constant 0 : i32
    %c0_i32_1 = arith.constant 0 : i32
    %c0_i32_2 = arith.constant 0 : i32
    return %c0_i32, %c0_i32_0, %c0_i32_1 : i32, i32, i32
  }
  func.func @transform_7(%arg0: i32) -> (i32, i32, i32) {
    %c0_i32 = arith.constant 0 : i32
    %c0_i32_0 = arith.constant 0 : i32
    %c0_i32_1 = arith.constant 0 : i32
    %c0_i32_2 = arith.constant 0 : i32
    return %c0_i32, %c0_i32_0, %c0_i32_1 : i32, i32, i32
  }
  func.func @transform_8(%arg0: i32) -> (i32, i32) {
    %c0_i32 = arith.constant 0 : i32
    %c0_i32_0 = arith.constant 0 : i32
    %c0_i32_1 = arith.constant 0 : i32
    return %c0_i32, %c0_i32_0 : i32, i32
  }
  func.func @transform_9(%arg0: i32) -> (i32, i32) {
    %c0_i32 = arith.constant 0 : i32
    %c0_i32_0 = arith.constant 0 : i32
    %c0_i32_1 = arith.constant 0 : i32
    return %c0_i32, %c0_i32_0 : i32, i32
  }
  func.func @transform_10(%arg0: i32) -> (i32, i32) {
    %c0_i32 = arith.constant 0 : i32
    %c0_i32_0 = arith.constant 0 : i32
    %c0_i32_1 = arith.constant 0 : i32
    return %c0_i32, %c0_i32_0 : i32, i32
  }
  func.func @transform_11(%arg0: i32) -> (i32, i32, i32) {
    %c0_i32 = arith.constant 0 : i32
    %c0_i32_0 = arith.constant 0 : i32
    %c0_i32_1 = arith.constant 0 : i32
    %c0_i32_2 = arith.constant 0 : i32
    return %c0_i32, %c0_i32_0, %c0_i32_1 : i32, i32, i32
  }
  func.func @transform_12(%arg0: i32) -> (i32, i32) {
    %c0_i32 = arith.constant 0 : i32
    %c0_i32_0 = arith.constant 0 : i32
    %c0_i32_1 = arith.constant 0 : i32
    return %c0_i32, %c0_i32_0 : i32, i32
  }
  func.func @transform_13(%arg0: i32) -> (i32, i32) {
    %c0_i32 = arith.constant 0 : i32
    %c0_i32_0 = arith.constant 0 : i32
    %c0_i32_1 = arith.constant 0 : i32
    return %c0_i32, %c0_i32_0 : i32, i32
  }
  func.func @transform_14(%arg0: i32) -> (i32, i32) {
    %c0_i32 = arith.constant 0 : i32
    %c0_i32_0 = arith.constant 0 : i32
    %c0_i32_1 = arith.constant 0 : i32
    return %c0_i32, %c0_i32_0 : i32, i32
  }
  func.func @transform_15(%arg0: i32) -> (i32, i32) {
    %c0_i32 = arith.constant 0 : i32
    %c0_i32_0 = arith.constant 0 : i32
    %c0_i32_1 = arith.constant 0 : i32
    return %c0_i32, %c0_i32_0 : i32, i32
  }
}

</mosaic_0001>

<bundles_post_ra>
// kernel: net_forward.1
= control target key start
LH: loop header
LB: loop body
LE: loop exit
PB: predicated region body
PF: predicated region fallthrough
CT: control target
= control target key end

     0   :  { %vm175_vm0 = vcmask 1043456   ;;  %vm84_vm1 = vcmask 228352   ;;  %vm3632_vm2 = vcmask 1046528   ;;  %s22035_s21 = smov 127   ;;  %vm3932_vm3 = vcmask 908288   ;;  %s22037_s26 = smov 126   ;;  %s28720_s0 = inlined_call_operand.vmem [shape: f32[2,28,28], index: 0, kind: input, shape index: {}]   ;;  %s28721_s1 = inlined_call_operand.vmem [shape: f32[5,240,28], index: 1, kind: input, shape index: {}]   ;;  %s28722_s2 = inlined_call_operand.vmem [shape: f32[5,28,24], index: 2, kind: input, shape index: {}]   ;;  %s28723_s3 = inlined_call_operand.vmem [shape: f32[240,1], index: 3, kind: input, shape index: {}]   ;;  %s28724_s4 = inlined_call_operand.vmem [shape: f32[120,239], index: 4, kind: input, shape index: {}]   ;;  %s28725_s8 = inlined_call_operand.vmem [shape: f32[160,1], index: 8, kind: input, shape index: {}]   ;;  %s28726_s5 = inlined_call_operand.vmem [shape: f32[23,12], index: 5, kind: input, shape index: {}]   ;;  %s28727_s6 = inlined_call_operand.vmem [shape: f32[5,160,120], index: 6, kind: input, shape index: {}]   ;;  %s28728_s7 = inlined_call_operand.vmem [shape: f32[5,12,8], index: 7, kind: input, shape index: {}]   ;;  %s28729_s9 = inlined_call_operand.vmem [shape: f32[80,159], index: 9, kind: input, shape index: {}]   ;;  %s28730_s10 = inlined_call_operand.vmem [shape: f32[7,4], index: 10, kind: input, shape index: {}]   ;;  %s28731_s11 = inlined_call_operand.vmem [shape: f32[4,50,80], index: 11, kind: input, shape index: {}]   ;;  %s28732_s12 = inlined_call_operand.vmem [shape: f32[50,1], index: 12, kind: input, shape index: {}]   ;;  %s28733_s13 = inlined_call_operand.vmem [shape: f32[2,50], index: 13, kind: input, shape index: {}]   ;;  %s28734_s14 = inlined_call_operand.vmem [shape: f32[2,1], index: 14, kind: input, shape index: {}]   ;;  %s28735_s15 = inlined_call_operand.vmem [shape: f32[2,1], index: 15, kind: output, shape index: {}]  }
   0x1   :  { %v22122_v0 = vld [vmem:[%s28720_s0 + $0x18] sm:$0xf]  ;;  %v22127_v1 = vld [vmem:[%s28720_s0 + $0x10] sm:$0xff]  ;;  %v22140_v2 = vld [vmem:[%s28720_s0 + $0x8] sm:$0xff]  ;;  %vm22036_vm4 = vmmov 0   ;;  %vm4124_vm5 = vcmask 187392  }
   0x2   :  { %19507 = vmatprep.subr.msk.mxu0 %vm175_vm0, %v22122_v0  ;;  %19560 = vmatprep.subr.msk.mxu1 %vm175_vm0, %v22122_v0  ;;  %v22149_v3 = vld [vmem:[%s28720_s0] sm:$0xff]  ;;  %v16386_v5 = vld [vmem:[%s28721_s1 + $0xf0] sm:$0xff]  ;;  %v55_v6 = vld [vmem:[%s28721_s1 + $0x8] sm:$0xff]  ;;  %vm4348_vm6 = vcmask 982016   ;;  %vm4825_vm7 = vcmask 97280   ;;  %vm7132_vm8 = vcmask 252928  }
   0x3   :  { %19508 = vmatpush3.msk.msra.mxu0 %vm175_vm0, %v22122_v0  ;;  %19561 = vmatpush3.msk.msra.mxu1 %vm175_vm0, %v22122_v0  ;;  %v54_v4 = vld [vmem:[%s28721_s1] sm:$0xff]  ;;  %v16387_v7 = vld [vmem:[%s28721_s1 + $0xf8] sm:$0xff]  ;;  %v56_v8 = vld [vmem:[%s28721_s1 + $0x10] sm:$0xff]  ;;  %vm7282_vm9 = vcmask 56320   ;;  %s22038_s27 = smov 125   ;;  %vm7455_vm10 = vcmask 654336  }
   0x4   :  { %19509 = vmatprep.subr.mxu0 %v22127_v1  ;;  %19562 = vmatprep.subr.mxu1 %v22127_v1  ;;  %v16388_v9 = vld [vmem:[%s28721_s1 + $0x100] sm:$0xff]  ;;  %v57_v10 = vld [vmem:[%s28721_s1 + $0x18] sm:$0xff]  ;;  %v16389_v11 = vld [vmem:[%s28721_s1 + $0x108] sm:$0xff]  ;;  %vm8105_vm11 = vcmask 1041408   ;;  %vm8101_vm12 = vcmask 408576   ;;  %vm8214_vm13 = vcmask 0  }
   0x5   :  { %19510 = vmatpush3.msra.mxu0 %v22127_v1  ;;  %19563 = vmatpush3.msra.mxu1 %v22127_v1  ;;  %v58_v12 = vld [vmem:[%s28721_s1 + $0x20] sm:$0xff]  ;;  %v16390_v13 = vld [vmem:[%s28721_s1 + $0x110] sm:$0xff]  ;;  %v59_v14 = vld [vmem:[%s28721_s1 + $0x28] sm:$0xff] }
   0x6   :  { %19511 = vmatprep.subr.mxu0 %v22140_v2  ;;  %19564 = vmatprep.subr.mxu1 %v22140_v2  ;;  %v16391_v15 = vld [vmem:[%s28721_s1 + $0x118] sm:$0xff]  ;;  %v60_v16 = vld [vmem:[%s28721_s1 + $0x30] sm:$0xff]  ;;  %v16392_v17 = vld [vmem:[%s28721_s1 + $0x120] sm:$0xff] }
   0x7   :  { %19512 = vmatpush3.msra.mxu0 %v22140_v2  ;;  %19565 = vmatpush3.msra.mxu1 %v22140_v2  ;;  %v61_v18 = vld [vmem:[%s28721_s1 + $0x38] sm:$0xff]  ;;  %v16393_v19 = vld [vmem:[%s28721_s1 + $0x128] sm:$0xff]  ;;  %v62_v20 = vld [vmem:[%s28721_s1 + $0x40] sm:$0xff] }
   0x8   :  { %19513 = vmatprep.subr.mxu0 %v22149_v3  ;;  %19566 = vmatprep.subr.mxu1 %v22149_v3  ;;  %v16394_v21 = vld [vmem:[%s28721_s1 + $0x130] sm:$0xff]  ;;  %v16450_v22 = vld [vmem:[%s28722_s2 + $0x38] sm:$0xf]  ;;  %v63_v24 = vld [vmem:[%s28721_s1 + $0x48] sm:$0xff] }
   0x9   :  { %19514 = vmatpush3.msra.mxu0 %v22149_v3  ;;  %19515 = vmatprep.mubr.msk.f32.mxu0 %vm84_vm1, %v54_v4  ;;  %v397_v23 = vld [vmem:[%s28722_s2 + $0x18] sm:$0xf]  ;;  %v64_v26 = vld [vmem:[%s28721_s1 + $0x50] sm:$0xff]  ;;  %v16396_v27 = vld [vmem:[%s28721_s1 + $0x140] sm:$0xff] }
   0xa   :  { %19567 = vmatpush3.msra.mxu1 %v22149_v3  ;;  %19568 = vmatprep.mubr.msk.f32.mxu1 %vm84_vm1, %v16386_v5  ;;  %v16395_v25 = vld [vmem:[%s28721_s1 + $0x138] sm:$0xff]  ;;  %v16449_v28 = vld [vmem:[%s28722_s2 + $0x30] sm:$0xff]  ;;  %v16397_v31 = vld [vmem:[%s28721_s1 + $0x148] sm:$0xff] }
   0xb   :  { %19516 = vmatmul.mubr.msk.f32.vlgmr.msra.gmra.mxu0 %vm84_vm1, %v55_v6  ;;  %19569 = vmatmul.mubr.msk.f32.vlgmr.msra.gmra.mxu1 %vm84_vm1, %v16387_v7  ;;  %v396_v29 = vld [vmem:[%s28722_s2 + $0x10] sm:$0xff]  ;;  %v65_v30 = vld [vmem:[%s28721_s1 + $0x58] sm:$0xff]  ;;  %v66_v32 = vld [vmem:[%s28721_s1 + $0x60] sm:$0xff] }
   0xc   :  { %19518 = vmatprep.mubr.msk.f32.mxu0 %vm84_vm1, %v56_v8  ;;  %19571 = vmatprep.mubr.msk.f32.mxu1 %vm84_vm1, %v16388_v9  ;;  %v16398_v33 = vld [vmem:[%s28721_s1 + $0x150] sm:$0xff]  ;;  %v67_v34 = vld [vmem:[%s28721_s1 + $0x68] sm:$0xff]  ;;  %v16399_v35 = vld [vmem:[%s28721_s1 + $0x158] sm:$0xff] }
   0xd   :  { %19613 = vmatprep.subr.msk.mxu0 %vm175_vm0, %v16450_v22  ;;  %19666 = vmatprep.subr.msk.mxu1 %vm175_vm0, %v397_v23  ;;  %v68_v36 = vld [vmem:[%s28721_s1 + $0x70] sm:$0xff]  ;;  %v16400_v37 = vld [vmem:[%s28721_s1 + $0x160] sm:$0xff]  ;;  %v69_v38 = vld [vmem:[%s28721_s1 + $0x78] sm:$0xff] }
   0xe   :  { %19614 = vmatpush3.msk.msra.mxu0 %vm175_vm0, %v16450_v22  ;;  %19667 = vmatpush3.msk.msra.mxu1 %vm175_vm0, %v397_v23  ;;  %v16401_v39 = vld [vmem:[%s28721_s1 + $0x168] sm:$0xff]  ;;  %v70_v40 = vld [vmem:[%s28721_s1 + $0x80] sm:$0xff]  ;;  %v16402_v41 = vld [vmem:[%s28721_s1 + $0x170] sm:$0xff] }
   0xf   :  { %19519 = vmatmul.mubr.msk.f32.gmra.mxu0 %vm84_vm1, %v57_v10  ;;  %19572 = vmatmul.mubr.msk.f32.gmra.mxu1 %vm84_vm1, %v16389_v11  ;;  %v71_v42 = vld [vmem:[%s28721_s1 + $0x88] sm:$0xff]  ;;  %v16403_v43 = vld [vmem:[%s28721_s1 + $0x178] sm:$0xff]  ;;  %v72_v44 = vld [vmem:[%s28721_s1 + $0x90] sm:$0xff] }
  0x10   :  { %19521 = vmatprep.mubr.msk.f32.mxu0 %vm84_vm1, %v58_v12  ;;  %19574 = vmatprep.mubr.msk.f32.mxu1 %vm84_vm1, %v16390_v13  ;;  %v16404_v45 = vld [vmem:[%s28721_s1 + $0x180] sm:$0xff]  ;;  %v73_v46 = vld [vmem:[%s28721_s1 + $0x98] sm:$0xff]  ;;  %v16405_v47 = vld [vmem:[%s28721_s1 + $0x188] sm:$0xff] }
  0x11   :  { %19615 = vmatprep.subr.mxu0 %v16449_v28  ;;  %19668 = vmatprep.subr.mxu1 %v396_v29  ;;  %v74_v48 = vld [vmem:[%s28721_s1 + $0xa0] sm:$0xff]  ;;  %v16406_v49 = vld [vmem:[%s28721_s1 + $0x190] sm:$0xff]  ;;  %v75_v50 = vld [vmem:[%s28721_s1 + $0xa8] sm:$0xff] }
  0x12   :  { %19616 = vmatpush3.msra.mxu0 %v16449_v28  ;;  %19669 = vmatpush3.msra.mxu1 %v396_v29  ;;  %v16407_v51 = vld [vmem:[%s28721_s1 + $0x198] sm:$0xff]  ;;  %v76_v52 = vld [vmem:[%s28721_s1 + $0xb0] sm:$0xff]  ;;  %v16408_v53 = vld [vmem:[%s28721_s1 + $0x1a0] sm:$0xff] }
  0x13   :  { %19522 = vmatmul.mubr.msk.f32.gmra.mxu0 %vm84_vm1, %v59_v14  ;;  %19575 = vmatmul.mubr.msk.f32.gmra.mxu1 %vm84_vm1, %v16391_v15  ;;  %v77_v54 = vld [vmem:[%s28721_s1 + $0xb8] sm:$0xff]  ;;  %v16409_v55 = vld [vmem:[%s28721_s1 + $0x1a8] sm:$0xff]  ;;  %v78_v56 = vld [vmem:[%s28721_s1 + $0xc0] sm:$0xff] }
  0x14   :  { %19524 = vmatprep.mubr.msk.f32.mxu0 %vm84_vm1, %v60_v16  ;;  %19577 = vmatprep.mubr.msk.f32.mxu1 %vm84_vm1, %v16392_v17  ;;  %v16410_v57 = vld [vmem:[%s28721_s1 + $0x1b0] sm:$0xff]  ;;  %v79_v58 = vld [vmem:[%s28721_s1 + $0xc8] sm:$0xff]  ;;  %v16411_v59 = vld [vmem:[%s28721_s1 + $0x1b8] sm:$0xff] }
  0x15   :  { %v80_v60 = vld [vmem:[%s28721_s1 + $0xd0] sm:$0xff]  ;;  %v16412_v61 = vld [vmem:[%s28721_s1 + $0x1c0] sm:$0xff]  ;;  %v81_v62 = vld [vmem:[%s28721_s1 + $0xd8] sm:$0xff] }
  0x16   :  { %v16413_v63 = vld [vmem:[%s28721_s1 + $0x1c8] sm:$0xff]  ;;  %v82_v4 = vld [vmem:[%s28721_s1 + $0xe0] sm:$0xff]  ;;  %v16414_v5 = vld [vmem:[%s28721_s1 + $0x1d0] sm:$0xff] }
  0x17   :  { %19525 = vmatmul.mubr.msk.f32.gmra.mxu0 %vm84_vm1, %v61_v18  ;;  %19578 = vmatmul.mubr.msk.f32.gmra.mxu1 %vm84_vm1, %v16393_v19  ;;  %v83_v6 = vld [vmem:[%s28721_s1 + $0xe8] sm:$0xff]  ;;  %v16415_v7 = vld [vmem:[%s28721_s1 + $0x1d8] sm:$0xff]  ;;  %v16447_v10 = vld [vmem:[%s28722_s2 + $0x20] sm:$0xff] }
  0x18   :  { %19527 = vmatprep.mubr.msk.f32.mxu0 %vm84_vm1, %v62_v20  ;;  %19580 = vmatprep.mubr.msk.f32.mxu1 %vm84_vm1, %v16394_v21  ;;  %v16448_v8 = vld [vmem:[%s28722_s2 + $0x28] sm:$0xff]  ;;  %v394_v11 = vld [vmem:[%s28722_s2] sm:$0xff] }
  0x19   :  { %v395_v9 = vld [vmem:[%s28722_s2 + $0x8] sm:$0xff]  ;;  %19617 = vmatprep.subr.mxu0 %v16448_v8 }
  0x1a   :  { %19670 = vmatprep.subr.mxu1 %v395_v9  ;;  %19618 = vmatpush3.msra.mxu0 %v16448_v8 }
  0x1b   :  { %19528 = vmatmul.mubr.msk.f32.gmra.mxu0 %vm84_vm1, %v63_v24  ;;  %19581 = vmatmul.mubr.msk.f32.gmra.mxu1 %vm84_vm1, %v16395_v25 }
  0x1c   :  { %19530 = vmatprep.mubr.msk.f32.mxu0 %vm84_vm1, %v64_v26  ;;  %19583 = vmatprep.mubr.msk.f32.mxu1 %vm84_vm1, %v16396_v27 }
  0x1d   :  { %19671 = vmatpush3.msra.mxu1 %v395_v9  ;;  %19619 = vmatprep.subr.mxu0 %v16447_v10 }
  0x1e   :  { %19672 = vmatprep.subr.mxu1 %v394_v11  ;;  %19620 = vmatpush3.msra.mxu0 %v16447_v10 }
  0x1f   :  { %19531 = vmatmul.mubr.msk.f32.gmra.mxu0 %vm84_vm1, %v65_v30  ;;  %19584 = vmatmul.mubr.msk.f32.gmra.mxu1 %vm84_vm1, %v16397_v31 }
  0x20   :  { %19533 = vmatprep.mubr.msk.f32.mxu0 %vm84_vm1, %v66_v32  ;;  %19586 = vmatprep.mubr.msk.f32.mxu1 %vm84_vm1, %v16398_v33 }
  0x21   :  { %19673 = vmatpush3.msra.mxu1 %v394_v11  ;;  %19719 = vmatprep.subr.msk.mxu0 %vm175_vm0, %v22122_v0 }
  0x23   :  { %19534 = vmatmul.mubr.msk.f32.gmra.mxu0 %vm84_vm1, %v67_v34  ;;  %19587 = vmatmul.mubr.msk.f32.gmra.mxu1 %vm84_vm1, %v16399_v35 }
  0x24   :  { %19536 = vmatprep.mubr.msk.f32.mxu0 %vm84_vm1, %v68_v36  ;;  %19589 = vmatprep.mubr.msk.f32.mxu1 %vm84_vm1, %v16400_v37 }
  0x27   :  { %19537 = vmatmul.mubr.msk.f32.gmra.mxu0 %vm84_vm1, %v69_v38  ;;  %19590 = vmatmul.mubr.msk.f32.gmra.mxu1 %vm84_vm1, %v16401_v39 }
  0x28   :  { %19539 = vmatprep.mubr.msk.f32.mxu0 %vm84_vm1, %v70_v40  ;;  %19592 = vmatprep.mubr.msk.f32.mxu1 %vm84_vm1, %v16402_v41 }
  0x2b   :  { %19540 = vmatmul.mubr.msk.f32.gmra.mxu0 %vm84_vm1, %v71_v42  ;;  %19593 = vmatmul.mubr.msk.f32.gmra.mxu1 %vm84_vm1, %v16403_v43 }
  0x2c   :  { %19542 = vmatprep.mubr.msk.f32.mxu0 %vm84_vm1, %v72_v44  ;;  %19595 = vmatprep.mubr.msk.f32.mxu1 %vm84_vm1, %v16404_v45 }
  0x2f   :  { %19543 = vmatmul.mubr.msk.f32.gmra.mxu0 %vm84_vm1, %v73_v46  ;;  %19596 = vmatmul.mubr.msk.f32.gmra.mxu1 %vm84_vm1, %v16405_v47 }
  0x30   :  { %19545 = vmatprep.mubr.msk.f32.mxu0 %vm84_vm1, %v74_v48  ;;  %19598 = vmatprep.mubr.msk.f32.mxu1 %vm84_vm1, %v16406_v49 }
  0x33   :  { %19546 = vmatmul.mubr.msk.f32.gmra.mxu0 %vm84_vm1, %v75_v50  ;;  %19599 = vmatmul.mubr.msk.f32.gmra.mxu1 %vm84_vm1, %v16407_v51 }
  0x34   :  { %19548 = vmatprep.mubr.msk.f32.mxu0 %vm84_vm1, %v76_v52  ;;  %19601 = vmatprep.mubr.msk.f32.mxu1 %vm84_vm1, %v16408_v53 }
  0x37   :  { %19549 = vmatmul.mubr.msk.f32.gmra.mxu0 %vm84_vm1, %v77_v54  ;;  %19602 = vmatmul.mubr.msk.f32.gmra.mxu1 %vm84_vm1, %v16409_v55 }
  0x38   :  { %19551 = vmatprep.mubr.msk.f32.mxu0 %vm84_vm1, %v78_v56  ;;  %19604 = vmatprep.mubr.msk.f32.mxu1 %vm84_vm1, %v16410_v57 }
  0x3b   :  { %19552 = vmatmul.mubr.msk.f32.gmra.mxu0 %vm84_vm1, %v79_v58  ;;  %19605 = vmatmul.mubr.msk.f32.gmra.mxu1 %vm84_vm1, %v16411_v59 }
  0x3c   :  { %19554 = vmatprep.mubr.msk.f32.mxu0 %vm84_vm1, %v80_v60  ;;  %19607 = vmatprep.mubr.msk.f32.mxu1 %vm84_vm1, %v16412_v61 }
  0x3f   :  { %19555 = vmatmul.mubr.msk.f32.gmra.mxu0 %vm84_vm1, %v81_v62  ;;  %19608 = vmatmul.mubr.msk.f32.gmra.mxu1 %vm84_vm1, %v16413_v63 }
  0x40   :  { %19557 = vmatprep.mubr.msk.f32.mxu0 %vm84_vm1, %v82_v4  ;;  %19610 = vmatprep.mubr.msk.f32.mxu1 %vm84_vm1, %v16414_v5 }
  0x43   :  { %19558 = vmatmul.mubr.msk.f32.gmra.mxu0 %vm84_vm1, %v83_v6  ;;  %19611 = vmatmul.mubr.msk.f32.gmra.mxu1 %vm84_vm1, %v16415_v7 }
  0xcb   :  { %v19517_v12 = vpop.f32.mrf.mxu0  ;;  %v19570_v13 = vpop.f32.mrf.mxu1 }
  0xcd   :  { %v245_v14 = vpop.f32.mrf.mxu0  ;;  %v585_v15 = vpop.f32.mrf.mxu1 }
  0xce   :  { %19621 = vmatprep.mubr.msk.f32.mxu0 %vm84_vm1, %v585_v15  ;;  %19674 = vmatprep.mubr.msk.f32.mxu1 %vm84_vm1, %v245_v14  ;;  %v16515_v14 = vld [vmem:[%s28721_s1 + $0x1f0] sm:$0xff]  ;;  %v16516_v15 = vld [vmem:[%s28721_s1 + $0x1f8] sm:$0xff] }
  0xcf   :  { %v19520_v16 = vpop.f32.mrf.mxu0  ;;  %v19573_v17 = vpop.f32.mrf.mxu1  ;;  %19622 = vmatmul.mubr.msk.f32.vlgmr.msra.gmra.mxu0 %vm84_vm1, %v19570_v13  ;;  %19675 = vmatmul.mubr.msk.f32.vlgmr.msra.gmra.mxu1 %vm84_vm1, %v19517_v12  ;;  %v16513_v12 = vld [vmem:[%s28721_s1 + $0x1e0] sm:$0xff]  ;;  %v16514_v13 = vld [vmem:[%s28721_s1 + $0x1e8] sm:$0xff] }
  0xd0   :  { %19720 = vmatpush3.msk.msra.mxu0 %vm175_vm0, %v22122_v0 }
  0xd1   :  { %v255_v18 = vpop.f32.mrf.mxu0  ;;  %v595_v19 = vpop.f32.mrf.mxu1  ;;  %19721 = vmatprep.subr.mxu0 %v22127_v1 }
  0xd2   :  { %19624 = vmatprep.mubr.msk.f32.mxu0 %vm84_vm1, %v595_v19  ;;  %19677 = vmatprep.mubr.msk.f32.mxu1 %vm84_vm1, %v255_v18  ;;  %v16519_v18 = vld [vmem:[%s28721_s1 + $0x210] sm:$0xff]  ;;  %v16520_v19 = vld [vmem:[%s28721_s1 + $0x218] sm:$0xff] }
  0xd3   :  { %v19523_v20 = vpop.f32.mrf.mxu0  ;;  %v19576_v21 = vpop.f32.mrf.mxu1  ;;  %19625 = vmatmul.mubr.msk.f32.gmra.mxu0 %vm84_vm1, %v19573_v17  ;;  %19678 = vmatmul.mubr.msk.f32.gmra.mxu1 %vm84_vm1, %v19520_v16  ;;  %v16517_v16 = vld [vmem:[%s28721_s1 + $0x200] sm:$0xff]  ;;  %v16518_v17 = vld [vmem:[%s28721_s1 + $0x208] sm:$0xff] }
  0xd4   :  { %19722 = vmatpush3.msra.mxu0 %v22127_v1 }
  0xd5   :  { %v265_v22 = vpop.f32.mrf.mxu0  ;;  %v605_v23 = vpop.f32.mrf.mxu1  ;;  %19723 = vmatprep.subr.mxu0 %v22140_v2 }
  0xd6   :  { %19627 = vmatprep.mubr.msk.f32.mxu0 %vm84_vm1, %v605_v23  ;;  %19680 = vmatprep.mubr.msk.f32.mxu1 %vm84_vm1, %v265_v22  ;;  %v16523_v22 = vld [vmem:[%s28721_s1 + $0x230] sm:$0xff]  ;;  %v16524_v23 = vld [vmem:[%s28721_s1 + $0x238] sm:$0xff] }
  0xd7   :  { %v19526_v24 = vpop.f32.mrf.mxu0  ;;  %v19579_v25 = vpop.f32.mrf.mxu1  ;;  %19628 = vmatmul.mubr.msk.f32.gmra.mxu0 %vm84_vm1, %v19576_v21  ;;  %19681 = vmatmul.mubr.msk.f32.gmra.mxu1 %vm84_vm1, %v19523_v20  ;;  %v16521_v20 = vld [vmem:[%s28721_s1 + $0x220] sm:$0xff]  ;;  %v16522_v21 = vld [vmem:[%s28721_s1 + $0x228] sm:$0xff] }
  0xd8   :  { %19724 = vmatpush3.msra.mxu0 %v22140_v2 }
  0xd9   :  { %v275_v26 = vpop.f32.mrf.mxu0  ;;  %v615_v27 = vpop.f32.mrf.mxu1  ;;  %19725 = vmatprep.subr.mxu0 %v22149_v3 }
  0xda   :  { %19630 = vmatprep.mubr.msk.f32.mxu0 %vm84_vm1, %v615_v27  ;;  %19683 = vmatprep.mubr.msk.f32.mxu1 %vm84_vm1, %v275_v26  ;;  %v16527_v26 = vld [vmem:[%s28721_s1 + $0x250] sm:$0xff]  ;;  %v16528_v27 = vld [vmem:[%s28721_s1 + $0x258] sm:$0xff] }
  0xdb   :  { %v19529_v28 = vpop.f32.mrf.mxu0  ;;  %v19582_v29 = vpop.f32.mrf.mxu1  ;;  %19631 = vmatmul.mubr.msk.f32.gmra.mxu0 %vm84_vm1, %v19579_v25  ;;  %19684 = vmatmul.mubr.msk.f32.gmra.mxu1 %vm84_vm1, %v19526_v24  ;;  %v16525_v24 = vld [vmem:[%s28721_s1 + $0x240] sm:$0xff]  ;;  %v16526_v25 = vld [vmem:[%s28721_s1 + $0x248] sm:$0xff] }
  0xdc   :  { %19726 = vmatpush3.msra.mxu0 %v22149_v3 }
  0xdd   :  { %v285_v30 = vpop.f32.mrf.mxu0  ;;  %v625_v31 = vpop.f32.mrf.mxu1  ;;  %19825 = vmatprep.subr.msk.mxu0 %vm175_vm0, %v22122_v0 }
  0xde   :  { %19633 = vmatprep.mubr.msk.f32.mxu0 %vm84_vm1, %v625_v31  ;;  %19686 = vmatprep.mubr.msk.f32.mxu1 %vm84_vm1, %v285_v30  ;;  %v16531_v30 = vld [vmem:[%s28721_s1 + $0x270] sm:$0xff]  ;;  %v16532_v31 = vld [vmem:[%s28721_s1 + $0x278] sm:$0xff] }
  0xdf   :  { %v19532_v32 = vpop.f32.mrf.mxu0  ;;  %v19585_v33 = vpop.f32.mrf.mxu1  ;;  %19634 = vmatmul.mubr.msk.f32.gmra.mxu0 %vm84_vm1, %v19582_v29  ;;  %19687 = vmatmul.mubr.msk.f32.gmra.mxu1 %vm84_vm1, %v19529_v28  ;;  %v16529_v28 = vld [vmem:[%s28721_s1 + $0x260] sm:$0xff]  ;;  %v16530_v29 = vld [vmem:[%s28721_s1 + $0x268] sm:$0xff] }
  0xe1   :  { %v295_v34 = vpop.f32.mrf.mxu0  ;;  %v635_v35 = vpop.f32.mrf.mxu1 }
  0xe2   :  { %19636 = vmatprep.mubr.msk.f32.mxu0 %vm84_vm1, %v635_v35  ;;  %19689 = vmatprep.mubr.msk.f32.mxu1 %vm84_vm1, %v295_v34  ;;  %v16535_v34 = vld [vmem:[%s28721_s1 + $0x290] sm:$0xff]  ;;  %v16577_v35 = vld [vmem:[%s28722_s2 + $0x58] sm:$0xf] }
  0xe3   :  { %v19535_v36 = vpop.f32.mrf.mxu0  ;;  %v19588_v37 = vpop.f32.mrf.mxu1  ;;  %19637 = vmatmul.mubr.msk.f32.gmra.mxu0 %vm84_vm1, %v19585_v33  ;;  %19690 = vmatmul.mubr.msk.f32.gmra.mxu1 %vm84_vm1, %v19532_v32  ;;  %v16533_v32 = vld [vmem:[%s28721_s1 + $0x280] sm:$0xff]  ;;  %v16534_v33 = vld [vmem:[%s28721_s1 + $0x288] sm:$0xff] }
  0xe4   :  { %19772 = vmatprep.subr.msk.mxu1 %vm175_vm0, %v16577_v35 }
  0xe5   :  { %v305_v38 = vpop.f32.mrf.mxu0  ;;  %v645_v39 = vpop.f32.mrf.mxu1  ;;  %19773 = vmatpush3.msk.msra.mxu1 %vm175_vm0, %v16577_v35  ;;  %v16717_v35 = vld [vmem:[%s28721_s1 + $0x420] sm:$0xff] }
  0xe6   :  { %19639 = vmatprep.mubr.msk.f32.mxu0 %vm84_vm1, %v645_v39  ;;  %19692 = vmatprep.mubr.msk.f32.mxu1 %vm84_vm1, %v305_v38  ;;  %v16538_v38 = vld [vmem:[%s28721_s1 + $0x2a8] sm:$0xff]  ;;  %v16539_v39 = vld [vmem:[%s28721_s1 + $0x2b0] sm:$0xff] }
  0xe7   :  { %v19538_v40 = vpop.f32.mrf.mxu0  ;;  %v19591_v41 = vpop.f32.mrf.mxu1  ;;  %19640 = vmatmul.mubr.msk.f32.gmra.mxu0 %vm84_vm1, %v19588_v37  ;;  %19693 = vmatmul.mubr.msk.f32.gmra.mxu1 %vm84_vm1, %v19535_v36  ;;  %v16536_v36 = vld [vmem:[%s28721_s1 + $0x298] sm:$0xff]  ;;  %v16537_v37 = vld [vmem:[%s28721_s1 + $0x2a0] sm:$0xff] }
  0xe9   :  { %v315_v42 = vpop.f32.mrf.mxu0  ;;  %v655_v43 = vpop.f32.mrf.mxu1 }
  0xea   :  { %19642 = vmatprep.mubr.msk.f32.mxu0 %vm84_vm1, %v655_v43  ;;  %19695 = vmatprep.mubr.msk.f32.mxu1 %vm84_vm1, %v315_v42  ;;  %v16542_v42 = vld [vmem:[%s28721_s1 + $0x2c8] sm:$0xff]  ;;  %v16576_v43 = vld [vmem:[%s28722_s2 + $0x50] sm:$0xff] }
  0xeb   :  { %v19541_v44 = vpop.f32.mrf.mxu0  ;;  %v19594_v45 = vpop.f32.mrf.mxu1  ;;  %19643 = vmatmul.mubr.msk.f32.gmra.mxu0 %vm84_vm1, %v19591_v41  ;;  %19696 = vmatmul.mubr.msk.f32.gmra.mxu1 %vm84_vm1, %v19538_v40  ;;  %v16540_v40 = vld [vmem:[%s28721_s1 + $0x2b8] sm:$0xff]  ;;  %v16541_v41 = vld [vmem:[%s28721_s1 + $0x2c0] sm:$0xff] }
  0xec   :  { %19774 = vmatprep.subr.mxu1 %v16576_v43 }
  0xed   :  { %v325_v46 = vpop.f32.mrf.mxu0  ;;  %v665_v47 = vpop.f32.mrf.mxu1  ;;  %19775 = vmatpush3.msra.mxu1 %v16576_v43 }
  0xee   :  { %19645 = vmatprep.mubr.msk.f32.mxu0 %vm84_vm1, %v665_v47  ;;  %19698 = vmatprep.mubr.msk.f32.mxu1 %vm84_vm1, %v325_v46  ;;  %v16611_v46 = vld [vmem:[%s28721_s1 + $0x2e0] sm:$0xff]  ;;  %v16612_v47 = vld [vmem:[%s28721_s1 + $0x2e8] sm:$0xff] }
  0xef   :  { %v19544_v48 = vpop.f32.mrf.mxu0  ;;  %v19597_v49 = vpop.f32.mrf.mxu1  ;;  %19646 = vmatmul.mubr.msk.f32.gmra.mxu0 %vm84_vm1, %v19594_v45  ;;  %19699 = vmatmul.mubr.msk.f32.gmra.mxu1 %vm84_vm1, %v19541_v44  ;;  %v16609_v44 = vld [vmem:[%s28721_s1 + $0x2d0] sm:$0xff]  ;;  %v16610_v45 = vld [vmem:[%s28721_s1 + $0x2d8] sm:$0xff] }
  0xf1   :  { %v335_v50 = vpop.f32.mrf.mxu0  ;;  %v675_v51 = vpop.f32.mrf.mxu1 }
  0xf2   :  { %19648 = vmatprep.mubr.msk.f32.mxu0 %vm84_vm1, %v675_v51  ;;  %19701 = vmatprep.mubr.msk.f32.mxu1 %vm84_vm1, %v335_v50  ;;  %v16615_v50 = vld [vmem:[%s28721_s1 + $0x300] sm:$0xff]  ;;  %v16617_v51 = vld [vmem:[%s28721_s1 + $0x310] sm:$0xff] }
  0xf3   :  { %v19547_v52 = vpop.f32.mrf.mxu0  ;;  %v19600_v53 = vpop.f32.mrf.mxu1  ;;  %19649 = vmatmul.mubr.msk.f32.gmra.mxu0 %vm84_vm1, %v19597_v49  ;;  %19702 = vmatmul.mubr.msk.f32.gmra.mxu1 %vm84_vm1, %v19544_v48  ;;  %v16613_v48 = vld [vmem:[%s28721_s1 + $0x2f0] sm:$0xff]  ;;  %v16575_v49 = vld [vmem:[%s28722_s2 + $0x48] sm:$0xff] }
  0xf4   :  { %19776 = vmatprep.subr.mxu1 %v16575_v49 }
  0xf5   :  { %v345_v54 = vpop.f32.mrf.mxu0  ;;  %v685_v55 = vpop.f32.mrf.mxu1  ;;  %19777 = vmatpush3.msra.mxu1 %v16575_v49  ;;  %v16721_v49 = vld [vmem:[%s28721_s1 + $0x440] sm:$0xff] }
  0xf6   :  { %19651 = vmatprep.mubr.msk.f32.mxu0 %vm84_vm1, %v685_v55  ;;  %19704 = vmatprep.mubr.msk.f32.mxu1 %vm84_vm1, %v345_v54  ;;  %v16621_v54 = vld [vmem:[%s28721_s1 + $0x330] sm:$0xff]  ;;  %v16622_v55 = vld [vmem:[%s28721_s1 + $0x338] sm:$0xff] }
  0xf7   :  { %v19550_v56 = vpop.f32.mrf.mxu0  ;;  %v19603_v57 = vpop.f32.mrf.mxu1  ;;  %19652 = vmatmul.mubr.msk.f32.gmra.mxu0 %vm84_vm1, %v19600_v53  ;;  %19705 = vmatmul.mubr.msk.f32.gmra.mxu1 %vm84_vm1, %v19547_v52  ;;  %v16619_v52 = vld [vmem:[%s28721_s1 + $0x320] sm:$0xff]  ;;  %v16620_v53 = vld [vmem:[%s28721_s1 + $0x328] sm:$0xff] }
  0xf9   :  { %v355_v58 = vpop.f32.mrf.mxu0  ;;  %v695_v59 = vpop.f32.mrf.mxu1 }
  0xfa   :  { %19654 = vmatprep.mubr.msk.f32.mxu0 %vm84_vm1, %v695_v59  ;;  %19707 = vmatprep.mubr.msk.f32.mxu1 %vm84_vm1, %v355_v58  ;;  %v16625_v58 = vld [vmem:[%s28721_s1 + $0x350] sm:$0xff]  ;;  %v16626_v59 = vld [vmem:[%s28721_s1 + $0x358] sm:$0xff] }
  0xfb   :  { %v19553_v60 = vpop.f32.mrf.mxu0  ;;  %v19606_v61 = vpop.f32.mrf.mxu1  ;;  %19655 = vmatmul.mubr.msk.f32.gmra.mxu0 %vm84_vm1, %v19603_v57  ;;  %19708 = vmatmul.mubr.msk.f32.gmra.mxu1 %vm84_vm1, %v19550_v56  ;;  %v16623_v56 = vld [vmem:[%s28721_s1 + $0x340] sm:$0xff]  ;;  %v16624_v57 = vld [vmem:[%s28721_s1 + $0x348] sm:$0xff] }
  0xfd   :  { %v365_v62 = vpop.f32.mrf.mxu0  ;;  %v705_v63 = vpop.f32.mrf.mxu1 }
  0xfe   :  { %19657 = vmatprep.mubr.msk.f32.mxu0 %vm84_vm1, %v705_v63  ;;  %19710 = vmatprep.mubr.msk.f32.mxu1 %vm84_vm1, %v365_v62  ;;  %v16629_v62 = vld [vmem:[%s28721_s1 + $0x370] sm:$0xff]  ;;  %v16630_v63 = vld [vmem:[%s28721_s1 + $0x378] sm:$0xff] }
  0xff   :  { %v19556_v4 = vpop.f32.mrf.mxu0  ;;  %v19609_v5 = vpop.f32.mrf.mxu1  ;;  %19658 = vmatmul.mubr.msk.f32.gmra.mxu0 %vm84_vm1, %v19606_v61  ;;  %19711 = vmatmul.mubr.msk.f32.gmra.mxu1 %vm84_vm1, %v19553_v60  ;;  %v16627_v60 = vld [vmem:[%s28721_s1 + $0x360] sm:$0xff]  ;;  %v16628_v61 = vld [vmem:[%s28721_s1 + $0x368] sm:$0xff] }
 0x101   :  { %v375_v6 = vpop.f32.mrf.mxu0  ;;  %v715_v7 = vpop.f32.mrf.mxu1 }
 0x102   :  { %19660 = vmatprep.mubr.msk.f32.mxu0 %vm84_vm1, %v715_v7  ;;  %19713 = vmatprep.mubr.msk.f32.mxu1 %vm84_vm1, %v375_v6  ;;  %v16632_v6 = vld [vmem:[%s28721_s1 + $0x388] sm:$0xff]  ;;  %v16633_v7 = vld [vmem:[%s28721_s1 + $0x390] sm:$0xff] }
 0x103   :  { %v19559_v8 = vpop.f32.mrf.mxu0  ;;  %v19612_v9 = vpop.f32.mrf.mxu1  ;;  %19661 = vmatmul.mubr.msk.f32.gmra.mxu0 %vm84_vm1, %v19609_v5  ;;  %19714 = vmatmul.mubr.msk.f32.gmra.mxu1 %vm84_vm1, %v19556_v4  ;;  %v16631_v4 = vld [vmem:[%s28721_s1 + $0x380] sm:$0xff]  ;;  %v22744_v5 = vld [vmem:[%s28722_s2 + $0x78] sm:$0xf] }
 0x105   :  { %v385_v10 = vpop.f32.mrf.mxu0  ;;  %v725_v11 = vpop.f32.mrf.mxu1 }
 0x106   :  { %19663 = vmatprep.mubr.msk.f32.mxu0 %vm84_vm1, %v725_v11  ;;  %19716 = vmatprep.mubr.msk.f32.mxu1 %vm84_vm1, %v385_v10  ;;  %v16636_v10 = vld [vmem:[%s28721_s1 + $0x3a8] sm:$0xff]  ;;  %v16637_v11 = vld [vmem:[%s28721_s1 + $0x3b0] sm:$0xff] }
 0x107   :  { %19664 = vmatmul.mubr.msk.f32.gmra.mxu0 %vm84_vm1, %v19612_v9  ;;  %19717 = vmatmul.mubr.msk.f32.gmra.mxu1 %vm84_vm1, %v19559_v8  ;;  %v16634_v8 = vld [vmem:[%s28721_s1 + $0x398] sm:$0xff]  ;;  %v16635_v9 = vld [vmem:[%s28721_s1 + $0x3a0] sm:$0xff] }
 0x108   :  { %19727 = vmatprep.mubr.msk.f32.mxu0 %vm84_vm1, %v16513_v12  ;;  %v16638_v12 = vld [vmem:[%s28721_s1 + $0x3b8] sm:$0xff] }
 0x10b   :  { %19728 = vmatmul.mubr.msk.f32.vlgmr.msra.gmra.mxu0 %vm84_vm1, %v16514_v13  ;;  %v16705_v13 = vld [vmem:[%s28721_s1 + $0x3c0] sm:$0xff] }
 0x10c   :  { %19730 = vmatprep.mubr.msk.f32.mxu0 %vm84_vm1, %v16515_v14  ;;  %19826 = vmatpush3.msk.msra.mxu0 %vm175_vm0, %v22122_v0  ;;  %v16706_v14 = vld [vmem:[%s28721_s1 + $0x3c8] sm:$0xff] }
 0x10d   :  { %19827 = vmatprep.subr.mxu0 %v22127_v1 }
 0x10e   :  { %19828 = vmatpush3.msra.mxu0 %v22127_v1 }
 0x10f   :  { %19731 = vmatmul.mubr.msk.f32.gmra.mxu0 %vm84_vm1, %v16516_v15  ;;  %19829 = vmatprep.subr.mxu0 %v22140_v2  ;;  %v16707_v15 = vld [vmem:[%s28721_s1 + $0x3d0] sm:$0xff] }
 0x110   :  { %19733 = vmatprep.mubr.msk.f32.mxu0 %vm84_vm1, %v16517_v16  ;;  %19830 = vmatpush3.msra.mxu0 %v22140_v2  ;;  %v16708_v16 = vld [vmem:[%s28721_s1 + $0x3d8] sm:$0xff] }
 0x111   :  { %19831 = vmatprep.subr.mxu0 %v22149_v3 }
 0x112   :  { %19832 = vmatpush3.msra.mxu0 %v22149_v3 }
 0x113   :  { %19734 = vmatmul.mubr.msk.f32.gmra.mxu0 %vm84_vm1, %v16518_v17  ;;  %19931 = vmatprep.subr.msk.mxu0 %vm175_vm0, %v22122_v0  ;;  %v16709_v17 = vld [vmem:[%s28721_s1 + $0x3e0] sm:$0xff] }
 0x114   :  { %19736 = vmatprep.mubr.msk.f32.mxu0 %vm84_vm1, %v16519_v18  ;;  %v16710_v18 = vld [vmem:[%s28721_s1 + $0x3e8] sm:$0xff] }
 0x117   :  { %19737 = vmatmul.mubr.msk.f32.gmra.mxu0 %vm84_vm1, %v16520_v19  ;;  %v16711_v19 = vld [vmem:[%s28721_s1 + $0x3f0] sm:$0xff] }
 0x118   :  { %19739 = vmatprep.mubr.msk.f32.mxu0 %vm84_vm1, %v16521_v20  ;;  %v16712_v20 = vld [vmem:[%s28721_s1 + $0x3f8] sm:$0xff] }
 0x11b   :  { %19740 = vmatmul.mubr.msk.f32.gmra.mxu0 %vm84_vm1, %v16522_v21  ;;  %v16713_v21 = vld [vmem:[%s28721_s1 + $0x400] sm:$0xff] }
 0x11c   :  { %19742 = vmatprep.mubr.msk.f32.mxu0 %vm84_vm1, %v16523_v22 }
 0x11f   :  { %19743 = vmatmul.mubr.msk.f32.gmra.mxu0 %vm84_vm1, %v16524_v23 }
 0x120   :  { %19745 = vmatprep.mubr.msk.f32.mxu0 %vm84_vm1, %v16525_v24 }
 0x123   :  { %19746 = vmatmul.mubr.msk.f32.gmra.mxu0 %vm84_vm1, %v16526_v25  ;;  %v16714_v25 = vld [vmem:[%s28721_s1 + $0x408] sm:$0xff] }
 0x124   :  { %19748 = vmatprep.mubr.msk.f32.mxu0 %vm84_vm1, %v16527_v26 }
 0x127   :  { %19749 = vmatmul.mubr.msk.f32.gmra.mxu0 %vm84_vm1, %v16528_v27 }
 0x128   :  { %19751 = vmatprep.mubr.msk.f32.mxu0 %vm84_vm1, %v16529_v28  ;;  %v16715_v28 = vld [vmem:[%s28721_s1 + $0x410] sm:$0xff] }
 0x12b   :  { %19752 = vmatmul.mubr.msk.f32.gmra.mxu0 %vm84_vm1, %v16530_v29 }
 0x12c   :  { %19754 = vmatprep.mubr.msk.f32.mxu0 %vm84_vm1, %v16531_v30 }
 0x12f   :  { %19755 = vmatmul.mubr.msk.f32.gmra.mxu0 %vm84_vm1, %v16532_v31 }
 0x130   :  { %19757 = vmatprep.mubr.msk.f32.mxu0 %vm84_vm1, %v16533_v32  ;;  %v16716_v32 = vld [vmem:[%s28721_s1 + $0x418] sm:$0xff] }
 0x133   :  { %19758 = vmatmul.mubr.msk.f32.gmra.mxu0 %vm84_vm1, %v16534_v33 }
 0x134   :  { %19760 = vmatprep.mubr.msk.f32.mxu0 %vm84_vm1, %v16535_v34 }
 0x137   :  { %19761 = vmatmul.mubr.msk.f32.gmra.mxu0 %vm84_vm1, %v16536_v36 }
 0x138   :  { %19763 = vmatprep.mubr.msk.f32.mxu0 %vm84_vm1, %v16537_v37 }
 0x13b   :  { %19764 = vmatmul.mubr.msk.f32.gmra.mxu0 %vm84_vm1, %v16538_v38 }
 0x13c   :  { %19766 = vmatprep.mubr.msk.f32.mxu0 %vm84_vm1, %v16539_v39  ;;  %v16718_v39 = vld [vmem:[%s28721_s1 + $0x428] sm:$0xff] }
 0x13f   :  { %19767 = vmatmul.mubr.msk.f32.gmra.mxu0 %vm84_vm1, %v16540_v40 }
 0x140   :  { %19769 = vmatprep.mubr.msk.f32.mxu0 %vm84_vm1, %v16541_v41 }
 0x143   :  { %19770 = vmatmul.mubr.msk.f32.gmra.mxu0 %vm84_vm1, %v16542_v42  ;;  %v16719_v42 = vld [vmem:[%s28721_s1 + $0x430] sm:$0xff] }
 0x144   :  { %19833 = vmatprep.mubr.msk.f32.mxu0 %vm84_vm1, %v16609_v44 }
 0x147   :  { %19834 = vmatmul.mubr.msk.f32.vlgmr.msra.gmra.mxu0 %vm84_vm1, %v16610_v45 }
 0x148   :  { %19836 = vmatprep.mubr.msk.f32.mxu0 %vm84_vm1, %v16611_v46  ;;  %19932 = vmatpush3.msk.msra.mxu0 %vm175_vm0, %v22122_v0  ;;  %v16614_v0 = vld [vmem:[%s28721_s1 + $0x2f8] sm:$0xff] }
 0x149   :  { %19933 = vmatprep.subr.mxu0 %v22127_v1  ;;  %v16720_v46 = vld [vmem:[%s28721_s1 + $0x438] sm:$0xff] }
 0x14a   :  { %19934 = vmatpush3.msra.mxu0 %v22127_v1  ;;  %v16574_v1 = vld [vmem:[%s28722_s2 + $0x40] sm:$0xff] }
 0x14b   :  { %19837 = vmatmul.mubr.msk.f32.gmra.mxu0 %vm84_vm1, %v16612_v47  ;;  %19935 = vmatprep.subr.mxu0 %v22140_v2 }
 0x14c   :  { %19839 = vmatprep.mubr.msk.f32.mxu0 %vm84_vm1, %v16613_v48  ;;  %19936 = vmatpush3.msra.mxu0 %v22140_v2  ;;  %v16616_v2 = vld [vmem:[%s28721_s1 + $0x308] sm:$0xff] }
 0x14d   :  { %19937 = vmatprep.subr.mxu0 %v22149_v3  ;;  %19778 = vmatprep.subr.mxu1 %v16574_v1 }
 0x14e   :  { %19938 = vmatpush3.msra.mxu0 %v22149_v3  ;;  %19779 = vmatpush3.msra.mxu1 %v16574_v1  ;;  %v16618_v3 = vld [vmem:[%s28721_s1 + $0x318] sm:$0xff] }
 0x14f   :  { %19840 = vmatmul.mubr.msk.f32.gmra.mxu0 %vm84_vm1, %v16614_v0  ;;  %19878 = vmatprep.subr.msk.mxu1 %vm175_vm0, %v22744_v5 }
 0x150   :  { %19842 = vmatprep.mubr.msk.f32.mxu0 %vm84_vm1, %v16615_v50 }
 0x153   :  { %19843 = vmatmul.mubr.msk.f32.gmra.mxu0 %vm84_vm1, %v16616_v2  ;;  %v16722_v2 = vld [vmem:[%s28721_s1 + $0x448] sm:$0xff] }
 0x154   :  { %19845 = vmatprep.mubr.msk.f32.mxu0 %vm84_vm1, %v16617_v51 }
 0x157   :  { %19846 = vmatmul.mubr.msk.f32.gmra.mxu0 %vm84_vm1, %v16618_v3 }
 0x158   :  { %19848 = vmatprep.mubr.msk.f32.mxu0 %vm84_vm1, %v16619_v52  ;;  %v16723_v52 = vld [vmem:[%s28721_s1 + $0x450] sm:$0xff] }
 0x15b   :  { %19849 = vmatmul.mubr.msk.f32.gmra.mxu0 %vm84_vm1, %v16620_v53 }
 0x15c   :  { %19851 = vmatprep.mubr.msk.f32.mxu0 %vm84_vm1, %v16621_v54 }
 0x15f   :  { %19852 = vmatmul.mubr.msk.f32.gmra.mxu0 %vm84_vm1, %v16622_v55 }
 0x160   :  { %19854 = vmatprep.mubr.msk.f32.mxu0 %vm84_vm1, %v16623_v56  ;;  %v16724_v56 = vld [vmem:[%s28721_s1 + $0x458] sm:$0xff] }
 0x163   :  { %19855 = vmatmul.mubr.msk.f32.gmra.mxu0 %vm84_vm1, %v16624_v57 }
 0x164   :  { %19857 = vmatprep.mubr.msk.f32.mxu0 %vm84_vm1, %v16625_v58 }
 0x167   :  { %19858 = vmatmul.mubr.msk.f32.gmra.mxu0 %vm84_vm1, %v16626_v59  ;;  %v16725_v59 = vld [vmem:[%s28721_s1 + $0x460] sm:$0xff] }
 0x168   :  { %19860 = vmatprep.mubr.msk.f32.mxu0 %vm84_vm1, %v16627_v60 }
 0x16b   :  { %19861 = vmatmul.mubr.msk.f32.gmra.mxu0 %vm84_vm1, %v16628_v61 }
 0x16c   :  { %19863 = vmatprep.mubr.msk.f32.mxu0 %vm84_vm1, %v16629_v62 }
 0x16f   :  { %19864 = vmatmul.mubr.msk.f32.gmra.mxu0 %vm84_vm1, %v16630_v63  ;;  %v16726_v63 = vld [vmem:[%s28721_s1 + $0x468] sm:$0xff] }
 0x170   :  { %19866 = vmatprep.mubr.msk.f32.mxu0 %vm84_vm1, %v16631_v4 }
 0x173   :  { %19867 = vmatmul.mubr.msk.f32.gmra.mxu0 %vm84_vm1, %v16632_v6 }
 0x174   :  { %19869 = vmatprep.mubr.msk.f32.mxu0 %vm84_vm1, %v16633_v7  ;;  %v16727_v7 = vld [vmem:[%s28721_s1 + $0x470] sm:$0xff] }
 0x177   :  { %19870 = vmatmul.mubr.msk.f32.gmra.mxu0 %vm84_vm1, %v16634_v8 }
 0x178   :  { %19872 = vmatprep.mubr.msk.f32.mxu0 %vm84_vm1, %v16635_v9 }
 0x17b   :  { %19873 = vmatmul.mubr.msk.f32.gmra.mxu0 %vm84_vm1, %v16636_v10 }
 0x17c   :  { %19875 = vmatprep.mubr.msk.f32.mxu0 %vm84_vm1, %v16637_v11  ;;  %v16728_v11 = vld [vmem:[%s28721_s1 + $0x478] sm:$0xff] }
 0x17f   :  { %19876 = vmatmul.mubr.msk.f32.gmra.mxu0 %vm84_vm1, %v16638_v12 }
 0x180   :  { %19939 = vmatprep.mubr.msk.f32.mxu0 %vm84_vm1, %v16705_v13 }
 0x183   :  { %19940 = vmatmul.mubr.msk.f32.vlgmr.msra.gmra.mxu0 %vm84_vm1, %v16706_v14  ;;  %v16729_v14 = vld [vmem:[%s28721_s1 + $0x480] sm:$0xff] }
 0x184   :  { %19942 = vmatprep.mubr.msk.f32.mxu0 %vm84_vm1, %v16707_v15 }
 0x187   :  { %19943 = vmatmul.mubr.msk.f32.gmra.mxu0 %vm84_vm1, %v16708_v16 }
 0x188   :  { %19945 = vmatprep.mubr.msk.f32.mxu0 %vm84_vm1, %v16709_v17 }
 0x18b   :  { %19946 = vmatmul.mubr.msk.f32.gmra.mxu0 %vm84_vm1, %v16710_v18  ;;  %v16730_v18 = vld [vmem:[%s28721_s1 + $0x488] sm:$0xff] }
 0x18c   :  { %19948 = vmatprep.mubr.msk.f32.mxu0 %vm84_vm1, %v16711_v19 }
 0x18f   :  { %v19623_v22 = vpop.f32.mrf.mxu0  ;;  %v19676_v23 = vpop.f32.mrf.mxu1  ;;  %19949 = vmatmul.mubr.msk.f32.gmra.mxu0 %vm84_vm1, %v16712_v20 }
 0x190   :  { %v22813_v24 = vadd.f32 %v19676_v23, %v19623_v22  ;;  %19951 = vmatprep.mubr.msk.f32.mxu0 %vm84_vm1, %v16713_v21  ;;  %v16731_v21 = vld [vmem:[%s28721_s1 + $0x490] sm:$0xff] }
 0x191   :  { %v22819_v26 = vpop.f32.mrf.mxu0  ;;  %v22821_v27 = vpop.f32.mrf.mxu1 }
 0x193   :  { %v19626_v29 = vpop.f32.mrf.mxu0  ;;  %v19679_v30 = vpop.f32.mrf.mxu1  ;;  %19952 = vmatmul.mubr.msk.f32.gmra.mxu0 %vm84_vm1, %v16714_v25 }
 0x194   :  { %v22827_v31 = vadd.f32 %v19679_v30, %v19626_v29  ;;  %19954 = vmatprep.mubr.msk.f32.mxu0 %vm84_vm1, %v16715_v28  ;;  %v16732_v28 = vld [vmem:[%s28721_s1 + $0x498] sm:$0xff] }
 0x195   :  { %v22833_v33 = vpop.f32.mrf.mxu0  ;;  %v22835_v34 = vpop.f32.mrf.mxu1 }
 0x197   :  { %v19629_v36 = vpop.f32.mrf.mxu0  ;;  %v19682_v37 = vpop.f32.mrf.mxu1  ;;  %19955 = vmatmul.mubr.msk.f32.gmra.mxu0 %vm84_vm1, %v16716_v32  ;;  %v16733_v32 = vld [vmem:[%s28721_s1 + $0x4a0] sm:$0xff] }
 0x198   :  { %v22841_v38 = vadd.f32 %v19682_v37, %v19629_v36  ;;  %19957 = vmatprep.mubr.msk.f32.mxu0 %vm84_vm1, %v16717_v35 }
 0x199   :  { %v22847_v40 = vpop.f32.mrf.mxu0  ;;  %v22849_v41 = vpop.f32.mrf.mxu1 }
 0x19b   :  { %v19632_v43 = vpop.f32.mrf.mxu0  ;;  %v19685_v44 = vpop.f32.mrf.mxu1  ;;  %19958 = vmatmul.mubr.msk.f32.gmra.mxu0 %vm84_vm1, %v16718_v39  ;;  %v16734_v39 = vld [vmem:[%s28721_s1 + $0x4a8] sm:$0xff] }
 0x19c   :  { %v22855_v45 = vadd.f32 %v19685_v44, %v19632_v43  ;;  %19960 = vmatprep.mubr.msk.f32.mxu0 %vm84_vm1, %v16719_v42 }
 0x19d   :  { %v22861_v47 = vpop.f32.mrf.mxu0  ;;  %v22863_v48 = vpop.f32.mrf.mxu1 }
 0x19f   :  { %v19635_v0 = vpop.f32.mrf.mxu0  ;;  %v19688_v1 = vpop.f32.mrf.mxu1  ;;  %19961 = vmatmul.mubr.msk.f32.gmra.mxu0 %vm84_vm1, %v16720_v46 }
 0x1a0   :  { %v22869_v50 = vadd.f32 %v19688_v1, %v19635_v0  ;;  %19963 = vmatprep.mubr.msk.f32.mxu0 %vm84_vm1, %v16721_v49 }
 0x1a1   :  { %v22875_v51 = vpop.f32.mrf.mxu0  ;;  %v22877_v3 = vpop.f32.mrf.mxu1 }
 0x1a3   :  { %v19638_v53 = vpop.f32.mrf.mxu0  ;;  %v19691_v54 = vpop.f32.mrf.mxu1  ;;  %19964 = vmatmul.mubr.msk.f32.gmra.mxu0 %vm84_vm1, %v16722_v2 }
 0x1a4   :  { %v22883_v55 = vadd.f32 %v19691_v54, %v19638_v53  ;;  %19966 = vmatprep.mubr.msk.f32.mxu0 %vm84_vm1, %v16723_v52 }
 0x1a5   :  { %v22889_v57 = vpop.f32.mrf.mxu0  ;;  %v22891_v58 = vpop.f32.mrf.mxu1 }
 0x1a7   :  { %v19641_v60 = vpop.f32.mrf.mxu0  ;;  %v19694_v61 = vpop.f32.mrf.mxu1  ;;  %19967 = vmatmul.mubr.msk.f32.gmra.mxu0 %vm84_vm1, %v16724_v56 }
 0x1a8   :  { %v22897_v62 = vadd.f32 %v19694_v61, %v19641_v60  ;;  %19969 = vmatprep.mubr.msk.f32.mxu0 %vm84_vm1, %v16725_v59 }
 0x1a9   :  { %v22903_v4 = vpop.f32.mrf.mxu0  ;;  %v22905_v6 = vpop.f32.mrf.mxu1 }
 0x1ab   :  { %v19644_v8 = vpop.f32.mrf.mxu0  ;;  %v19697_v9 = vpop.f32.mrf.mxu1  ;;  %19970 = vmatmul.mubr.msk.f32.gmra.mxu0 %vm84_vm1, %v16726_v63 }
 0x1ac   :  { %v22911_v10 = vadd.f32 %v19697_v9, %v19644_v8  ;;  %19972 = vmatprep.mubr.msk.f32.mxu0 %vm84_vm1, %v16727_v7 }
 0x1ad   :  { %v22917_v12 = vpop.f32.mrf.mxu0  ;;  %v22919_v13 = vpop.f32.mrf.mxu1 }
 0x1af   :  { %v19647_v15 = vpop.f32.mrf.mxu0  ;;  %v19700_v16 = vpop.f32.mrf.mxu1  ;;  %19973 = vmatmul.mubr.msk.f32.gmra.mxu0 %vm84_vm1, %v16728_v11 }
 0x1b0   :  { %v22925_v17 = vadd.f32 %v19700_v16, %v19647_v15  ;;  %19975 = vmatprep.mubr.msk.f32.mxu0 %vm84_vm1, %v16729_v14 }
 0x1b1   :  { %v22931_v19 = vpop.f32.mrf.mxu0  ;;  %v22933_v20 = vpop.f32.mrf.mxu1 }
 0x1b3   :  { %v19650_v22 = vpop.f32.mrf.mxu0  ;;  %v19703_v23 = vpop.f32.mrf.mxu1  ;;  %19976 = vmatmul.mubr.msk.f32.gmra.mxu0 %vm84_vm1, %v16730_v18  ;;  %v16672_v18 = vld [vmem:[%s28722_s2 + $0x70] sm:$0xff] }
 0x1b4   :  { %v22939_v25 = vadd.f32 %v19703_v23, %v19650_v22  ;;  %19978 = vmatprep.mubr.msk.f32.mxu0 %vm84_vm1, %v16731_v21  ;;  %v16671_v22 = vld [vmem:[%s28722_s2 + $0x68] sm:$0xff] }
 0x1b5   :  { %v22945_v29 = vpop.f32.mrf.mxu0  ;;  %v22947_v30 = vpop.f32.mrf.mxu1 }
 0x1b6   :  { %28740 = vst [vmem:[#allocation2_spill] sm:$0xff] %v22945_v29  ;;  %28741 = vst [vmem:[#allocation3_spill] sm:$0xff] %v22947_v30 }
 0x1b7   :  { %v19653_v35 = vpop.f32.mrf.mxu0  ;;  %v19706_v36 = vpop.f32.mrf.mxu1  ;;  %19979 = vmatmul.mubr.msk.f32.gmra.mxu0 %vm84_vm1, %v16732_v28  ;;  %v16670_v28 = vld [vmem:[%s28722_s2 + $0x60] sm:$0xff] }
 0x1b8   :  { %v22953_v37 = vadd.f32 %v19706_v36, %v19653_v35  ;;  %19981 = vmatprep.mubr.msk.f32.mxu0 %vm84_vm1, %v16733_v32 }
 0x1b9   :  { %v22959_v42 = vpop.f32.mrf.mxu0  ;;  %v22961_v43 = vpop.f32.mrf.mxu1 }
 0x1ba   :  { %28742 = vst [vmem:[#allocation4_spill] sm:$0xff] %v22959_v42  ;;  %28743 = vst [vmem:[#allocation5_spill] sm:$0xff] %v22961_v43 }
 0x1bb   :  { %v19656_v44 = vpop.f32.mrf.mxu0  ;;  %v19709_v46 = vpop.f32.mrf.mxu1  ;;  %19982 = vmatmul.mubr.msk.f32.gmra.mxu0 %vm84_vm1, %v16734_v39 }
 0x1bc   :  { %v22964_v49 = vadd.f32 %v19709_v46, %v19656_v44 }
 0x1bd   :  { %v22966_v0 = vpop.f32.mrf.mxu0  ;;  %v22968_v1 = vpop.f32.mrf.mxu1 }
 0x1be   :  { %28744 = vst [vmem:[#allocation6_spill] sm:$0xff] %v22966_v0  ;;  %28745 = vst [vmem:[#allocation7_spill] sm:$0xff] %v22968_v1 }
 0x1bf   :  { %v19659_v2 = vpop.f32.mrf.mxu0  ;;  %v19712_v52 = vpop.f32.mrf.mxu1 }
 0x1c0   :  { %v22970_v53 = vadd.f32 %v19712_v52, %v19659_v2 }
 0x1c1   :  { %v22972_v54 = vpop.f32.mrf.mxu0  ;;  %v22974_v56 = vpop.f32.mrf.mxu1 }
 0x1c2   :  { %28746 = vst [vmem:[#allocation8_spill] sm:$0xff] %v22972_v54  ;;  %28747 = vst [vmem:[#allocation9_spill] sm:$0xff] %v22974_v56 }
 0x1c3   :  { %v19662_v59 = vpop.f32.mrf.mxu0  ;;  %v19715_v60 = vpop.f32.mrf.mxu1 }
 0x1c4   :  { %v22976_v61 = vadd.f32 %v19715_v60, %v19662_v59 }
 0x1c5   :  { %v22978_v63 = vpop.f32.mrf.mxu0  ;;  %v22980_v7 = vpop.f32.mrf.mxu1 }
 0x1c6   :  { %28748 = vst [vmem:[#allocation10_spill] sm:$0xff] %v22978_v63  ;;  %28749 = vst [vmem:[#allocation11_spill] sm:$0xff] %v22980_v7 }
 0x1c7   :  { %v19665_v8 = vpop.f32.mrf.mxu0  ;;  %v19718_v9 = vpop.f32.mrf.mxu1 }
 0x1c8   :  { %v22982_v11 = vadd.f32 %v19718_v9, %v19665_v8 }
 0x1c9   :  { %v22984_v14 = vpop.f32.mrf.mxu0 }
 0x1ca   :  { %28750 = vst [vmem:[#allocation12_spill] sm:$0xff] %v22984_v14 }
 0x1cb   :  { %v19729_v15 = vpop.f32.mrf.mxu0 }
 0x1cd   :  { %v1542_v16 = vpop.f32.mrf.mxu0 }
 0x1ce   :  { %19780 = vmatprep.mubr.msk.f32.mxu1 %vm84_vm1, %v1542_v16 }
 0x1cf   :  { %v19732_v21 = vpop.f32.mrf.mxu0  ;;  %19781 = vmatmul.mubr.msk.f32.vlgmr.msra.gmra.mxu1 %vm84_vm1, %v19729_v15 }
 0x1d0   :  { %19879 = vmatpush3.msk.msra.mxu1 %vm175_vm0, %v22744_v5  ;;  %v23004_v5 = vld [vmem:[%s28722_s2 + $0x98] sm:$0xf] }
 0x1d1   :  { %v1552_v23 = vpop.f32.mrf.mxu0  ;;  %19880 = vmatprep.subr.mxu1 %v16672_v18 }
 0x1d2   :  { %19783 = vmatprep.mubr.msk.f32.mxu1 %vm84_vm1, %v1552_v23  ;;  %19881 = vmatpush3.msra.mxu1 %v16672_v18 }
 0x1d3   :  { %v19735_v32 = vpop.f32.mrf.mxu0  ;;  %19784 = vmatmul.mubr.msk.f32.gmra.mxu1 %vm84_vm1, %v19732_v21  ;;  %19882 = vmatprep.subr.mxu1 %v16671_v22  ;;  %v22033_v21 = vmov 0  }
 0x1d4   :  { %19883 = vmatpush3.msra.mxu1 %v16671_v22  ;;  %22011 = vset.pattern.permute.xlu0 %v22033_v21  ;;  %v3407_v22 = vld [vmem:[%s28723_s3 + $0x78] sm:$0xff] }
 0x1d5   :  { %v1562_v35 = vpop.f32.mrf.mxu0  ;;  %19884 = vmatprep.subr.mxu1 %v16670_v28  ;;  %3499 = vperm.xlu0 %22011, %v3407_v22   ;;  %v3398_v22 = vld [vmem:[%s28723_s3 + $0x30] sm:$0xff] }
 0x1d6   :  { %19786 = vmatprep.mubr.msk.f32.mxu1 %vm84_vm1, %v1562_v35  ;;  %19885 = vmatpush3.msra.mxu1 %v16670_v28  ;;  %v3406_v28 = vld [vmem:[%s28723_s3 + $0x70] sm:$0xff]  ;;  %v3408_v35 = vld [vmem:[%s28723_s3 + $0x80] sm:$0xff] }
 0x1d7   :  { %v19738_v36 = vpop.f32.mrf.mxu0  ;;  %19787 = vmatmul.mubr.msk.f32.gmra.mxu1 %vm84_vm1, %v19735_v32  ;;  %19984 = vmatprep.subr.msk.mxu1 %vm175_vm0, %v23004_v5 }
 0x1d8   :  { %22012 = vset.pattern.permute.xlu1 %v22033_v21 }
 0x1d9   :  { %v1572_v39 = vpop.f32.mrf.mxu0  ;;  %3494 = vperm.xlu1 %22012, %v3406_v28   ;;  %3504 = vperm.xlu0 %22011, %v3408_v35   ;;  %v3397_v28 = vld [vmem:[%s28723_s3 + $0x28] sm:$0xff]  ;;  %v3396_v35 = vld [vmem:[%s28723_s3 + $0x20] sm:$0xff] }
 0x1da   :  { %19789 = vmatprep.mubr.msk.f32.mxu1 %vm84_vm1, %v1572_v39  ;;  %v3405_v39 = vld [vmem:[%s28723_s3 + $0x68] sm:$0xff] }
 0x1db   :  { %v19741_v44 = vpop.f32.mrf.mxu0  ;;  %19790 = vmatmul.mubr.msk.f32.gmra.mxu1 %vm84_vm1, %v19738_v36 }
 0x1dd   :  { %v1582_v46 = vpop.f32.mrf.mxu0  ;;  %3489 = vperm.xlu1 %22012, %v3405_v39   ;;  %v3395_v39 = vld [vmem:[%s28723_s3 + $0x18] sm:$0xff] }
 0x1de   :  { %19792 = vmatprep.mubr.msk.f32.mxu1 %vm84_vm1, %v1582_v46  ;;  %v3404_v46 = vld [vmem:[%s28723_s3 + $0x60] sm:$0xff] }
 0x1df   :  { %v19744_v2 = vpop.f32.mrf.mxu0  ;;  %19793 = vmatmul.mubr.msk.f32.gmra.mxu1 %vm84_vm1, %v19741_v44  ;;  %3484 = vperm.xlu0 %22011, %v3404_v46   ;;  %v3394_v46 = vld [vmem:[%s28723_s3 + $0x10] sm:$0xff] }
 0x1e1   :  { %v1592_v52 = vpop.f32.mrf.mxu0 }
 0x1e2   :  { %19795 = vmatprep.mubr.msk.f32.mxu1 %vm84_vm1, %v1592_v52  ;;  %v3403_v52 = vld [vmem:[%s28723_s3 + $0x58] sm:$0xff] }
 0x1e3   :  { %v19747_v59 = vpop.f32.mrf.mxu0  ;;  %19796 = vmatmul.mubr.msk.f32.gmra.mxu1 %vm84_vm1, %v19744_v2  ;;  %3479 = vperm.xlu1 %22012, %v3403_v52  }
 0x1e5   :  { %v1602_v60 = vpop.f32.mrf.mxu0 }
 0x1e6   :  { %19798 = vmatprep.mubr.msk.f32.mxu1 %vm84_vm1, %v1602_v60  ;;  %v3402_v60 = vld [vmem:[%s28723_s3 + $0x50] sm:$0xff] }
 0x1e7   :  { %v19750_v8 = vpop.f32.mrf.mxu0  ;;  %19799 = vmatmul.mubr.msk.f32.gmra.mxu1 %vm84_vm1, %v19747_v59  ;;  %3474 = vperm.xlu0 %22011, %v3402_v60  }
 0x1e9   :  { %v1612_v9 = vpop.f32.mrf.mxu0 }
 0x1ea   :  { %19801 = vmatprep.mubr.msk.f32.mxu1 %vm84_vm1, %v1612_v9  ;;  %v3401_v9 = vld [vmem:[%s28723_s3 + $0x48] sm:$0xff] }
 0x1eb   :  { %v19753_v15 = vpop.f32.mrf.mxu0  ;;  %19802 = vmatmul.mubr.msk.f32.gmra.mxu1 %vm84_vm1, %v19750_v8  ;;  %3469 = vperm.xlu1 %22012, %v3401_v9   ;;  %v16766_v9 = vld [vmem:[%s28722_s2 + $0x80] sm:$0xff] }
 0x1ed   :  { %v1622_v16 = vpop.f32.mrf.mxu0 }
 0x1ee   :  { %19804 = vmatprep.mubr.msk.f32.mxu1 %vm84_vm1, %v1622_v16  ;;  %v3400_v16 = vld [vmem:[%s28723_s3 + $0x40] sm:$0xff] }
 0x1ef   :  { %v19756_v18 = vpop.f32.mrf.mxu0  ;;  %19805 = vmatmul.mubr.msk.f32.gmra.mxu1 %vm84_vm1, %v19753_v15  ;;  %3464 = vperm.xlu0 %22011, %v3400_v16  }
 0x1f1   :  { %v1632_v23 = vpop.f32.mrf.mxu0 }
 0x1f2   :  { %19807 = vmatprep.mubr.msk.f32.mxu1 %vm84_vm1, %v1632_v23 }
 0x1f3   :  { %v19759_v32 = vpop.f32.mrf.mxu0  ;;  %19808 = vmatmul.mubr.msk.f32.gmra.mxu1 %vm84_vm1, %v19756_v18  ;;  %v3399_v18 = vld [vmem:[%s28723_s3 + $0x38] sm:$0xff]  ;;  %3454 = vperm.xlu0 %22011, %v3398_v22   ;;  %v3421_v22 = vld [vmem:[%s28723_s3 + $0xe8] sm:$0xff] }
 0x1f4   :  { %3459 = vperm.xlu1 %22012, %v3399_v18  }
 0x1f5   :  { %v1642_v36 = vpop.f32.mrf.mxu0 }
 0x1f6   :  { %19810 = vmatprep.mubr.msk.f32.mxu1 %vm84_vm1, %v1642_v36 }
 0x1f7   :  { %v19762_v44 = vpop.f32.mrf.mxu0  ;;  %19811 = vmatmul.mubr.msk.f32.gmra.mxu1 %vm84_vm1, %v19759_v32  ;;  %3444 = vperm.xlu0 %22011, %v3396_v35   ;;  %v3419_v35 = vld [vmem:[%s28723_s3 + $0xd8] sm:$0xff] }
 0x1f8   :  { %3449 = vperm.xlu1 %22012, %v3397_v28   ;;  %v3420_v28 = vld [vmem:[%s28723_s3 + $0xe0] sm:$0xff] }
 0x1f9   :  { %v1652_v2 = vpop.f32.mrf.mxu0 }
 0x1fa   :  { %19813 = vmatprep.mubr.msk.f32.mxu1 %vm84_vm1, %v1652_v2  ;;  %v16768_v2 = vld [vmem:[%s28722_s2 + $0x90] sm:$0xff] }
 0x1fb   :  { %v19765_v59 = vpop.f32.mrf.mxu0  ;;  %19814 = vmatmul.mubr.msk.f32.gmra.mxu1 %vm84_vm1, %v19762_v44  ;;  %3434 = vperm.xlu0 %22011, %v3394_v46   ;;  %v3417_v46 = vld [vmem:[%s28723_s3 + $0xc8] sm:$0xff] }
 0x1fc   :  { %3439 = vperm.xlu1 %22012, %v3395_v39   ;;  %v3418_v39 = vld [vmem:[%s28723_s3 + $0xd0] sm:$0xff] }
 0x1fd   :  { %v1662_v8 = vpop.f32.mrf.mxu0 }
 0x1fe   :  { %19816 = vmatprep.mubr.msk.f32.mxu1 %vm84_vm1, %v1662_v8  ;;  %v3393_v8 = vld [vmem:[%s28723_s3 + $0x8] sm:$0xff] }
 0x1ff   :  { %v19768_v15 = vpop.f32.mrf.mxu0  ;;  %19817 = vmatmul.mubr.msk.f32.gmra.mxu1 %vm84_vm1, %v19765_v59  ;;  %v16767_v59 = vld [vmem:[%s28722_s2 + $0x88] sm:$0xff] }
 0x200   :  { %3429 = vperm.xlu1 %22012, %v3393_v8  }
 0x201   :  { %v1672_v21 = vpop.f32.mrf.mxu0 }
 0x202   :  { %19819 = vmatprep.mubr.msk.f32.mxu1 %vm84_vm1, %v1672_v21 }
 0x203   :  { %v19771_v23 = vpop.f32.mrf.mxu0  ;;  %19820 = vmatmul.mubr.msk.f32.gmra.mxu1 %vm84_vm1, %v19768_v15 }
 0x204   :  { %3569 = vperm.xlu1 %22012, %v3421_v22   ;;  %v3411_v22 = vld [vmem:[%s28723_s3 + $0x98] sm:$0xff] }
 0x205   :  { %v1682_v32 = vpop.f32.mrf.mxu0 }
 0x206   :  { %19822 = vmatprep.mubr.msk.f32.mxu1 %vm84_vm1, %v1682_v32 }
 0x207   :  { %19823 = vmatmul.mubr.msk.f32.gmra.mxu1 %vm84_vm1, %v19771_v23  ;;  %v19835_v36 = vpop.f32.mrf.mxu0 }
 0x208   :  { %3559 = vperm.xlu1 %22012, %v3419_v35   ;;  %v3409_v35 = vld [vmem:[%s28723_s3 + $0x88] sm:$0xff] }
 0x209   :  { %v2221_v44 = vpop.f32.mrf.mxu0 }
 0x20a   :  { %19886 = vmatprep.mubr.msk.f32.mxu1 %vm84_vm1, %v2221_v44 }
 0x20b   :  { %v19838_v52 = vpop.f32.mrf.mxu0  ;;  %19887 = vmatmul.mubr.msk.f32.vlgmr.msra.gmra.mxu1 %vm84_vm1, %v19835_v36 }
 0x20c   :  { %19985 = vmatpush3.msk.msra.mxu1 %vm175_vm0, %v23004_v5  ;;  %v3392_v5 = vld [vmem:[%s28723_s3] sm:$0xff]  ;;  %3549 = vperm.xlu1 %22012, %v3417_v46  }
 0x20d   :  { %v2231_v60 = vpop.f32.mrf.mxu0  ;;  %19986 = vmatprep.subr.mxu1 %v16768_v2  ;;  %3424 = vperm.xlu0 %22011, %v3392_v5   ;;  %v3413_v5 = vld [vmem:[%s28723_s3 + $0xa8] sm:$0xff] }
 0x20e   :  { %19889 = vmatprep.mubr.msk.f32.mxu1 %vm84_vm1, %v2231_v60  ;;  %19987 = vmatpush3.msra.mxu1 %v16768_v2  ;;  %v3415_v60 = vld [vmem:[%s28723_s3 + $0xb8] sm:$0xff] }
 0x20f   :  { %v19841_v15 = vpop.f32.mrf.mxu0  ;;  %19890 = vmatmul.mubr.msk.f32.gmra.mxu1 %vm84_vm1, %v19838_v52  ;;  %19988 = vmatprep.subr.mxu1 %v16767_v59  ;;  %v3416_v52 = vld [vmem:[%s28723_s3 + $0xc0] sm:$0xff] }
 0x210   :  { %19989 = vmatpush3.msra.mxu1 %v16767_v59  ;;  %3539 = vperm.xlu1 %22012, %v3415_v60  }
 0x211   :  { %v2241_v16 = vpop.f32.mrf.mxu0  ;;  %19990 = vmatprep.subr.mxu1 %v16766_v9  ;;  %3564 = vperm.xlu0 %22011, %v3420_v28   ;;  %v3410_v28 = vld [vmem:[%s28723_s3 + $0x90] sm:$0xff] }
 0x212   :  { %19892 = vmatprep.mubr.msk.f32.mxu1 %vm84_vm1, %v2241_v16  ;;  %19991 = vmatpush3.msra.mxu1 %v16766_v9  ;;  %v3414_v9 = vld [vmem:[%s28723_s3 + $0xb0] sm:$0xff] }
 0x213   :  { %v19844_v18 = vpop.f32.mrf.mxu0  ;;  %19893 = vmatmul.mubr.msk.f32.gmra.mxu1 %vm84_vm1, %v19841_v15 }
 0x214   :  { %3529 = vperm.xlu1 %22012, %v3413_v5  }
 0x215   :  { %v2251_v21 = vpop.f32.mrf.mxu0  ;;  %3554 = vperm.xlu0 %22011, %v3418_v39  }
 0x216   :  { %19895 = vmatprep.mubr.msk.f32.mxu1 %vm84_vm1, %v2251_v21 }
 0x217   :  { %v19847_v23 = vpop.f32.mrf.mxu0  ;;  %19896 = vmatmul.mubr.msk.f32.gmra.mxu1 %vm84_vm1, %v19844_v18  ;;  %v3412_v18 = vld [vmem:[%s28723_s3 + $0xa0] sm:$0xff] }
 0x218   :  { %3519 = vperm.xlu1 %22012, %v3411_v22  }
 0x219   :  { %v2261_v32 = vpop.f32.mrf.mxu0  ;;  %3544 = vperm.xlu0 %22011, %v3416_v52  }
 0x21a   :  { %19898 = vmatprep.mubr.msk.f32.mxu1 %vm84_vm1, %v2261_v32 }
 0x21b   :  { %v19850_v36 = vpop.f32.mrf.mxu0  ;;  %19899 = vmatmul.mubr.msk.f32.gmra.mxu1 %vm84_vm1, %v19847_v23 }
 0x21c   :  { %3509 = vperm.xlu1 %22012, %v3409_v35  }
 0x21d   :  { %v2271_v44 = vpop.f32.mrf.mxu0  ;;  %3534 = vperm.xlu0 %22011, %v3414_v9  }
 0x21e   :  { %19901 = vmatprep.mubr.msk.f32.mxu1 %vm84_vm1, %v2271_v44 }
 0x21f   :  { %v19853_v2 = vpop.f32.mrf.mxu0  ;;  %19902 = vmatmul.mubr.msk.f32.gmra.mxu1 %vm84_vm1, %v19850_v36 }
 0x221   :  { %v2281_v59 = vpop.f32.mrf.mxu0  ;;  %3524 = vperm.xlu0 %22011, %v3412_v18  }
 0x222   :  { %19904 = vmatprep.mubr.msk.f32.mxu1 %vm84_vm1, %v2281_v59 }
 0x223   :  { %v19856_v8 = vpop.f32.mrf.mxu0  ;;  %19905 = vmatmul.mubr.msk.f32.gmra.mxu1 %vm84_vm1, %v19853_v2 }
 0x225   :  { %v2291_v15 = vpop.f32.mrf.mxu0  ;;  %3514 = vperm.xlu0 %22011, %v3410_v28  }
 0x226   :  { %19907 = vmatprep.mubr.msk.f32.mxu1 %vm84_vm1, %v2291_v15 }
 0x227   :  { %v19859_v16 = vpop.f32.mrf.mxu0  ;;  %19908 = vmatmul.mubr.msk.f32.gmra.mxu1 %vm84_vm1, %v19856_v8 }
 0x229   :  { %v2301_v21 = vpop.f32.mrf.mxu0 }
 0x22a   :  { %19910 = vmatprep.mubr.msk.f32.mxu1 %vm84_vm1, %v2301_v21 }
 0x22b   :  { %v19862_v23 = vpop.f32.mrf.mxu0  ;;  %19911 = vmatmul.mubr.msk.f32.gmra.mxu1 %vm84_vm1, %v19859_v16 }
 0x22d   :  { %v2311_v32 = vpop.f32.mrf.mxu0 }
 0x22e   :  { %19913 = vmatprep.mubr.msk.f32.mxu1 %vm84_vm1, %v2311_v32 }
 0x22f   :  { %v19865_v36 = vpop.f32.mrf.mxu0  ;;  %19914 = vmatmul.mubr.msk.f32.gmra.mxu1 %vm84_vm1, %v19862_v23 }
 0x231   :  { %v2321_v39 = vpop.f32.mrf.mxu0 }
 0x232   :  { %19916 = vmatprep.mubr.msk.f32.mxu1 %vm84_vm1, %v2321_v39 }
 0x233   :  { %v19868_v44 = vpop.f32.mrf.mxu0  ;;  %19917 = vmatmul.mubr.msk.f32.gmra.mxu1 %vm84_vm1, %v19865_v36 }
 0x235   :  { %v2331_v46 = vpop.f32.mrf.mxu0 }
 0x236   :  { %19919 = vmatprep.mubr.msk.f32.mxu1 %vm84_vm1, %v2331_v46 }
 0x237   :  { %v19871_v2 = vpop.f32.mrf.mxu0  ;;  %19920 = vmatmul.mubr.msk.f32.gmra.mxu1 %vm84_vm1, %v19868_v44 }
 0x239   :  { %v2341_v52 = vpop.f32.mrf.mxu0 }
 0x23a   :  { %19922 = vmatprep.mubr.msk.f32.mxu1 %vm84_vm1, %v2341_v52 }
 0x23b   :  { %v19874_v59 = vpop.f32.mrf.mxu0  ;;  %19923 = vmatmul.mubr.msk.f32.gmra.mxu1 %vm84_vm1, %v19871_v2 }
 0x23d   :  { %v2351_v60 = vpop.f32.mrf.mxu0 }
 0x23e   :  { %19925 = vmatprep.mubr.msk.f32.mxu1 %vm84_vm1, %v2351_v60 }
 0x23f   :  { %v19877_v8 = vpop.f32.mrf.mxu0  ;;  %19926 = vmatmul.mubr.msk.f32.gmra.mxu1 %vm84_vm1, %v19874_v59 }
 0x241   :  { %v2361_v9 = vpop.f32.mrf.mxu0 }
 0x242   :  { %19928 = vmatprep.mubr.msk.f32.mxu1 %vm84_vm1, %v2361_v9 }
 0x243   :  { %19929 = vmatmul.mubr.msk.f32.gmra.mxu1 %vm84_vm1, %v19877_v8  ;;  %v19941_v15 = vpop.f32.mrf.mxu0 }
 0x245   :  { %v2900_v5 = vpop.f32.mrf.mxu0 }
 0x246   :  { %19992 = vmatprep.mubr.msk.f32.mxu1 %vm84_vm1, %v2900_v5 }
 0x247   :  { %v19944_v16 = vpop.f32.mrf.mxu0  ;;  %19993 = vmatmul.mubr.msk.f32.vlgmr.msra.gmra.mxu1 %vm84_vm1, %v19941_v15 }
 0x249   :  { %v2910_v18 = vpop.f32.mrf.mxu0 }
 0x24a   :  { %19995 = vmatprep.mubr.msk.f32.mxu1 %vm84_vm1, %v2910_v18 }
 0x24b   :  { %v19947_v21 = vpop.f32.mrf.mxu0  ;;  %19996 = vmatmul.mubr.msk.f32.gmra.mxu1 %vm84_vm1, %v19944_v16 }
 0x24d   :  { %v2920_v22 = vpop.f32.mrf.mxu0 }
 0x24e   :  { %19998 = vmatprep.mubr.msk.f32.mxu1 %vm84_vm1, %v2920_v22 }
 0x24f   :  { %v19950_v23 = vpop.f32.mrf.mxu0  ;;  %19999 = vmatmul.mubr.msk.f32.gmra.mxu1 %vm84_vm1, %v19947_v21 }
 0x251   :  { %v2930_v28 = vpop.f32.mrf.mxu0 }
 0x252   :  { %20001 = vmatprep.mubr.msk.f32.mxu1 %vm84_vm1, %v2930_v28 }
 0x253   :  { %v19953_v32 = vpop.f32.mrf.mxu0  ;;  %20002 = vmatmul.mubr.msk.f32.gmra.mxu1 %vm84_vm1, %v19950_v23 }
 0x255   :  { %v2940_v35 = vpop.f32.mrf.mxu0 }
 0x256   :  { %20004 = vmatprep.mubr.msk.f32.mxu1 %vm84_vm1, %v2940_v35 }
 0x257   :  { %v19956_v36 = vpop.f32.mrf.mxu0  ;;  %20005 = vmatmul.mubr.msk.f32.gmra.mxu1 %vm84_vm1, %v19953_v32 }
 0x259   :  { %v2950_v39 = vpop.f32.mrf.mxu0 }
 0x25a   :  { %20007 = vmatprep.mubr.msk.f32.mxu1 %vm84_vm1, %v2950_v39 }
 0x25b   :  { %v19959_v44 = vpop.f32.mrf.mxu0  ;;  %20008 = vmatmul.mubr.msk.f32.gmra.mxu1 %vm84_vm1, %v19956_v36  ;;  %v23195_v36 = vpop.f32.mrf.mxu1 }
 0x25c   :  { %28751 = vst [vmem:[#allocation13_spill] sm:$0xff] %v23195_v36 }
 0x25d   :  { %v2960_v46 = vpop.f32.mrf.mxu0 }
 0x25e   :  { %20010 = vmatprep.mubr.msk.f32.mxu1 %vm84_vm1, %v2960_v46 }
 0x25f   :  { %v19962_v2 = vpop.f32.mrf.mxu0  ;;  %20011 = vmatmul.mubr.msk.f32.gmra.mxu1 %vm84_vm1, %v19959_v44 }
 0x261   :  { %v2970_v52 = vpop.f32.mrf.mxu0 }
 0x262   :  { %20013 = vmatprep.mubr.msk.f32.mxu1 %vm84_vm1, %v2970_v52 }
 0x263   :  { %v19965_v59 = vpop.f32.mrf.mxu0  ;;  %20014 = vmatmul.mubr.msk.f32.gmra.mxu1 %vm84_vm1, %v19962_v2 }
 0x265   :  { %v2980_v60 = vpop.f32.mrf.mxu0 }
 0x266   :  { %20016 = vmatprep.mubr.msk.f32.mxu1 %vm84_vm1, %v2980_v60 }
 0x267   :  { %v19968_v8 = vpop.f32.mrf.mxu0  ;;  %20017 = vmatmul.mubr.msk.f32.gmra.mxu1 %vm84_vm1, %v19965_v59 }
 0x269   :  { %v2990_v9 = vpop.f32.mrf.mxu0 }
 0x26a   :  { %20019 = vmatprep.mubr.msk.f32.mxu1 %vm84_vm1, %v2990_v9 }
 0x26b   :  { %v19971_v15 = vpop.f32.mrf.mxu0  ;;  %20020 = vmatmul.mubr.msk.f32.gmra.mxu1 %vm84_vm1, %v19968_v8 }
 0x26d   :  { %v3000_v5 = vpop.f32.mrf.mxu0 }
 0x26e   :  { %20022 = vmatprep.mubr.msk.f32.mxu1 %vm84_vm1, %v3000_v5 }
 0x26f   :  { %v19974_v16 = vpop.f32.mrf.mxu0  ;;  %20023 = vmatmul.mubr.msk.f32.gmra.mxu1 %vm84_vm1, %v19971_v15 }
 0x271   :  { %v3010_v18 = vpop.f32.mrf.mxu0 }
 0x272   :  { %20025 = vmatprep.mubr.msk.f32.mxu1 %vm84_vm1, %v3010_v18 }
 0x273   :  { %v19977_v21 = vpop.f32.mrf.mxu0  ;;  %20026 = vmatmul.mubr.msk.f32.gmra.mxu1 %vm84_vm1, %v19974_v16 }
 0x275   :  { %v3020_v22 = vpop.f32.mrf.mxu0 }
 0x276   :  { %20028 = vmatprep.mubr.msk.f32.mxu1 %vm84_vm1, %v3020_v22 }
 0x277   :  { %v19980_v23 = vpop.f32.mrf.mxu0  ;;  %20029 = vmatmul.mubr.msk.f32.gmra.mxu1 %vm84_vm1, %v19977_v21 }
 0x279   :  { %v3030_v28 = vpop.f32.mrf.mxu0 }
 0x27a   :  { %20031 = vmatprep.mubr.msk.f32.mxu1 %vm84_vm1, %v3030_v28 }
 0x27b   :  { %v19983_v32 = vpop.f32.mrf.mxu0  ;;  %20032 = vmatmul.mubr.msk.f32.gmra.mxu1 %vm84_vm1, %v19980_v23 }
 0x27d   :  { %v3040_v35 = vpop.f32.mrf.mxu0 }
 0x27e   :  { %20034 = vmatprep.mubr.msk.f32.mxu1 %vm84_vm1, %v3040_v35 }
 0x27f   :  { %20035 = vmatmul.mubr.msk.f32.gmra.mxu1 %vm84_vm1, %v19983_v32 }
 0x28f   :  { %v19782_v39 = vpop.f32.mrf.mxu1 }
 0x290   :  { %v2005_v44 = vadd.f32 %v19782_v39, %v22813_v24 }
 0x291   :  { %v23198_v46 = vpop.f32.mrf.mxu1 }
 0x293   :  { %v19785_v2 = vpop.f32.mrf.mxu1 }
 0x294   :  { %v2007_v52 = vadd.f32 %v19785_v2, %v22827_v31 }
 0x295   :  { %v23201_v59 = vpop.f32.mrf.mxu1 }
 0x297   :  { %v19788_v60 = vpop.f32.mrf.mxu1 }
 0x298   :  { %v2009_v8 = vadd.f32 %v19788_v60, %v22841_v38 }
 0x299   :  { %v23204_v9 = vpop.f32.mrf.mxu1 }
 0x29b   :  { %v19791_v15 = vpop.f32.mrf.mxu1 }
 0x29c   :  { %v2011_v5 = vadd.f32 %v19791_v15, %v22855_v45 }
 0x29d   :  { %v23207_v16 = vpop.f32.mrf.mxu1 }
 0x29f   :  { %v19794_v18 = vpop.f32.mrf.mxu1 }
 0x2a0   :  { %v2013_v24 = vadd.f32 %v19794_v18, %v22869_v50 }
 0x2a1   :  { %v23210_v21 = vpop.f32.mrf.mxu1 }
 0x2a3   :  { %v19797_v22 = vpop.f32.mrf.mxu1 }
 0x2a4   :  { %v2015_v31 = vadd.f32 %v19797_v22, %v22883_v55 }
 0x2a5   :  { %v23213_v23 = vpop.f32.mrf.mxu1 }
 0x2a7   :  { %v19800_v28 = vpop.f32.mrf.mxu1 }
 0x2a8   :  { %v2017_v38 = vadd.f32 %v19800_v28, %v22897_v62 }
 0x2a9   :  { %v23216_v32 = vpop.f32.mrf.mxu1 }
 0x2ab   :  { %v19803_v35 = vpop.f32.mrf.mxu1 }
 0x2ac   :  { %v23219_v45 = vadd.f32 %v19803_v35, %v22911_v10 }
 0x2ad   :  { %v23221_v39 = vpop.f32.mrf.mxu1 }
 0x2af   :  { %v19806_v2 = vpop.f32.mrf.mxu1 }
 0x2b0   :  { %v2021_v50 = vadd.f32 %v19806_v2, %v22925_v17 }
 0x2b1   :  { %v23224_v60 = vpop.f32.mrf.mxu1 }
 0x2b3   :  { %v19809_v15 = vpop.f32.mrf.mxu1 }
 0x2b4   :  { %v2023_v55 = vadd.f32 %v19809_v15, %v22939_v25 }
 0x2b5   :  { %v23227_v18 = vpop.f32.mrf.mxu1 }
 0x2b6   :  { %28752 = vst [vmem:[#allocation14_spill] sm:$0xff] %v23227_v18 }
 0x2b7   :  { %v19812_v22 = vpop.f32.mrf.mxu1 }
 0x2b8   :  { %v2025_v62 = vadd.f32 %v19812_v22, %v22953_v37 }
 0x2b9   :  { %v23230_v28 = vpop.f32.mrf.mxu1 }
 0x2ba   :  { %28753 = vst [vmem:[#allocation15_spill] sm:$0xff] %v23230_v28 }
 0x2bb   :  { %v19815_v30 = vpop.f32.mrf.mxu1 }
 0x2bc   :  { %v2027_v10 = vadd.f32 %v19815_v30, %v22964_v49 }
 0x2bd   :  { %v23233_v35 = vpop.f32.mrf.mxu1 }
 0x2be   :  { %28754 = vst [vmem:[#allocation16_spill] sm:$0xff] %v23233_v35 }
 0x2bf   :  { %v19818_v29 = vpop.f32.mrf.mxu1 }
 0x2c0   :  { %v2029_v17 = vadd.f32 %v19818_v29, %v22970_v53 }
 0x2c1   :  { %v23236_v2 = vpop.f32.mrf.mxu1 }
 0x2c2   :  { %28755 = vst [vmem:[#allocation17_spill] sm:$0xff] %v23236_v2 }
 0x2c3   :  { %v19821_v43 = vpop.f32.mrf.mxu1 }
 0x2c4   :  { %v2031_v25 = vadd.f32 %v19821_v43, %v22976_v61 }
 0x2c5   :  { %v23239_v15 = vpop.f32.mrf.mxu1 }
 0x2c6   :  { %28756 = vst [vmem:[#allocation18_spill] sm:$0xff] %v23239_v15 }
 0x2c7   :  { %v19824_v18 = vpop.f32.mrf.mxu1 }
 0x2c8   :  { %v2033_v37 = vadd.f32 %v19824_v18, %v22982_v11  ;;  %v23258_v18 = vpop.permute.xlu0 %3499 }
 0x2c9   :  { %v23242_v22 = vpop.f32.mrf.mxu1 }
 0x2ca   :  { %28757 = vst [vmem:[#allocation19_spill] sm:$0xff] %v23242_v22 }
 0x2cb   :  { %v19888_v28 = vpop.f32.mrf.mxu1 }
 0x2cc   :  { %v23244_v42 = vadd.f32 %v19888_v28, %v2005_v44  ;;  %v23266_v56 = vpop.permute.xlu0 %3504 }
 0x2cd   :  { %v2534_v30 = vpop.f32.mrf.mxu1  ;;  %28761 = vst [vmem:[#allocation23_spill] sm:$0xff] %v23266_v56 }
 0x2cf   :  { %v19891_v49 = vpop.f32.mrf.mxu1 }
 0x2d0   :  { %v23246_v35 = vadd.f32 %v19891_v49, %v2007_v52  ;;  %v23264_v52 = vpop.permute.xlu1 %3494 }
 0x2d1   :  { %v23248_v29 = vpop.f32.mrf.mxu1  ;;  %28760 = vst [vmem:[#allocation22_spill] sm:$0xff] %v23264_v52 }
 0x2d3   :  { %v19894_v53 = vpop.f32.mrf.mxu1 }
 0x2d4   :  { %v23250_v1 = vadd.f32 %v19894_v53, %v2009_v8 }
 0x2d5   :  { %v23252_v43 = vpop.f32.mrf.mxu1 }
 0x2d7   :  { %v19897_v61 = vpop.f32.mrf.mxu1 }
 0x2d8   :  { %v23254_v0 = vadd.f32 %v19897_v61, %v2011_v5  ;;  %v23272_v61 = vpop.permute.xlu1 %3489 }
 0x2d9   :  { %v23256_v11 = vpop.f32.mrf.mxu1  ;;  %28763 = vst [vmem:[#allocation25_spill] sm:$0xff] %v23272_v61 }
 0x2db   :  { %v19900_v44 = vpop.f32.mrf.mxu1 }
 0x2dc   :  { %v23260_v28 = vadd.f32 %v19900_v44, %v2013_v24  ;;  %v23278_v24 = vpop.permute.xlu0 %3484  ;;  %v23284_v36 = vpop.permute.xlu1 %3479 }
 0x2dd   :  { %v23262_v2 = vpop.f32.mrf.mxu1  ;;  %28764 = vst [vmem:[#allocation26_spill] sm:$0xff] %v23284_v36 }
 0x2de   :  { %28758 = vst [vmem:[#allocation20_spill] sm:$0xff] %v23260_v28  ;;  %28759 = vst [vmem:[#allocation21_spill] sm:$0xff] %v23262_v2 }
 0x2df   :  { %v19903_v49 = vpop.f32.mrf.mxu1 }
 0x2e0   :  { %v23268_v8 = vadd.f32 %v19903_v49, %v2015_v31  ;;  %v23286_v31 = vpop.permute.xlu0 %3474 }
 0x2e1   :  { %v23270_v53 = vpop.f32.mrf.mxu1  ;;  %28765 = vst [vmem:[#allocation27_spill] sm:$0xff] %v23286_v31 }
 0x2e2   :  { %28762 = vst [vmem:[#allocation24_spill] sm:$0xff] %v23268_v8 }
 0x2e3   :  { %v19906_v5 = vpop.f32.mrf.mxu1 }
 0x2e4   :  { %v23274_v54 = vadd.f32 %v19906_v5, %v2017_v38  ;;  %v23292_v38 = vpop.permute.xlu1 %3469  ;;  %v23298_v28 = vpop.permute.xlu0 %3464 }
 0x2e5   :  { %v23276_v22 = vpop.f32.mrf.mxu1  ;;  %28768 = vst [vmem:[#allocation30_spill] sm:$0xff] %v23292_v38  ;;  %28771 = vst [vmem:[#allocation33_spill] sm:$0xff] %v23298_v28 }
 0x2e7   :  { %v23280_v44 = vpop.f32.mrf.mxu1 }
 0x2e8   :  { %v23304_v8 = vpop.permute.xlu1 %3459 }
 0x2e9   :  { %v23282_v15 = vpop.f32.mrf.mxu1 }
 0x2eb   :  { %v19912_v14 = vpop.f32.mrf.mxu1 }
 0x2ec   :  { %v23288_v49 = vadd.f32 %v19912_v14, %v2021_v50  ;;  %v23306_v50 = vpop.permute.xlu0 %3454 }
 0x2ed   :  { %v23290_v7 = vpop.f32.mrf.mxu1 }
 0x2ee   :  { %28766 = vst [vmem:[#allocation28_spill] sm:$0xff] %v23288_v49  ;;  %28767 = vst [vmem:[#allocation29_spill] sm:$0xff] %v23290_v7 }
 0x2ef   :  { %v19915_v63 = vpop.f32.mrf.mxu1 }
 0x2f0   :  { %v23294_v5 = vadd.f32 %v19915_v63, %v2023_v55  ;;  %v3450_v55 = vpop.permute.xlu1 %3449  ;;  %v3445_v38 = vpop.permute.xlu0 %3444 }
 0x2f1   :  { %v23296_v56 = vpop.f32.mrf.mxu1 }
 0x2f2   :  { %28769 = vst [vmem:[#allocation31_spill] sm:$0xff] %v23294_v5  ;;  %28770 = vst [vmem:[#allocation32_spill] sm:$0xff] %v23296_v56 }
 0x2f3   :  { %v19918_v52 = vpop.f32.mrf.mxu1 }
 0x2f4   :  { %v23300_v61 = vadd.f32 %v19918_v52, %v2025_v62  ;;  %v3435_v7 = vpop.permute.xlu0 %3434 }
 0x2f5   :  { %v23302_v36 = vpop.f32.mrf.mxu1 }
 0x2f6   :  { %28772 = vst [vmem:[#allocation34_spill] sm:$0xff] %v23300_v61  ;;  %28773 = vst [vmem:[#allocation35_spill] sm:$0xff] %v23302_v36  ;;  %v3440_v36 = vpop.permute.xlu1 %3439 }
 0x2f7   :  { %v19921_v14 = vpop.f32.mrf.mxu1 }
 0x2f8   :  { %v23308_v49 = vadd.f32 %v19921_v14, %v2027_v10  ;;  %v1207_v10 = vadd.f32 %v22821_v27, %v22819_v26  ;;  %v1227_v27 = vadd.f32 %v22849_v41, %v22847_v40 }
 0x2f9   :  { %v23310_v31 = vpop.f32.mrf.mxu1 }
 0x2fa   :  { %28774 = vst [vmem:[#allocation36_spill] sm:$0xff] %v23308_v49  ;;  %28775 = vst [vmem:[#allocation37_spill] sm:$0xff] %v23310_v31 }
 0x2fb   :  { %v19924_v63 = vpop.f32.mrf.mxu1 }
 0x2fc   :  { %v23312_v5 = vadd.f32 %v19924_v63, %v2029_v17  ;;  %v2004_v17 = vadd.f32 %v23198_v46, %v1207_v10 }
 0x2fd   :  { %v23314_v56 = vpop.f32.mrf.mxu1 }
 0x2fe   :  { %28776 = vst [vmem:[#allocation38_spill] sm:$0xff] %v23312_v5  ;;  %28777 = vst [vmem:[#allocation39_spill] sm:$0xff] %v23314_v56  ;;  %v3430_v5 = vpop.permute.xlu1 %3429  ;;  %v3425_v56 = vpop.permute.xlu0 %3424 }
 0x2ff   :  { %v19927_v62 = vpop.f32.mrf.mxu1 }
 0x300   :  { %v23316_v52 = vadd.f32 %v19927_v62, %v2031_v25  ;;  %v1217_v25 = vadd.f32 %v22835_v34, %v22833_v33  ;;  %v2683_v62 = vadd.f32 %v2534_v30, %v2004_v17  ;;  %v2008_v33 = vadd.f32 %v23204_v9, %v1227_v27 }
 0x301   :  { %v23318_v61 = vpop.f32.mrf.mxu1 }
 0x302   :  { %28778 = vst [vmem:[#allocation40_spill] sm:$0xff] %v23316_v52  ;;  %28779 = vst [vmem:[#allocation41_spill] sm:$0xff] %v23318_v61  ;;  %v2006_v61 = vadd.f32 %v23201_v59, %v1217_v25  ;;  %v1237_v59 = vadd.f32 %v22863_v48, %v22861_v47  ;;  %v2687_v40 = vadd.f32 %v23252_v43, %v2008_v33 }
 0x303   :  { %v19930_v28 = vpop.f32.mrf.mxu1 }
 0x304   :  { %v23322_v14 = vadd.f32 %v19930_v28, %v2033_v37  ;;  %v2685_v46 = vadd.f32 %v23248_v29, %v2006_v61 }
 0x305   :  { %v23324_v49 = vpop.f32.mrf.mxu1 }
 0x307   :  { %v19994_v63 = vpop.f32.mrf.mxu1 }
 0x308   :  { %v3363_v31 = vadd.f32 %v19994_v63, %v23244_v42 }
 0x309   :  { %v3213_v52 = vpop.f32.mrf.mxu1 }
 0x30a   :  { %v3573_v2 = vadd.f32 %v3430_v5, %v3363_v31  ;;  %v3362_v26 = vadd.f32 %v3213_v52, %v2683_v62 }
 0x30b   :  { %v19997_v37 = vpop.f32.mrf.mxu1 }
 0x30c   :  { %v3572_v28 = vadd.f32 %v3425_v56, %v3362_v26  ;;  %v3365_v10 = vadd.f32 %v19997_v37, %v23246_v35  ;;  %v3634_v42 = vrot.slane %v3573_v2, 1  ;;  %v2010_v35 = vadd.f32 %v23207_v16, %v1237_v59 }
 0x30d   :  { %v3223_v34 = vpop.f32.mrf.mxu1 }
 0x30e   :  { %v3633_v30 = vrot.slane %v3572_v28, 1  ;;  %v3575_v17 = vadd.f32 %v3440_v36, %v3365_v10  ;;  %v3364_v63 = vadd.f32 %v3223_v34, %v2685_v46  ;;  %v2689_v47 = vadd.f32 %v23256_v11, %v2010_v35 }
 0x30f   :  { %v20000_v31 = vpop.f32.mrf.mxu1 }
 0x310   :  { %v3635_v41 = vsel %vm3632_vm2, %v3633_v30, %v3634_v42  ;;  %v3574_v29 = vadd.f32 %v3435_v7, %v3364_v63  ;;  %v3367_v56 = vadd.f32 %v20000_v31, %v23250_v1  ;;  %v3638_v5 = vrot.slane %v3575_v17, 1 }
 0x311   :  { %v23342_v9 = vmax.f32 %v3572_v28, %v3635_v41  ;;  %v3233_v61 = vpop.f32.mrf.mxu1 }
 0x312   :  { %v3636_v52 = vrot.slane %v3574_v29, 1  ;;  %v3577_v36 = vadd.f32 %v3450_v55, %v3367_v56  ;;  %v3366_v25 = vadd.f32 %v3233_v61, %v2687_v40 }
 0x313   :  { %v20003_v62 = vpop.f32.mrf.mxu1 }
 0x314   :  { %v3576_v48 = vadd.f32 %v3445_v38, %v3366_v25  ;;  %v3369_v43 = vadd.f32 %v20003_v62, %v23254_v0  ;;  %v3639_v26 = vsel %vm3632_vm2, %v3636_v52, %v3638_v5  ;;  %v3642_v7 = vrot.slane %v3577_v36, 1 }
 0x315   :  { %v3243_v27 = vpop.f32.mrf.mxu1  ;;  %v23347_v1 = vmax.f32 %v3574_v29, %v3639_v26  ;;  %v3637_v16 = vsel %vm3632_vm2, %v3634_v42, %v3636_v52  ;;  %v2698_v52 = vadd.f32 %v23280_v44, %v23219_v45 }
 0x316   :  { %v3640_v37 = vrot.slane %v3576_v48, 1  ;;  %v23351_v46 = vadd.f32 %v23304_v8, %v3369_v43  ;;  %v3368_v55 = vadd.f32 %v3243_v27, %v2689_v47  ;;  %v23353_v28 = vmax.f32 %v3573_v2, %v3637_v16  ;;  %v28783_v43 = vld [vmem:[#allocation25_spill] sm:$0xff] }
 0x317   :  { %v20006_v10 = vpop.f32.mrf.mxu1  ;;  %v1267_v2 = vadd.f32 %v22905_v6, %v22903_v4  ;;  %v1277_v4 = vadd.f32 %v22919_v13, %v22917_v12 }
 0x318   :  { %v3578_v11 = vadd.f32 %v23306_v50, %v3368_v55  ;;  %v3643_v0 = vsel %vm3632_vm2, %v3640_v37, %v3642_v7  ;;  %v3641_v34 = vsel %vm3632_vm2, %v3638_v5, %v3640_v37  ;;  %v3646_v30 = vrot.slane %v23351_v46, 1 }
 0x319   :  { %v3253_v38 = vpop.f32.mrf.mxu1  ;;  %v23357_v33 = vmax.f32 %v3576_v48, %v3643_v0  ;;  %v23361_v63 = vmax.f32 %v3575_v17, %v3641_v34  ;;  %v2016_v41 = vadd.f32 %v23216_v32, %v1267_v2  ;;  %v1257_v17 = vadd.f32 %v22891_v58, %v22889_v57  ;;  %v28786_v34 = vld [vmem:[#allocation20_spill] sm:$0xff]  ;;  %v28787_v2 = vld [vmem:[#allocation26_spill] sm:$0xff] }
 0x31a   :  { %v3644_v42 = vrot.slane %v3578_v11, 1  ;;  %v2018_v5 = vadd.f32 %v23221_v39, %v1277_v4  ;;  %v1287_v57 = vadd.f32 %v22933_v20, %v22931_v19  ;;  %v28780_v19 = vld [vmem:[#allocation21_spill] sm:$0xff] }
 0x31b   :  { %v20009_v8 = vpop.f32.mrf.mxu1  ;;  %v2695_v6 = vadd.f32 %v23276_v22, %v2016_v41  ;;  %v2014_v35 = vadd.f32 %v23213_v23, %v1257_v17  ;;  %v28789_v4 = vld [vmem:[#allocation33_spill] sm:$0xff] }
 0x31c   :  { %v3647_v50 = vsel %vm3632_vm2, %v3644_v42, %v3646_v30  ;;  %v3645_v40 = vsel %vm3632_vm2, %v3642_v7, %v3644_v42  ;;  %v2697_v13 = vadd.f32 %v23282_v15, %v2018_v5  ;;  %v2020_v25 = vadd.f32 %v23224_v60, %v1287_v57  ;;  %v28782_v15 = vld [vmem:[#allocation24_spill] sm:$0xff] }
 0x31d   :  { %v3263_v59 = vpop.f32.mrf.mxu1  ;;  %v23368_v31 = vmax.f32 %v3578_v11, %v3647_v50  ;;  %v23372_v29 = vmax.f32 %v3577_v36, %v3645_v40  ;;  %v1247_v36 = vadd.f32 %v22877_v3, %v22875_v51  ;;  %v2693_v58 = vadd.f32 %v23270_v53, %v2014_v35  ;;  %v28781_v53 = vld [vmem:[#allocation29_spill] sm:$0xff]  ;;  %v28788_v40 = vld [vmem:[#allocation23_spill] sm:$0xff] }
 0x31e   :  { %v2699_v47 = vadd.f32 %v28781_v53, %v2020_v25  ;;  %v28736_v60 = vmov 0.0   ;;  %v3371_v42 = vadd.f32 %v20006_v10, %v28786_v34  ;;  %v3565_v53 = vpop.permute.xlu0 %3564 }
 0x31f   :  { %v20012_v56 = vpop.f32.mrf.mxu1  ;;  %v2012_v39 = vadd.f32 %v23210_v21, %v1247_v36  ;;  %v3372_v45 = vadd.f32 %v3263_v59, %v2693_v58  ;;  %v28784_v21 = vld [vmem:[#allocation22_spill] sm:$0xff]  ;;  %3981 = vmatprep.subr.mxu0 %v28736_v60  ;;  %20037 = vmatprep.subr.mxu1 %v28736_v60 }
 0x320   :  { %v3375_v23 = vadd.f32 %v20012_v56, %v23274_v54  ;;  %v3373_v54 = vadd.f32 %v20009_v8, %v28782_v15  ;;  %20043 = vmatprep.mubr.msk.f32.mxu1 %vm22036_vm4, %v28736_v60 }
 0x321   :  { %v3273_v61 = vpop.f32.mrf.mxu1  ;;  %v2691_v20 = vadd.f32 %v28780_v19, %v2012_v39 }
 0x322   :  { %v3374_v32 = vadd.f32 %v3273_v61, %v2695_v6  ;;  %v3585_v26 = vadd.f32 %v28783_v43, %v3375_v23  ;;  %v3583_v50 = vadd.f32 %v28787_v2, %v3373_v54 }
 0x323   :  { %v20015_v12 = vpop.f32.mrf.mxu1 }
 0x324   :  { %v3377_v22 = vadd.f32 %v20015_v12, %v2698_v52  ;;  %v3584_v62 = vadd.f32 %v23278_v24, %v3374_v32  ;;  %v3370_v24 = vadd.f32 %v3253_v38, %v2691_v20  ;;  %v3658_v59 = vrot.slane %v3585_v26, 1  ;;  %v28790_v52 = vld [vmem:[#allocation30_spill] sm:$0xff] }
 0x325   :  { %v3283_v44 = vpop.f32.mrf.mxu1  ;;  %v3581_v32 = vadd.f32 %v28790_v52, %v3371_v42  ;;  %v3654_v36 = vrot.slane %v3583_v50, 1  ;;  %v28795_v42 = vld [vmem:[#allocation18_spill] sm:$0xff] }
 0x326   :  { %v3587_v51 = vadd.f32 %v23258_v18, %v3377_v22  ;;  %v3376_v3 = vadd.f32 %v3283_v44, %v2697_v13  ;;  %v28785_v18 = vld [vmem:[#allocation27_spill] sm:$0xff]  ;;  %v3656_v37 = vrot.slane %v3584_v62, 1  ;;  %v3580_v6 = vadd.f32 %v28789_v4, %v3370_v24  ;;  %v3570_v44 = vpop.permute.xlu1 %3569  ;;  %v28791_v24 = vld [vmem:[#allocation10_spill] sm:$0xff]  ;;  %v28797_v4 = vld [vmem:[#allocation8_spill] sm:$0xff] }
 0x327   :  { %v23396_v48 = vpop.f32.mrf.mxu1  ;;  %v3582_v27 = vadd.f32 %v28785_v18, %v3372_v45  ;;  %v3650_v45 = vrot.slane %v3581_v32, 1  ;;  %v28792_v18 = vld [vmem:[#allocation11_spill] sm:$0xff] }
 0x328   :  { %v3586_v7 = vadd.f32 %v28784_v21, %v3376_v3  ;;  %v3662_v55 = vrot.slane %v3587_v51, 1  ;;  %v3659_v10 = vsel %vm3632_vm2, %v3656_v37, %v3658_v59  ;;  %v3648_v23 = vrot.slane %v3580_v6, 1 }
 0x329   :  { %v3293_v16 = vpop.f32.mrf.mxu1  ;;  %v3652_v35 = vrot.slane %v3582_v27, 1  ;;  %v23429_v12 = vmax.f32 %v3584_v62, %v3659_v10  ;;  %v3657_v20 = vsel %vm3632_vm2, %v3654_v36, %v3656_v37  ;;  %v28794_v37 = vld [vmem:[#allocation13_spill] sm:$0xff] }
 0x32a   :  { %v3660_v11 = vrot.slane %v3586_v7, 1  ;;  %v3378_v0 = vadd.f32 %v3293_v16, %v2699_v47  ;;  %v3651_v19 = vsel %vm3632_vm2, %v3648_v23, %v3650_v45  ;;  %v23453_v43 = vmax.f32 %v3583_v50, %v3657_v20  ;;  %v3560_v21 = vpop.permute.xlu1 %3559  ;;  %v28793_v16 = vld [vmem:[#allocation12_spill] sm:$0xff]  ;;  %v28796_v50 = vld [vmem:[#allocation19_spill] sm:$0xff]  ;;  %v28799_v10 = vld [vmem:[#allocation41_spill] sm:$0xff] }
 0x32b   :  { %v23405_v8 = vpop.f32.mrf.mxu1  ;;  %v3655_v22 = vsel %vm3632_vm2, %v3652_v35, %v3654_v36  ;;  %v23451_v54 = vmax.f32 %v3580_v6, %v3651_v19  ;;  %v28798_v6 = vld [vmem:[#allocation9_spill] sm:$0xff]  ;;  %v28801_v20 = vld [vmem:[#allocation6_spill] sm:$0xff] }
 0x32c   :  { %v23409_v41 = vadd.f32 %v28788_v40, %v3378_v0  ;;  %v3663_v17 = vsel %vm3632_vm2, %v3660_v11, %v3662_v55  ;;  %v3661_v39 = vsel %vm3632_vm2, %v3658_v59, %v3660_v11  ;;  %v23441_v62 = vmax.f32 %v3582_v27, %v3655_v22  ;;  %v3555_v11 = vpop.permute.xlu0 %3554 }
 0x32d   :  { %v23412_v38 = vpop.f32.mrf.mxu1  ;;  %v23414_v56 = vmax.f32 %v3586_v7, %v3663_v17  ;;  %v1337_v27 = vadd.f32 %v28792_v18, %v28791_v24  ;;  %v3649_v40 = vsel %vm3632_vm2, %v3646_v30, %v3648_v23  ;;  %v28800_v23 = vld [vmem:[#allocation17_spill] sm:$0xff] }
 0x32e   :  { %v3664_v61 = vrot.slane %v23409_v41, 1  ;;  %v23481_v30 = vmax.f32 %v23351_v46, %v3649_v40  ;;  %v28807_v40 = vld [vmem:[#allocation5_spill] sm:$0xff] }
 0x32f   :  { %3810 = vrot.lane.b32.xlu1 %v23414_v56, %s22035_s21  ;;  %v23421_v5 = vpop.f32.mrf.mxu1  ;;  %v2030_v2 = vadd.f32 %v28795_v42, %v1337_v27  ;;  %v28804_v27 = vld [vmem:[#allocation40_spill] sm:$0xff] }
 0x330   :  { %v3665_v57 = vsel %vm3632_vm2, %v3662_v55, %v3664_v61  ;;  %v1347_v55 = vadd.f32 %v28794_v37, %v28793_v16  ;;  %v3545_v18 = vpop.permute.xlu0 %3544 }
 0x331   :  { %v23427_v58 = vpop.f32.mrf.mxu1  ;;  %v23431_v13 = vmax.f32 %v3587_v51, %v3665_v57  ;;  %v23443_v51 = vmax.f32 %v3585_v26, %v3661_v39  ;;  %v3653_v26 = vsel %vm3632_vm2, %v3650_v45, %v3652_v35  ;;  %v1327_v35 = vadd.f32 %v28798_v6, %v28797_v4  ;;  %v3550_v57 = vpop.permute.xlu1 %3549  ;;  %v28808_v6 = vld [vmem:[#allocation37_spill] sm:$0xff] }
 0x332   :  { %v23464_v34 = vmax.f32 %v3581_v32, %v3653_v26  ;;  %v2032_v59 = vadd.f32 %v28796_v50, %v1347_v55  ;;  %v2709_v52 = vadd.f32 %v28799_v10, %v2030_v2  ;;  %v28802_v26 = vld [vmem:[#allocation7_spill] sm:$0xff]  ;;  %v28805_v55 = vld [vmem:[#allocation16_spill] sm:$0xff] }
 0x333   :  { %3806 = vrot.lane.b32.xlu1 %v23429_v12, %s22035_s21  ;;  %3812 = vrot.lane.b32.xlu0 %v23431_v13, %s22035_s21  ;;  %v23439_v25 = vpop.f32.mrf.mxu1  ;;  %v2028_v39 = vadd.f32 %v28800_v23, %v1327_v35  ;;  %v1317_v24 = vadd.f32 %v28802_v26, %v28801_v20  ;;  %v28814_v20 = vld [vmem:[#allocation36_spill] sm:$0xff] }
 0x334   :  { %v2711_v32 = vadd.f32 %v23324_v49, %v2032_v59  ;;  %v28803_v49 = vld [vmem:[#allocation39_spill] sm:$0xff]  ;;  %v28806_v59 = vld [vmem:[#allocation4_spill] sm:$0xff]  ;;  %v3385_v26 = vadd.f32 %v23439_v25, %v28814_v20  ;;  %v28817_v25 = vld [vmem:[#allocation34_spill] sm:$0xff] }
 0x335   :  { %v3323_v3 = vpop.f32.mrf.mxu1  ;;  %v2026_v42 = vadd.f32 %v28805_v55, %v1317_v24  ;;  %v3540_v4 = vpop.permute.xlu1 %3539 }
 0x337   :  { %3802 = vrot.lane.b32.xlu1 %v23441_v62, %s22035_s21  ;;  %3808 = vrot.lane.b32.xlu0 %v23443_v51, %s22035_s21  ;;  %v20030_v47 = vpop.f32.mrf.mxu1  ;;  %v2705_v35 = vadd.f32 %v28808_v6, %v2026_v42 }
 0x339   :  { %v3333_v15 = vpop.f32.mrf.mxu1 }
 0x33b   :  { %3798 = vrot.lane.b32.xlu1 %v23451_v54, %s22035_s21  ;;  %3804 = vrot.lane.b32.xlu0 %v23453_v43, %s22035_s21  ;;  %v20033_v7 = vpop.f32.mrf.mxu1 }
 0x33c   :  { %v3389_v16 = vadd.f32 %v20033_v7, %v28804_v27  ;;  %v28809_v7 = vld [vmem:[#allocation38_spill] sm:$0xff] }
 0x33d   :  { %v3343_v0 = vpop.f32.mrf.mxu1 }
 0x33e   :  { %v3388_v45 = vadd.f32 %v3343_v0, %v2709_v52  ;;  %v28810_v52 = vld [vmem:[#allocation15_spill] sm:$0xff] }
 0x33f   :  { %3794 = vrot.lane.b32.xlu1 %v23368_v31, %s22035_s21  ;;  %3800 = vrot.lane.b32.xlu0 %v23464_v34, %s22035_s21  ;;  %v20036_v17 = vpop.f32.mrf.mxu1 }
 0x340   :  { %v3391_v36 = vadd.f32 %v20036_v17, %v23322_v14  ;;  %v2707_v14 = vadd.f32 %v28803_v49, %v2028_v39  ;;  %v3598_v2 = vadd.f32 %v3555_v11, %v3388_v45  ;;  %v1307_v17 = vadd.f32 %v28807_v40, %v28806_v59  ;;  %v3535_v11 = vpop.permute.xlu0 %3534  ;;  %v28811_v39 = vld [vmem:[#allocation2_spill] sm:$0xff]  ;;  %v28812_v45 = vld [vmem:[#allocation3_spill] sm:$0xff]  ;;  %v28816_v59 = vld [vmem:[#allocation32_spill] sm:$0xff] }
 0x341   :  { %v3353_v22 = vpop.f32.mrf.mxu1 }
 0x342   :  { %v3390_v19 = vadd.f32 %v3353_v22, %v2711_v32  ;;  %v3601_v46 = vadd.f32 %v3570_v44, %v3391_v36  ;;  %v3386_v0 = vadd.f32 %v3333_v15, %v2707_v14  ;;  %v3387_v44 = vadd.f32 %v20030_v47, %v28809_v7  ;;  %v28813_v47 = vld [vmem:[#allocation35_spill] sm:$0xff]  ;;  %v3530_v14 = vpop.permute.xlu1 %3529 }
 0x343   :  { %3790 = vrot.lane.b32.xlu1 %v23357_v33, %s22035_s21  ;;  %3796 = vrot.lane.b32.xlu0 %v23481_v30, %s22035_s21  ;;  %v2024_v15 = vadd.f32 %v28810_v52, %v1307_v17  ;;  %v3384_v32 = vadd.f32 %v3323_v3, %v2705_v35  ;;  %v3684_v22 = vrot.slane %v3598_v2, 1 }
 0x344   :  { %v3600_v37 = vadd.f32 %v3565_v53, %v3390_v19  ;;  %v3599_v53 = vadd.f32 %v3560_v21, %v3389_v16  ;;  %v3690_v10 = vrot.slane %v3601_v46, 1  ;;  %v3596_v36 = vadd.f32 %v3545_v18, %v3386_v0  ;;  %v28815_v18 = vld [vmem:[#allocation14_spill] sm:$0xff]  ;;  %v3525_v17 = vpop.permute.xlu0 %3524 }
 0x345   :  { %v1297_v19 = vadd.f32 %v28812_v45, %v28811_v39  ;;  %v2703_v21 = vadd.f32 %v28813_v47, %v2024_v15  ;;  %v3597_v24 = vadd.f32 %v3550_v57, %v3387_v44  ;;  %v3594_v55 = vadd.f32 %v3535_v11, %v3384_v32 }
 0x346   :  { %v3688_v50 = vrot.slane %v3600_v37, 1  ;;  %v3686_v3 = vrot.slane %v3599_v53, 1  ;;  %v3680_v42 = vrot.slane %v3596_v36, 1  ;;  %v3383_v57 = vadd.f32 %v23421_v5, %v28817_v25  ;;  %v3520_v32 = vpop.permute.xlu1 %3519  ;;  %v28818_v5 = vld [vmem:[#allocation31_spill] sm:$0xff] }
 0x347   :  { %3786 = vrot.lane.b32.xlu1 %v23347_v1, %s22035_s21  ;;  %3792 = vrot.lane.b32.xlu0 %v23372_v29, %s22035_s21  ;;  %v2022_v49 = vadd.f32 %v28815_v18, %v1297_v19  ;;  %v3382_v16 = vadd.f32 %v23427_v58, %v2703_v21  ;;  %v3682_v6 = vrot.slane %v3597_v24, 1  ;;  %v23525_v35 = vmax.f32 %v3601_v46, %v3690_v10  ;;  %v3903_v25 = vld [vmem:[%s28724_s4 + $0x8] sm:$0xff] }
 0x348   :  { %v3691_v23 = vsel %vm3632_vm2, %v3688_v50, %v3690_v10  ;;  %v3687_v0 = vsel %vm3632_vm2, %v3684_v22, %v3686_v3  ;;  %v3676_v52 = vrot.slane %v3594_v55, 1  ;;  %v3689_v11 = vsel %vm3632_vm2, %v3686_v3, %v3688_v50  ;;  %16802 = vmatprep.mubr.msk.f32.mxu0 %vm3932_vm3, %v3903_v25 }
 0x349   :  { %v23513_v27 = vmax.f32 %v3600_v37, %v3691_v23  ;;  %v2701_v40 = vadd.f32 %v28816_v59, %v2022_v49  ;;  %v3595_v37 = vadd.f32 %v3540_v4, %v3385_v26  ;;  %v23527_v7 = vmax.f32 %v3598_v2, %v3687_v0  ;;  %v3515_v2 = vpop.permute.xlu0 %3514 }
 0x34a   :  { %v3592_v44 = vadd.f32 %v3525_v17, %v3382_v16  ;;  %v3683_v15 = vsel %vm3632_vm2, %v3680_v42, %v3682_v6  ;;  %v3593_v46 = vadd.f32 %v3530_v14, %v3383_v57  ;;  %v23539_v23 = vmax.f32 %v3599_v53, %v3689_v11  ;;  %v3510_v20 = vpop.permute.xlu1 %3509  ;;  %v6782_v11 = vld [vmem:[%s28725_s8 + $0x48] sm:$0xff] }
 0x34b   :  { %3782 = vrot.lane.b32.xlu1 %v23342_v9, %s22035_s21  ;;  %3788 = vrot.lane.b32.xlu0 %v23361_v63, %s22035_s21  ;;  %v3380_v58 = vadd.f32 %v23412_v38, %v2701_v40  ;;  %v3381_v38 = vadd.f32 %v23405_v8, %v28818_v5  ;;  %v3678_v4 = vrot.slane %v3595_v37, 1  ;;  %v23537_v10 = vmax.f32 %v3596_v36, %v3683_v15  ;;  %v28819_v8 = vld [vmem:[#allocation28_spill] sm:$0xff]  ;;  %v6780_v5 = vld [vmem:[%s28725_s8 + $0x38] sm:$0xff] }
 0x34c   :  { %v3672_v45 = vrot.slane %v3592_v44, 1  ;;  %v3685_v19 = vsel %vm3632_vm2, %v3682_v6, %v3684_v22  ;;  %v3379_v47 = vadd.f32 %v23396_v48, %v28819_v8  ;;  %v3674_v36 = vrot.slane %v3593_v46, 1  ;;  %v6789_v6 = vld [vmem:[%s28725_s8 + $0x80] sm:$0xff]  ;;  %v6787_v15 = vld [vmem:[%s28725_s8 + $0x70] sm:$0xff] }
 0x34d   :  { %v3590_v39 = vadd.f32 %v3515_v2, %v3380_v58  ;;  %v3679_v50 = vsel %vm3632_vm2, %v3676_v52, %v3678_v4  ;;  %v3591_v21 = vadd.f32 %v3520_v32, %v3381_v38  ;;  %v23551_v26 = vmax.f32 %v3597_v24, %v3685_v19  ;;  %v6785_v32 = vld [vmem:[%s28725_s8 + $0x60] sm:$0xff]  ;;  %v6783_v38 = vld [vmem:[%s28725_s8 + $0x50] sm:$0xff]  ;;  %v6776_v2 = vld [vmem:[%s28725_s8 + $0x18] sm:$0xff] }
 0x34e   :  { %v23549_v53 = vmax.f32 %v3594_v55, %v3679_v50  ;;  %v3675_v18 = vsel %vm3632_vm2, %v3672_v45, %v3674_v36  ;;  %v3681_v22 = vsel %vm3632_vm2, %v3678_v4, %v3680_v42  ;;  %v3589_v49 = vadd.f32 %v3510_v20, %v3379_v47  ;;  %v6781_v4 = vld [vmem:[%s28725_s8 + $0x40] sm:$0xff]  ;;  %v6792_v19 = vld [vmem:[%s28725_s8 + $0x98] sm:$0xff]  ;;  %v6775_v8 = vld [vmem:[%s28725_s8 + $0x10] sm:$0xff] }
 0x34f   :  { %3784 = vrot.lane.b32.xlu0 %v23353_v28, %s22035_s21  ;;  %3838 = vrot.lane.b32.xlu1 %v23513_v27, %s22035_s21  ;;  %v3668_v3 = vrot.slane %v3590_v39, 1  ;;  %v3670_v48 = vrot.slane %v3591_v21, 1  ;;  %v23559_v14 = vmax.f32 %v3592_v44, %v3675_v18  ;;  %v23561_v16 = vmax.f32 %v3595_v37, %v3681_v22  ;;  %v6788_v44 = vld [vmem:[%s28725_s8 + $0x78] sm:$0xff]  ;;  %v6777_v50 = vld [vmem:[%s28725_s8 + $0x20] sm:$0xff] }
 0x350   :  { %v3677_v55 = vsel %vm3632_vm2, %v3674_v36, %v3676_v52  ;;  %v3666_v42 = vrot.slane %v3589_v49, 1  ;;  %v6784_v52 = vld [vmem:[%s28725_s8 + $0x58] sm:$0xff]  ;;  %v6790_v47 = vld [vmem:[%s28725_s8 + $0x88] sm:$0xff]  ;;  %v6791_v36 = vld [vmem:[%s28725_s8 + $0x90] sm:$0xff] }
 0x351   :  { %v3671_v24 = vsel %vm3632_vm2, %v3668_v3, %v3670_v48  ;;  %v23571_v59 = vmax.f32 %v3593_v46, %v3677_v55  ;;  %v3673_v17 = vsel %vm3632_vm2, %v3670_v48, %v3672_v45  ;;  %v6778_v46 = vld [vmem:[%s28725_s8 + $0x28] sm:$0xff]  ;;  %v4123_v20 = vld [vmem:[%s28726_s5 + $0x10] sm:$0x7f] }
 0x352   :  { %v23569_v0 = vmax.f32 %v3590_v39, %v3671_v24  ;;  %v3667_v40 = vsel %vm3632_vm2, %v3664_v61, %v3666_v42  ;;  %v23588_v37 = vmax.f32 %v3591_v21, %v3673_v17  ;;  %v3669_v61 = vsel %vm3632_vm2, %v3666_v42, %v3668_v3  ;;  %v6779_v39 = vld [vmem:[%s28725_s8 + $0x30] sm:$0xff]  ;;  %v6774_v45 = vld [vmem:[%s28725_s8 + $0x8] sm:$0xff]  ;;  %v6773_v21 = vld [vmem:[%s28725_s8] sm:$0xff]  ;;  %20038 = vmatpush3.msk.msra.mxu1 %vm3632_vm2, %v4123_v20 }
 0x353   :  { %3840 = vrot.lane.b32.xlu0 %v23525_v35, %s22035_s21  ;;  %3834 = vrot.lane.b32.xlu1 %v23527_v7, %s22035_s21  ;;  %v23586_v57 = vmax.f32 %v23409_v41, %v3667_v40  ;;  %v23598_v58 = vmax.f32 %v3589_v49, %v3669_v61  ;;  %v6786_v41 = vld [vmem:[%s28725_s8 + $0x68] sm:$0xff] }
 0x354   :  { %v4122_v3 = vld [vmem:[%s28726_s5 + $0x8] sm:$0xff]  ;;  %20039 = vmatprep.subr.mxu1 %v28736_v60 }
 0x355   :  { %20040 = vmatpush3.msra.mxu1 %v4122_v3 }
 0x356   :  { %20041 = vmatprep.subr.mxu1 %v28736_v60 }
 0x357   :  { %3830 = vrot.lane.b32.xlu1 %v23537_v10, %s22035_s21  ;;  %3836 = vrot.lane.b32.xlu0 %v23539_v23, %s22035_s21 }
 0x35b   :  { %3826 = vrot.lane.b32.xlu1 %v23549_v53, %s22035_s21  ;;  %3832 = vrot.lane.b32.xlu0 %v23551_v26, %s22035_s21 }
 0x35f   :  { %3822 = vrot.lane.b32.xlu1 %v23559_v14, %s22035_s21  ;;  %3828 = vrot.lane.b32.xlu0 %v23561_v16, %s22035_s21 }
 0x363   :  { %3818 = vrot.lane.b32.xlu1 %v23569_v0, %s22035_s21  ;;  %3824 = vrot.lane.b32.xlu0 %v23571_v59, %s22035_s21 }
 0x367   :  { %3814 = vrot.lane.b32.xlu1 %v23586_v57, %s22035_s21  ;;  %3820 = vrot.lane.b32.xlu0 %v23588_v37, %s22035_s21 }
 0x36b   :  { %6875 = vperm.xlu1 %22012, %v6789_v6   ;;  %3816 = vrot.lane.b32.xlu0 %v23598_v58, %s22035_s21 }
 0x36f   :  { %6860 = vperm.xlu1 %22012, %v6786_v41   ;;  %6870 = vperm.xlu0 %22011, %v6788_v44  }
 0x373   :  { %6850 = vperm.xlu1 %22012, %v6784_v52   ;;  %6865 = vperm.xlu0 %22011, %v6787_v15  }
 0x377   :  { %6840 = vperm.xlu1 %22012, %v6782_v11   ;;  %6855 = vperm.xlu0 %22011, %v6785_v32  }
 0x37b   :  { %6830 = vperm.xlu1 %22012, %v6780_v5   ;;  %6845 = vperm.xlu0 %22011, %v6783_v38  }
 0x37f   :  { %6820 = vperm.xlu1 %22012, %v6778_v46   ;;  %6835 = vperm.xlu0 %22011, %v6781_v4  }
 0x383   :  { %6810 = vperm.xlu1 %22012, %v6776_v2   ;;  %6825 = vperm.xlu0 %22011, %v6779_v39  }
 0x387   :  { %6800 = vperm.xlu1 %22012, %v6774_v45   ;;  %6815 = vperm.xlu0 %22011, %v6777_v50  }
 0x38b   :  { %6890 = vperm.xlu1 %22012, %v6792_v19   ;;  %6805 = vperm.xlu0 %22011, %v6775_v8  }
 0x38f   :  { %6880 = vperm.xlu1 %22012, %v6790_v47   ;;  %6795 = vperm.xlu0 %22011, %v6773_v21  }
 0x393   :  { %6885 = vperm.xlu0 %22011, %v6791_v36  }
 0x3a1   :  { %v3811_v18 = vpop.permute.xlu1 %3810 }
 0x3a2   :  { %v3886_v24 = vmax.f32 %v23414_v56, %v3811_v18 }
 0x3a5   :  { %v3807_v22 = vpop.permute.xlu1 %3806  ;;  %v3813_v49 = vpop.permute.xlu0 %3812 }
 0x3a6   :  { %v3887_v48 = vmax.f32 %v23431_v13, %v3813_v49  ;;  %v3884_v17 = vmax.f32 %v23429_v12, %v3807_v22  ;;  %v3906_v22 = vld [vmem:[%s28724_s4 + $0x20] sm:$0xff]  ;;  %v3909_v49 = vld [vmem:[%s28724_s4 + $0x38] sm:$0xff] }
 0x3a8   :  { %3982 = vmatpush1.msra.mxu0 %v3887_v48  ;;  %v3908_v48 = vld [vmem:[%s28724_s4 + $0x30] sm:$0xff] }
 0x3a9   :  { %v3803_v55 = vpop.permute.xlu1 %3802  ;;  %3983 = vmatprep.subr.mxu0 %v28736_v60  ;;  %v3809_v42 = vpop.permute.xlu0 %3808 }
 0x3aa   :  { %v3885_v40 = vmax.f32 %v23443_v51, %v3809_v42  ;;  %3984 = vmatpush1.msra.mxu0 %v3886_v24  ;;  %v3882_v56 = vmax.f32 %v23441_v62, %v3803_v55  ;;  %v3911_v24 = vld [vmem:[%s28724_s4 + $0x48] sm:$0xff]  ;;  %v3910_v55 = vld [vmem:[%s28724_s4 + $0x40] sm:$0xff]  ;;  %v3913_v42 = vld [vmem:[%s28724_s4 + $0x58] sm:$0xff] }
 0x3ab   :  { %3985 = vmatprep.subr.mxu0 %v28736_v60 }
 0x3ac   :  { %3986 = vmatpush1.msra.mxu0 %v3885_v40  ;;  %v3912_v40 = vld [vmem:[%s28724_s4 + $0x50] sm:$0xff] }
 0x3ad   :  { %v3799_v25 = vpop.permute.xlu1 %3798  ;;  %3987 = vmatprep.subr.mxu0 %v28736_v60  ;;  %v3805_v61 = vpop.permute.xlu0 %3804 }
 0x3ae   :  { %v3883_v13 = vmax.f32 %v23453_v43, %v3805_v61  ;;  %3988 = vmatpush1.msra.mxu0 %v3884_v17  ;;  %v3880_v12 = vmax.f32 %v23451_v54, %v3799_v25  ;;  %v3915_v17 = vld [vmem:[%s28724_s4 + $0x68] sm:$0xff]  ;;  %v3914_v25 = vld [vmem:[%s28724_s4 + $0x60] sm:$0xff]  ;;  %v3917_v61 = vld [vmem:[%s28724_s4 + $0x78] sm:$0xff] }
 0x3af   :  { %3989 = vmatprep.subr.mxu0 %v28736_v60 }
 0x3b0   :  { %3990 = vmatpush1.msra.mxu0 %v3883_v13  ;;  %v3916_v13 = vld [vmem:[%s28724_s4 + $0x70] sm:$0xff] }
 0x3b1   :  { %v3795_v6 = vpop.permute.xlu1 %3794  ;;  %3991 = vmatprep.subr.mxu0 %v28736_v60  ;;  %v3801_v51 = vpop.permute.xlu0 %3800 }
 0x3b2   :  { %v3881_v41 = vmax.f32 %v23464_v34, %v3801_v51  ;;  %3992 = vmatpush1.msra.mxu0 %v3882_v56  ;;  %v3878_v62 = vmax.f32 %v23368_v31, %v3795_v6  ;;  %v3919_v56 = vld [vmem:[%s28724_s4 + $0x88] sm:$0xff]  ;;  %v3918_v6 = vld [vmem:[%s28724_s4 + $0x80] sm:$0xff]  ;;  %v3921_v51 = vld [vmem:[%s28724_s4 + $0x98] sm:$0xff] }
 0x3b3   :  { %3993 = vmatprep.subr.mxu0 %v28736_v60 }
 0x3b4   :  { %3994 = vmatpush1.msra.mxu0 %v3881_v41  ;;  %v3920_v41 = vld [vmem:[%s28724_s4 + $0x90] sm:$0xff] }
 0x3b5   :  { %v3791_v44 = vpop.permute.xlu1 %3790  ;;  %3995 = vmatprep.subr.mxu0 %v28736_v60  ;;  %v3797_v43 = vpop.permute.xlu0 %3796 }
 0x3b6   :  { %v3879_v52 = vmax.f32 %v23481_v30, %v3797_v43  ;;  %3996 = vmatpush1.msra.mxu0 %v3880_v12  ;;  %v3876_v54 = vmax.f32 %v23357_v33, %v3791_v44  ;;  %v3923_v12 = vld [vmem:[%s28724_s4 + $0xa8] sm:$0xff]  ;;  %v3922_v44 = vld [vmem:[%s28724_s4 + $0xa0] sm:$0xff]  ;;  %v3925_v43 = vld [vmem:[%s28724_s4 + $0xb8] sm:$0xff] }
 0x3b7   :  { %3997 = vmatprep.subr.mxu0 %v28736_v60 }
 0x3b8   :  { %3998 = vmatpush1.msra.mxu0 %v3879_v52  ;;  %v3924_v52 = vld [vmem:[%s28724_s4 + $0xb0] sm:$0xff] }
 0x3b9   :  { %v3787_v15 = vpop.permute.xlu1 %3786  ;;  %3999 = vmatprep.subr.mxu0 %v28736_v60  ;;  %v3793_v34 = vpop.permute.xlu0 %3792 }
 0x3ba   :  { %v3877_v11 = vmax.f32 %v23372_v29, %v3793_v34  ;;  %4000 = vmatpush1.msra.mxu0 %v3878_v62  ;;  %v3874_v31 = vmax.f32 %v23347_v1, %v3787_v15  ;;  %v3927_v62 = vld [vmem:[%s28724_s4 + $0xc8] sm:$0xff]  ;;  %v3926_v15 = vld [vmem:[%s28724_s4 + $0xc0] sm:$0xff]  ;;  %v3929_v34 = vld [vmem:[%s28724_s4 + $0xd8] sm:$0xff] }
 0x3bb   :  { %4001 = vmatprep.subr.mxu0 %v28736_v60 }
 0x3bc   :  { %4002 = vmatpush1.msra.mxu0 %v3877_v11  ;;  %v3928_v11 = vld [vmem:[%s28724_s4 + $0xd0] sm:$0xff] }
 0x3bd   :  { %v3783_v32 = vpop.permute.xlu1 %3782  ;;  %4003 = vmatprep.subr.mxu0 %v28736_v60  ;;  %v3789_v30 = vpop.permute.xlu0 %3788 }
 0x3be   :  { %v3875_v5 = vmax.f32 %v23361_v63, %v3789_v30  ;;  %4004 = vmatpush1.msra.mxu0 %v3876_v54  ;;  %v3872_v33 = vmax.f32 %v23342_v9, %v3783_v32  ;;  %v3931_v54 = vld [vmem:[%s28724_s4 + $0xe8] sm:$0xff]  ;;  %v3930_v32 = vld [vmem:[%s28724_s4 + $0xe0] sm:$0xff] }
 0x3bf   :  { %4005 = vmatprep.subr.mxu0 %v28736_v60  ;;  %v4121_v30 = vld [vmem:[%s28726_s5] sm:$0xff] }
 0x3c0   :  { %4006 = vmatpush1.msra.mxu0 %v3875_v5  ;;  %20042 = vmatpush3.msra.mxu1 %v4121_v30 }
 0x3c1   :  { %4007 = vmatprep.subr.mxu0 %v28736_v60  ;;  %v3785_v29 = vpop.permute.xlu0 %3784  ;;  %v3839_v38 = vpop.permute.xlu1 %3838 }
 0x3c2   :  { %v3873_v46 = vmax.f32 %v23353_v28, %v3785_v29  ;;  %4008 = vmatpush1.msra.mxu0 %v3874_v31  ;;  %v3900_v1 = vmax.f32 %v23513_v27, %v3839_v38 }
 0x3c3   :  { %4009 = vmatprep.subr.mxu0 %v28736_v60 }
 0x3c4   :  { %4010 = vmatpush1.msra.mxu0 %v3873_v46 }
 0x3c5   :  { %4011 = vmatprep.subr.mxu0 %v28736_v60  ;;  %v3841_v63 = vpop.permute.xlu0 %3840  ;;  %v3835_v4 = vpop.permute.xlu1 %3834 }
 0x3c6   :  { %v3901_v2 = vmax.f32 %v23525_v35, %v3841_v63  ;;  %4012 = vmatpush1.msra.mxu0 %v3872_v33  ;;  %v3898_v45 = vmax.f32 %v23527_v7, %v3835_v4 }
 0x3c7   :  { %4017 = vmatprep.subr.mxu0 %v28736_v60 }
 0x3c8   :  { %16801 = vmatpush2.msk.msra.mxu0 %vm3632_vm2, %v3901_v2 }
 0x3c9   :  { %4019 = vmatprep.subr.mxu0 %v28736_v60  ;;  %v3831_v28 = vpop.permute.xlu1 %3830  ;;  %v3837_v39 = vpop.permute.xlu0 %3836 }
 0x3ca   :  { %v3899_v9 = vmax.f32 %v23539_v23, %v3837_v39  ;;  %4020 = vmatpush2.msra.mxu0 %v3900_v1  ;;  %v3896_v19 = vmax.f32 %v23537_v10, %v3831_v28 }
 0x3cb   :  { %4021 = vmatprep.subr.mxu0 %v28736_v60 }
 0x3cc   :  { %4022 = vmatpush2.msra.mxu0 %v3899_v9 }
 0x3cd   :  { %v3827_v35 = vpop.permute.xlu1 %3826  ;;  %4023 = vmatprep.subr.mxu0 %v28736_v60  ;;  %v3833_v50 = vpop.permute.xlu0 %3832 }
 0x3ce   :  { %v3897_v27 = vmax.f32 %v23551_v26, %v3833_v50  ;;  %4024 = vmatpush2.msra.mxu0 %v3898_v45  ;;  %v3894_v7 = vmax.f32 %v23549_v53, %v3827_v35 }
 0x3cf   :  { %4025 = vmatprep.subr.mxu0 %v28736_v60 }
 0x3d0   :  { %4026 = vmatpush2.msra.mxu0 %v3897_v27 }
 0x3d1   :  { %v3823_v8 = vpop.permute.xlu1 %3822  ;;  %4027 = vmatprep.subr.mxu0 %v28736_v60  ;;  %v3829_v23 = vpop.permute.xlu0 %3828 }
 0x3d2   :  { %v3895_v47 = vmax.f32 %v23561_v16, %v3829_v23  ;;  %4028 = vmatpush2.msra.mxu0 %v3896_v19  ;;  %v3892_v36 = vmax.f32 %v23559_v14, %v3823_v8 }
 0x3d3   :  { %4029 = vmatprep.subr.mxu0 %v28736_v60 }
 0x3d4   :  { %4030 = vmatpush2.msra.mxu0 %v3895_v47 }
 0x3d5   :  { %4031 = vmatprep.subr.mxu0 %v28736_v60  ;;  %v3825_v26 = vpop.permute.xlu0 %3824  ;;  %v3819_v10 = vpop.permute.xlu1 %3818 }
 0x3d6   :  { %v3893_v21 = vmax.f32 %v23571_v59, %v3825_v26  ;;  %4032 = vmatpush2.msra.mxu0 %v3894_v7  ;;  %v3890_v53 = vmax.f32 %v23569_v0, %v3819_v10  ;;  %v3905_v0 = vld [vmem:[%s28724_s4 + $0x18] sm:$0xff] }
 0x3d7   :  { %4033 = vmatprep.subr.mxu0 %v28736_v60 }
 0x3d8   :  { %4034 = vmatpush2.msra.mxu0 %v3893_v21 }
 0x3d9   :  { %4035 = vmatprep.subr.mxu0 %v28736_v60  ;;  %v3821_v16 = vpop.permute.xlu0 %3820  ;;  %v3815_v3 = vpop.permute.xlu1 %3814 }
 0x3da   :  { %v3891_v20 = vmax.f32 %v23588_v37, %v3821_v16  ;;  %4036 = vmatpush2.msra.mxu0 %v3892_v36  ;;  %v3888_v14 = vmax.f32 %v23586_v57, %v3815_v3  ;;  %v3902_v37 = vld [vmem:[%s28724_s4] sm:$0xff]  ;;  %v3907_v57 = vld [vmem:[%s28724_s4 + $0x28] sm:$0xff] }
 0x3db   :  { %4037 = vmatprep.subr.mxu0 %v28736_v60 }
 0x3dc   :  { %4038 = vmatpush2.msra.mxu0 %v3891_v20 }
 0x3dd   :  { %4039 = vmatprep.subr.mxu0 %v28736_v60  ;;  %v3817_v59 = vpop.permute.xlu0 %3816 }
 0x3de   :  { %v3889_v18 = vmax.f32 %v23598_v58, %v3817_v59  ;;  %4040 = vmatpush2.msra.mxu0 %v3890_v53  ;;  %v3904_v58 = vld [vmem:[%s28724_s4 + $0x10] sm:$0xff]  ;;  %v4328_v59 = vld [vmem:[%s28727_s6] sm:$0xff] }
 0x3df   :  { %4041 = vmatprep.subr.mxu0 %v28736_v60 }
 0x3e0   :  { %4042 = vmatpush2.msra.mxu0 %v3889_v18  ;;  %v16853_v18 = vld [vmem:[%s28727_s6 + $0xa0] sm:$0xff] }
 0x3e1   :  { %4043 = vmatprep.subr.mxu0 %v28736_v60 }
 0x3e2   :  { %4044 = vmatpush2.msra.mxu0 %v3888_v14 }
 0x3e3   :  { %4046 = vmatmul.mubr.f32.vlgmr.msra.gmra.mxu0 %v3902_v37 }
 0x3e4   :  { %16803 = vmatprep.mubr.msk.f32.mxu0 %vm3932_vm3, %v3905_v0 }
 0x3e7   :  { %4051 = vmatmul.mubr.f32.gmra.mxu0 %v3904_v58 }
 0x3e8   :  { %16804 = vmatprep.mubr.msk.f32.mxu0 %vm3932_vm3, %v3907_v57 }
 0x3eb   :  { %4056 = vmatmul.mubr.f32.gmra.mxu0 %v3906_v22 }
 0x3ec   :  { %16805 = vmatprep.mubr.msk.f32.mxu0 %vm3932_vm3, %v3909_v49 }
 0x3ef   :  { %4061 = vmatmul.mubr.f32.gmra.mxu0 %v3908_v48 }
 0x3f0   :  { %16806 = vmatprep.mubr.msk.f32.mxu0 %vm3932_vm3, %v3911_v24 }
 0x3f3   :  { %4066 = vmatmul.mubr.f32.gmra.mxu0 %v3910_v55 }
 0x3f4   :  { %16807 = vmatprep.mubr.msk.f32.mxu0 %vm3932_vm3, %v3913_v42 }
 0x3f7   :  { %4071 = vmatmul.mubr.f32.gmra.mxu0 %v3912_v40 }
 0x3f8   :  { %16808 = vmatprep.mubr.msk.f32.mxu0 %vm3932_vm3, %v3915_v17 }
 0x3fb   :  { %4076 = vmatmul.mubr.f32.gmra.mxu0 %v3914_v25 }
 0x3fc   :  { %16809 = vmatprep.mubr.msk.f32.mxu0 %vm3932_vm3, %v3917_v61 }
 0x3ff   :  { %4081 = vmatmul.mubr.f32.gmra.mxu0 %v3916_v13 }
 0x400   :  { %16810 = vmatprep.mubr.msk.f32.mxu0 %vm3932_vm3, %v3919_v56 }
 0x403   :  { %4086 = vmatmul.mubr.f32.gmra.mxu0 %v3918_v6 }
 0x404   :  { %16811 = vmatprep.mubr.msk.f32.mxu0 %vm3932_vm3, %v3921_v51 }
 0x407   :  { %4091 = vmatmul.mubr.f32.gmra.mxu0 %v3920_v41 }
 0x408   :  { %16812 = vmatprep.mubr.msk.f32.mxu0 %vm3932_vm3, %v3923_v12 }
 0x40b   :  { %4096 = vmatmul.mubr.f32.gmra.mxu0 %v3922_v44 }
 0x40c   :  { %16813 = vmatprep.mubr.msk.f32.mxu0 %vm3932_vm3, %v3925_v43 }
 0x40f   :  { %4101 = vmatmul.mubr.f32.gmra.mxu0 %v3924_v52 }
 0x410   :  { %16814 = vmatprep.mubr.msk.f32.mxu0 %vm3932_vm3, %v3927_v62 }
 0x413   :  { %4106 = vmatmul.mubr.f32.gmra.mxu0 %v3926_v15 }
 0x414   :  { %16815 = vmatprep.mubr.msk.f32.mxu0 %vm3932_vm3, %v3929_v34 }
 0x417   :  { %4111 = vmatmul.mubr.f32.gmra.mxu0 %v3928_v11 }
 0x418   :  { %16816 = vmatprep.mubr.msk.f32.mxu0 %vm3932_vm3, %v3931_v54 }
 0x41b   :  { %4116 = vmatmul.mubr.f32.gmra.mxu0 %v3930_v32 }
 0x41c   :  { %20118 = vmatprep.mubr.msk.f32.mxu0 %vm4348_vm6, %v4328_v59  ;;  %v16861_v59 = vld [vmem:[%s28727_s6 + $0xe0] sm:$0xff] }
 0x4a3   :  { %v4047_v5 = vpop.f32.mrf.mxu0 }
 0x4a4   :  { %20044 = vmatmul.mubr.msk.f32.vlgmr.msra.gmra.mxu1 %vm4124_vm5, %v4047_v5 }
 0x4a5   :  { %v4049_v31 = vpop.f32.mrf.mxu0  ;;  %20046 = vmatprep.mubr.msk.f32.mxu1 %vm22036_vm4, %v28736_v60 }
 0x4a7   :  { %v4052_v29 = vpop.f32.mrf.mxu0 }
 0x4a8   :  { %20047 = vmatmul.mubr.msk.f32.gmra.mxu1 %vm4124_vm5, %v4052_v29 }
 0x4a9   :  { %v4054_v38 = vpop.f32.mrf.mxu0  ;;  %20049 = vmatprep.mubr.msk.f32.mxu1 %vm22036_vm4, %v28736_v60 }
 0x4ab   :  { %v4057_v46 = vpop.f32.mrf.mxu0 }
 0x4ac   :  { %20050 = vmatmul.mubr.msk.f32.gmra.mxu1 %vm4124_vm5, %v4057_v46 }
 0x4ad   :  { %v4059_v33 = vpop.f32.mrf.mxu0  ;;  %20052 = vmatprep.mubr.msk.f32.mxu1 %vm22036_vm4, %v28736_v60 }
 0x4af   :  { %v4062_v63 = vpop.f32.mrf.mxu0 }
 0x4b0   :  { %20053 = vmatmul.mubr.msk.f32.gmra.mxu1 %vm4124_vm5, %v4062_v63 }
 0x4b1   :  { %v4064_v4 = vpop.f32.mrf.mxu0  ;;  %20055 = vmatprep.mubr.msk.f32.mxu1 %vm22036_vm4, %v28736_v60 }
 0x4b3   :  { %v4067_v2 = vpop.f32.mrf.mxu0 }
 0x4b4   :  { %20056 = vmatmul.mubr.msk.f32.gmra.mxu1 %vm4124_vm5, %v4067_v2 }
 0x4b5   :  { %v4069_v1 = vpop.f32.mrf.mxu0  ;;  %20058 = vmatprep.mubr.msk.f32.mxu1 %vm22036_vm4, %v28736_v60 }
 0x4b7   :  { %v4072_v28 = vpop.f32.mrf.mxu0 }
 0x4b8   :  { %20059 = vmatmul.mubr.msk.f32.gmra.mxu1 %vm4124_vm5, %v4072_v28 }
 0x4b9   :  { %v4074_v39 = vpop.f32.mrf.mxu0  ;;  %20061 = vmatprep.mubr.msk.f32.mxu1 %vm22036_vm4, %v28736_v60 }
 0x4bb   :  { %v4077_v9 = vpop.f32.mrf.mxu0 }
 0x4bc   :  { %20062 = vmatmul.mubr.msk.f32.gmra.mxu1 %vm4124_vm5, %v4077_v9 }
 0x4bd   :  { %v4079_v45 = vpop.f32.mrf.mxu0  ;;  %20064 = vmatprep.mubr.msk.f32.mxu1 %vm22036_vm4, %v28736_v60 }
 0x4bf   :  { %v4082_v35 = vpop.f32.mrf.mxu0 }
 0x4c0   :  { %20065 = vmatmul.mubr.msk.f32.gmra.mxu1 %vm4124_vm5, %v4082_v35  ;;  %v4329_v35 = vld [vmem:[%s28727_s6 + $0x8] sm:$0xff] }
 0x4c1   :  { %v4084_v50 = vpop.f32.mrf.mxu0  ;;  %20067 = vmatprep.mubr.msk.f32.mxu1 %vm22036_vm4, %v28736_v60 }
 0x4c2   :  { %v16854_v50 = vld [vmem:[%s28727_s6 + $0xa8] sm:$0xff] }
 0x4c3   :  { %v4087_v27 = vpop.f32.mrf.mxu0 }
 0x4c4   :  { %20068 = vmatmul.mubr.msk.f32.gmra.mxu1 %vm4124_vm5, %v4087_v27  ;;  %v16894_v27 = vld [vmem:[%s28728_s7 + $0x18] sm:$0xf] }
 0x4c5   :  { %v4089_v19 = vpop.f32.mrf.mxu0  ;;  %20070 = vmatprep.mubr.msk.f32.mxu1 %vm22036_vm4, %v28736_v60 }
 0x4c6   :  { %v4330_v19 = vld [vmem:[%s28727_s6 + $0x10] sm:$0xff] }
 0x4c7   :  { %v4092_v8 = vpop.f32.mrf.mxu0 }
 0x4c8   :  { %20071 = vmatmul.mubr.msk.f32.gmra.mxu1 %vm4124_vm5, %v4092_v8  ;;  %v16855_v8 = vld [vmem:[%s28727_s6 + $0xb0] sm:$0xff] }
 0x4c9   :  { %v4094_v23 = vpop.f32.mrf.mxu0  ;;  %20073 = vmatprep.mubr.msk.f32.mxu1 %vm22036_vm4, %v28736_v60 }
 0x4ca   :  { %v16893_v23 = vld [vmem:[%s28728_s7 + $0x10] sm:$0xff] }
 0x4cb   :  { %v4097_v47 = vpop.f32.mrf.mxu0 }
 0x4cc   :  { %20074 = vmatmul.mubr.msk.f32.gmra.mxu1 %vm4124_vm5, %v4097_v47  ;;  %v16856_v47 = vld [vmem:[%s28727_s6 + $0xb8] sm:$0xff] }
 0x4cd   :  { %v4099_v7 = vpop.f32.mrf.mxu0  ;;  %20076 = vmatprep.mubr.msk.f32.mxu1 %vm22036_vm4, %v28736_v60 }
 0x4ce   :  { %v4331_v7 = vld [vmem:[%s28727_s6 + $0x18] sm:$0xff] }
 0x4cf   :  { %v4102_v26 = vpop.f32.mrf.mxu0 }
 0x4d0   :  { %20077 = vmatmul.mubr.msk.f32.gmra.mxu1 %vm4124_vm5, %v4102_v26  ;;  %v4332_v26 = vld [vmem:[%s28727_s6 + $0x20] sm:$0xff] }
 0x4d1   :  { %v4104_v21 = vpop.f32.mrf.mxu0  ;;  %20079 = vmatprep.mubr.msk.f32.mxu1 %vm22036_vm4, %v28736_v60 }
 0x4d2   :  { %v16857_v21 = vld [vmem:[%s28727_s6 + $0xc0] sm:$0xff] }
 0x4d3   :  { %v4107_v10 = vpop.f32.mrf.mxu0 }
 0x4d4   :  { %20080 = vmatmul.mubr.msk.f32.gmra.mxu1 %vm4124_vm5, %v4107_v10  ;;  %v16858_v10 = vld [vmem:[%s28727_s6 + $0xc8] sm:$0xff] }
 0x4d5   :  { %v4109_v36 = vpop.f32.mrf.mxu0  ;;  %20082 = vmatprep.mubr.msk.f32.mxu1 %vm22036_vm4, %v28736_v60 }
 0x4d6   :  { %v4333_v36 = vld [vmem:[%s28727_s6 + $0x28] sm:$0xff] }
 0x4d7   :  { %v4112_v16 = vpop.f32.mrf.mxu0 }
 0x4d8   :  { %20083 = vmatmul.mubr.msk.f32.gmra.mxu1 %vm4124_vm5, %v4112_v16  ;;  %v16859_v16 = vld [vmem:[%s28727_s6 + $0xd0] sm:$0xff] }
 0x4d9   :  { %v4114_v20 = vpop.f32.mrf.mxu0  ;;  %20085 = vmatprep.mubr.msk.f32.mxu1 %vm22036_vm4, %v28736_v60 }
 0x4da   :  { %v4334_v20 = vld [vmem:[%s28727_s6 + $0x30] sm:$0xff] }
 0x4db   :  { %v4117_v53 = vpop.f32.mrf.mxu0 }
 0x4dc   :  { %20086 = vmatmul.mubr.msk.f32.gmra.mxu1 %vm4124_vm5, %v4117_v53  ;;  %v16860_v53 = vld [vmem:[%s28727_s6 + $0xd8] sm:$0xff] }
 0x4dd   :  { %v4119_v3 = vpop.f32.mrf.mxu0  ;;  %20178 = vmatprep.mubr.msk.f32.mxu1 %vm4348_vm6, %v16853_v18  ;;  %v4336_v18 = vld [vmem:[%s28727_s6 + $0x40] sm:$0xff] }
 0x4de   :  { %v4335_v3 = vld [vmem:[%s28727_s6 + $0x38] sm:$0xff] }
 0x564   :  { %v23885_v14 = vpop.f32.mrf.mxu1 }
 0x565   :  { %v23980_v45 = vmax.f32 %v23885_v14, 0.0  ;;  %v16862_v14 = vld [vmem:[%s28727_s6 + $0xe8] sm:$0xff] }
 0x566   :  { %v20045_v37 = vpop.f32.mrf.mxu1 }
 0x567   :  { %v4337_v37 = vld [vmem:[%s28727_s6 + $0x48] sm:$0xff] }
 0x568   :  { %v23887_v0 = vpop.f32.mrf.mxu1 }
 0x569   :  { %v23973_v9 = vmax.f32 %v23887_v0, 0.0  ;;  %v16863_v0 = vld [vmem:[%s28727_s6 + $0xf0] sm:$0xff] }
 0x56a   :  { %v20048_v58 = vpop.f32.mrf.mxu1 }
 0x56b   :  { %v4338_v58 = vld [vmem:[%s28727_s6 + $0x50] sm:$0xff] }
 0x56c   :  { %v23889_v57 = vpop.f32.mrf.mxu1 }
 0x56d   :  { %v23966_v39 = vmax.f32 %v23889_v57, 0.0  ;;  %v16864_v57 = vld [vmem:[%s28727_s6 + $0xf8] sm:$0xff] }
 0x56e   :  { %v20051_v22 = vpop.f32.mrf.mxu1 }
 0x56f   :  { %v4339_v22 = vld [vmem:[%s28727_s6 + $0x58] sm:$0xff] }
 0x570   :  { %v23891_v49 = vpop.f32.mrf.mxu1 }
 0x571   :  { %v23959_v28 = vmax.f32 %v23891_v49, 0.0  ;;  %v16865_v49 = vld [vmem:[%s28727_s6 + $0x100] sm:$0xff] }
 0x572   :  { %v20054_v48 = vpop.f32.mrf.mxu1 }
 0x573   :  { %v4340_v48 = vld [vmem:[%s28727_s6 + $0x60] sm:$0xff] }
 0x574   :  { %v23893_v24 = vpop.f32.mrf.mxu1 }
 0x575   :  { %v23952_v1 = vmax.f32 %v23893_v24, 0.0  ;;  %v16866_v24 = vld [vmem:[%s28727_s6 + $0x108] sm:$0xff] }
 0x576   :  { %v20057_v55 = vpop.f32.mrf.mxu1 }
 0x577   :  { %v4341_v55 = vld [vmem:[%s28727_s6 + $0x68] sm:$0xff] }
 0x578   :  { %v4264_v42 = vpop.f32.mrf.mxu1 }
 0x579   :  { %v23945_v2 = vmax.f32 %v4264_v42, 0.0  ;;  %v16867_v42 = vld [vmem:[%s28727_s6 + $0x110] sm:$0xff] }
 0x57a   :  { %v20060_v40 = vpop.f32.mrf.mxu1 }
 0x57b   :  { %v4342_v40 = vld [vmem:[%s28727_s6 + $0x70] sm:$0xff] }
 0x57c   :  { %v4269_v17 = vpop.f32.mrf.mxu1 }
 0x57d   :  { %v23939_v4 = vmax.f32 %v4269_v17, 0.0  ;;  %v16868_v17 = vld [vmem:[%s28727_s6 + $0x118] sm:$0xff] }
 0x57e   :  { %v20063_v25 = vpop.f32.mrf.mxu1 }
 0x57f   :  { %v4343_v25 = vld [vmem:[%s28727_s6 + $0x78] sm:$0xff] }
 0x580   :  { %v4274_v61 = vpop.f32.mrf.mxu1 }
 0x581   :  { %v23933_v63 = vmax.f32 %v4274_v61, 0.0  ;;  %v16869_v61 = vld [vmem:[%s28727_s6 + $0x120] sm:$0xff] }
 0x582   :  { %v20066_v13 = vpop.f32.mrf.mxu1 }
 0x583   :  { %v4344_v13 = vld [vmem:[%s28727_s6 + $0x80] sm:$0xff] }
 0x584   :  { %v4279_v56 = vpop.f32.mrf.mxu1 }
 0x585   :  { %v23927_v33 = vmax.f32 %v4279_v56, 0.0  ;;  %v16870_v56 = vld [vmem:[%s28727_s6 + $0x128] sm:$0xff] }
 0x586   :  { %v20069_v6 = vpop.f32.mrf.mxu1 }
 0x587   :  { %v4345_v6 = vld [vmem:[%s28727_s6 + $0x88] sm:$0xff] }
 0x588   :  { %v4284_v51 = vpop.f32.mrf.mxu1 }
 0x589   :  { %v23921_v46 = vmax.f32 %v4284_v51, 0.0  ;;  %v16871_v51 = vld [vmem:[%s28727_s6 + $0x130] sm:$0xff] }
 0x58a   :  { %v20072_v41 = vpop.f32.mrf.mxu1 }
 0x58b   :  { %v4346_v41 = vld [vmem:[%s28727_s6 + $0x90] sm:$0xff] }
 0x58c   :  { %v4289_v12 = vpop.f32.mrf.mxu1 }
 0x58d   :  { %v23915_v38 = vmax.f32 %v4289_v12, 0.0  ;;  %v16872_v12 = vld [vmem:[%s28727_s6 + $0x138] sm:$0xff] }
 0x58e   :  { %v20075_v44 = vpop.f32.mrf.mxu1 }
 0x58f   :  { %v4347_v44 = vld [vmem:[%s28727_s6 + $0x98] sm:$0xff] }
 0x590   :  { %v4294_v43 = vpop.f32.mrf.mxu1 }
 0x591   :  { %v23909_v29 = vmax.f32 %v4294_v43, 0.0  ;;  %v4575_v43 = vld [vmem:[%s28728_s7 + $0x8] sm:$0xf] }
 0x592   :  { %v20078_v52 = vpop.f32.mrf.mxu1 }
 0x593   :  { %v4574_v52 = vld [vmem:[%s28728_s7] sm:$0xff] }
 0x594   :  { %v4299_v62 = vpop.f32.mrf.mxu1 }
 0x595   :  { %v23903_v31 = vmax.f32 %v4299_v62, 0.0 }
 0x596   :  { %v20081_v15 = vpop.f32.mrf.mxu1 }
 0x598   :  { %v4304_v34 = vpop.f32.mrf.mxu1 }
 0x599   :  { %v23897_v5 = vmax.f32 %v4304_v34, 0.0 }
 0x59a   :  { %v20084_v11 = vpop.f32.mrf.mxu1 }
 0x59c   :  { %v4309_v54 = vpop.f32.mrf.mxu1 }
 0x59d   :  { %v23895_v32 = vmax.f32 %v4309_v54, 0.0 }
 0x59e   :  { %v20087_v30 = vpop.f32.mrf.mxu1 }
 0x59f   :  { %20088 = vmatprep.subr.mxu0 %v23895_v32  ;;  %20148 = vmatprep.subr.mxu1 %v23895_v32 }
 0x5a0   :  { %20089 = vmatpush3.msra.mxu0 %v23895_v32  ;;  %20149 = vmatpush3.msra.mxu1 %v23895_v32 }
 0x5a1   :  { %20090 = vmatprep.subr.mxu0 %v23897_v5  ;;  %20150 = vmatprep.subr.mxu1 %v23897_v5 }
 0x5a2   :  { %20091 = vmatpush3.msra.mxu0 %v23897_v5  ;;  %20151 = vmatpush3.msra.mxu1 %v23897_v5 }
 0x5a3   :  { %20092 = vmatprep.subr.mxu0 %v23903_v31  ;;  %20152 = vmatprep.subr.mxu1 %v23903_v31 }
 0x5a4   :  { %20093 = vmatpush3.msra.mxu0 %v23903_v31  ;;  %20153 = vmatpush3.msra.mxu1 %v23903_v31 }
 0x5a5   :  { %20094 = vmatprep.subr.mxu0 %v23909_v29  ;;  %20154 = vmatprep.subr.mxu1 %v23909_v29 }
 0x5a6   :  { %20095 = vmatpush3.msra.mxu0 %v23909_v29  ;;  %20155 = vmatpush3.msra.mxu1 %v23909_v29 }
 0x5a7   :  { %20096 = vmatprep.subr.mxu0 %v23915_v38  ;;  %20156 = vmatprep.subr.mxu1 %v23915_v38 }
 0x5a8   :  { %20097 = vmatpush3.msra.mxu0 %v23915_v38  ;;  %20157 = vmatpush3.msra.mxu1 %v23915_v38 }
 0x5a9   :  { %20098 = vmatprep.subr.mxu0 %v23921_v46  ;;  %20158 = vmatprep.subr.mxu1 %v23921_v46 }
 0x5aa   :  { %20099 = vmatpush3.msra.mxu0 %v23921_v46  ;;  %20159 = vmatpush3.msra.mxu1 %v23921_v46 }
 0x5ab   :  { %20100 = vmatprep.subr.mxu0 %v23927_v33  ;;  %20160 = vmatprep.subr.mxu1 %v23927_v33 }
 0x5ac   :  { %20101 = vmatpush3.msra.mxu0 %v23927_v33  ;;  %20161 = vmatpush3.msra.mxu1 %v23927_v33 }
 0x5ad   :  { %20102 = vmatprep.subr.mxu0 %v23933_v63  ;;  %20162 = vmatprep.subr.mxu1 %v23933_v63 }
 0x5ae   :  { %20103 = vmatpush3.msra.mxu0 %v23933_v63  ;;  %20163 = vmatpush3.msra.mxu1 %v23933_v63 }
 0x5af   :  { %20104 = vmatprep.subr.mxu0 %v23939_v4  ;;  %20164 = vmatprep.subr.mxu1 %v23939_v4 }
 0x5b0   :  { %20105 = vmatpush3.msra.mxu0 %v23939_v4  ;;  %20165 = vmatpush3.msra.mxu1 %v23939_v4 }
 0x5b1   :  { %20106 = vmatprep.subr.mxu0 %v23945_v2  ;;  %20166 = vmatprep.subr.mxu1 %v23945_v2 }
 0x5b2   :  { %20107 = vmatpush3.msra.mxu0 %v23945_v2  ;;  %20167 = vmatpush3.msra.mxu1 %v23945_v2 }
 0x5b3   :  { %20108 = vmatprep.subr.mxu0 %v23952_v1  ;;  %20168 = vmatprep.subr.mxu1 %v23952_v1 }
 0x5b4   :  { %20109 = vmatpush3.msra.mxu0 %v23952_v1  ;;  %20169 = vmatpush3.msra.mxu1 %v23952_v1 }
 0x5b5   :  { %20110 = vmatprep.subr.mxu0 %v23959_v28  ;;  %20170 = vmatprep.subr.mxu1 %v23959_v28 }
 0x5b6   :  { %20111 = vmatpush3.msra.mxu0 %v23959_v28  ;;  %20171 = vmatpush3.msra.mxu1 %v23959_v28 }
 0x5b7   :  { %20112 = vmatprep.subr.mxu0 %v23966_v39  ;;  %20172 = vmatprep.subr.mxu1 %v23966_v39 }
 0x5b8   :  { %20113 = vmatpush3.msra.mxu0 %v23966_v39  ;;  %20173 = vmatpush3.msra.mxu1 %v23966_v39 }
 0x5b9   :  { %20114 = vmatprep.subr.mxu0 %v23973_v9  ;;  %20174 = vmatprep.subr.mxu1 %v23973_v9 }
 0x5ba   :  { %20115 = vmatpush3.msra.mxu0 %v23973_v9  ;;  %20175 = vmatpush3.msra.mxu1 %v23973_v9 }
 0x5bb   :  { %20116 = vmatprep.subr.mxu0 %v23980_v45  ;;  %20176 = vmatprep.subr.mxu1 %v23980_v45 }
 0x5bc   :  { %20117 = vmatpush3.msra.mxu0 %v23980_v45  ;;  %20177 = vmatpush3.msra.mxu1 %v23980_v45 }
 0x5bd   :  { %20119 = vmatmul.mubr.msk.f32.vlgmr.msra.gmra.mxu0 %vm4348_vm6, %v4329_v35  ;;  %20179 = vmatmul.mubr.msk.f32.vlgmr.msra.gmra.mxu1 %vm4348_vm6, %v16854_v50 }
 0x5be   :  { %20208 = vmatprep.subr.msk.mxu0 %vm175_vm0, %v16894_v27  ;;  %20121 = vmatprep.mubr.msk.f32.mxu0 %vm4348_vm6, %v4330_v19 }
 0x5bf   :  { %20209 = vmatpush3.msk.msra.mxu0 %vm175_vm0, %v16894_v27  ;;  %20181 = vmatprep.mubr.msk.f32.mxu1 %vm4348_vm6, %v16855_v8 }
 0x5c0   :  { %20210 = vmatprep.subr.mxu0 %v16893_v23  ;;  %20242 = vmatprep.subr.msk.mxu1 %vm175_vm0, %v4575_v43 }
 0x5c1   :  { %20211 = vmatpush3.msra.mxu0 %v16893_v23  ;;  %20182 = vmatmul.mubr.msk.f32.gmra.mxu1 %vm4348_vm6, %v16856_v47 }
 0x5c2   :  { %20122 = vmatmul.mubr.msk.f32.gmra.mxu0 %vm4348_vm6, %v4331_v7  ;;  %20276 = vmatprep.subr.mxu0 %v23895_v32 }
 0x5c3   :  { %20124 = vmatprep.mubr.msk.f32.mxu0 %vm4348_vm6, %v4332_v26  ;;  %20184 = vmatprep.mubr.msk.f32.mxu1 %vm4348_vm6, %v16857_v21 }
 0x5c4   :  { %20243 = vmatpush3.msk.msra.mxu1 %vm175_vm0, %v4575_v43  ;;  %v16943_v43 = vld [vmem:[%s28727_s6 + $0x170] sm:$0xff] }
 0x5c5   :  { %20185 = vmatmul.mubr.msk.f32.gmra.mxu1 %vm4348_vm6, %v16858_v10  ;;  %20244 = vmatprep.subr.mxu1 %v4574_v52 }
 0x5c6   :  { %20125 = vmatmul.mubr.msk.f32.gmra.mxu0 %vm4348_vm6, %v4333_v36  ;;  %20187 = vmatprep.mubr.msk.f32.mxu1 %vm4348_vm6, %v16859_v16 }
 0x5c7   :  { %20127 = vmatprep.mubr.msk.f32.mxu0 %vm4348_vm6, %v4334_v20  ;;  %20245 = vmatpush3.msra.mxu1 %v4574_v52  ;;  %v16944_v52 = vld [vmem:[%s28727_s6 + $0x178] sm:$0xff] }
 0x5c9   :  { %20188 = vmatmul.mubr.msk.f32.gmra.mxu1 %vm4348_vm6, %v16860_v53 }
 0x5ca   :  { %20128 = vmatmul.mubr.msk.f32.gmra.mxu0 %vm4348_vm6, %v4335_v3  ;;  %20190 = vmatprep.mubr.msk.f32.mxu1 %vm4348_vm6, %v16861_v59 }
 0x5cb   :  { %20130 = vmatprep.mubr.msk.f32.mxu0 %vm4348_vm6, %v4336_v18 }
 0x5cd   :  { %20191 = vmatmul.mubr.msk.f32.gmra.mxu1 %vm4348_vm6, %v16862_v14 }
 0x5ce   :  { %20131 = vmatmul.mubr.msk.f32.gmra.mxu0 %vm4348_vm6, %v4337_v37  ;;  %20193 = vmatprep.mubr.msk.f32.mxu1 %vm4348_vm6, %v16863_v0 }
 0x5cf   :  { %20133 = vmatprep.mubr.msk.f32.mxu0 %vm4348_vm6, %v4338_v58 }
 0x5d1   :  { %20194 = vmatmul.mubr.msk.f32.gmra.mxu1 %vm4348_vm6, %v16864_v57 }
 0x5d2   :  { %20134 = vmatmul.mubr.msk.f32.gmra.mxu0 %vm4348_vm6, %v4339_v22  ;;  %20196 = vmatprep.mubr.msk.f32.mxu1 %vm4348_vm6, %v16865_v49 }
 0x5d3   :  { %20136 = vmatprep.mubr.msk.f32.mxu0 %vm4348_vm6, %v4340_v48 }
 0x5d5   :  { %20197 = vmatmul.mubr.msk.f32.gmra.mxu1 %vm4348_vm6, %v16866_v24 }
 0x5d6   :  { %20137 = vmatmul.mubr.msk.f32.gmra.mxu0 %vm4348_vm6, %v4341_v55  ;;  %20199 = vmatprep.mubr.msk.f32.mxu1 %vm4348_vm6, %v16867_v42 }
 0x5d7   :  { %20139 = vmatprep.mubr.msk.f32.mxu0 %vm4348_vm6, %v4342_v40 }
 0x5d9   :  { %20200 = vmatmul.mubr.msk.f32.gmra.mxu1 %vm4348_vm6, %v16868_v17 }
 0x5da   :  { %20140 = vmatmul.mubr.msk.f32.gmra.mxu0 %vm4348_vm6, %v4343_v25  ;;  %20202 = vmatprep.mubr.msk.f32.mxu1 %vm4348_vm6, %v16869_v61 }
 0x5db   :  { %20142 = vmatprep.mubr.msk.f32.mxu0 %vm4348_vm6, %v4344_v13 }
 0x5dd   :  { %20203 = vmatmul.mubr.msk.f32.gmra.mxu1 %vm4348_vm6, %v16870_v56  ;;  %v16937_v56 = vld [vmem:[%s28727_s6 + $0x140] sm:$0xff] }
 0x5de   :  { %20143 = vmatmul.mubr.msk.f32.gmra.mxu0 %vm4348_vm6, %v4345_v6  ;;  %20205 = vmatprep.mubr.msk.f32.mxu1 %vm4348_vm6, %v16871_v51  ;;  %v16938_v6 = vld [vmem:[%s28727_s6 + $0x148] sm:$0xff]  ;;  %v16939_v51 = vld [vmem:[%s28727_s6 + $0x150] sm:$0xff] }
 0x5df   :  { %20145 = vmatprep.mubr.msk.f32.mxu0 %vm4348_vm6, %v4346_v41  ;;  %v16940_v41 = vld [vmem:[%s28727_s6 + $0x158] sm:$0xff] }
 0x5e1   :  { %20206 = vmatmul.mubr.msk.f32.gmra.mxu1 %vm4348_vm6, %v16872_v12  ;;  %v16941_v12 = vld [vmem:[%s28727_s6 + $0x160] sm:$0xff] }
 0x5e2   :  { %20146 = vmatmul.mubr.msk.f32.gmra.mxu0 %vm4348_vm6, %v4347_v44  ;;  %v16942_v44 = vld [vmem:[%s28727_s6 + $0x168] sm:$0xff] }
 0x67d   :  { %v20120_v62 = vpop.f32.mrf.mxu0  ;;  %v20180_v15 = vpop.f32.mrf.mxu1 }
 0x67f   :  { %v4475_v34 = vpop.f32.mrf.mxu0  ;;  %v4723_v11 = vpop.f32.mrf.mxu1 }
 0x680   :  { %20212 = vmatprep.mubr.msk.f32.mxu0 %vm4825_vm7, %v4723_v11  ;;  %20246 = vmatprep.mubr.msk.f32.mxu1 %vm4825_vm7, %v4475_v34  ;;  %v16947_v34 = vld [vmem:[%s28727_s6 + $0x190] sm:$0xff]  ;;  %v16948_v11 = vld [vmem:[%s28727_s6 + $0x198] sm:$0xff] }
 0x681   :  { %v20183_v54 = vpop.f32.mrf.mxu1  ;;  %20213 = vmatmul.mubr.msk.f32.vlgmr.msra.gmra.mxu0 %vm4825_vm7, %v20180_v15  ;;  %20247 = vmatmul.mubr.msk.f32.vlgmr.msra.gmra.mxu1 %vm4825_vm7, %v20120_v62  ;;  %v16945_v62 = vld [vmem:[%s28727_s6 + $0x180] sm:$0xff]  ;;  %v16946_v15 = vld [vmem:[%s28727_s6 + $0x188] sm:$0xff] }
 0x682   :  { %v20123_v30 = vpop.f32.mrf.mxu0  ;;  %20277 = vmatpush3.msra.mxu0 %v23895_v32 }
 0x683   :  { %20278 = vmatprep.subr.mxu0 %v23897_v5  ;;  %v4733_v35 = vpop.f32.mrf.mxu1 }
 0x684   :  { %v4485_v50 = vpop.f32.mrf.mxu0  ;;  %20279 = vmatpush3.msra.mxu0 %v23897_v5  ;;  %20215 = vmatprep.mubr.msk.f32.mxu0 %vm4825_vm7, %v4733_v35  ;;  %v16951_v35 = vld [vmem:[%s28727_s6 + $0x1b0] sm:$0xff] }
 0x685   :  { %20249 = vmatprep.mubr.msk.f32.mxu1 %vm4825_vm7, %v4485_v50  ;;  %20280 = vmatprep.subr.mxu0 %v23903_v31  ;;  %v20186_v27 = vpop.f32.mrf.mxu1  ;;  %v16952_v50 = vld [vmem:[%s28727_s6 + $0x1b8] sm:$0xff] }
 0x686   :  { %v20126_v19 = vpop.f32.mrf.mxu0  ;;  %20216 = vmatmul.mubr.msk.f32.gmra.mxu0 %vm4825_vm7, %v20183_v54  ;;  %20250 = vmatmul.mubr.msk.f32.gmra.mxu1 %vm4825_vm7, %v20123_v30  ;;  %v16949_v54 = vld [vmem:[%s28727_s6 + $0x1a0] sm:$0xff]  ;;  %v16950_v30 = vld [vmem:[%s28727_s6 + $0x1a8] sm:$0xff] }
 0x687   :  { %20281 = vmatpush3.msra.mxu0 %v23903_v31  ;;  %v4743_v8 = vpop.f32.mrf.mxu1 }
 0x688   :  { %20282 = vmatprep.subr.mxu0 %v23909_v29  ;;  %v4495_v23 = vpop.f32.mrf.mxu0  ;;  %20218 = vmatprep.mubr.msk.f32.mxu0 %vm4825_vm7, %v4743_v8  ;;  %v16955_v8 = vld [vmem:[%s28727_s6 + $0x1d0] sm:$0xff] }
 0x689   :  { %20283 = vmatpush3.msra.mxu0 %v23909_v29  ;;  %20252 = vmatprep.mubr.msk.f32.mxu1 %vm4825_vm7, %v4495_v23  ;;  %v20189_v47 = vpop.f32.mrf.mxu1  ;;  %v16956_v23 = vld [vmem:[%s28727_s6 + $0x1d8] sm:$0xff] }
 0x68a   :  { %20284 = vmatprep.subr.mxu0 %v23915_v38  ;;  %v20129_v7 = vpop.f32.mrf.mxu0  ;;  %20219 = vmatmul.mubr.msk.f32.gmra.mxu0 %vm4825_vm7, %v20186_v27  ;;  %v16953_v27 = vld [vmem:[%s28727_s6 + $0x1c0] sm:$0xff] }
 0x68b   :  { %20253 = vmatmul.mubr.msk.f32.gmra.mxu1 %vm4825_vm7, %v20126_v19  ;;  %20285 = vmatpush3.msra.mxu0 %v23915_v38  ;;  %v4753_v26 = vpop.f32.mrf.mxu1  ;;  %v16954_v19 = vld [vmem:[%s28727_s6 + $0x1c8] sm:$0xff] }
 0x68c   :  { %20286 = vmatprep.subr.mxu0 %v23921_v46  ;;  %v4505_v21 = vpop.f32.mrf.mxu0  ;;  %20221 = vmatprep.mubr.msk.f32.mxu0 %vm4825_vm7, %v4753_v26  ;;  %v17002_v26 = vld [vmem:[%s28727_s6 + $0x1f0] sm:$0xff] }
 0x68d   :  { %20287 = vmatpush3.msra.mxu0 %v23921_v46  ;;  %20255 = vmatprep.mubr.msk.f32.mxu1 %vm4825_vm7, %v4505_v21  ;;  %v20192_v10 = vpop.f32.mrf.mxu1  ;;  %v17003_v21 = vld [vmem:[%s28727_s6 + $0x1f8] sm:$0xff] }
 0x68e   :  { %20288 = vmatprep.subr.mxu0 %v23927_v33  ;;  %v20132_v36 = vpop.f32.mrf.mxu0  ;;  %20222 = vmatmul.mubr.msk.f32.gmra.mxu0 %vm4825_vm7, %v20189_v47  ;;  %v17000_v47 = vld [vmem:[%s28727_s6 + $0x1e0] sm:$0xff] }
 0x68f   :  { %20256 = vmatmul.mubr.msk.f32.gmra.mxu1 %vm4825_vm7, %v20129_v7  ;;  %20289 = vmatpush3.msra.mxu0 %v23927_v33  ;;  %v4763_v16 = vpop.f32.mrf.mxu1  ;;  %v17001_v7 = vld [vmem:[%s28727_s6 + $0x1e8] sm:$0xff] }
 0x690   :  { %20290 = vmatprep.subr.mxu0 %v23933_v63  ;;  %v4515_v20 = vpop.f32.mrf.mxu0  ;;  %20224 = vmatprep.mubr.msk.f32.mxu0 %vm4825_vm7, %v4763_v16  ;;  %v16977_v16 = vld [vmem:[%s28728_s7 + $0x20] sm:$0xff] }
 0x691   :  { %20291 = vmatpush3.msra.mxu0 %v23933_v63  ;;  %20258 = vmatprep.mubr.msk.f32.mxu1 %vm4825_vm7, %v4515_v20  ;;  %v20195_v53 = vpop.f32.mrf.mxu1  ;;  %v17018_v20 = vld [vmem:[%s28727_s6 + $0x270] sm:$0xff] }
 0x692   :  { %20292 = vmatprep.subr.mxu0 %v23939_v4  ;;  %v20135_v3 = vpop.f32.mrf.mxu0  ;;  %20225 = vmatmul.mubr.msk.f32.gmra.mxu0 %vm4825_vm7, %v20192_v10  ;;  %v17004_v10 = vld [vmem:[%s28727_s6 + $0x200] sm:$0xff] }
 0x693   :  { %20259 = vmatmul.mubr.msk.f32.gmra.mxu1 %vm4825_vm7, %v20132_v36  ;;  %20293 = vmatpush3.msra.mxu0 %v23939_v4  ;;  %v4773_v59 = vpop.f32.mrf.mxu1  ;;  %v17006_v36 = vld [vmem:[%s28727_s6 + $0x210] sm:$0xff] }
 0x694   :  { %20294 = vmatprep.subr.mxu0 %v23945_v2  ;;  %v4525_v18 = vpop.f32.mrf.mxu0  ;;  %20227 = vmatprep.mubr.msk.f32.mxu0 %vm4825_vm7, %v4773_v59  ;;  %v17066_v59 = vld [vmem:[%s28727_s6 + $0x298] sm:$0xff] }
 0x695   :  { %20295 = vmatpush3.msra.mxu0 %v23945_v2  ;;  %20261 = vmatprep.mubr.msk.f32.mxu1 %vm4825_vm7, %v4525_v18  ;;  %v20198_v14 = vpop.f32.mrf.mxu1  ;;  %v17067_v18 = vld [vmem:[%s28727_s6 + $0x2a0] sm:$0xff] }
 0x696   :  { %20296 = vmatprep.subr.mxu0 %v23952_v1  ;;  %v20138_v37 = vpop.f32.mrf.mxu0  ;;  %20228 = vmatmul.mubr.msk.f32.gmra.mxu0 %vm4825_vm7, %v20195_v53  ;;  %v17064_v53 = vld [vmem:[%s28727_s6 + $0x288] sm:$0xff] }
 0x697   :  { %20262 = vmatmul.mubr.msk.f32.gmra.mxu1 %vm4825_vm7, %v20135_v3  ;;  %20297 = vmatpush3.msra.mxu0 %v23952_v1  ;;  %v4783_v0 = vpop.f32.mrf.mxu1  ;;  %v17065_v3 = vld [vmem:[%s28727_s6 + $0x290] sm:$0xff] }
 0x698   :  { %20298 = vmatprep.subr.mxu0 %v23959_v28  ;;  %v4535_v58 = vpop.f32.mrf.mxu0  ;;  %20230 = vmatprep.mubr.msk.f32.mxu0 %vm4825_vm7, %v4783_v0  ;;  %v17070_v0 = vld [vmem:[%s28727_s6 + $0x2b8] sm:$0xff] }
 0x699   :  { %20299 = vmatpush3.msra.mxu0 %v23959_v28  ;;  %20264 = vmatprep.mubr.msk.f32.mxu1 %vm4825_vm7, %v4535_v58  ;;  %v20201_v57 = vpop.f32.mrf.mxu1  ;;  %v17071_v58 = vld [vmem:[%s28727_s6 + $0x2c0] sm:$0xff] }
 0x69a   :  { %20300 = vmatprep.subr.mxu0 %v23966_v39  ;;  %v20141_v22 = vpop.f32.mrf.mxu0  ;;  %20231 = vmatmul.mubr.msk.f32.gmra.mxu0 %vm4825_vm7, %v20198_v14  ;;  %v17068_v14 = vld [vmem:[%s28727_s6 + $0x2a8] sm:$0xff] }
 0x69b   :  { %20265 = vmatmul.mubr.msk.f32.gmra.mxu1 %vm4825_vm7, %v20138_v37  ;;  %20301 = vmatpush3.msra.mxu0 %v23966_v39  ;;  %v4793_v49 = vpop.f32.mrf.mxu1  ;;  %v17069_v37 = vld [vmem:[%s28727_s6 + $0x2b0] sm:$0xff] }
 0x69c   :  { %20302 = vmatprep.subr.mxu0 %v23973_v9  ;;  %v4545_v48 = vpop.f32.mrf.mxu0  ;;  %20233 = vmatprep.mubr.msk.f32.mxu0 %vm4825_vm7, %v4793_v49  ;;  %v17074_v49 = vld [vmem:[%s28727_s6 + $0x2d8] sm:$0xff] }
 0x69d   :  { %20303 = vmatpush3.msra.mxu0 %v23973_v9  ;;  %20267 = vmatprep.mubr.msk.f32.mxu1 %vm4825_vm7, %v4545_v48  ;;  %v20204_v24 = vpop.f32.mrf.mxu1  ;;  %v17075_v48 = vld [vmem:[%s28727_s6 + $0x2e0] sm:$0xff] }
 0x69e   :  { %20304 = vmatprep.subr.mxu0 %v23980_v45  ;;  %v20144_v55 = vpop.f32.mrf.mxu0  ;;  %20234 = vmatmul.mubr.msk.f32.gmra.mxu0 %vm4825_vm7, %v20201_v57  ;;  %v17072_v57 = vld [vmem:[%s28727_s6 + $0x2c8] sm:$0xff] }
 0x69f   :  { %20268 = vmatmul.mubr.msk.f32.gmra.mxu1 %vm4825_vm7, %v20141_v22  ;;  %20305 = vmatpush3.msra.mxu0 %v23980_v45  ;;  %v4803_v42 = vpop.f32.mrf.mxu1  ;;  %v17073_v22 = vld [vmem:[%s28727_s6 + $0x2d0] sm:$0xff] }
 0x6a0   :  { %20370 = vmatprep.subr.mxu0 %v23895_v32  ;;  %v4555_v40 = vpop.f32.mrf.mxu0  ;;  %20236 = vmatprep.mubr.msk.f32.mxu0 %vm4825_vm7, %v4803_v42  ;;  %v17077_v42 = vld [vmem:[%s28727_s6 + $0x2f0] sm:$0xff] }
 0x6a1   :  { %20270 = vmatprep.mubr.msk.f32.mxu1 %vm4825_vm7, %v4555_v40  ;;  %v20207_v17 = vpop.f32.mrf.mxu1  ;;  %v17078_v40 = vld [vmem:[%s28727_s6 + $0x2f8] sm:$0xff] }
 0x6a2   :  { %v20147_v25 = vpop.f32.mrf.mxu0  ;;  %20237 = vmatmul.mubr.msk.f32.gmra.mxu0 %vm4825_vm7, %v20204_v24  ;;  %v24510_v24 = vld [vmem:[%s28728_s7 + $0x38] sm:$0xf] }
 0x6a3   :  { %20271 = vmatmul.mubr.msk.f32.gmra.mxu1 %vm4825_vm7, %v20144_v55  ;;  %v4813_v61 = vpop.f32.mrf.mxu1  ;;  %v17076_v55 = vld [vmem:[%s28727_s6 + $0x2e8] sm:$0xff] }
 0x6a4   :  { %v4565_v13 = vpop.f32.mrf.mxu0  ;;  %20239 = vmatprep.mubr.msk.f32.mxu0 %vm4825_vm7, %v4813_v61  ;;  %v17081_v61 = vld [vmem:[%s28727_s6 + $0x310] sm:$0xff] }
 0x6a5   :  { %20273 = vmatprep.mubr.msk.f32.mxu1 %vm4825_vm7, %v4565_v13  ;;  %v17082_v13 = vld [vmem:[%s28727_s6 + $0x318] sm:$0xff] }
 0x6a6   :  { %20240 = vmatmul.mubr.msk.f32.gmra.mxu0 %vm4825_vm7, %v20207_v17  ;;  %v17079_v17 = vld [vmem:[%s28727_s6 + $0x300] sm:$0xff] }
 0x6a7   :  { %20274 = vmatmul.mubr.msk.f32.gmra.mxu1 %vm4825_vm7, %v20147_v25  ;;  %20306 = vmatprep.mubr.msk.f32.mxu0 %vm4348_vm6, %v16937_v56  ;;  %v17080_v25 = vld [vmem:[%s28727_s6 + $0x308] sm:$0xff] }
 0x6aa   :  { %20307 = vmatmul.mubr.msk.f32.vlgmr.msra.gmra.mxu0 %vm4348_vm6, %v16938_v6 }
 0x6ab   :  { %20371 = vmatpush3.msra.mxu0 %v23895_v32  ;;  %20309 = vmatprep.mubr.msk.f32.mxu0 %vm4348_vm6, %v16939_v51 }
 0x6ac   :  { %20372 = vmatprep.subr.mxu0 %v23897_v5 }
 0x6ad   :  { %20373 = vmatpush3.msra.mxu0 %v23897_v5 }
 0x6ae   :  { %20374 = vmatprep.subr.mxu0 %v23903_v31  ;;  %20310 = vmatmul.mubr.msk.f32.gmra.mxu0 %vm4348_vm6, %v16940_v41 }
 0x6af   :  { %20375 = vmatpush3.msra.mxu0 %v23903_v31  ;;  %20312 = vmatprep.mubr.msk.f32.mxu0 %vm4348_vm6, %v16941_v12 }
 0x6b0   :  { %20376 = vmatprep.subr.mxu0 %v23909_v29 }
 0x6b1   :  { %20377 = vmatpush3.msra.mxu0 %v23909_v29 }
 0x6b2   :  { %20378 = vmatprep.subr.mxu0 %v23915_v38  ;;  %20313 = vmatmul.mubr.msk.f32.gmra.mxu0 %vm4348_vm6, %v16942_v44 }
 0x6b3   :  { %20379 = vmatpush3.msra.mxu0 %v23915_v38  ;;  %20315 = vmatprep.mubr.msk.f32.mxu0 %vm4348_vm6, %v16943_v43 }
 0x6b4   :  { %20380 = vmatprep.subr.mxu0 %v23921_v46 }
 0x6b5   :  { %20381 = vmatpush3.msra.mxu0 %v23921_v46 }
 0x6b6   :  { %20382 = vmatprep.subr.mxu0 %v23927_v33  ;;  %20316 = vmatmul.mubr.msk.f32.gmra.mxu0 %vm4348_vm6, %v16944_v52 }
 0x6b7   :  { %20383 = vmatpush3.msra.mxu0 %v23927_v33  ;;  %20318 = vmatprep.mubr.msk.f32.mxu0 %vm4348_vm6, %v16945_v62 }
 0x6b8   :  { %20384 = vmatprep.subr.mxu0 %v23933_v63 }
 0x6b9   :  { %20385 = vmatpush3.msra.mxu0 %v23933_v63 }
 0x6ba   :  { %20386 = vmatprep.subr.mxu0 %v23939_v4  ;;  %20319 = vmatmul.mubr.msk.f32.gmra.mxu0 %vm4348_vm6, %v16946_v15 }
 0x6bb   :  { %20387 = vmatpush3.msra.mxu0 %v23939_v4  ;;  %20321 = vmatprep.mubr.msk.f32.mxu0 %vm4348_vm6, %v16947_v34 }
 0x6bc   :  { %20388 = vmatprep.subr.mxu0 %v23945_v2 }
 0x6bd   :  { %20389 = vmatpush3.msra.mxu0 %v23945_v2 }
 0x6be   :  { %20390 = vmatprep.subr.mxu0 %v23952_v1  ;;  %20322 = vmatmul.mubr.msk.f32.gmra.mxu0 %vm4348_vm6, %v16948_v11 }
 0x6bf   :  { %20391 = vmatpush3.msra.mxu0 %v23952_v1  ;;  %20324 = vmatprep.mubr.msk.f32.mxu0 %vm4348_vm6, %v16949_v54 }
 0x6c0   :  { %20392 = vmatprep.subr.mxu0 %v23959_v28 }
 0x6c1   :  { %20393 = vmatpush3.msra.mxu0 %v23959_v28 }
 0x6c2   :  { %20394 = vmatprep.subr.mxu0 %v23966_v39  ;;  %20325 = vmatmul.mubr.msk.f32.gmra.mxu0 %vm4348_vm6, %v16950_v30 }
 0x6c3   :  { %20395 = vmatpush3.msra.mxu0 %v23966_v39  ;;  %20327 = vmatprep.mubr.msk.f32.mxu0 %vm4348_vm6, %v16951_v35 }
 0x6c4   :  { %20396 = vmatprep.subr.mxu0 %v23973_v9 }
 0x6c5   :  { %20397 = vmatpush3.msra.mxu0 %v23973_v9 }
 0x6c6   :  { %20398 = vmatprep.subr.mxu0 %v23980_v45  ;;  %20328 = vmatmul.mubr.msk.f32.gmra.mxu0 %vm4348_vm6, %v16952_v50 }
 0x6c7   :  { %20399 = vmatpush3.msra.mxu0 %v23980_v45  ;;  %20330 = vmatprep.mubr.msk.f32.mxu0 %vm4348_vm6, %v16953_v27 }
 0x6c8   :  { %20464 = vmatprep.subr.mxu0 %v23895_v32 }
 0x6ca   :  { %20331 = vmatmul.mubr.msk.f32.gmra.mxu0 %vm4348_vm6, %v16954_v19 }
 0x6cb   :  { %20333 = vmatprep.mubr.msk.f32.mxu0 %vm4348_vm6, %v16955_v8 }
 0x6ce   :  { %20334 = vmatmul.mubr.msk.f32.gmra.mxu0 %vm4348_vm6, %v16956_v23 }
 0x6cf   :  { %20400 = vmatprep.mubr.msk.f32.mxu0 %vm4348_vm6, %v17000_v47 }
 0x6d2   :  { %20401 = vmatmul.mubr.msk.f32.vlgmr.msra.gmra.mxu0 %vm4348_vm6, %v17001_v7 }
 0x6d3   :  { %20465 = vmatpush3.msra.mxu0 %v23895_v32  ;;  %20403 = vmatprep.mubr.msk.f32.mxu0 %vm4348_vm6, %v17002_v26  ;;  %v17005_v32 = vld [vmem:[%s28727_s6 + $0x208] sm:$0xff] }
 0x6d4   :  { %20466 = vmatprep.subr.mxu0 %v23897_v5 }
 0x6d5   :  { %20467 = vmatpush3.msra.mxu0 %v23897_v5  ;;  %v17007_v5 = vld [vmem:[%s28727_s6 + $0x218] sm:$0xff] }
 0x6d6   :  { %20468 = vmatprep.subr.mxu0 %v23903_v31  ;;  %20404 = vmatmul.mubr.msk.f32.gmra.mxu0 %vm4348_vm6, %v17003_v21 }
 0x6d7   :  { %20469 = vmatpush3.msra.mxu0 %v23903_v31  ;;  %20406 = vmatprep.mubr.msk.f32.mxu0 %vm4348_vm6, %v17004_v10  ;;  %v17008_v31 = vld [vmem:[%s28727_s6 + $0x220] sm:$0xff] }
 0x6d8   :  { %20470 = vmatprep.subr.mxu0 %v23909_v29 }
 0x6d9   :  { %20471 = vmatpush3.msra.mxu0 %v23909_v29  ;;  %v17009_v29 = vld [vmem:[%s28727_s6 + $0x228] sm:$0xff] }
 0x6da   :  { %20472 = vmatprep.subr.mxu0 %v23915_v38  ;;  %20407 = vmatmul.mubr.msk.f32.gmra.mxu0 %vm4348_vm6, %v17005_v32 }
 0x6db   :  { %20473 = vmatpush3.msra.mxu0 %v23915_v38  ;;  %20409 = vmatprep.mubr.msk.f32.mxu0 %vm4348_vm6, %v17006_v36  ;;  %v17010_v38 = vld [vmem:[%s28727_s6 + $0x230] sm:$0xff] }
 0x6dc   :  { %20474 = vmatprep.subr.mxu0 %v23921_v46 }
 0x6dd   :  { %20475 = vmatpush3.msra.mxu0 %v23921_v46  ;;  %v17011_v46 = vld [vmem:[%s28727_s6 + $0x238] sm:$0xff] }
 0x6de   :  { %20476 = vmatprep.subr.mxu0 %v23927_v33  ;;  %20410 = vmatmul.mubr.msk.f32.gmra.mxu0 %vm4348_vm6, %v17007_v5 }
 0x6df   :  { %20477 = vmatpush3.msra.mxu0 %v23927_v33  ;;  %20412 = vmatprep.mubr.msk.f32.mxu0 %vm4348_vm6, %v17008_v31  ;;  %v17012_v33 = vld [vmem:[%s28727_s6 + $0x240] sm:$0xff] }
 0x6e0   :  { %20478 = vmatprep.subr.mxu0 %v23933_v63 }
 0x6e1   :  { %20479 = vmatpush3.msra.mxu0 %v23933_v63  ;;  %v16978_v63 = vld [vmem:[%s28728_s7 + $0x28] sm:$0xf] }
 0x6e2   :  { %20480 = vmatprep.subr.mxu0 %v23939_v4  ;;  %20413 = vmatmul.mubr.msk.f32.gmra.mxu0 %vm4348_vm6, %v17009_v29 }
 0x6e3   :  { %20481 = vmatpush3.msra.mxu0 %v23939_v4  ;;  %20415 = vmatprep.mubr.msk.f32.mxu0 %vm4348_vm6, %v17010_v38  ;;  %v17013_v4 = vld [vmem:[%s28727_s6 + $0x248] sm:$0xff] }
 0x6e4   :  { %20482 = vmatprep.subr.mxu0 %v23945_v2  ;;  %20336 = vmatprep.subr.msk.mxu1 %vm175_vm0, %v16978_v63 }
 0x6e5   :  { %20483 = vmatpush3.msra.mxu0 %v23945_v2  ;;  %v17014_v2 = vld [vmem:[%s28727_s6 + $0x250] sm:$0xff]  ;;  %20337 = vmatpush3.msk.msra.mxu1 %vm175_vm0, %v16978_v63 }
 0x6e6   :  { %20484 = vmatprep.subr.mxu0 %v23952_v1  ;;  %20416 = vmatmul.mubr.msk.f32.gmra.mxu0 %vm4348_vm6, %v17011_v46 }
 0x6e7   :  { %20485 = vmatpush3.msra.mxu0 %v23952_v1  ;;  %20418 = vmatprep.mubr.msk.f32.mxu0 %vm4348_vm6, %v17012_v33  ;;  %v17015_v1 = vld [vmem:[%s28727_s6 + $0x258] sm:$0xff] }
 0x6e8   :  { %20486 = vmatprep.subr.mxu0 %v23959_v28  ;;  %20338 = vmatprep.subr.mxu1 %v16977_v16 }
 0x6e9   :  { %20487 = vmatpush3.msra.mxu0 %v23959_v28  ;;  %v17016_v28 = vld [vmem:[%s28727_s6 + $0x260] sm:$0xff]  ;;  %20339 = vmatpush3.msra.mxu1 %v16977_v16 }
 0x6ea   :  { %20488 = vmatprep.subr.mxu0 %v23966_v39  ;;  %20419 = vmatmul.mubr.msk.f32.gmra.mxu0 %vm4348_vm6, %v17013_v4 }
 0x6eb   :  { %20489 = vmatpush3.msra.mxu0 %v23966_v39  ;;  %20421 = vmatprep.mubr.msk.f32.mxu0 %vm4348_vm6, %v17014_v2  ;;  %v17017_v39 = vld [vmem:[%s28727_s6 + $0x268] sm:$0xff] }
 0x6ec   :  { %20490 = vmatprep.subr.mxu0 %v23973_v9  ;;  %20430 = vmatprep.subr.msk.mxu1 %vm175_vm0, %v24510_v24 }
 0x6ed   :  { %20491 = vmatpush3.msra.mxu0 %v23973_v9  ;;  %v17019_v9 = vld [vmem:[%s28727_s6 + $0x278] sm:$0xff] }
 0x6ee   :  { %20492 = vmatprep.subr.mxu0 %v23980_v45  ;;  %20422 = vmatmul.mubr.msk.f32.gmra.mxu0 %vm4348_vm6, %v17015_v1 }
 0x6ef   :  { %20493 = vmatpush3.msra.mxu0 %v23980_v45  ;;  %20424 = vmatprep.mubr.msk.f32.mxu0 %vm4348_vm6, %v17016_v28  ;;  %v17063_v45 = vld [vmem:[%s28727_s6 + $0x280] sm:$0xff] }
 0x6f0   :  { %7166 = vmatprep.subr.mxu0 %v28736_v60  ;;  %v24743_v60 = vpop.permute.xlu1 %6875 }
 0x6f2   :  { %20425 = vmatmul.mubr.msk.f32.gmra.mxu0 %vm4348_vm6, %v17017_v39 }
 0x6f3   :  { %20427 = vmatprep.mubr.msk.f32.mxu0 %vm4348_vm6, %v17018_v20 }
 0x6f6   :  { %20428 = vmatmul.mubr.msk.f32.gmra.mxu0 %vm4348_vm6, %v17019_v9 }
 0x6f7   :  { %20494 = vmatprep.mubr.msk.f32.mxu0 %vm4348_vm6, %v17063_v45 }
 0x6fa   :  { %20495 = vmatmul.mubr.msk.f32.vlgmr.msra.gmra.mxu0 %vm4348_vm6, %v17064_v53 }
 0x6fb   :  { %20497 = vmatprep.mubr.msk.f32.mxu0 %vm4348_vm6, %v17065_v3 }
 0x6fe   :  { %20498 = vmatmul.mubr.msk.f32.gmra.mxu0 %vm4348_vm6, %v17066_v59 }
 0x6ff   :  { %20500 = vmatprep.mubr.msk.f32.mxu0 %vm4348_vm6, %v17067_v18 }
 0x702   :  { %20501 = vmatmul.mubr.msk.f32.gmra.mxu0 %vm4348_vm6, %v17068_v14 }
 0x703   :  { %20503 = vmatprep.mubr.msk.f32.mxu0 %vm4348_vm6, %v17069_v37 }
 0x706   :  { %20504 = vmatmul.mubr.msk.f32.gmra.mxu0 %vm4348_vm6, %v17070_v0 }
 0x707   :  { %20506 = vmatprep.mubr.msk.f32.mxu0 %vm4348_vm6, %v17071_v58 }
 0x70a   :  { %20507 = vmatmul.mubr.msk.f32.gmra.mxu0 %vm4348_vm6, %v17072_v57  ;;  %v17040_v57 = vld [vmem:[%s28728_s7 + $0x30] sm:$0xff] }
 0x70b   :  { %20509 = vmatprep.mubr.msk.f32.mxu0 %vm4348_vm6, %v17073_v22 }
 0x70e   :  { %20510 = vmatmul.mubr.msk.f32.gmra.mxu0 %vm4348_vm6, %v17074_v49  ;;  %v17104_v49 = vld [vmem:[%s28728_s7 + $0x48] sm:$0xf] }
 0x70f   :  { %20512 = vmatprep.mubr.msk.f32.mxu0 %vm4348_vm6, %v17075_v48 }
 0x712   :  { %20513 = vmatmul.mubr.msk.f32.gmra.mxu0 %vm4348_vm6, %v17076_v55 }
 0x713   :  { %20515 = vmatprep.mubr.msk.f32.mxu0 %vm4348_vm6, %v17077_v42 }
 0x716   :  { %20516 = vmatmul.mubr.msk.f32.gmra.mxu0 %vm4348_vm6, %v17078_v40 }
 0x717   :  { %20518 = vmatprep.mubr.msk.f32.mxu0 %vm4348_vm6, %v17079_v17 }
 0x71a   :  { %20519 = vmatmul.mubr.msk.f32.gmra.mxu0 %vm4348_vm6, %v17080_v25 }
 0x71b   :  { %20521 = vmatprep.mubr.msk.f32.mxu0 %vm4348_vm6, %v17081_v61 }
 0x71e   :  { %20522 = vmatmul.mubr.msk.f32.gmra.mxu0 %vm4348_vm6, %v17082_v13 }
 0x741   :  { %v20214_v56 = vpop.f32.mrf.mxu0  ;;  %v20248_v6 = vpop.f32.mrf.mxu1 }
 0x742   :  { %v24544_v51 = vadd.f32 %v20248_v6, %v20214_v56 }
 0x743   :  { %v24546_v41 = vpop.f32.mrf.mxu0  ;;  %v24548_v12 = vpop.f32.mrf.mxu1 }
 0x744   :  { %28820 = vst [vmem:[#allocation21_spill] sm:$0xff] %v24546_v41  ;;  %28821 = vst [vmem:[#allocation29_spill] sm:$0xff] %v24548_v12 }
 0x746   :  { %v20217_v44 = vpop.f32.mrf.mxu0  ;;  %v20251_v43 = vpop.f32.mrf.mxu1 }
 0x747   :  { %v24550_v52 = vadd.f32 %v20251_v43, %v20217_v44 }
 0x748   :  { %v24552_v62 = vpop.f32.mrf.mxu0  ;;  %v24554_v15 = vpop.f32.mrf.mxu1 }
 0x74a   :  { %v20220_v34 = vpop.f32.mrf.mxu0 }
 0x74b   :  { %v20254_v11 = vpop.f32.mrf.mxu1 }
 0x74c   :  { %v24556_v54 = vadd.f32 %v20254_v11, %v20220_v34  ;;  %v24558_v30 = vpop.f32.mrf.mxu0 }
 0x74d   :  { %v24560_v35 = vpop.f32.mrf.mxu1 }
 0x74e   :  { %v20223_v50 = vpop.f32.mrf.mxu0 }
 0x74f   :  { %v20257_v27 = vpop.f32.mrf.mxu1 }
 0x750   :  { %v24562_v19 = vadd.f32 %v20257_v27, %v20223_v50  ;;  %v24564_v8 = vpop.f32.mrf.mxu0 }
 0x751   :  { %v24566_v23 = vpop.f32.mrf.mxu1 }
 0x752   :  { %v20226_v47 = vpop.f32.mrf.mxu0 }
 0x753   :  { %v20260_v7 = vpop.f32.mrf.mxu1 }
 0x754   :  { %v24568_v26 = vadd.f32 %v20260_v7, %v20226_v47  ;;  %v24570_v21 = vpop.f32.mrf.mxu0 }
 0x755   :  { %v24572_v10 = vpop.f32.mrf.mxu1 }
 0x756   :  { %v20229_v32 = vpop.f32.mrf.mxu0 }
 0x757   :  { %v20263_v36 = vpop.f32.mrf.mxu1 }
 0x758   :  { %v24574_v5 = vadd.f32 %v20263_v36, %v20229_v32  ;;  %v24576_v31 = vpop.f32.mrf.mxu0  ;;  %v17103_v32 = vld [vmem:[%s28728_s7 + $0x40] sm:$0xff] }
 0x759   :  { %v24578_v29 = vpop.f32.mrf.mxu1 }
 0x75a   :  { %v20232_v38 = vpop.f32.mrf.mxu0 }
 0x75b   :  { %v20266_v46 = vpop.f32.mrf.mxu1 }
 0x75c   :  { %v24580_v33 = vadd.f32 %v20266_v46, %v20232_v38  ;;  %v24582_v63 = vpop.f32.mrf.mxu0 }
 0x75d   :  { %v24584_v4 = vpop.f32.mrf.mxu1 }
 0x75e   :  { %v20235_v2 = vpop.f32.mrf.mxu0 }
 0x75f   :  { %v20269_v1 = vpop.f32.mrf.mxu1 }
 0x760   :  { %v24586_v28 = vadd.f32 %v20269_v1, %v20235_v2  ;;  %v24588_v16 = vpop.f32.mrf.mxu0 }
 0x761   :  { %v24590_v39 = vpop.f32.mrf.mxu1 }
 0x762   :  { %v20238_v20 = vpop.f32.mrf.mxu0 }
 0x763   :  { %v20272_v9 = vpop.f32.mrf.mxu1 }
 0x764   :  { %v24592_v45 = vadd.f32 %v20272_v9, %v20238_v20  ;;  %v24594_v53 = vpop.f32.mrf.mxu0 }
 0x765   :  { %v24596_v3 = vpop.f32.mrf.mxu1 }
 0x766   :  { %v20241_v59 = vpop.f32.mrf.mxu0 }
 0x767   :  { %v20275_v18 = vpop.f32.mrf.mxu1 }
 0x768   :  { %v24598_v14 = vadd.f32 %v20275_v18, %v20241_v59  ;;  %v24600_v37 = vpop.f32.mrf.mxu0 }
 0x769   :  { %28822 = vst [vmem:[#allocation24_spill] sm:$0xff] %v24600_v37 }
 0x76a   :  { %v20308_v0 = vpop.f32.mrf.mxu0 }
 0x76c   :  { %v5429_v58 = vpop.f32.mrf.mxu0 }
 0x76d   :  { %20340 = vmatprep.mubr.msk.f32.mxu1 %vm4825_vm7, %v5429_v58 }
 0x76e   :  { %v20311_v22 = vpop.f32.mrf.mxu0  ;;  %20341 = vmatmul.mubr.msk.f32.vlgmr.msra.gmra.mxu1 %vm4825_vm7, %v20308_v0 }
 0x76f   :  { %20431 = vmatpush3.msk.msra.mxu1 %vm175_vm0, %v24510_v24 }
 0x770   :  { %v5439_v48 = vpop.f32.mrf.mxu0  ;;  %20432 = vmatprep.subr.mxu1 %v17040_v57 }
 0x771   :  { %20343 = vmatprep.mubr.msk.f32.mxu1 %vm4825_vm7, %v5439_v48  ;;  %20433 = vmatpush3.msra.mxu1 %v17040_v57 }
 0x772   :  { %v20314_v55 = vpop.f32.mrf.mxu0  ;;  %20344 = vmatmul.mubr.msk.f32.gmra.mxu1 %vm4825_vm7, %v20311_v22  ;;  %20524 = vmatprep.subr.msk.mxu1 %vm175_vm0, %v17104_v49 }
 0x774   :  { %v5449_v42 = vpop.f32.mrf.mxu0 }
 0x775   :  { %20346 = vmatprep.mubr.msk.f32.mxu1 %vm4825_vm7, %v5449_v42 }
 0x776   :  { %v20317_v40 = vpop.f32.mrf.mxu0  ;;  %20347 = vmatmul.mubr.msk.f32.gmra.mxu1 %vm4825_vm7, %v20314_v55 }
 0x778   :  { %v5459_v24 = vpop.f32.mrf.mxu0 }
 0x779   :  { %20349 = vmatprep.mubr.msk.f32.mxu1 %vm4825_vm7, %v5459_v24 }
 0x77a   :  { %v20320_v17 = vpop.f32.mrf.mxu0  ;;  %20350 = vmatmul.mubr.msk.f32.gmra.mxu1 %vm4825_vm7, %v20317_v40 }
 0x77c   :  { %v5469_v25 = vpop.f32.mrf.mxu0 }
 0x77d   :  { %20352 = vmatprep.mubr.msk.f32.mxu1 %vm4825_vm7, %v5469_v25 }
 0x77e   :  { %v20323_v61 = vpop.f32.mrf.mxu0  ;;  %20353 = vmatmul.mubr.msk.f32.gmra.mxu1 %vm4825_vm7, %v20320_v17 }
 0x780   :  { %v5479_v13 = vpop.f32.mrf.mxu0 }
 0x781   :  { %20355 = vmatprep.mubr.msk.f32.mxu1 %vm4825_vm7, %v5479_v13 }
 0x782   :  { %v20326_v56 = vpop.f32.mrf.mxu0  ;;  %20356 = vmatmul.mubr.msk.f32.gmra.mxu1 %vm4825_vm7, %v20323_v61 }
 0x784   :  { %v5489_v6 = vpop.f32.mrf.mxu0 }
 0x785   :  { %20358 = vmatprep.mubr.msk.f32.mxu1 %vm4825_vm7, %v5489_v6 }
 0x786   :  { %v20329_v44 = vpop.f32.mrf.mxu0  ;;  %20359 = vmatmul.mubr.msk.f32.gmra.mxu1 %vm4825_vm7, %v20326_v56 }
 0x788   :  { %v5499_v43 = vpop.f32.mrf.mxu0 }
 0x789   :  { %20361 = vmatprep.mubr.msk.f32.mxu1 %vm4825_vm7, %v5499_v43 }
 0x78a   :  { %v20332_v34 = vpop.f32.mrf.mxu0  ;;  %20362 = vmatmul.mubr.msk.f32.gmra.mxu1 %vm4825_vm7, %v20329_v44 }
 0x78c   :  { %v5509_v11 = vpop.f32.mrf.mxu0 }
 0x78d   :  { %20364 = vmatprep.mubr.msk.f32.mxu1 %vm4825_vm7, %v5509_v11 }
 0x78e   :  { %v20335_v50 = vpop.f32.mrf.mxu0  ;;  %20365 = vmatmul.mubr.msk.f32.gmra.mxu1 %vm4825_vm7, %v20332_v34 }
 0x790   :  { %v5519_v27 = vpop.f32.mrf.mxu0 }
 0x791   :  { %20367 = vmatprep.mubr.msk.f32.mxu1 %vm4825_vm7, %v5519_v27 }
 0x792   :  { %20368 = vmatmul.mubr.msk.f32.gmra.mxu1 %vm4825_vm7, %v20335_v50  ;;  %v20402_v47 = vpop.f32.mrf.mxu0 }
 0x794   :  { %v5926_v7 = vpop.f32.mrf.mxu0 }
 0x795   :  { %20434 = vmatprep.mubr.msk.f32.mxu1 %vm4825_vm7, %v5926_v7 }
 0x796   :  { %v20405_v36 = vpop.f32.mrf.mxu0  ;;  %20435 = vmatmul.mubr.msk.f32.vlgmr.msra.gmra.mxu1 %vm4825_vm7, %v20402_v47 }
 0x797   :  { %20525 = vmatpush3.msk.msra.mxu1 %vm175_vm0, %v17104_v49 }
 0x798   :  { %v5936_v38 = vpop.f32.mrf.mxu0  ;;  %20526 = vmatprep.subr.mxu1 %v17103_v32 }
 0x799   :  { %20437 = vmatprep.mubr.msk.f32.mxu1 %vm4825_vm7, %v5936_v38  ;;  %20527 = vmatpush3.msra.mxu1 %v17103_v32 }
 0x79a   :  { %v20408_v46 = vpop.f32.mrf.mxu0  ;;  %20438 = vmatmul.mubr.msk.f32.gmra.mxu1 %vm4825_vm7, %v20405_v36 }
 0x79c   :  { %v5946_v2 = vpop.f32.mrf.mxu0 }
 0x79d   :  { %20440 = vmatprep.mubr.msk.f32.mxu1 %vm4825_vm7, %v5946_v2 }
 0x79e   :  { %v20411_v1 = vpop.f32.mrf.mxu0  ;;  %20441 = vmatmul.mubr.msk.f32.gmra.mxu1 %vm4825_vm7, %v20408_v46 }
 0x7a0   :  { %v5956_v20 = vpop.f32.mrf.mxu0 }
 0x7a1   :  { %20443 = vmatprep.mubr.msk.f32.mxu1 %vm4825_vm7, %v5956_v20 }
 0x7a2   :  { %v20414_v9 = vpop.f32.mrf.mxu0  ;;  %20444 = vmatmul.mubr.msk.f32.gmra.mxu1 %vm4825_vm7, %v20411_v1  ;;  %v24675_v1 = vpop.f32.mrf.mxu1 }
 0x7a3   :  { %28823 = vst [vmem:[#allocation25_spill] sm:$0xff] %v24675_v1  ;;  %v5234_v1 = vadd.f32 %v24578_v29, %v24576_v31  ;;  %v5264_v31 = vadd.f32 %v24596_v3, %v24594_v53 }
 0x7a4   :  { %v5966_v59 = vpop.f32.mrf.mxu0 }
 0x7a5   :  { %20446 = vmatprep.mubr.msk.f32.mxu1 %vm4825_vm7, %v5966_v59 }
 0x7a6   :  { %v20417_v18 = vpop.f32.mrf.mxu0  ;;  %20447 = vmatmul.mubr.msk.f32.gmra.mxu1 %vm4825_vm7, %v20414_v9 }
 0x7a8   :  { %v5976_v0 = vpop.f32.mrf.mxu0 }
 0x7a9   :  { %20449 = vmatprep.mubr.msk.f32.mxu1 %vm4825_vm7, %v5976_v0 }
 0x7aa   :  { %v20420_v58 = vpop.f32.mrf.mxu0  ;;  %20450 = vmatmul.mubr.msk.f32.gmra.mxu1 %vm4825_vm7, %v20417_v18 }
 0x7ac   :  { %v5986_v57 = vpop.f32.mrf.mxu0 }
 0x7ad   :  { %20452 = vmatprep.mubr.msk.f32.mxu1 %vm4825_vm7, %v5986_v57 }
 0x7ae   :  { %v20423_v22 = vpop.f32.mrf.mxu0  ;;  %20453 = vmatmul.mubr.msk.f32.gmra.mxu1 %vm4825_vm7, %v20420_v58 }
 0x7b0   :  { %v5996_v49 = vpop.f32.mrf.mxu0 }
 0x7b1   :  { %20455 = vmatprep.mubr.msk.f32.mxu1 %vm4825_vm7, %v5996_v49 }
 0x7b2   :  { %v20426_v48 = vpop.f32.mrf.mxu0  ;;  %20456 = vmatmul.mubr.msk.f32.gmra.mxu1 %vm4825_vm7, %v20423_v22 }
 0x7b4   :  { %v6006_v55 = vpop.f32.mrf.mxu0 }
 0x7b5   :  { %20458 = vmatprep.mubr.msk.f32.mxu1 %vm4825_vm7, %v6006_v55 }
 0x7b6   :  { %v20429_v42 = vpop.f32.mrf.mxu0  ;;  %20459 = vmatmul.mubr.msk.f32.gmra.mxu1 %vm4825_vm7, %v20426_v48 }
 0x7b8   :  { %v6016_v40 = vpop.f32.mrf.mxu0 }
 0x7b9   :  { %20461 = vmatprep.mubr.msk.f32.mxu1 %vm4825_vm7, %v6016_v40 }
 0x7ba   :  { %20462 = vmatmul.mubr.msk.f32.gmra.mxu1 %vm4825_vm7, %v20429_v42  ;;  %v20496_v24 = vpop.f32.mrf.mxu0 }
 0x7bc   :  { %v6423_v17 = vpop.f32.mrf.mxu0 }
 0x7bd   :  { %20528 = vmatprep.mubr.msk.f32.mxu1 %vm4825_vm7, %v6423_v17 }
 0x7be   :  { %v20499_v25 = vpop.f32.mrf.mxu0  ;;  %20529 = vmatmul.mubr.msk.f32.vlgmr.msra.gmra.mxu1 %vm4825_vm7, %v20496_v24 }
 0x7c0   :  { %v6433_v61 = vpop.f32.mrf.mxu0 }
 0x7c1   :  { %20531 = vmatprep.mubr.msk.f32.mxu1 %vm4825_vm7, %v6433_v61 }
 0x7c2   :  { %v20502_v13 = vpop.f32.mrf.mxu0  ;;  %20532 = vmatmul.mubr.msk.f32.gmra.mxu1 %vm4825_vm7, %v20499_v25 }
 0x7c4   :  { %v6443_v56 = vpop.f32.mrf.mxu0 }
 0x7c5   :  { %20534 = vmatprep.mubr.msk.f32.mxu1 %vm4825_vm7, %v6443_v56 }
 0x7c6   :  { %v20505_v6 = vpop.f32.mrf.mxu0  ;;  %20535 = vmatmul.mubr.msk.f32.gmra.mxu1 %vm4825_vm7, %v20502_v13 }
 0x7c8   :  { %v6453_v44 = vpop.f32.mrf.mxu0 }
 0x7c9   :  { %20537 = vmatprep.mubr.msk.f32.mxu1 %vm4825_vm7, %v6453_v44 }
 0x7ca   :  { %v20508_v43 = vpop.f32.mrf.mxu0  ;;  %20538 = vmatmul.mubr.msk.f32.gmra.mxu1 %vm4825_vm7, %v20505_v6 }
 0x7cc   :  { %v6463_v34 = vpop.f32.mrf.mxu0 }
 0x7cd   :  { %20540 = vmatprep.mubr.msk.f32.mxu1 %vm4825_vm7, %v6463_v34 }
 0x7ce   :  { %v20511_v11 = vpop.f32.mrf.mxu0  ;;  %20541 = vmatmul.mubr.msk.f32.gmra.mxu1 %vm4825_vm7, %v20508_v43 }
 0x7d0   :  { %v6473_v50 = vpop.f32.mrf.mxu0 }
 0x7d1   :  { %20543 = vmatprep.mubr.msk.f32.mxu1 %vm4825_vm7, %v6473_v50 }
 0x7d2   :  { %v20514_v27 = vpop.f32.mrf.mxu0  ;;  %20544 = vmatmul.mubr.msk.f32.gmra.mxu1 %vm4825_vm7, %v20511_v11 }
 0x7d4   :  { %v6483_v47 = vpop.f32.mrf.mxu0 }
 0x7d5   :  { %20546 = vmatprep.mubr.msk.f32.mxu1 %vm4825_vm7, %v6483_v47 }
 0x7d6   :  { %v20517_v7 = vpop.f32.mrf.mxu0  ;;  %20547 = vmatmul.mubr.msk.f32.gmra.mxu1 %vm4825_vm7, %v20514_v27 }
 0x7d8   :  { %v6493_v32 = vpop.f32.mrf.mxu0 }
 0x7d9   :  { %20549 = vmatprep.mubr.msk.f32.mxu1 %vm4825_vm7, %v6493_v32 }
 0x7da   :  { %v20520_v36 = vpop.f32.mrf.mxu0  ;;  %20550 = vmatmul.mubr.msk.f32.gmra.mxu1 %vm4825_vm7, %v20517_v7 }
 0x7dc   :  { %v6503_v38 = vpop.f32.mrf.mxu0 }
 0x7dd   :  { %20552 = vmatprep.mubr.msk.f32.mxu1 %vm4825_vm7, %v6503_v38 }
 0x7de   :  { %v20523_v46 = vpop.f32.mrf.mxu0  ;;  %20553 = vmatmul.mubr.msk.f32.gmra.mxu1 %vm4825_vm7, %v20520_v36 }
 0x7e0   :  { %v6513_v2 = vpop.f32.mrf.mxu0 }
 0x7e1   :  { %20555 = vmatprep.mubr.msk.f32.mxu1 %vm4825_vm7, %v6513_v2 }
 0x7e2   :  { %20556 = vmatmul.mubr.msk.f32.gmra.mxu1 %vm4825_vm7, %v20523_v46 }
 0x82e   :  { %v20342_v20 = vpop.f32.mrf.mxu1 }
 0x82f   :  { %v5760_v9 = vadd.f32 %v20342_v20, %v24544_v51 }
 0x830   :  { %v24678_v59 = vpop.f32.mrf.mxu1 }
 0x831   :  { %28824 = vst [vmem:[#allocation22_spill] sm:$0xff] %v24678_v59 }
 0x832   :  { %v20345_v18 = vpop.f32.mrf.mxu1 }
 0x833   :  { %v5762_v0 = vadd.f32 %v20345_v18, %v24550_v52 }
 0x834   :  { %v24681_v58 = vpop.f32.mrf.mxu1 }
 0x836   :  { %v20348_v57 = vpop.f32.mrf.mxu1 }
 0x837   :  { %v5764_v22 = vadd.f32 %v20348_v57, %v24556_v54 }
 0x838   :  { %v24684_v49 = vpop.f32.mrf.mxu1 }
 0x83a   :  { %v20351_v48 = vpop.f32.mrf.mxu1 }
 0x83b   :  { %v5766_v55 = vadd.f32 %v20351_v48, %v24562_v19 }
 0x83c   :  { %v24687_v42 = vpop.f32.mrf.mxu1 }
 0x83e   :  { %v20354_v40 = vpop.f32.mrf.mxu1 }
 0x83f   :  { %v5768_v51 = vadd.f32 %v20354_v40, %v24568_v26 }
 0x840   :  { %v24690_v24 = vpop.f32.mrf.mxu1 }
 0x842   :  { %v20357_v17 = vpop.f32.mrf.mxu1 }
 0x843   :  { %v24693_v52 = vadd.f32 %v20357_v17, %v24574_v5 }
 0x844   :  { %v24695_v25 = vpop.f32.mrf.mxu1 }
 0x846   :  { %v20360_v61 = vpop.f32.mrf.mxu1 }
 0x847   :  { %v24698_v54 = vadd.f32 %v20360_v61, %v24580_v33 }
 0x848   :  { %v5720_v13 = vpop.f32.mrf.mxu1 }
 0x84a   :  { %v20363_v56 = vpop.f32.mrf.mxu1 }
 0x84b   :  { %v24701_v19 = vadd.f32 %v20363_v56, %v24586_v28 }
 0x84c   :  { %v5730_v6 = vpop.f32.mrf.mxu1 }
 0x84e   :  { %v20366_v44 = vpop.f32.mrf.mxu1 }
 0x84f   :  { %v5776_v26 = vadd.f32 %v20366_v44, %v24592_v45 }
 0x850   :  { %v24704_v43 = vpop.f32.mrf.mxu1 }
 0x852   :  { %v20369_v34 = vpop.f32.mrf.mxu1 }
 0x853   :  { %v5778_v5 = vadd.f32 %v20369_v34, %v24598_v14 }
 0x854   :  { %v24707_v11 = vpop.f32.mrf.mxu1 }
 0x855   :  { %28825 = vst [vmem:[#allocation27_spill] sm:$0xff] %v24707_v11  ;;  %v5244_v11 = vadd.f32 %v24584_v4, %v24582_v63 }
 0x856   :  { %v20436_v50 = vpop.f32.mrf.mxu1 }
 0x857   :  { %v24709_v27 = vadd.f32 %v20436_v50, %v5760_v9 }
 0x858   :  { %v24711_v33 = vpop.f32.mrf.mxu1 }
 0x859   :  { %28826 = vst [vmem:[#allocation20_spill] sm:$0xff] %v24709_v27  ;;  %28827 = vst [vmem:[#allocation26_spill] sm:$0xff] %v24711_v33  ;;  %v5771_v33 = vadd.f32 %v5720_v13, %v5244_v11  ;;  %v5224_v13 = vadd.f32 %v24572_v10, %v24570_v21  ;;  %v5214_v10 = vadd.f32 %v24566_v23, %v24564_v8 }
 0x85a   :  { %v20439_v47 = vpop.f32.mrf.mxu1  ;;  %v5204_v23 = vadd.f32 %v24560_v35, %v24558_v30 }
 0x85b   :  { %v24713_v7 = vadd.f32 %v20439_v47, %v5762_v0  ;;  %v6871_v47 = vpop.permute.xlu0 %6870 }
 0x85c   :  { %v24715_v28 = vpop.f32.mrf.mxu1 }
 0x85d   :  { %28828 = vst [vmem:[#allocation23_spill] sm:$0xff] %v24713_v7  ;;  %28829 = vst [vmem:[#allocation33_spill] sm:$0xff] %v24715_v28 }
 0x85e   :  { %v20442_v32 = vpop.f32.mrf.mxu1 }
 0x85f   :  { %v24717_v36 = vadd.f32 %v20442_v32, %v5764_v22 }
 0x860   :  { %v24719_v45 = vpop.f32.mrf.mxu1 }
 0x861   :  { %28830 = vst [vmem:[#allocation30_spill] sm:$0xff] %v24717_v36 }
 0x862   :  { %v20445_v38 = vpop.f32.mrf.mxu1 }
 0x863   :  { %v24721_v46 = vadd.f32 %v20445_v38, %v5766_v55 }
 0x864   :  { %v24723_v14 = vpop.f32.mrf.mxu1 }
 0x866   :  { %v20448_v2 = vpop.f32.mrf.mxu1 }
 0x867   :  { %v24725_v20 = vadd.f32 %v20448_v2, %v5768_v51 }
 0x868   :  { %v6197_v9 = vpop.f32.mrf.mxu1 }
 0x86a   :  { %v20451_v18 = vpop.f32.mrf.mxu1 }
 0x86c   :  { %v6207_v57 = vpop.f32.mrf.mxu1 }
 0x86e   :  { %v20454_v0 = vpop.f32.mrf.mxu1 }
 0x86f   :  { %v6269_v41 = vadd.f32 %v20454_v0, %v24698_v54 }
 0x870   :  { %v6217_v48 = vpop.f32.mrf.mxu1 }
 0x871   :  { %v6268_v59 = vadd.f32 %v6217_v48, %v5771_v33 }
 0x872   :  { %v20457_v40 = vpop.f32.mrf.mxu1 }
 0x873   :  { %v6271_v63 = vadd.f32 %v20457_v40, %v24701_v19 }
 0x874   :  { %v6227_v17 = vpop.f32.mrf.mxu1 }
 0x876   :  { %v20460_v61 = vpop.f32.mrf.mxu1 }
 0x877   :  { %v24727_v22 = vadd.f32 %v20460_v61, %v5776_v26  ;;  %v6866_v26 = vpop.permute.xlu0 %6865 }
 0x878   :  { %v6237_v56 = vpop.f32.mrf.mxu1 }
 0x879   :  { %28831 = vst [vmem:[#allocation10_spill] sm:$0xff] %v24727_v22  ;;  %v6861_v22 = vpop.permute.xlu1 %6860 }
 0x87a   :  { %v20463_v44 = vpop.f32.mrf.mxu1 }
 0x87b   :  { %v24729_v34 = vadd.f32 %v20463_v44, %v5778_v5 }
 0x87c   :  { %v24731_v55 = vpop.f32.mrf.mxu1 }
 0x87d   :  { %28832 = vst [vmem:[#allocation11_spill] sm:$0xff] %v24729_v34  ;;  %28833 = vst [vmem:[#allocation12_spill] sm:$0xff] %v24731_v55  ;;  %v6856_v34 = vpop.permute.xlu0 %6855 }
 0x87e   :  { %v24733_v50 = vpop.f32.mrf.mxu1 }
 0x87f   :  { %28834 = vst [vmem:[#allocation13_spill] sm:$0xff] %v24733_v50 }
 0x880   :  { %v24735_v51 = vpop.f32.mrf.mxu1 }
 0x881   :  { %28835 = vst [vmem:[#allocation18_spill] sm:$0xff] %v24735_v51  ;;  %v6851_v51 = vpop.permute.xlu1 %6850 }
 0x882   :  { %v24737_v32 = vpop.f32.mrf.mxu1 }
 0x883   :  { %28836 = vst [vmem:[#allocation19_spill] sm:$0xff] %v24737_v32  ;;  %v6846_v32 = vpop.permute.xlu0 %6845 }
 0x884   :  { %v24739_v38 = vpop.f32.mrf.mxu1 }
 0x885   :  { %28837 = vst [vmem:[#allocation8_spill] sm:$0xff] %v24739_v38  ;;  %v5254_v38 = vadd.f32 %v24590_v39, %v24588_v16  ;;  %v6841_v28 = vpop.permute.xlu1 %6840 }
 0x886   :  { %v24741_v2 = vpop.f32.mrf.mxu1 }
 0x887   :  { %28838 = vst [vmem:[#allocation9_spill] sm:$0xff] %v24741_v2  ;;  %v5769_v2 = vadd.f32 %v24695_v25, %v5234_v1  ;;  %v5773_v12 = vadd.f32 %v5730_v6, %v5254_v38  ;;  %v5767_v25 = vadd.f32 %v24690_v24, %v5224_v13  ;;  %v5775_v6 = vadd.f32 %v24704_v43, %v5264_v31  ;;  %v28842_v31 = vld [vmem:[#allocation29_spill] sm:$0xff] }
 0x888   :  { %v24745_v61 = vpop.f32.mrf.mxu1 }
 0x889   :  { %28839 = vst [vmem:[#allocation41_spill] sm:$0xff] %v24745_v61  ;;  %v6836_v61 = vpop.permute.xlu0 %6835  ;;  %v6266_v29 = vadd.f32 %v6207_v57, %v5769_v2  ;;  %v6270_v39 = vadd.f32 %v6227_v17, %v5773_v12  ;;  %v6264_v53 = vadd.f32 %v6197_v9, %v5767_v25  ;;  %v6272_v12 = vadd.f32 %v6237_v56, %v5775_v6 }
 0x88a   :  { %v24747_v5 = vpop.f32.mrf.mxu1 }
 0x88c   :  { %v24749_v44 = vpop.f32.mrf.mxu1 }
 0x88d   :  { %v6826_v43 = vpop.permute.xlu0 %6825 }
 0x88e   :  { %v20542_v50 = vpop.f32.mrf.mxu1 }
 0x890   :  { %v6694_v27 = vpop.f32.mrf.mxu1 }
 0x891   :  { %v6761_v0 = vadd.f32 %v6694_v27, %v6264_v53 }
 0x892   :  { %v20545_v55 = vpop.f32.mrf.mxu1 }
 0x893   :  { %v24789_v2 = vadd.f32 %v6836_v61, %v6761_v0 }
 0x894   :  { %v6704_v7 = vpop.f32.mrf.mxu1 }
 0x895   :  { %v6763_v54 = vadd.f32 %v6704_v7, %v6266_v29  ;;  %v5765_v7 = vadd.f32 %v24687_v42, %v5214_v10 }
 0x896   :  { %v20548_v37 = vpop.f32.mrf.mxu1 }
 0x897   :  { %v6766_v11 = vadd.f32 %v20548_v37, %v6269_v41  ;;  %v6831_v41 = vpop.permute.xlu1 %6830  ;;  %v6262_v9 = vadd.f32 %v24723_v14, %v5765_v7  ;;  %v28848_v7 = vld [vmem:[#allocation24_spill] sm:$0xff] }
 0x898   :  { %v6714_v36 = vpop.f32.mrf.mxu1 }
 0x899   :  { %v6765_v4 = vadd.f32 %v6714_v36, %v6268_v59  ;;  %v6267_v59 = vadd.f32 %v20451_v18, %v24693_v52  ;;  %v6906_v24 = vadd.f32 %v6861_v22, %v6766_v11  ;;  %v24774_v52 = vadd.f32 %v6846_v32, %v6763_v54  ;;  %v28844_v11 = vld [vmem:[#allocation30_spill] sm:$0xff] }
 0x89a   :  { %v20551_v16 = vpop.f32.mrf.mxu1  ;;  %v6762_v22 = vadd.f32 %v20542_v50, %v24725_v20  ;;  %v6816_v20 = vpop.permute.xlu0 %6815 }
 0x89b   :  { %v6768_v1 = vadd.f32 %v20551_v16, %v6271_v63  ;;  %v24767_v19 = vadd.f32 %v6856_v34, %v6765_v4  ;;  %v6764_v37 = vadd.f32 %v20545_v55, %v6267_v59  ;;  %v6958_v34 = vrot.slane %v6906_v24, 1  ;;  %v6821_v38 = vpop.permute.xlu1 %6820  ;;  %v28840_v63 = vld [vmem:[#allocation41_spill] sm:$0xff]  ;;  %v28846_v59 = vld [vmem:[#allocation22_spill] sm:$0xff] }
 0x89c   :  { %v6724_v33 = vpop.f32.mrf.mxu1  ;;  %v5763_v55 = vadd.f32 %v24684_v49, %v5204_v23  ;;  %v6952_v30 = vrot.slane %v24774_v52, 1  ;;  %v6760_v49 = vadd.f32 %v24747_v5, %v24721_v46  ;;  %v28841_v5 = vld [vmem:[#allocation21_spill] sm:$0xff] }
 0x89d   :  { %v6908_v36 = vadd.f32 %v6871_v47, %v6768_v1  ;;  %v6767_v21 = vadd.f32 %v6724_v33, %v6270_v39  ;;  %v6956_v48 = vrot.slane %v24767_v19, 1  ;;  %v6904_v56 = vadd.f32 %v6851_v51, %v6764_v37  ;;  %v28843_v16 = vld [vmem:[#allocation33_spill] sm:$0xff] }
 0x89e   :  { %v24771_v3 = vpop.f32.mrf.mxu1  ;;  %v6759_v47 = vadd.f32 %v24749_v44, %v6262_v9  ;;  %v6260_v50 = vadd.f32 %v24719_v45, %v5763_v55  ;;  %v6902_v51 = vadd.f32 %v6841_v28, %v6762_v22  ;;  %v6948_v45 = vrot.slane %v24789_v2, 1  ;;  %v28845_v1 = vld [vmem:[#allocation9_spill] sm:$0xff]  ;;  %v6806_v33 = vpop.permute.xlu0 %6805 }
 0x89f   :  { %v6907_v57 = vadd.f32 %v6866_v26, %v6767_v21  ;;  %v6962_v40 = vrot.slane %v6908_v36, 1  ;;  %v6959_v14 = vsel %vm3632_vm2, %v6956_v48, %v6958_v34  ;;  %v6954_v26 = vrot.slane %v6904_v56, 1  ;;  %v6811_v39 = vpop.permute.xlu1 %6810 }
 0x8a0   :  { %v6734_v18 = vpop.f32.mrf.mxu1  ;;  %v6757_v4 = vadd.f32 %v28840_v63, %v6260_v50  ;;  %v5184_v29 = vadd.f32 %v28842_v31, %v28841_v5  ;;  %v6758_v25 = vadd.f32 %v28845_v1, %v28844_v11  ;;  %v6900_v6 = vadd.f32 %v6831_v41, %v6760_v49  ;;  %v28849_v41 = vld [vmem:[#allocation25_spill] sm:$0xff]  ;;  %v28858_v1 = vld [vmem:[#allocation11_spill] sm:$0xff] }
 0x8a1   :  { %v6960_v17 = vrot.slane %v6907_v57, 1  ;;  %v6769_v8 = vadd.f32 %v6734_v18, %v6272_v12  ;;  %v6955_v46 = vsel %vm3632_vm2, %v6952_v30, %v6954_v26  ;;  %v6950_v54 = vrot.slane %v6902_v51, 1  ;;  %v28850_v18 = vld [vmem:[#allocation26_spill] sm:$0xff] }
 0x8a2   :  { %v24830_v53 = vmax.f32 %v24774_v52, %v6955_v46  ;;  %v6897_v12 = vadd.f32 %v6816_v20, %v6757_v4  ;;  %v5274_v0 = vadd.f32 %v28849_v41, %v28848_v7  ;;  %v28852_v52 = vld [vmem:[#allocation19_spill] sm:$0xff]  ;;  %v6898_v23 = vadd.f32 %v6821_v38, %v6758_v25 }
 0x8a3   :  { %v24782_v42 = vadd.f32 %v24743_v60, %v6769_v8  ;;  %v6963_v27 = vsel %vm3632_vm2, %v6960_v17, %v6962_v40  ;;  %v5194_v60 = vadd.f32 %v24554_v15, %v24552_v62  ;;  %v24809_v62 = vmax.f32 %v24767_v19, %v6959_v14  ;;  %v6801_v14 = vpop.permute.xlu1 %6800 }
 0x8a4   :  { %v24787_v32 = vmax.f32 %v6907_v57, %v6963_v27  ;;  %v24811_v15 = vadd.f32 %v6826_v43, %v6759_v47  ;;  %v6961_v28 = vsel %vm3632_vm2, %v6958_v34, %v6960_v17  ;;  %v5759_v19 = vadd.f32 %v28846_v59, %v5184_v29  ;;  %v20557_v17 = vpop.f32.mrf.mxu1  ;;  %v28854_v34 = vld [vmem:[#allocation18_spill] sm:$0xff] }
 0x8a5   :  { %v6964_v35 = vrot.slane %v24782_v42, 1  ;;  %v5761_v44 = vadd.f32 %v24681_v58, %v5194_v60  ;;  %v24827_v10 = vmax.f32 %v6906_v24, %v6961_v28  ;;  %v6957_v57 = vsel %vm3632_vm2, %v6954_v26, %v6956_v48  ;;  %v28851_v24 = vld [vmem:[#allocation23_spill] sm:$0xff]  ;;  %v6796_v26 = vpop.permute.xlu0 %6795 }
 0x8a6   :  { %7060 = vrot.lane.b32.xlu1 %v24787_v32, %s22035_s21  ;;  %v6944_v37 = vrot.slane %v24811_v15, 1  ;;  %v6951_v43 = vsel %vm3632_vm2, %v6948_v45, %v6950_v54  ;;  %v6756_v8 = vadd.f32 %v28852_v52, %v28851_v24  ;;  %v6946_v9 = vrot.slane %v6900_v6, 1  ;;  %v28853_v48 = vld [vmem:[#allocation27_spill] sm:$0xff] }
 0x8a7   :  { %v6965_v61 = vsel %vm3632_vm2, %v6962_v40, %v6964_v35  ;;  %v6258_v58 = vadd.f32 %v28843_v16, %v5761_v44  ;;  %v6256_v40 = vadd.f32 %v28850_v18, %v5759_v19  ;;  %v5777_v22 = vadd.f32 %v28853_v48, %v5274_v0  ;;  %v28856_v44 = vld [vmem:[#allocation20_spill] sm:$0xff]  ;;  %v6891_v25 = vpop.permute.xlu1 %6890 }
 0x8a8   :  { %v24806_v13 = vmax.f32 %v6908_v36, %v6965_v61  ;;  %v28847_v36 = vld [vmem:[#allocation8_spill] sm:$0xff]  ;;  %v24846_v55 = vmax.f32 %v6904_v56, %v6957_v57  ;;  %v24849_v47 = vmax.f32 %v24789_v2, %v6951_v43  ;;  %v6940_v60 = vrot.slane %v6897_v12, 1  ;;  %v6744_v61 = vpop.f32.mrf.mxu1  ;;  %v28857_v2 = vld [vmem:[#allocation13_spill] sm:$0xff]  ;;  %v28859_v57 = vld [vmem:[#allocation10_spill] sm:$0xff] }
 0x8a9   :  { %v6755_v21 = vadd.f32 %v28847_v36, %v6258_v58  ;;  %v6753_v27 = vadd.f32 %v28854_v34, %v6256_v40  ;;  %v6953_v50 = vsel %vm3632_vm2, %v6950_v54, %v6952_v30  ;;  %v6947_v49 = vsel %vm3632_vm2, %v6944_v37, %v6946_v9  ;;  %v28855_v56 = vld [vmem:[#allocation12_spill] sm:$0xff]  ;;  %v6886_v54 = vpop.permute.xlu0 %6885  ;;  %v7113_v34 = vld [vmem:[%s28729_s9 + $0x8] sm:$0xff] }
 0x8aa   :  { %7062 = vrot.lane.b32.xlu0 %v24806_v13, %s22035_s21  ;;  %7056 = vrot.lane.b32.xlu1 %v24809_v62, %s22035_s21  ;;  %v6274_v38 = vadd.f32 %v28855_v56, %v5777_v22  ;;  %v6754_v63 = vadd.f32 %v28857_v2, %v28856_v44  ;;  %v6896_v4 = vadd.f32 %v6811_v39, %v6756_v8  ;;  %v6942_v28 = vrot.slane %v6898_v23, 1 }
 0x8ab   :  { %v6895_v20 = vadd.f32 %v6806_v33, %v6755_v21  ;;  %v6893_v46 = vadd.f32 %v6796_v26, %v6753_v27  ;;  %v24860_v5 = vmax.f32 %v6902_v51, %v6953_v50  ;;  %v24863_v30 = vmax.f32 %v24811_v15, %v6947_v49  ;;  %v6881_v18 = vpop.permute.xlu1 %6880  ;;  %17127 = vmatprep.mubr.msk.f32.mxu0 %vm7132_vm8, %v7113_v34  ;;  %v7130_v34 = vld [vmem:[%s28729_s9 + $0x90] sm:$0xff] }
 0x8ac   :  { %v6771_v29 = vadd.f32 %v6744_v61, %v6274_v38  ;;  %v6949_v16 = vsel %vm3632_vm2, %v6946_v9, %v6948_v45  ;;  %v6943_v58 = vsel %vm3632_vm2, %v6940_v60, %v6942_v28  ;;  %v6894_v39 = vadd.f32 %v6801_v14, %v6754_v63 }
 0x8ad   :  { %v6936_v31 = vrot.slane %v6895_v20, 1  ;;  %v6938_v11 = vrot.slane %v6896_v4, 1  ;;  %v6772_v51 = vadd.f32 %v20557_v17, %v28858_v1  ;;  %v24872_v15 = vmax.f32 %v6900_v6, %v6949_v16 }
 0x8ae   :  { %7058 = vrot.lane.b32.xlu0 %v24827_v10, %s22035_s21  ;;  %7052 = vrot.lane.b32.xlu1 %v24830_v53, %s22035_s21  ;;  %v24874_v33 = vmax.f32 %v6897_v12, %v6943_v58  ;;  %v6933_v59 = vrot.slane %v6893_v46, 1  ;;  %v6911_v45 = vadd.f32 %v6886_v54, %v6771_v29  ;;  %v6945_v19 = vsel %vm3632_vm2, %v6942_v28, %v6944_v37 }
 0x8af   :  { %v6939_v36 = vsel %vm3632_vm2, %v6936_v31, %v6938_v11  ;;  %v6934_v21 = vrot.slane %v6894_v39, 1  ;;  %v6770_v43 = vadd.f32 %v24771_v3, %v28859_v57  ;;  %v6912_v6 = vadd.f32 %v6891_v25, %v6772_v51 }
 0x8b0   :  { %v24884_v7 = vmax.f32 %v6898_v23, %v6945_v19  ;;  %v24886_v12 = vmax.f32 %v6895_v20, %v6939_v36  ;;  %v6968_v41 = vrot.slane %v6911_v45, 1  ;;  %v6941_v37 = vsel %vm3632_vm2, %v6938_v11, %v6940_v60 }
 0x8b1   :  { %v6935_v0 = vsel %vm3632_vm2, %v6933_v59, %v6934_v21  ;;  %v6910_v40 = vadd.f32 %v6881_v18, %v6770_v43  ;;  %v6970_v17 = vrot.slane %v6912_v6, 1  ;;  %v24894_v3 = vmax.f32 %v6896_v4, %v6941_v37  ;;  %v7112_v43 = vld [vmem:[%s28729_s9] sm:$0xff]  ;;  %v7119_v37 = vld [vmem:[%s28729_s9 + $0x38] sm:$0xff]  ;;  %v7121_v18 = vld [vmem:[%s28729_s9 + $0x48] sm:$0xff] }
 0x8b2   :  { %7054 = vrot.lane.b32.xlu0 %v24846_v55, %s22035_s21  ;;  %7048 = vrot.lane.b32.xlu1 %v24849_v47, %s22035_s21  ;;  %v24896_v24 = vmax.f32 %v6893_v46, %v6935_v0  ;;  %v6937_v52 = vsel %vm3632_vm2, %v6934_v21, %v6936_v31  ;;  %v28860_v56 = vmov 0.0   ;;  %v7118_v0 = vld [vmem:[%s28729_s9 + $0x30] sm:$0xff] }
 0x8b3   :  { %v6971_v8 = vsel %vm3632_vm2, %v6968_v41, %v6970_v17  ;;  %v6966_v23 = vrot.slane %v6910_v40, 1  ;;  %v24904_v9 = vmax.f32 %v6894_v39, %v6937_v52  ;;  %v24922_v14 = vmax.f32 %v6912_v6, %v6970_v17  ;;  %v7115_v6 = vld [vmem:[%s28729_s9 + $0x18] sm:$0xff]  ;;  %v7124_v52 = vld [vmem:[%s28729_s9 + $0x60] sm:$0xff] }
 0x8b4   :  { %v24906_v48 = vmax.f32 %v6911_v45, %v6971_v8  ;;  %v7123_v17 = vld [vmem:[%s28729_s9 + $0x58] sm:$0xff] }
 0x8b5   :  { %v6967_v22 = vsel %vm3632_vm2, %v6964_v35, %v6966_v23  ;;  %v6969_v35 = vsel %vm3632_vm2, %v6966_v23, %v6968_v41  ;;  %v7116_v41 = vld [vmem:[%s28729_s9 + $0x20] sm:$0xff]  ;;  %v7127_v8 = vld [vmem:[%s28729_s9 + $0x78] sm:$0xff]  ;;  %v7126_v23 = vld [vmem:[%s28729_s9 + $0x70] sm:$0xff] }
 0x8b6   :  { %7050 = vrot.lane.b32.xlu0 %v24860_v5, %s22035_s21  ;;  %7044 = vrot.lane.b32.xlu1 %v24863_v30, %s22035_s21  ;;  %v24920_v27 = vmax.f32 %v24782_v42, %v6967_v22  ;;  %v24929_v20 = vmax.f32 %v6910_v40, %v6969_v35  ;;  %v7120_v40 = vld [vmem:[%s28729_s9 + $0x40] sm:$0xff]  ;;  %v7131_v22 = vld [vmem:[%s28729_s9 + $0x98] sm:$0xff] }
 0x8ba   :  { %7046 = vrot.lane.b32.xlu0 %v24872_v15, %s22035_s21  ;;  %7040 = vrot.lane.b32.xlu1 %v24874_v33, %s22035_s21 }
 0x8be   :  { %7042 = vrot.lane.b32.xlu0 %v24884_v7, %s22035_s21  ;;  %7036 = vrot.lane.b32.xlu1 %v24886_v12, %s22035_s21 }
 0x8c2   :  { %7038 = vrot.lane.b32.xlu0 %v24894_v3, %s22035_s21  ;;  %7032 = vrot.lane.b32.xlu1 %v24896_v24, %s22035_s21 }
 0x8c6   :  { %7034 = vrot.lane.b32.xlu0 %v24904_v9, %s22035_s21  ;;  %7068 = vrot.lane.b32.xlu1 %v24906_v48, %s22035_s21 }
 0x8ca   :  { %7070 = vrot.lane.b32.xlu0 %v24922_v14, %s22035_s21  ;;  %7064 = vrot.lane.b32.xlu1 %v24920_v27, %s22035_s21 }
 0x8ce   :  { %7066 = vrot.lane.b32.xlu0 %v24929_v20, %s22035_s21 }
 0x918   :  { %v7061_v60 = vpop.permute.xlu1 %7060 }
 0x919   :  { %v7106_v26 = vmax.f32 %v24787_v32, %v7061_v60 }
 0x91c   :  { %v7057_v50 = vpop.permute.xlu1 %7056  ;;  %v7063_v49 = vpop.permute.xlu0 %7062 }
 0x91d   :  { %v7107_v42 = vmax.f32 %v24806_v13, %v7063_v49  ;;  %v7104_v2 = vmax.f32 %v24809_v62, %v7057_v50 }
 0x91f   :  { %7167 = vmatpush1.msra.mxu0 %v7107_v42 }
 0x920   :  { %v7053_v61 = vpop.permute.xlu1 %7052  ;;  %7168 = vmatprep.subr.mxu0 %v28860_v56  ;;  %v7059_v38 = vpop.permute.xlu0 %7058 }
 0x921   :  { %v7105_v44 = vmax.f32 %v24827_v10, %v7059_v38  ;;  %7169 = vmatpush1.msra.mxu0 %v7106_v26  ;;  %v7102_v32 = vmax.f32 %v24830_v53, %v7053_v61 }
 0x922   :  { %7170 = vmatprep.subr.mxu0 %v28860_v56 }
 0x923   :  { %7171 = vmatpush1.msra.mxu0 %v7105_v44 }
 0x924   :  { %v7049_v63 = vpop.permute.xlu1 %7048  ;;  %7172 = vmatprep.subr.mxu0 %v28860_v56  ;;  %v7055_v4 = vpop.permute.xlu0 %7054 }
 0x925   :  { %v7103_v13 = vmax.f32 %v24846_v55, %v7055_v4  ;;  %7173 = vmatpush1.msra.mxu0 %v7104_v2  ;;  %v7100_v62 = vmax.f32 %v24849_v47, %v7049_v63 }
 0x926   :  { %7174 = vmatprep.subr.mxu0 %v28860_v56 }
 0x927   :  { %7175 = vmatpush1.msra.mxu0 %v7103_v13 }
 0x928   :  { %v7045_v28 = vpop.permute.xlu1 %7044  ;;  %7176 = vmatprep.subr.mxu0 %v28860_v56  ;;  %v7051_v10 = vpop.permute.xlu0 %7050 }
 0x929   :  { %v7101_v46 = vmax.f32 %v24860_v5, %v7051_v10  ;;  %7177 = vmatpush1.msra.mxu0 %v7102_v32  ;;  %v7098_v53 = vmax.f32 %v24863_v30, %v7045_v28 }
 0x92a   :  { %7178 = vmatprep.subr.mxu0 %v28860_v56 }
 0x92b   :  { %7179 = vmatpush1.msra.mxu0 %v7101_v46 }
 0x92c   :  { %v7041_v31 = vpop.permute.xlu1 %7040  ;;  %7180 = vmatprep.subr.mxu0 %v28860_v56  ;;  %v7047_v55 = vpop.permute.xlu0 %7046 }
 0x92d   :  { %v7099_v29 = vmax.f32 %v24872_v15, %v7047_v55  ;;  %7181 = vmatpush1.msra.mxu0 %v7100_v62  ;;  %v7096_v47 = vmax.f32 %v24874_v33, %v7041_v31 }
 0x92e   :  { %7182 = vmatprep.subr.mxu0 %v28860_v56 }
 0x92f   :  { %7183 = vmatpush1.msra.mxu0 %v7099_v29 }
 0x930   :  { %v7037_v16 = vpop.permute.xlu1 %7036  ;;  %7184 = vmatprep.subr.mxu0 %v28860_v56  ;;  %v7043_v5 = vpop.permute.xlu0 %7042 }
 0x931   :  { %v7097_v58 = vmax.f32 %v24884_v7, %v7043_v5  ;;  %7185 = vmatpush1.msra.mxu0 %v7098_v53  ;;  %v7094_v30 = vmax.f32 %v24886_v12, %v7037_v16  ;;  %v7114_v7 = vld [vmem:[%s28729_s9 + $0x10] sm:$0xff]  ;;  %v7117_v12 = vld [vmem:[%s28729_s9 + $0x28] sm:$0xff] }
 0x932   :  { %7186 = vmatprep.subr.mxu0 %v28860_v56 }
 0x933   :  { %7187 = vmatpush1.msra.mxu0 %v7097_v58 }
 0x934   :  { %v7033_v39 = vpop.permute.xlu1 %7032  ;;  %7188 = vmatprep.subr.mxu0 %v28860_v56  ;;  %v7039_v11 = vpop.permute.xlu0 %7038 }
 0x935   :  { %v7095_v1 = vmax.f32 %v24894_v3, %v7039_v11  ;;  %7189 = vmatpush1.msra.mxu0 %v7096_v47  ;;  %v7092_v15 = vmax.f32 %v24896_v24, %v7033_v39  ;;  %v7122_v3 = vld [vmem:[%s28729_s9 + $0x50] sm:$0xff]  ;;  %v7125_v24 = vld [vmem:[%s28729_s9 + $0x68] sm:$0xff] }
 0x936   :  { %7190 = vmatprep.subr.mxu0 %v28860_v56 }
 0x937   :  { %7191 = vmatpush1.msra.mxu0 %v7095_v1 }
 0x938   :  { %7192 = vmatprep.subr.mxu0 %v28860_v56  ;;  %v7035_v51 = vpop.permute.xlu0 %7034  ;;  %v7069_v54 = vpop.permute.xlu1 %7068 }
 0x939   :  { %v7093_v25 = vmax.f32 %v24904_v9, %v7035_v51  ;;  %7193 = vmatpush1.msra.mxu0 %v7094_v30  ;;  %v7110_v45 = vmax.f32 %v24906_v48, %v7069_v54  ;;  %v7129_v9 = vld [vmem:[%s28729_s9 + $0x88] sm:$0xff]  ;;  %v7128_v48 = vld [vmem:[%s28729_s9 + $0x80] sm:$0xff] }
 0x93a   :  { %7194 = vmatprep.subr.mxu0 %v28860_v56 }
 0x93b   :  { %7195 = vmatpush1.msra.mxu0 %v7093_v25 }
 0x93c   :  { %7196 = vmatprep.subr.mxu0 %v28860_v56  ;;  %v7071_v33 = vpop.permute.xlu0 %7070  ;;  %v7065_v19 = vpop.permute.xlu1 %7064 }
 0x93d   :  { %v7111_v59 = vmax.f32 %v24922_v14, %v7071_v33  ;;  %7197 = vmatpush1.msra.mxu0 %v7092_v15  ;;  %v7108_v57 = vmax.f32 %v24920_v27, %v7065_v19  ;;  %v7281_v27 = vld [vmem:[%s28730_s10] sm:$0x7f] }
 0x93e   :  { %7222 = vmatprep.subr.mxu0 %v28860_v56  ;;  %20558 = vmatprep.subr.msk.mxu1 %vm3632_vm2, %v7281_v27 }
 0x93f   :  { %17126 = vmatpush2.msk.msra.mxu0 %vm3632_vm2, %v7111_v59  ;;  %20559 = vmatpush3.msk.msra.mxu1 %vm3632_vm2, %v7281_v27  ;;  %v11550_v27 = vld [vmem:[%s28723_s3 + $0x8] sm:$0xff] }
 0x940   :  { %7224 = vmatprep.subr.mxu0 %v28860_v56  ;;  %v7067_v36 = vpop.permute.xlu0 %7066  ;;  %20575 = vmatprep.subr.mxu1 %v28860_v56 }
 0x941   :  { %v7109_v21 = vmax.f32 %v24929_v20, %v7067_v36  ;;  %7225 = vmatpush2.msra.mxu0 %v7110_v45  ;;  %v7448_v36 = vld [vmem:[%s28731_s11] sm:$0xff] }
 0x942   :  { %7226 = vmatprep.subr.mxu0 %v28860_v56 }
 0x943   :  { %7227 = vmatpush2.msra.mxu0 %v7109_v21  ;;  %v7449_v21 = vld [vmem:[%s28731_s11 + $0x8] sm:$0xff] }
 0x944   :  { %7228 = vmatprep.subr.mxu0 %v28860_v56 }
 0x945   :  { %7229 = vmatpush2.msra.mxu0 %v7108_v57  ;;  %v7450_v57 = vld [vmem:[%s28731_s11 + $0x10] sm:$0xff] }
 0x946   :  { %7231 = vmatmul.mubr.f32.vlgmr.msra.gmra.mxu0 %v7112_v43  ;;  %20616 = vmatprep.subr.mxu0 %v28860_v56  ;;  %v7451_v43 = vld [vmem:[%s28731_s11 + $0x18] sm:$0xff] }
 0x947   :  { %17128 = vmatprep.mubr.msk.f32.mxu0 %vm7132_vm8, %v7115_v6  ;;  %v7452_v6 = vld [vmem:[%s28731_s11 + $0x20] sm:$0xff] }
 0x94a   :  { %7236 = vmatmul.mubr.f32.gmra.mxu0 %v7114_v7  ;;  %v7453_v7 = vld [vmem:[%s28731_s11 + $0x28] sm:$0xff] }
 0x94b   :  { %17129 = vmatprep.mubr.msk.f32.mxu0 %vm7132_vm8, %v7117_v12  ;;  %v7454_v12 = vld [vmem:[%s28731_s11 + $0x30] sm:$0x3] }
 0x94e   :  { %7241 = vmatmul.mubr.f32.gmra.mxu0 %v7116_v41  ;;  %v11564_v41 = vld [vmem:[%s28723_s3 + $0x78] sm:$0xff] }
 0x94f   :  { %17130 = vmatprep.mubr.msk.f32.mxu0 %vm7132_vm8, %v7119_v37  ;;  %v11565_v37 = vld [vmem:[%s28723_s3 + $0x80] sm:$0xff] }
 0x952   :  { %7246 = vmatmul.mubr.f32.gmra.mxu0 %v7118_v0  ;;  %v11563_v0 = vld [vmem:[%s28723_s3 + $0x70] sm:$0xff] }
 0x953   :  { %17131 = vmatprep.mubr.msk.f32.mxu0 %vm7132_vm8, %v7121_v18  ;;  %v11562_v18 = vld [vmem:[%s28723_s3 + $0x68] sm:$0xff] }
 0x956   :  { %7251 = vmatmul.mubr.f32.gmra.mxu0 %v7120_v40  ;;  %v11561_v40 = vld [vmem:[%s28723_s3 + $0x60] sm:$0xff] }
 0x957   :  { %17132 = vmatprep.mubr.msk.f32.mxu0 %vm7132_vm8, %v7123_v17  ;;  %v11560_v17 = vld [vmem:[%s28723_s3 + $0x58] sm:$0xff] }
 0x95a   :  { %7256 = vmatmul.mubr.f32.gmra.mxu0 %v7122_v3  ;;  %v11559_v3 = vld [vmem:[%s28723_s3 + $0x50] sm:$0xff] }
 0x95b   :  { %17133 = vmatprep.mubr.msk.f32.mxu0 %vm7132_vm8, %v7125_v24  ;;  %v11558_v24 = vld [vmem:[%s28723_s3 + $0x48] sm:$0xff] }
 0x95e   :  { %7261 = vmatmul.mubr.f32.gmra.mxu0 %v7124_v52  ;;  %v11557_v52 = vld [vmem:[%s28723_s3 + $0x40] sm:$0xff] }
 0x95f   :  { %17134 = vmatprep.mubr.msk.f32.mxu0 %vm7132_vm8, %v7127_v8  ;;  %v11556_v8 = vld [vmem:[%s28723_s3 + $0x38] sm:$0xff] }
 0x962   :  { %7266 = vmatmul.mubr.f32.gmra.mxu0 %v7126_v23  ;;  %v11555_v23 = vld [vmem:[%s28723_s3 + $0x30] sm:$0xff] }
 0x963   :  { %17135 = vmatprep.mubr.msk.f32.mxu0 %vm7132_vm8, %v7129_v9  ;;  %v11554_v9 = vld [vmem:[%s28723_s3 + $0x28] sm:$0xff] }
 0x966   :  { %7271 = vmatmul.mubr.f32.gmra.mxu0 %v7128_v48  ;;  %v11553_v48 = vld [vmem:[%s28723_s3 + $0x20] sm:$0xff] }
 0x967   :  { %17136 = vmatprep.mubr.msk.f32.mxu0 %vm7132_vm8, %v7131_v22  ;;  %v11552_v22 = vld [vmem:[%s28723_s3 + $0x18] sm:$0xff] }
 0x96a   :  { %7276 = vmatmul.mubr.f32.gmra.mxu0 %v7130_v34  ;;  %v11551_v34 = vld [vmem:[%s28723_s3 + $0x10] sm:$0xff] }
 0x96b   :  { %20636 = vmatprep.mubr.msk.f32.mxu0 %vm22036_vm4, %v28860_v56 }
 0xa06   :  { %v7232_v14 = vpop.f32.mrf.mxu0 }
 0xa07   :  { %20560 = vmatprep.mubr.msk.f32.mxu1 %vm7282_vm9, %v7232_v14  ;;  %v11549_v14 = vld [vmem:[%s28723_s3] sm:$0xff] }
 0xa08   :  { %v7234_v35 = vpop.f32.mrf.mxu0 }
 0xa09   :  { %v11578_v35 = vld [vmem:[%s28723_s3 + $0xe8] sm:$0xff] }
 0xa0a   :  { %v7237_v20 = vpop.f32.mrf.mxu0 }
 0xa0b   :  { %20561 = vmatmul.mubr.msk.f32.vlgmr.msra.gmra.mxu1 %vm7282_vm9, %v7237_v20  ;;  %v11577_v20 = vld [vmem:[%s28723_s3 + $0xe0] sm:$0xff] }
 0xa0c   :  { %v7239_v60 = vpop.f32.mrf.mxu0 }
 0xa0d   :  { %v11576_v60 = vld [vmem:[%s28723_s3 + $0xd8] sm:$0xff] }
 0xa0e   :  { %v7242_v50 = vpop.f32.mrf.mxu0 }
 0xa0f   :  { %20563 = vmatprep.mubr.msk.f32.mxu1 %vm7282_vm9, %v7242_v50  ;;  %v11575_v50 = vld [vmem:[%s28723_s3 + $0xd0] sm:$0xff] }
 0xa10   :  { %v7244_v49 = vpop.f32.mrf.mxu0 }
 0xa11   :  { %v11574_v49 = vld [vmem:[%s28723_s3 + $0xc8] sm:$0xff] }
 0xa12   :  { %v7247_v42 = vpop.f32.mrf.mxu0 }
 0xa13   :  { %20564 = vmatmul.mubr.msk.f32.gmra.mxu1 %vm7282_vm9, %v7247_v42  ;;  %v11573_v42 = vld [vmem:[%s28723_s3 + $0xc0] sm:$0xff] }
 0xa14   :  { %v7249_v26 = vpop.f32.mrf.mxu0 }
 0xa15   :  { %v11572_v26 = vld [vmem:[%s28723_s3 + $0xb8] sm:$0xff] }
 0xa16   :  { %v7252_v61 = vpop.f32.mrf.mxu0 }
 0xa17   :  { %20566 = vmatprep.mubr.msk.f32.mxu1 %vm7282_vm9, %v7252_v61  ;;  %v11571_v61 = vld [vmem:[%s28723_s3 + $0xb0] sm:$0xff] }
 0xa18   :  { %v7254_v38 = vpop.f32.mrf.mxu0 }
 0xa19   :  { %v11570_v38 = vld [vmem:[%s28723_s3 + $0xa8] sm:$0xff] }
 0xa1a   :  { %v7257_v44 = vpop.f32.mrf.mxu0 }
 0xa1b   :  { %20567 = vmatmul.mubr.msk.f32.gmra.mxu1 %vm7282_vm9, %v7257_v44  ;;  %v11569_v44 = vld [vmem:[%s28723_s3 + $0xa0] sm:$0xff] }
 0xa1c   :  { %v7259_v2 = vpop.f32.mrf.mxu0 }
 0xa1d   :  { %v11568_v2 = vld [vmem:[%s28723_s3 + $0x98] sm:$0xff] }
 0xa1e   :  { %v7262_v63 = vpop.f32.mrf.mxu0 }
 0xa1f   :  { %20569 = vmatprep.mubr.msk.f32.mxu1 %vm7282_vm9, %v7262_v63  ;;  %v11567_v63 = vld [vmem:[%s28723_s3 + $0x90] sm:$0xff] }
 0xa20   :  { %v7264_v4 = vpop.f32.mrf.mxu0 }
 0xa22   :  { %v7267_v13 = vpop.f32.mrf.mxu0 }
 0xa23   :  { %20570 = vmatmul.mubr.msk.f32.gmra.mxu1 %vm7282_vm9, %v7267_v13  ;;  %v11566_v13 = vld [vmem:[%s28723_s3 + $0x88] sm:$0xff] }
 0xa24   :  { %v7269_v32 = vpop.f32.mrf.mxu0 }
 0xa26   :  { %v7272_v28 = vpop.f32.mrf.mxu0 }
 0xa27   :  { %20572 = vmatprep.mubr.msk.f32.mxu1 %vm7282_vm9, %v7272_v28 }
 0xa28   :  { %v7274_v10 = vpop.f32.mrf.mxu0 }
 0xa2a   :  { %v7277_v46 = vpop.f32.mrf.mxu0 }
 0xa2b   :  { %20573 = vmatmul.mubr.msk.f32.gmra.mxu1 %vm7282_vm9, %v7277_v46 }
 0xa2c   :  { %v7279_v62 = vpop.f32.mrf.mxu0  ;;  %20595 = vmatprep.mubr.msk.f32.mxu1 %vm22036_vm4, %v28860_v56 }
 0xacb   :  { %v20562_v31 = vpop.f32.mrf.mxu1 }
 0xacc   :  { %v25077_v45 = vmax.f32 %v20562_v31, 0.0 }
 0xacd   :  { %v7382_v55 = vpop.f32.mrf.mxu1 }
 0xace   :  { %v25081_v19 = vmax.f32 %v7382_v55, 0.0 }
 0xad3   :  { %v20565_v29 = vpop.f32.mrf.mxu1 }
 0xad4   :  { %v25060_v53 = vmax.f32 %v20565_v29, 0.0 }
 0xad5   :  { %v7392_v16 = vpop.f32.mrf.mxu1 }
 0xad6   :  { %v25062_v5 = vmax.f32 %v7392_v16, 0.0  ;;  %7608 = vrot.lane.b32.xlu0 %v25060_v53, %s22035_s21 }
 0xad8   :  { %7606 = vrot.lane.b32.xlu1 %v25062_v5, %s22035_s21 }
 0xadb   :  { %v20568_v58 = vpop.f32.mrf.mxu1 }
 0xadc   :  { %v7436_v47 = vmax.f32 %v20568_v58, 0.0 }
 0xadd   :  { %v7402_v39 = vpop.f32.mrf.mxu1 }
 0xade   :  { %v25068_v11 = vmax.f32 %v7402_v39, 0.0  ;;  %7612 = vrot.lane.b32.xlu0 %v7436_v47, %s22035_s21 }
 0xae0   :  { %7610 = vrot.lane.b32.xlu1 %v25068_v11, %s22035_s21 }
 0xae3   :  { %v20571_v1 = vpop.f32.mrf.mxu1 }
 0xae4   :  { %v7438_v30 = vmax.f32 %v20571_v1, 0.0 }
 0xae5   :  { %v7412_v51 = vpop.f32.mrf.mxu1 }
 0xae6   :  { %v7437_v25 = vmax.f32 %v7412_v51, 0.0  ;;  %7616 = vrot.lane.b32.xlu0 %v7438_v30, %s22035_s21  ;;  %v17156_v51 = vld [vmem:[%s28731_s11 + $0x40] sm:$0xff] }
 0xae8   :  { %7614 = vrot.lane.b32.xlu1 %v7437_v25, %s22035_s21 }
 0xaeb   :  { %v20574_v54 = vpop.f32.mrf.mxu1 }
 0xaec   :  { %v7440_v15 = vmax.f32 %v20574_v54, 0.0 }
 0xaed   :  { %v7422_v33 = vpop.f32.mrf.mxu1 }
 0xaee   :  { %v7439_v59 = vmax.f32 %v7422_v33, 0.0  ;;  %7620 = vrot.lane.b32.xlu0 %v7440_v15, %s22035_s21  ;;  %20576 = vmatpush3.msra.mxu1 %v7440_v15 }
 0xaef   :  { %20577 = vmatprep.subr.mxu1 %v28860_v56 }
 0xaf0   :  { %7618 = vrot.lane.b32.xlu1 %v7439_v59, %s22035_s21  ;;  %20578 = vmatpush3.msra.mxu1 %v7439_v59 }
 0xaf1   :  { %20579 = vmatprep.subr.mxu1 %v28860_v56 }
 0xaf2   :  { %7604 = vrot.lane.b32.xlu0 %v25077_v45, %s22035_s21  ;;  %20580 = vmatpush3.msra.mxu1 %v7438_v30 }
 0xaf3   :  { %20581 = vmatprep.subr.mxu1 %v28860_v56 }
 0xaf4   :  { %7602 = vrot.lane.b32.xlu1 %v25081_v19, %s22035_s21  ;;  %20582 = vmatpush3.msra.mxu1 %v7437_v25 }
 0xaf5   :  { %20583 = vmatprep.subr.mxu1 %v28860_v56 }
 0xaf6   :  { %7786 = vrot.lane.b32.xlu0 %v7440_v15, %s22037_s26  ;;  %20584 = vmatpush3.msra.mxu1 %v7436_v47 }
 0xaf7   :  { %20585 = vmatprep.subr.mxu1 %v28860_v56 }
 0xaf8   :  { %7782 = vrot.lane.b32.xlu1 %v7438_v30, %s22037_s26  ;;  %20586 = vmatpush3.msra.mxu1 %v25068_v11 }
 0xaf9   :  { %20587 = vmatprep.subr.mxu1 %v28860_v56 }
 0xafa   :  { %7952 = vrot.lane.b32.xlu0 %v7440_v15, %s22038_s27  ;;  %20588 = vmatpush3.msra.mxu1 %v25060_v53  ;;  %v17157_v15 = vld [vmem:[%s28731_s11 + $0x48] sm:$0xff] }
 0xafb   :  { %20589 = vmatprep.subr.mxu1 %v28860_v56 }
 0xafc   :  { %7780 = vrot.lane.b32.xlu1 %v7437_v25, %s22037_s26  ;;  %20590 = vmatpush3.msra.mxu1 %v25062_v5 }
 0xafd   :  { %20591 = vmatprep.subr.mxu1 %v28860_v56 }
 0xafe   :  { %7948 = vrot.lane.b32.xlu0 %v7438_v30, %s22038_s27  ;;  %20592 = vmatpush3.msra.mxu1 %v25077_v45 }
 0xaff   :  { %20593 = vmatprep.subr.mxu1 %v28860_v56 }
 0xb00   :  { %7778 = vrot.lane.b32.xlu1 %v7436_v47, %s22037_s26  ;;  %20594 = vmatpush3.msra.mxu1 %v25081_v19 }
 0xb01   :  { %20657 = vmatprep.subr.mxu1 %v28860_v56  ;;  %20596 = vmatmul.mubr.msk.f32.vlgmr.msra.gmra.mxu1 %vm7455_vm10, %v7448_v36 }
 0xb02   :  { %7946 = vrot.lane.b32.xlu0 %v7437_v25, %s22038_s27  ;;  %20598 = vmatprep.mubr.msk.f32.mxu1 %vm22036_vm4, %v28860_v56 }
 0xb04   :  { %7776 = vrot.lane.b32.xlu1 %v25068_v11, %s22037_s26 }
 0xb05   :  { %20599 = vmatmul.mubr.msk.f32.gmra.mxu1 %vm7455_vm10, %v7449_v21 }
 0xb06   :  { %7944 = vrot.lane.b32.xlu0 %v7436_v47, %s22038_s27  ;;  %20601 = vmatprep.mubr.msk.f32.mxu1 %vm22036_vm4, %v28860_v56 }
 0xb08   :  { %7784 = vrot.lane.b32.xlu1 %v7439_v59, %s22037_s26 }
 0xb09   :  { %20602 = vmatmul.mubr.msk.f32.gmra.mxu1 %vm7455_vm10, %v7450_v57  ;;  %v17159_v57 = vld [vmem:[%s28731_s11 + $0x58] sm:$0xff] }
 0xb0a   :  { %7950 = vrot.lane.b32.xlu0 %v7439_v59, %s22038_s27  ;;  %20604 = vmatprep.mubr.msk.f32.mxu1 %vm22036_vm4, %v28860_v56 }
 0xb0c   :  { %7774 = vrot.lane.b32.xlu1 %v25060_v53, %s22037_s26 }
 0xb0d   :  { %20605 = vmatmul.mubr.msk.f32.gmra.mxu1 %vm7455_vm10, %v7451_v43 }
 0xb0e   :  { %7942 = vrot.lane.b32.xlu0 %v25068_v11, %s22038_s27  ;;  %20607 = vmatprep.mubr.msk.f32.mxu1 %vm22036_vm4, %v28860_v56  ;;  %v17155_v11 = vld [vmem:[%s28731_s11 + $0x38] sm:$0xff] }
 0xb10   :  { %7772 = vrot.lane.b32.xlu1 %v25062_v5, %s22037_s26 }
 0xb11   :  { %20608 = vmatmul.mubr.msk.f32.gmra.mxu1 %vm7455_vm10, %v7452_v6 }
 0xb12   :  { %7940 = vrot.lane.b32.xlu0 %v25060_v53, %s22038_s27  ;;  %20610 = vmatprep.mubr.msk.f32.mxu1 %vm22036_vm4, %v28860_v56 }
 0xb14   :  { %7770 = vrot.lane.b32.xlu1 %v25077_v45, %s22037_s26 }
 0xb15   :  { %20611 = vmatmul.mubr.msk.f32.gmra.mxu1 %vm7455_vm10, %v7453_v7 }
 0xb16   :  { %7938 = vrot.lane.b32.xlu0 %v25062_v5, %s22038_s27  ;;  %20613 = vmatprep.mubr.msk.f32.mxu1 %vm22036_vm4, %v28860_v56 }
 0xb18   :  { %7768 = vrot.lane.b32.xlu1 %v25081_v19, %s22037_s26 }
 0xb19   :  { %20614 = vmatmul.mubr.msk.f32.gmra.mxu1 %vm7455_vm10, %v7454_v12  ;;  %v17160_v12 = vld [vmem:[%s28731_s11 + $0x60] sm:$0xff] }
 0xb1a   :  { %7936 = vrot.lane.b32.xlu0 %v25077_v45, %s22038_s27  ;;  %20677 = vmatprep.mubr.msk.f32.mxu1 %vm22036_vm4, %v28860_v56 }
 0xb1c   :  { %7934 = vrot.lane.b32.xlu1 %v25081_v19, %s22038_s27  ;;  %v17158_v19 = vld [vmem:[%s28731_s11 + $0x50] sm:$0xff] }
 0xb1e   :  { %11656 = vperm.xlu0 %22011, %v11564_v41  }
 0xb20   :  { %11661 = vperm.xlu1 %22012, %v11565_v37   ;;  %v17161_v37 = vld [vmem:[%s28731_s11 + $0x68] sm:$0x3] }
 0xb22   :  { %11651 = vperm.xlu0 %22011, %v11563_v0   ;;  %v17169_v0 = vld [vmem:[%s28731_s11 + $0x70] sm:$0xff] }
 0xb24   :  { %11646 = vperm.xlu1 %22012, %v11562_v18  }
 0xb26   :  { %11641 = vperm.xlu0 %22011, %v11561_v40  }
 0xb28   :  { %11636 = vperm.xlu1 %22012, %v11560_v17   ;;  %v17170_v17 = vld [vmem:[%s28731_s11 + $0x78] sm:$0xff] }
 0xb2a   :  { %11631 = vperm.xlu0 %22011, %v11559_v3   ;;  %v17183_v3 = vld [vmem:[%s28731_s11 + $0xa8] sm:$0xff] }
 0xb2c   :  { %11626 = vperm.xlu1 %22012, %v11558_v24   ;;  %v25347_v24 = vld [vmem:[%s28720_s0 + $0x38] sm:$0xf] }
 0xb2e   :  { %11621 = vperm.xlu0 %22011, %v11557_v52   ;;  %v17171_v52 = vld [vmem:[%s28731_s11 + $0x80] sm:$0xff] }
 0xb30   :  { %11616 = vperm.xlu1 %22012, %v11556_v8   ;;  %v17184_v8 = vld [vmem:[%s28731_s11 + $0xb0] sm:$0xff] }
 0xb32   :  { %11611 = vperm.xlu0 %22011, %v11555_v23   ;;  %v25369_v23 = vld [vmem:[%s28720_s0 + $0x30] sm:$0xff] }
 0xb34   :  { %11606 = vperm.xlu1 %22012, %v11554_v9   ;;  %v17172_v9 = vld [vmem:[%s28731_s11 + $0x88] sm:$0xff] }
 0xb36   :  { %11601 = vperm.xlu0 %22011, %v11553_v48   ;;  %v17185_v48 = vld [vmem:[%s28731_s11 + $0xb8] sm:$0xff] }
 0xb38   :  { %11596 = vperm.xlu1 %22012, %v11552_v22   ;;  %v25388_v22 = vld [vmem:[%s28720_s0 + $0x28] sm:$0xff] }
 0xb3a   :  { %11591 = vperm.xlu0 %22011, %v11551_v34   ;;  %v17173_v34 = vld [vmem:[%s28731_s11 + $0x90] sm:$0xff] }
 0xb3c   :  { %11586 = vperm.xlu1 %22012, %v11550_v27   ;;  %v17186_v27 = vld [vmem:[%s28731_s11 + $0xc0] sm:$0xff] }
 0xb3e   :  { %11581 = vperm.xlu0 %22011, %v11549_v14   ;;  %v25407_v14 = vld [vmem:[%s28720_s0 + $0x20] sm:$0xff] }
 0xb40   :  { %11726 = vperm.xlu1 %22012, %v11578_v35   ;;  %v17174_v35 = vld [vmem:[%s28731_s11 + $0x98] sm:$0xff] }
 0xb42   :  { %11721 = vperm.xlu0 %22011, %v11577_v20   ;;  %v17187_v20 = vld [vmem:[%s28731_s11 + $0xc8] sm:$0xff] }
 0xb44   :  { %11716 = vperm.xlu1 %22012, %v11576_v60   ;;  %v17175_v60 = vld [vmem:[%s28731_s11 + $0xa0] sm:$0x3] }
 0xb46   :  { %11711 = vperm.xlu0 %22011, %v11575_v50   ;;  %v17188_v50 = vld [vmem:[%s28731_s11 + $0xd0] sm:$0xff] }
 0xb48   :  { %11706 = vperm.xlu1 %22012, %v11574_v49   ;;  %v7609_v4 = vpop.permute.xlu0 %7608  ;;  %v17189_v49 = vld [vmem:[%s28731_s11 + $0xd8] sm:$0x3] }
 0xb4a   :  { %11701 = vperm.xlu0 %22011, %v11573_v42   ;;  %v7607_v32 = vpop.permute.xlu1 %7606  ;;  %v17234_v42 = vld [vmem:[%s28721_s1 + $0xf0] sm:$0xff] }
 0xb4c   :  { %11696 = vperm.xlu1 %22012, %v11572_v26   ;;  %v17235_v26 = vld [vmem:[%s28721_s1 + $0xf8] sm:$0xff] }
 0xb4e   :  { %11691 = vperm.xlu0 %22011, %v11571_v61   ;;  %v17236_v61 = vld [vmem:[%s28721_s1 + $0x100] sm:$0xff] }
 0xb50   :  { %11686 = vperm.xlu1 %22012, %v11570_v38   ;;  %v7613_v28 = vpop.permute.xlu0 %7612  ;;  %v17237_v38 = vld [vmem:[%s28721_s1 + $0x108] sm:$0xff] }
 0xb52   :  { %11681 = vperm.xlu0 %22011, %v11569_v44   ;;  %v7611_v10 = vpop.permute.xlu1 %7610  ;;  %v17238_v44 = vld [vmem:[%s28721_s1 + $0x110] sm:$0xff] }
 0xb54   :  { %11676 = vperm.xlu1 %22012, %v11568_v2   ;;  %v17239_v2 = vld [vmem:[%s28721_s1 + $0x118] sm:$0xff] }
 0xb56   :  { %11671 = vperm.xlu0 %22011, %v11567_v63   ;;  %v17240_v63 = vld [vmem:[%s28721_s1 + $0x120] sm:$0xff] }
 0xb58   :  { %11666 = vperm.xlu1 %22012, %v11566_v13   ;;  %v7617_v46 = vpop.permute.xlu0 %7616  ;;  %v17242_v13 = vld [vmem:[%s28721_s1 + $0x130] sm:$0xff] }
 0xb5a   :  { %v7615_v62 = vpop.permute.xlu1 %7614 }
 0xb60   :  { %v7621_v31 = vpop.permute.xlu0 %7620 }
 0xb61   :  { %20617 = vmatpush3.msra.mxu0 %v7621_v31 }
 0xb62   :  { %20618 = vmatprep.subr.mxu0 %v28860_v56  ;;  %v7619_v55 = vpop.permute.xlu1 %7618 }
 0xb63   :  { %20619 = vmatpush3.msra.mxu0 %v7619_v55  ;;  %v17247_v55 = vld [vmem:[%s28721_s1 + $0x158] sm:$0xff] }
 0xb64   :  { %v7605_v29 = vpop.permute.xlu0 %7604  ;;  %20620 = vmatprep.subr.mxu0 %v28860_v56 }
 0xb65   :  { %20621 = vmatpush3.msra.mxu0 %v7617_v46  ;;  %v17246_v46 = vld [vmem:[%s28721_s1 + $0x150] sm:$0xff] }
 0xb66   :  { %20622 = vmatprep.subr.mxu0 %v28860_v56  ;;  %v7603_v53 = vpop.permute.xlu1 %7602 }
 0xb67   :  { %20623 = vmatpush3.msra.mxu0 %v7615_v62 }
 0xb68   :  { %v7787_v16 = vpop.permute.xlu0 %7786  ;;  %20624 = vmatprep.subr.mxu0 %v28860_v56 }
 0xb69   :  { %20625 = vmatpush3.msra.mxu0 %v7613_v28  ;;  %20658 = vmatpush3.msra.mxu1 %v7787_v16  ;;  %v17244_v28 = vld [vmem:[%s28721_s1 + $0x140] sm:$0xff] }
 0xb6a   :  { %20626 = vmatprep.subr.mxu0 %v28860_v56  ;;  %v7783_v5 = vpop.permute.xlu1 %7782  ;;  %20659 = vmatprep.subr.mxu1 %v28860_v56 }
 0xb6b   :  { %20627 = vmatpush3.msra.mxu0 %v7611_v10  ;;  %v17245_v10 = vld [vmem:[%s28721_s1 + $0x148] sm:$0xff] }
 0xb6c   :  { %v7953_v58 = vpop.permute.xlu0 %7952  ;;  %20628 = vmatprep.subr.mxu0 %v28860_v56 }
 0xb6d   :  { %20629 = vmatpush3.msra.mxu0 %v7609_v4  ;;  %v17241_v4 = vld [vmem:[%s28721_s1 + $0x128] sm:$0xff] }
 0xb6e   :  { %20630 = vmatprep.subr.mxu0 %v28860_v56  ;;  %v7781_v47 = vpop.permute.xlu1 %7780 }
 0xb6f   :  { %20631 = vmatpush3.msra.mxu0 %v7607_v32  ;;  %v17243_v32 = vld [vmem:[%s28721_s1 + $0x138] sm:$0xff] }
 0xb70   :  { %v7949_v39 = vpop.permute.xlu0 %7948  ;;  %20632 = vmatprep.subr.mxu0 %v28860_v56 }
 0xb71   :  { %20633 = vmatpush3.msra.mxu0 %v7605_v29  ;;  %v17248_v29 = vld [vmem:[%s28721_s1 + $0x160] sm:$0xff] }
 0xb72   :  { %20634 = vmatprep.subr.mxu0 %v28860_v56  ;;  %v7779_v1 = vpop.permute.xlu1 %7778 }
 0xb73   :  { %20635 = vmatpush3.msra.mxu0 %v7603_v53 }
 0xb74   :  { %v7947_v30 = vpop.permute.xlu0 %7946  ;;  %20637 = vmatmul.mubr.msk.f32.vlgmr.msra.gmra.mxu0 %vm7455_vm10, %v17155_v11  ;;  %20698 = vmatprep.subr.mxu0 %v28860_v56  ;;  %v17251_v11 = vld [vmem:[%s28721_s1 + $0x178] sm:$0xff] }
 0xb75   :  { %20699 = vmatpush3.msra.mxu0 %v7953_v58  ;;  %20639 = vmatprep.mubr.msk.f32.mxu0 %vm22036_vm4, %v28860_v56  ;;  %v17250_v58 = vld [vmem:[%s28721_s1 + $0x170] sm:$0xff] }
 0xb76   :  { %v7777_v25 = vpop.permute.xlu1 %7776  ;;  %20700 = vmatprep.subr.mxu0 %v28860_v56 }
 0xb78   :  { %v7945_v54 = vpop.permute.xlu0 %7944  ;;  %20640 = vmatmul.mubr.msk.f32.gmra.mxu0 %vm7455_vm10, %v17156_v51 }
 0xb79   :  { %20642 = vmatprep.mubr.msk.f32.mxu0 %vm22036_vm4, %v28860_v56 }
 0xb7a   :  { %v7785_v33 = vpop.permute.xlu1 %7784 }
 0xb7b   :  { %20660 = vmatpush3.msra.mxu1 %v7785_v33 }
 0xb7c   :  { %v7951_v59 = vpop.permute.xlu0 %7950  ;;  %20643 = vmatmul.mubr.msk.f32.gmra.mxu0 %vm7455_vm10, %v17157_v15  ;;  %20661 = vmatprep.subr.mxu1 %v28860_v56 }
 0xb7d   :  { %20662 = vmatpush3.msra.mxu1 %v7783_v5  ;;  %20701 = vmatpush3.msra.mxu0 %v7951_v59  ;;  %v17249_v5 = vld [vmem:[%s28721_s1 + $0x168] sm:$0xff]  ;;  %v17255_v59 = vld [vmem:[%s28721_s1 + $0x198] sm:$0xff] }
 0xb7e   :  { %20702 = vmatprep.subr.mxu0 %v28860_v56  ;;  %v7775_v45 = vpop.permute.xlu1 %7774  ;;  %20663 = vmatprep.subr.mxu1 %v28860_v56 }
 0xb7f   :  { %20645 = vmatprep.mubr.msk.f32.mxu0 %vm22036_vm4, %v28860_v56  ;;  %20664 = vmatpush3.msra.mxu1 %v7781_v47 }
 0xb80   :  { %20703 = vmatpush3.msra.mxu0 %v7949_v39  ;;  %v7943_v36 = vpop.permute.xlu0 %7942  ;;  %20665 = vmatprep.subr.mxu1 %v28860_v56 }
 0xb81   :  { %20646 = vmatmul.mubr.msk.f32.gmra.mxu0 %vm7455_vm10, %v17158_v19  ;;  %20704 = vmatprep.subr.mxu0 %v28860_v56 }
 0xb82   :  { %20666 = vmatpush3.msra.mxu1 %v7779_v1  ;;  %20705 = vmatpush3.msra.mxu0 %v7947_v30  ;;  %v7773_v21 = vpop.permute.xlu1 %7772  ;;  %v17252_v1 = vld [vmem:[%s28721_s1 + $0x180] sm:$0xff] }
 0xb83   :  { %20706 = vmatprep.subr.mxu0 %v28860_v56  ;;  %20667 = vmatprep.subr.mxu1 %v28860_v56 }
 0xb84   :  { %20648 = vmatprep.mubr.msk.f32.mxu0 %vm22036_vm4, %v28860_v56  ;;  %20668 = vmatpush3.msra.mxu1 %v7777_v25  ;;  %v7941_v43 = vpop.permute.xlu0 %7940  ;;  %v17253_v25 = vld [vmem:[%s28721_s1 + $0x188] sm:$0xff] }
 0xb85   :  { %20707 = vmatpush3.msra.mxu0 %v7945_v54  ;;  %20669 = vmatprep.subr.mxu1 %v28860_v56  ;;  %v17254_v54 = vld [vmem:[%s28721_s1 + $0x190] sm:$0xff] }
 0xb86   :  { %20649 = vmatmul.mubr.msk.f32.gmra.mxu0 %vm7455_vm10, %v17159_v57  ;;  %20708 = vmatprep.subr.mxu0 %v28860_v56  ;;  %v7771_v6 = vpop.permute.xlu1 %7770  ;;  %v17258_v57 = vld [vmem:[%s28721_s1 + $0x1b0] sm:$0xff] }
 0xb87   :  { %20670 = vmatpush3.msra.mxu1 %v7775_v45  ;;  %20709 = vmatpush3.msra.mxu0 %v7943_v36  ;;  %v17256_v45 = vld [vmem:[%s28721_s1 + $0x1a0] sm:$0xff] }
 0xb88   :  { %20710 = vmatprep.subr.mxu0 %v28860_v56  ;;  %20671 = vmatprep.subr.mxu1 %v28860_v56  ;;  %v7939_v7 = vpop.permute.xlu0 %7938 }
 0xb89   :  { %20651 = vmatprep.mubr.msk.f32.mxu0 %vm22036_vm4, %v28860_v56  ;;  %20672 = vmatpush3.msra.mxu1 %v7773_v21  ;;  %v17257_v21 = vld [vmem:[%s28721_s1 + $0x1a8] sm:$0xff] }
 0xb8a   :  { %20711 = vmatpush3.msra.mxu0 %v7941_v43  ;;  %20673 = vmatprep.subr.mxu1 %v28860_v56  ;;  %v7769_v41 = vpop.permute.xlu1 %7768 }
 0xb8b   :  { %20652 = vmatmul.mubr.msk.f32.gmra.mxu0 %vm7455_vm10, %v17160_v12  ;;  %20712 = vmatprep.subr.mxu0 %v28860_v56  ;;  %v17260_v12 = vld [vmem:[%s28721_s1 + $0x1c0] sm:$0xff] }
 0xb8c   :  { %20674 = vmatpush3.msra.mxu1 %v7771_v6  ;;  %20713 = vmatpush3.msra.mxu0 %v7939_v7  ;;  %v7937_v18 = vpop.permute.xlu0 %7936  ;;  %v17259_v7 = vld [vmem:[%s28721_s1 + $0x1b8] sm:$0xff] }
 0xb8d   :  { %20675 = vmatprep.subr.mxu1 %v28860_v56  ;;  %20654 = vmatprep.mubr.msk.f32.mxu0 %vm22036_vm4, %v28860_v56 }
 0xb8e   :  { %20676 = vmatpush3.msra.mxu1 %v7769_v41  ;;  %20714 = vmatprep.subr.mxu0 %v28860_v56  ;;  %v7935_v40 = vpop.permute.xlu1 %7934  ;;  %v17261_v41 = vld [vmem:[%s28721_s1 + $0x1c8] sm:$0xff] }
 0xb8f   :  { %20655 = vmatmul.mubr.msk.f32.gmra.mxu0 %vm7455_vm10, %v17161_v37  ;;  %20678 = vmatmul.mubr.msk.f32.vlgmr.msra.gmra.mxu1 %vm7455_vm10, %v17169_v0  ;;  %v17262_v37 = vld [vmem:[%s28721_s1 + $0x1d0] sm:$0xff]  ;;  %v17263_v0 = vld [vmem:[%s28721_s1 + $0x1d8] sm:$0xff] }
 0xb90   :  { %20715 = vmatpush3.msra.mxu0 %v7937_v18  ;;  %20680 = vmatprep.mubr.msk.f32.mxu1 %vm22036_vm4, %v28860_v56 }
 0xb91   :  { %20716 = vmatprep.subr.mxu0 %v28860_v56  ;;  %20718 = vmatprep.mubr.msk.f32.mxu0 %vm22036_vm4, %v28860_v56 }
 0xb92   :  { %20717 = vmatpush3.msra.mxu0 %v7935_v40  ;;  %20739 = vmatprep.subr.mxu1 %v28860_v56 }
 0xb93   :  { %20681 = vmatmul.mubr.msk.f32.gmra.mxu1 %vm7455_vm10, %v17170_v17  ;;  %20719 = vmatmul.mubr.msk.f32.vlgmr.msra.gmra.mxu0 %vm7455_vm10, %v17183_v3 }
 0xb94   :  { %20683 = vmatprep.mubr.msk.f32.mxu1 %vm22036_vm4, %v28860_v56  ;;  %20721 = vmatprep.mubr.msk.f32.mxu0 %vm22036_vm4, %v28860_v56 }
 0xb95   :  { %20809 = vmatprep.subr.msk.mxu0 %vm175_vm0, %v25347_v24 }
 0xb96   :  { %20810 = vmatpush3.msk.msra.mxu0 %vm175_vm0, %v25347_v24 }
 0xb97   :  { %20684 = vmatmul.mubr.msk.f32.gmra.mxu1 %vm7455_vm10, %v17171_v52  ;;  %20722 = vmatmul.mubr.msk.f32.gmra.mxu0 %vm7455_vm10, %v17184_v8 }
 0xb98   :  { %20686 = vmatprep.mubr.msk.f32.mxu1 %vm22036_vm4, %v28860_v56  ;;  %20724 = vmatprep.mubr.msk.f32.mxu0 %vm22036_vm4, %v28860_v56 }
 0xb99   :  { %20811 = vmatprep.subr.mxu0 %v25369_v23 }
 0xb9a   :  { %20812 = vmatpush3.msra.mxu0 %v25369_v23 }
 0xb9b   :  { %20687 = vmatmul.mubr.msk.f32.gmra.mxu1 %vm7455_vm10, %v17172_v9  ;;  %20725 = vmatmul.mubr.msk.f32.gmra.mxu0 %vm7455_vm10, %v17185_v48 }
 0xb9c   :  { %20727 = vmatprep.mubr.msk.f32.mxu0 %vm22036_vm4, %v28860_v56  ;;  %20689 = vmatprep.mubr.msk.f32.mxu1 %vm22036_vm4, %v28860_v56 }
 0xb9d   :  { %20813 = vmatprep.subr.mxu0 %v25388_v22 }
 0xb9e   :  { %20814 = vmatpush3.msra.mxu0 %v25388_v22 }
 0xb9f   :  { %20690 = vmatmul.mubr.msk.f32.gmra.mxu1 %vm7455_vm10, %v17173_v34  ;;  %20728 = vmatmul.mubr.msk.f32.gmra.mxu0 %vm7455_vm10, %v17186_v27 }
 0xba0   :  { %20730 = vmatprep.mubr.msk.f32.mxu0 %vm22036_vm4, %v28860_v56  ;;  %20692 = vmatprep.mubr.msk.f32.mxu1 %vm22036_vm4, %v28860_v56 }
 0xba1   :  { %20815 = vmatprep.subr.mxu0 %v25407_v14 }
 0xba2   :  { %20816 = vmatpush3.msra.mxu0 %v25407_v14 }
 0xba3   :  { %20693 = vmatmul.mubr.msk.f32.gmra.mxu1 %vm7455_vm10, %v17174_v35  ;;  %20731 = vmatmul.mubr.msk.f32.gmra.mxu0 %vm7455_vm10, %v17187_v20 }
 0xba4   :  { %20733 = vmatprep.mubr.msk.f32.mxu0 %vm22036_vm4, %v28860_v56  ;;  %20695 = vmatprep.mubr.msk.f32.mxu1 %vm22036_vm4, %v28860_v56 }
 0xba7   :  { %20696 = vmatmul.mubr.msk.f32.gmra.mxu1 %vm7455_vm10, %v17175_v60  ;;  %20734 = vmatmul.mubr.msk.f32.gmra.mxu0 %vm7455_vm10, %v17188_v50 }
 0xba8   :  { %20736 = vmatprep.mubr.msk.f32.mxu0 %vm22036_vm4, %v28860_v56  ;;  %20753 = vmatprep.mubr.msk.f32.mxu1 %vm22036_vm4, %v28860_v56 }
 0xbab   :  { %20737 = vmatmul.mubr.msk.f32.gmra.mxu0 %vm7455_vm10, %v17189_v49 }
 0xbac   :  { %20817 = vmatprep.mubr.msk.f32.mxu0 %vm84_vm1, %v17234_v42 }
 0xbaf   :  { %20818 = vmatmul.mubr.msk.f32.vlgmr.msra.gmra.mxu0 %vm84_vm1, %v17235_v26 }
 0xbb0   :  { %20820 = vmatprep.mubr.msk.f32.mxu0 %vm84_vm1, %v17236_v61 }
 0xbb3   :  { %20821 = vmatmul.mubr.msk.f32.gmra.mxu0 %vm84_vm1, %v17237_v38 }
 0xbb4   :  { %20823 = vmatprep.mubr.msk.f32.mxu0 %vm84_vm1, %v17238_v44 }
 0xbb7   :  { %20824 = vmatmul.mubr.msk.f32.gmra.mxu0 %vm84_vm1, %v17239_v2 }
 0xbb8   :  { %20826 = vmatprep.mubr.msk.f32.mxu0 %vm84_vm1, %v17240_v63 }
 0xbbb   :  { %20827 = vmatmul.mubr.msk.f32.gmra.mxu0 %vm84_vm1, %v17241_v4 }
 0xbbc   :  { %20829 = vmatprep.mubr.msk.f32.mxu0 %vm84_vm1, %v17242_v13 }
 0xbbf   :  { %20830 = vmatmul.mubr.msk.f32.gmra.mxu0 %vm84_vm1, %v17243_v32 }
 0xbc0   :  { %20832 = vmatprep.mubr.msk.f32.mxu0 %vm84_vm1, %v17244_v28 }
 0xbc1   :  { %v25495_v62 = vpop.f32.mrf.mxu1 }
 0xbc3   :  { %20833 = vmatmul.mubr.msk.f32.gmra.mxu0 %vm84_vm1, %v17245_v10  ;;  %v20597_v31 = vpop.f32.mrf.mxu1 }
 0xbc4   :  { %20835 = vmatprep.mubr.msk.f32.mxu0 %vm84_vm1, %v17246_v46 }
 0xbc5   :  { %v25505_v53 = vpop.f32.mrf.mxu1 }
 0xbc7   :  { %20836 = vmatmul.mubr.msk.f32.gmra.mxu0 %vm84_vm1, %v17247_v55  ;;  %v20600_v16 = vpop.f32.mrf.mxu1 }
 0xbc8   :  { %20838 = vmatprep.mubr.msk.f32.mxu0 %vm84_vm1, %v17248_v29  ;;  %v7446_v29 = vld [vmem:[%s28732_s12 + $0x28] sm:$0xff]  ;;  %v7447_v16 = vld [vmem:[%s28732_s12 + $0x30] sm:$0x3] }
 0xbc9   :  { %v25515_v47 = vpop.f32.mrf.mxu1 }
 0xbcb   :  { %20839 = vmatmul.mubr.msk.f32.gmra.mxu0 %vm84_vm1, %v17249_v5  ;;  %v20603_v39 = vpop.f32.mrf.mxu1 }
 0xbcc   :  { %20841 = vmatprep.mubr.msk.f32.mxu0 %vm84_vm1, %v17250_v58  ;;  %v7445_v39 = vld [vmem:[%s28732_s12 + $0x20] sm:$0xff] }
 0xbcd   :  { %v25525_v30 = vpop.f32.mrf.mxu1 }
 0xbcf   :  { %20842 = vmatmul.mubr.msk.f32.gmra.mxu0 %vm84_vm1, %v17251_v11  ;;  %v20606_v51 = vpop.f32.mrf.mxu1 }
 0xbd0   :  { %20844 = vmatprep.mubr.msk.f32.mxu0 %vm84_vm1, %v17252_v1 }
 0xbd1   :  { %v25535_v15 = vpop.f32.mrf.mxu1 }
 0xbd3   :  { %20845 = vmatmul.mubr.msk.f32.gmra.mxu0 %vm84_vm1, %v17253_v25  ;;  %v20609_v33 = vpop.f32.mrf.mxu1 }
 0xbd4   :  { %20847 = vmatprep.mubr.msk.f32.mxu0 %vm84_vm1, %v17254_v54  ;;  %v7444_v54 = vld [vmem:[%s28732_s12 + $0x18] sm:$0xff] }
 0xbd5   :  { %v7568_v19 = vpop.f32.mrf.mxu1 }
 0xbd6   :  { %v7582_v51 = vadd.f32 %v7568_v19, %v7446_v29  ;;  %v7580_v19 = vadd.f32 %v25525_v30, %v7444_v54  ;;  %v8223_v29 = vld [vmem:[%s28721_s1 + $0x10] sm:$0xff] }
 0xbd7   :  { %20848 = vmatmul.mubr.msk.f32.gmra.mxu0 %vm84_vm1, %v17255_v59  ;;  %v20612_v36 = vpop.f32.mrf.mxu1  ;;  %v8227_v54 = vld [vmem:[%s28721_s1 + $0x30] sm:$0xff] }
 0xbd8   :  { %20850 = vmatprep.mubr.msk.f32.mxu0 %vm84_vm1, %v17256_v45  ;;  %v7581_v45 = vadd.f32 %v25535_v15, %v7445_v39  ;;  %v7443_v36 = vld [vmem:[%s28732_s12 + $0x10] sm:$0xff]  ;;  %v7441_v15 = vld [vmem:[%s28732_s12] sm:$0xff]  ;;  %v17296_v39 = vld [vmem:[%s28722_s2 + $0x28] sm:$0xff] }
 0xbd9   :  { %v7573_v43 = vpop.f32.mrf.mxu1 }
 0xbda   :  { %v7583_v25 = vadd.f32 %v7573_v43, %v7447_v16 }
 0xbdb   :  { %20851 = vmatmul.mubr.msk.f32.gmra.mxu0 %vm84_vm1, %v17257_v21  ;;  %v20615_v6 = vpop.f32.mrf.mxu1 }
 0xbdc   :  { %20853 = vmatprep.mubr.msk.f32.mxu0 %vm84_vm1, %v17258_v57  ;;  %v7442_v6 = vld [vmem:[%s28732_s12 + $0x8] sm:$0xff] }
 0xbdf   :  { %20854 = vmatmul.mubr.msk.f32.gmra.mxu0 %vm84_vm1, %v17259_v7 }
 0xbe0   :  { %20856 = vmatprep.mubr.msk.f32.mxu0 %vm84_vm1, %v17260_v12 }
 0xbe3   :  { %20857 = vmatmul.mubr.msk.f32.gmra.mxu0 %vm84_vm1, %v17261_v41 }
 0xbe4   :  { %20859 = vmatprep.mubr.msk.f32.mxu0 %vm84_vm1, %v17262_v37  ;;  %v7579_v37 = vadd.f32 %v25515_v47, %v7443_v36 }
 0xbe7   :  { %20860 = vmatmul.mubr.msk.f32.gmra.mxu0 %vm84_vm1, %v17263_v0 }
 0xc34   :  { %v25575_v18 = vpop.f32.mrf.mxu0 }
 0xc36   :  { %v20638_v40 = vpop.f32.mrf.mxu0 }
 0xc38   :  { %v25577_v17 = vpop.f32.mrf.mxu0 }
 0xc3a   :  { %v20641_v3 = vpop.f32.mrf.mxu0 }
 0xc3c   :  { %v25579_v52 = vpop.f32.mrf.mxu0 }
 0xc3e   :  { %v20644_v8 = vpop.f32.mrf.mxu0 }
 0xc3f   :  { %v7578_v8 = vadd.f32 %v25505_v53, %v7442_v6 }
 0xc41   :  { %v7734_v9 = vpop.f32.mrf.mxu0  ;;  %v7754_v47 = vadd.f32 %v25577_v17, %v7578_v8  ;;  %v8239_v8 = vld [vmem:[%s28721_s1 + $0x90] sm:$0xff] }
 0xc43   :  { %v20647_v48 = vpop.f32.mrf.mxu0 }
 0xc46   :  { %v7739_v34 = vpop.f32.mrf.mxu0 }
 0xc47   :  { %v7757_v0 = vadd.f32 %v7739_v34, %v7581_v45  ;;  %v8229_v45 = vld [vmem:[%s28721_s1 + $0x40] sm:$0xff] }
 0xc48   :  { %v20650_v27 = vpop.f32.mrf.mxu0 }
 0xc49   :  { %v7756_v27 = vadd.f32 %v7734_v9, %v7580_v19  ;;  %v8232_v19 = vld [vmem:[%s28721_s1 + $0x58] sm:$0xff] }
 0xc4b   :  { %v7744_v35 = vpop.f32.mrf.mxu0 }
 0xc4c   :  { %v7758_v43 = vadd.f32 %v7744_v35, %v7582_v51  ;;  %v7577_v35 = vadd.f32 %v25495_v62, %v7441_v15  ;;  %v17295_v51 = vld [vmem:[%s28722_s2 + $0x20] sm:$0xff] }
 0xc4d   :  { %v20653_v20 = vpop.f32.mrf.mxu0 }
 0xc4e   :  { %v7753_v53 = vadd.f32 %v25575_v18, %v7577_v35  ;;  %v8243_v35 = vld [vmem:[%s28721_s1 + $0xb0] sm:$0xff] }
 0xc4f   :  { %v7749_v60 = vpop.f32.mrf.mxu0  ;;  %v25581_v50 = vpop.f32.mrf.mxu1 }
 0xc50   :  { %v7759_v7 = vadd.f32 %v7749_v60, %v7583_v25  ;;  %v8226_v25 = vld [vmem:[%s28721_s1 + $0x28] sm:$0xff] }
 0xc51   :  { %v20656_v49 = vpop.f32.mrf.mxu0  ;;  %v20679_v42 = vpop.f32.mrf.mxu1 }
 0xc52   :  { %v7755_v42 = vadd.f32 %v25579_v52, %v7579_v37  ;;  %v7919_v52 = vadd.f32 %v25581_v50, %v7753_v53  ;;  %v8099_v50 = vld [vmem:[%s28733_s13] sm:$0x3]  ;;  %v8236_v37 = vld [vmem:[%s28721_s1 + $0x78] sm:$0xff] }
 0xc53   :  { %v7890_v26 = vpop.f32.mrf.mxu1  ;;  %v25583_v61 = vpop.f32.mrf.mxu0 }
 0xc54   :  { %v7920_v9 = vadd.f32 %v7890_v26, %v7754_v47  ;;  %v8247_v47 = vld [vmem:[%s28721_s1 + $0xd0] sm:$0xff] }
 0xc55   :  { %v20682_v38 = vpop.f32.mrf.mxu1  ;;  %v20720_v44 = vpop.f32.mrf.mxu0 }
 0xc57   :  { %v7895_v2 = vpop.f32.mrf.mxu1  ;;  %v25585_v63 = vpop.f32.mrf.mxu0 }
 0xc58   :  { %v7921_v34 = vadd.f32 %v7895_v2, %v7755_v42  ;;  %v8085_v2 = vadd.f32 %v25583_v61, %v7919_v52  ;;  %v8221_v61 = vld [vmem:[%s28721_s1] sm:$0xff]  ;;  %v8244_v42 = vld [vmem:[%s28721_s1 + $0xb8] sm:$0xff] }
 0xc59   :  { %v20685_v4 = vpop.f32.mrf.mxu1  ;;  %v20723_v13 = vpop.f32.mrf.mxu0  ;;  %v8562_v52 = vld [vmem:[%s28722_s2 + $0x18] sm:$0xf] }
 0xc5a   :  { %v8092_v26 = vmax.f32 %v8085_v2, 0.0  ;;  %20915 = vmatprep.subr.msk.mxu0 %vm175_vm0, %v8562_v52  ;;  %v8560_v2 = vld [vmem:[%s28722_s2 + $0x8] sm:$0xff] }
 0xc5b   :  { %v7900_v32 = vpop.f32.mrf.mxu1  ;;  %v8061_v28 = vpop.f32.mrf.mxu0  ;;  %20916 = vmatpush3.msk.msra.mxu0 %vm175_vm0, %v8562_v52  ;;  %v17465_v52 = vld [vmem:[%s28721_s1 + $0x310] sm:$0xff] }
 0xc5c   :  { %v7922_v38 = vadd.f32 %v7900_v32, %v7756_v27  ;;  %v8087_v62 = vadd.f32 %v8061_v28, %v7921_v34  ;;  %v8086_v32 = vadd.f32 %v25585_v63, %v7920_v9  ;;  %v8222_v28 = vld [vmem:[%s28721_s1 + $0x8] sm:$0xff]  ;;  %v8240_v27 = vld [vmem:[%s28721_s1 + $0x98] sm:$0xff] }
 0xc5d   :  { %v20688_v10 = vpop.f32.mrf.mxu1  ;;  %v20726_v46 = vpop.f32.mrf.mxu0  ;;  %v8250_v9 = vld [vmem:[%s28721_s1 + $0xe8] sm:$0xff] }
 0xc5e   :  { %v8093_v18 = vmax.f32 %v8086_v32, 0.0  ;;  %v8561_v32 = vld [vmem:[%s28722_s2 + $0x10] sm:$0xff] }
 0xc5f   :  { %v7905_v31 = vpop.f32.mrf.mxu1  ;;  %v8066_v55 = vpop.f32.mrf.mxu0  ;;  %20917 = vmatprep.subr.mxu0 %v8561_v32 }
 0xc60   :  { %v7923_v20 = vadd.f32 %v7905_v31, %v7757_v0  ;;  %v8088_v13 = vadd.f32 %v8066_v55, %v7922_v38  ;;  %v8094_v31 = vmax.f32 %v8087_v62, 0.0  ;;  %v17298_v55 = vld [vmem:[%s28722_s2 + $0x38] sm:$0xf]  ;;  %v8237_v0 = vld [vmem:[%s28721_s1 + $0x80] sm:$0xff]  ;;  %20918 = vmatpush3.msra.mxu0 %v8561_v32 }
 0xc61   :  { %v20691_v5 = vpop.f32.mrf.mxu1  ;;  %v20729_v58 = vpop.f32.mrf.mxu0  ;;  %v8245_v38 = vld [vmem:[%s28721_s1 + $0xc0] sm:$0xff]  ;;  %20919 = vmatprep.subr.mxu0 %v8560_v2 }
 0xc62   :  { %v8095_v17 = vmax.f32 %v8088_v13, 0.0  ;;  %v17297_v5 = vld [vmem:[%s28722_s2 + $0x30] sm:$0xff]  ;;  %v8224_v58 = vld [vmem:[%s28721_s1 + $0x18] sm:$0xff]  ;;  %20920 = vmatpush3.msra.mxu0 %v8560_v2 }
 0xc63   :  { %v7910_v11 = vpop.f32.mrf.mxu1  ;;  %v8071_v1 = vpop.f32.mrf.mxu0  ;;  %v8248_v13 = vld [vmem:[%s28721_s1 + $0xd8] sm:$0xff] }
 0xc64   :  { %v7924_v40 = vadd.f32 %v7910_v11, %v7758_v43  ;;  %v8089_v44 = vadd.f32 %v8071_v1, %v7923_v20  ;;  %v8225_v11 = vld [vmem:[%s28721_s1 + $0x20] sm:$0xff] }
 0xc65   :  { %v20694_v33 = vpop.f32.mrf.mxu1  ;;  %v20732_v59 = vpop.f32.mrf.mxu0  ;;  %v8233_v43 = vld [vmem:[%s28721_s1 + $0x60] sm:$0xff] }
 0xc66   :  { %v8096_v46 = vmax.f32 %v8089_v44, 0.0  ;;  %v8228_v59 = vld [vmem:[%s28721_s1 + $0x38] sm:$0xff]  ;;  %v8241_v20 = vld [vmem:[%s28721_s1 + $0xa0] sm:$0xff] }
 0xc67   :  { %v7915_v21 = vpop.f32.mrf.mxu1  ;;  %v8076_v57 = vpop.f32.mrf.mxu0 }
 0xc68   :  { %v7925_v3 = vadd.f32 %v7915_v21, %v7759_v7  ;;  %v8090_v49 = vadd.f32 %v8076_v57, %v7924_v40  ;;  %v8230_v21 = vld [vmem:[%s28721_s1 + $0x48] sm:$0xff]  ;;  %v8231_v57 = vld [vmem:[%s28721_s1 + $0x50] sm:$0xff] }
 0xc69   :  { %v20697_v12 = vpop.f32.mrf.mxu1  ;;  %v20735_v41 = vpop.f32.mrf.mxu0 }
 0xc6a   :  { %v8097_v10 = vmax.f32 %v8090_v49, 0.0  ;;  %v8234_v12 = vld [vmem:[%s28721_s1 + $0x68] sm:$0xff]  ;;  %v8235_v41 = vld [vmem:[%s28721_s1 + $0x70] sm:$0xff] }
 0xc6b   :  { %v8081_v48 = vpop.f32.mrf.mxu0 }
 0xc6c   :  { %v8091_v30 = vadd.f32 %v8081_v48, %v7925_v3  ;;  %v8238_v3 = vld [vmem:[%s28721_s1 + $0x88] sm:$0xff] }
 0xc6d   :  { %v20738_v60 = vpop.f32.mrf.mxu0 }
 0xc6e   :  { %v8098_v4 = vmax.f32 %v8091_v30, 0.0  ;;  %v8242_v30 = vld [vmem:[%s28721_s1 + $0xa8] sm:$0xff] }
 0xc6f   :  { %v25639_v63 = vpop.f32.mrf.mxu0 }
 0xc70   :  { %20740 = vmatpush3.msk.msra.mxu1 %vm8105_vm11, %v8098_v4  ;;  %v8246_v4 = vld [vmem:[%s28721_s1 + $0xc8] sm:$0xff] }
 0xc71   :  { %20741 = vmatprep.subr.mxu1 %v28860_v56  ;;  %v25654_v16 = vpop.f32.mrf.mxu0 }
 0xc72   :  { %20742 = vmatpush3.msra.mxu1 %v8097_v10  ;;  %v8249_v10 = vld [vmem:[%s28721_s1 + $0xe0] sm:$0xff] }
 0xc73   :  { %20743 = vmatprep.subr.mxu1 %v28860_v56  ;;  %v25673_v1 = vpop.f32.mrf.mxu0 }
 0xc74   :  { %20744 = vmatpush3.msra.mxu1 %v8096_v46 }
 0xc75   :  { %20745 = vmatprep.subr.mxu1 %v28860_v56  ;;  %v25686_v33 = vpop.f32.mrf.mxu0 }
 0xc76   :  { %20746 = vmatpush3.msra.mxu1 %v8095_v17 }
 0xc77   :  { %20747 = vmatprep.subr.mxu1 %v28860_v56  ;;  %v25698_v36 = vpop.f32.mrf.mxu0 }
 0xc78   :  { %20748 = vmatpush3.msra.mxu1 %v8094_v31 }
 0xc79   :  { %20749 = vmatprep.subr.mxu1 %v28860_v56  ;;  %v25708_v6 = vpop.f32.mrf.mxu0 }
 0xc7a   :  { %20750 = vmatpush3.msra.mxu1 %v8093_v18  ;;  %v8559_v18 = vld [vmem:[%s28722_s2] sm:$0xff] }
 0xc7b   :  { %20751 = vmatprep.subr.mxu1 %v28860_v56  ;;  %v25718_v7 = vpop.f32.mrf.mxu0  ;;  %20921 = vmatprep.subr.mxu0 %v8559_v18 }
 0xc7c   :  { %20752 = vmatpush3.msra.mxu1 %v8092_v26  ;;  %20922 = vmatpush3.msra.mxu0 %v8559_v18 }
 0xc7d   :  { %20754 = vmatmul.mubr.msk.f32.vlgmr.msra.gmra.mxu1 %vm8101_vm12, %v8099_v50  ;;  %20756 = vmatprep.subr.msk.mxu1 %vm175_vm0, %v25347_v24  ;;  %v25728_v15 = vpop.f32.mrf.mxu0 }
 0xc7e   :  { %20757 = vmatpush3.msk.msra.mxu1 %vm175_vm0, %v25347_v24  ;;  %20764 = vmatprep.mubr.msk.f32.mxu1 %vm84_vm1, %v8221_v61 }
 0xc7f   :  { %20758 = vmatprep.subr.mxu1 %v25369_v23  ;;  %v25738_v40 = vpop.f32.mrf.mxu0 }
 0xc80   :  { %20759 = vmatpush3.msra.mxu1 %v25369_v23 }
 0xc81   :  { %20760 = vmatprep.subr.mxu1 %v25388_v22  ;;  %v25748_v48 = vpop.f32.mrf.mxu0 }
 0xc82   :  { %20761 = vmatpush3.msra.mxu1 %v25388_v22 }
 0xc83   :  { %20762 = vmatprep.subr.mxu1 %v25407_v14  ;;  %v25758_v49 = vpop.f32.mrf.mxu0 }
 0xc84   :  { %20763 = vmatpush3.msra.mxu1 %v25407_v14 }
 0xc85   :  { %20765 = vmatmul.mubr.msk.f32.vlgmr.msra.gmra.mxu1 %vm84_vm1, %v8222_v28  ;;  %20862 = vmatprep.subr.msk.mxu1 %vm175_vm0, %v17298_v55  ;;  %v8799_v60 = vpop.f32.mrf.mxu0 }
 0xc86   :  { %20767 = vmatprep.mubr.msk.f32.mxu1 %vm84_vm1, %v8223_v29  ;;  %20863 = vmatpush3.msk.msra.mxu1 %vm175_vm0, %v17298_v55 }
 0xc87   :  { %20864 = vmatprep.subr.mxu1 %v17297_v5  ;;  %v20837_v44 = vpop.f32.mrf.mxu0 }
 0xc88   :  { %20865 = vmatpush3.msra.mxu1 %v17297_v5 }
 0xc89   :  { %20768 = vmatmul.mubr.msk.f32.gmra.mxu1 %vm84_vm1, %v8224_v58  ;;  %20866 = vmatprep.subr.mxu1 %v17296_v39  ;;  %v8809_v34 = vpop.f32.mrf.mxu0 }
 0xc8a   :  { %20770 = vmatprep.mubr.msk.f32.mxu1 %vm84_vm1, %v8225_v11  ;;  %20867 = vmatpush3.msra.mxu1 %v17296_v39  ;;  %v17361_v11 = vld [vmem:[%s28721_s1 + $0x1e0] sm:$0xff] }
 0xc8b   :  { %20868 = vmatprep.subr.mxu1 %v17295_v51  ;;  %v20840_v53 = vpop.f32.mrf.mxu0 }
 0xc8c   :  { %20869 = vmatpush3.msra.mxu1 %v17295_v51  ;;  %v17363_v51 = vld [vmem:[%s28721_s1 + $0x1f0] sm:$0xff] }
 0xc8d   :  { %20771 = vmatmul.mubr.msk.f32.gmra.mxu1 %vm84_vm1, %v8226_v25  ;;  %20968 = vmatprep.subr.msk.mxu1 %vm175_vm0, %v25347_v24  ;;  %v8819_v62 = vpop.f32.mrf.mxu0  ;;  %v17364_v25 = vld [vmem:[%s28721_s1 + $0x1f8] sm:$0xff] }
 0xc8e   :  { %20773 = vmatprep.mubr.msk.f32.mxu1 %vm84_vm1, %v8227_v54  ;;  %v17365_v54 = vld [vmem:[%s28721_s1 + $0x200] sm:$0xff] }
 0xc8f   :  { %v20843_v46 = vpop.f32.mrf.mxu0 }
 0xc91   :  { %20774 = vmatmul.mubr.msk.f32.gmra.mxu1 %vm84_vm1, %v8228_v59  ;;  %v8829_v17 = vpop.f32.mrf.mxu0  ;;  %v17367_v59 = vld [vmem:[%s28721_s1 + $0x210] sm:$0xff] }
 0xc92   :  { %20776 = vmatprep.mubr.msk.f32.mxu1 %vm84_vm1, %v8229_v45  ;;  %v17368_v45 = vld [vmem:[%s28721_s1 + $0x218] sm:$0xff] }
 0xc93   :  { %v20846_v31 = vpop.f32.mrf.mxu0 }
 0xc95   :  { %20777 = vmatmul.mubr.msk.f32.gmra.mxu1 %vm84_vm1, %v8230_v21  ;;  %v8839_v26 = vpop.f32.mrf.mxu0  ;;  %v17370_v21 = vld [vmem:[%s28721_s1 + $0x228] sm:$0xff] }
 0xc96   :  { %20779 = vmatprep.mubr.msk.f32.mxu1 %vm84_vm1, %v8231_v57  ;;  %v17371_v57 = vld [vmem:[%s28721_s1 + $0x230] sm:$0xff] }
 0xc97   :  { %v20849_v50 = vpop.f32.mrf.mxu0 }
 0xc99   :  { %20780 = vmatmul.mubr.msk.f32.gmra.mxu1 %vm84_vm1, %v8232_v19  ;;  %v8849_v61 = vpop.f32.mrf.mxu0  ;;  %v17373_v19 = vld [vmem:[%s28721_s1 + $0x240] sm:$0xff] }
 0xc9a   :  { %20782 = vmatprep.mubr.msk.f32.mxu1 %vm84_vm1, %v8233_v43  ;;  %v17374_v43 = vld [vmem:[%s28721_s1 + $0x248] sm:$0xff] }
 0xc9d   :  { %20783 = vmatmul.mubr.msk.f32.gmra.mxu1 %vm84_vm1, %v8234_v12  ;;  %v17376_v12 = vld [vmem:[%s28721_s1 + $0x258] sm:$0xff] }
 0xc9e   :  { %20785 = vmatprep.mubr.msk.f32.mxu1 %vm84_vm1, %v8235_v41  ;;  %v17377_v41 = vld [vmem:[%s28721_s1 + $0x260] sm:$0xff] }
 0xca1   :  { %20786 = vmatmul.mubr.msk.f32.gmra.mxu1 %vm84_vm1, %v8236_v37  ;;  %v17379_v37 = vld [vmem:[%s28721_s1 + $0x270] sm:$0xff] }
 0xca2   :  { %20788 = vmatprep.mubr.msk.f32.mxu1 %vm84_vm1, %v8237_v0  ;;  %v17380_v0 = vld [vmem:[%s28721_s1 + $0x278] sm:$0xff] }
 0xca5   :  { %20789 = vmatmul.mubr.msk.f32.gmra.mxu1 %vm84_vm1, %v8238_v3  ;;  %v17382_v3 = vld [vmem:[%s28721_s1 + $0x288] sm:$0xff] }
 0xca6   :  { %20791 = vmatprep.mubr.msk.f32.mxu1 %vm84_vm1, %v8239_v8  ;;  %v17383_v8 = vld [vmem:[%s28721_s1 + $0x290] sm:$0xff] }
 0xca9   :  { %20792 = vmatmul.mubr.msk.f32.gmra.mxu1 %vm84_vm1, %v8240_v27  ;;  %v17384_v27 = vld [vmem:[%s28721_s1 + $0x298] sm:$0xff] }
 0xcaa   :  { %20794 = vmatprep.mubr.msk.f32.mxu1 %vm84_vm1, %v8241_v20  ;;  %v17385_v20 = vld [vmem:[%s28721_s1 + $0x2a0] sm:$0xff] }
 0xcad   :  { %20795 = vmatmul.mubr.msk.f32.gmra.mxu1 %vm84_vm1, %v8242_v30  ;;  %v17387_v30 = vld [vmem:[%s28721_s1 + $0x2b0] sm:$0xff] }
 0xcae   :  { %20797 = vmatprep.mubr.msk.f32.mxu1 %vm84_vm1, %v8243_v35  ;;  %v17388_v35 = vld [vmem:[%s28721_s1 + $0x2b8] sm:$0xff] }
 0xcb1   :  { %20798 = vmatmul.mubr.msk.f32.gmra.mxu1 %vm84_vm1, %v8244_v42  ;;  %v17390_v42 = vld [vmem:[%s28721_s1 + $0x2c8] sm:$0xff] }
 0xcb2   :  { %20800 = vmatprep.mubr.msk.f32.mxu1 %vm84_vm1, %v8245_v38  ;;  %v17457_v38 = vld [vmem:[%s28721_s1 + $0x2d0] sm:$0xff] }
 0xcb5   :  { %20801 = vmatmul.mubr.msk.f32.gmra.mxu1 %vm84_vm1, %v8246_v4  ;;  %v17459_v4 = vld [vmem:[%s28721_s1 + $0x2e0] sm:$0xff] }
 0xcb6   :  { %20803 = vmatprep.mubr.msk.f32.mxu1 %vm84_vm1, %v8247_v47  ;;  %v17460_v47 = vld [vmem:[%s28721_s1 + $0x2e8] sm:$0xff] }
 0xcb9   :  { %20804 = vmatmul.mubr.msk.f32.gmra.mxu1 %vm84_vm1, %v8248_v13  ;;  %v17461_v13 = vld [vmem:[%s28721_s1 + $0x2f0] sm:$0xff] }
 0xcba   :  { %20806 = vmatprep.mubr.msk.f32.mxu1 %vm84_vm1, %v8249_v10 }
 0xcbd   :  { %20807 = vmatmul.mubr.msk.f32.gmra.mxu1 %vm84_vm1, %v8250_v9 }
 0xcbe   :  { %20870 = vmatprep.mubr.msk.f32.mxu1 %vm84_vm1, %v25654_v16 }
 0xcc1   :  { %20871 = vmatmul.mubr.msk.f32.vlgmr.msra.gmra.mxu1 %vm84_vm1, %v25639_v63  ;;  %v20852_v63 = vpop.f32.mrf.mxu0 }
 0xcc2   :  { %20873 = vmatprep.mubr.msk.f32.mxu1 %vm84_vm1, %v25686_v33  ;;  %20969 = vmatpush3.msk.msra.mxu1 %vm175_vm0, %v25347_v24  ;;  %v17366_v33 = vld [vmem:[%s28721_s1 + $0x208] sm:$0xff] }
 0xcc3   :  { %20970 = vmatprep.subr.mxu1 %v25369_v23  ;;  %v8859_v28 = vpop.f32.mrf.mxu0 }
 0xcc4   :  { %20971 = vmatpush3.msra.mxu1 %v25369_v23 }
 0xcc5   :  { %20874 = vmatmul.mubr.msk.f32.gmra.mxu1 %vm84_vm1, %v25673_v1  ;;  %20972 = vmatprep.subr.mxu1 %v25388_v22  ;;  %v20855_v55 = vpop.f32.mrf.mxu0  ;;  %v17362_v1 = vld [vmem:[%s28721_s1 + $0x1e8] sm:$0xff] }
 0xcc6   :  { %20876 = vmatprep.mubr.msk.f32.mxu1 %vm84_vm1, %v25708_v6  ;;  %20973 = vmatpush3.msra.mxu1 %v25388_v22  ;;  %v17372_v6 = vld [vmem:[%s28721_s1 + $0x238] sm:$0xff] }
 0xcc7   :  { %20974 = vmatprep.subr.mxu1 %v25407_v14  ;;  %v8869_v29 = vpop.f32.mrf.mxu0 }
 0xcc8   :  { %20975 = vmatpush3.msra.mxu1 %v25407_v14 }
 0xcc9   :  { %20877 = vmatmul.mubr.msk.f32.gmra.mxu1 %vm84_vm1, %v25698_v36  ;;  %21074 = vmatprep.subr.msk.mxu1 %vm175_vm0, %v25347_v24  ;;  %v20858_v16 = vpop.f32.mrf.mxu0  ;;  %v17369_v36 = vld [vmem:[%s28721_s1 + $0x220] sm:$0xff] }
 0xcca   :  { %20879 = vmatprep.mubr.msk.f32.mxu1 %vm84_vm1, %v25728_v15  ;;  %v17378_v15 = vld [vmem:[%s28721_s1 + $0x268] sm:$0xff] }
 0xccb   :  { %v8879_v5 = vpop.f32.mrf.mxu0 }
 0xccd   :  { %20880 = vmatmul.mubr.msk.f32.gmra.mxu1 %vm84_vm1, %v25718_v7  ;;  %v20861_v58 = vpop.f32.mrf.mxu0  ;;  %v17375_v7 = vld [vmem:[%s28721_s1 + $0x250] sm:$0xff] }
 0xcce   :  { %20882 = vmatprep.mubr.msk.f32.mxu1 %vm84_vm1, %v25748_v48  ;;  %v25966_v48 = vld [vmem:[%s28722_s2 + $0x58] sm:$0xf] }
 0xccf   :  { %v8889_v39 = vpop.f32.mrf.mxu0  ;;  %21021 = vmatprep.subr.msk.mxu0 %vm175_vm0, %v25966_v48 }
 0xcd1   :  { %20883 = vmatmul.mubr.msk.f32.gmra.mxu1 %vm84_vm1, %v25738_v40  ;;  %v17381_v40 = vld [vmem:[%s28721_s1 + $0x280] sm:$0xff] }
 0xcd2   :  { %20885 = vmatprep.mubr.msk.f32.mxu1 %vm84_vm1, %v8799_v60  ;;  %v17389_v60 = vld [vmem:[%s28721_s1 + $0x2c0] sm:$0xff] }
 0xcd5   :  { %20886 = vmatmul.mubr.msk.f32.gmra.mxu1 %vm84_vm1, %v25758_v49  ;;  %v17386_v49 = vld [vmem:[%s28721_s1 + $0x2a8] sm:$0xff] }
 0xcd6   :  { %20888 = vmatprep.mubr.msk.f32.mxu1 %vm84_vm1, %v8809_v34  ;;  %v8100_v34 = vld [vmem:[%s28734_s14] sm:$0x3] }
 0xcd9   :  { %20889 = vmatmul.mubr.msk.f32.gmra.mxu1 %vm84_vm1, %v20837_v44  ;;  %v17458_v44 = vld [vmem:[%s28721_s1 + $0x2d8] sm:$0xff] }
 0xcda   :  { %20891 = vmatprep.mubr.msk.f32.mxu1 %vm84_vm1, %v8819_v62  ;;  %v17463_v62 = vld [vmem:[%s28721_s1 + $0x300] sm:$0xff] }
 0xcdd   :  { %20892 = vmatmul.mubr.msk.f32.gmra.mxu1 %vm84_vm1, %v20840_v53 }
 0xcde   :  { %20894 = vmatprep.mubr.msk.f32.mxu1 %vm84_vm1, %v8829_v17 }
 0xce1   :  { %20895 = vmatmul.mubr.msk.f32.gmra.mxu1 %vm84_vm1, %v20843_v46 }
 0xce2   :  { %20897 = vmatprep.mubr.msk.f32.mxu1 %vm84_vm1, %v8839_v26  ;;  %v17467_v26 = vld [vmem:[%s28721_s1 + $0x320] sm:$0xff] }
 0xce5   :  { %20898 = vmatmul.mubr.msk.f32.gmra.mxu1 %vm84_vm1, %v20846_v31  ;;  %v17466_v31 = vld [vmem:[%s28721_s1 + $0x318] sm:$0xff] }
 0xce6   :  { %20900 = vmatprep.mubr.msk.f32.mxu1 %vm84_vm1, %v8849_v61 }
 0xce9   :  { %20901 = vmatmul.mubr.msk.f32.gmra.mxu1 %vm84_vm1, %v20849_v50 }
 0xcea   :  { %20903 = vmatprep.mubr.msk.f32.mxu1 %vm84_vm1, %v8859_v28 }
 0xced   :  { %20904 = vmatmul.mubr.msk.f32.gmra.mxu1 %vm84_vm1, %v20852_v63  ;;  %v17424_v63 = vld [vmem:[%s28722_s2 + $0x50] sm:$0xff] }
 0xcee   :  { %20906 = vmatprep.mubr.msk.f32.mxu1 %vm84_vm1, %v8869_v29 }
 0xcf1   :  { %20907 = vmatmul.mubr.msk.f32.gmra.mxu1 %vm84_vm1, %v20855_v55  ;;  %v17468_v55 = vld [vmem:[%s28721_s1 + $0x328] sm:$0xff] }
 0xcf2   :  { %20909 = vmatprep.mubr.msk.f32.mxu1 %vm84_vm1, %v8879_v5  ;;  %v17423_v5 = vld [vmem:[%s28722_s2 + $0x48] sm:$0xff] }
 0xcf5   :  { %20910 = vmatmul.mubr.msk.f32.gmra.mxu1 %vm84_vm1, %v20858_v16  ;;  %v17469_v16 = vld [vmem:[%s28721_s1 + $0x330] sm:$0xff] }
 0xcf6   :  { %20912 = vmatprep.mubr.msk.f32.mxu1 %vm84_vm1, %v8889_v39  ;;  %v17422_v39 = vld [vmem:[%s28722_s2 + $0x40] sm:$0xff] }
 0xcf9   :  { %20913 = vmatmul.mubr.msk.f32.gmra.mxu1 %vm84_vm1, %v20861_v58 }
 0xcfa   :  { %20976 = vmatprep.mubr.msk.f32.mxu1 %vm84_vm1, %v17361_v11  ;;  %v17470_v11 = vld [vmem:[%s28721_s1 + $0x338] sm:$0xff] }
 0xcfd   :  { %20977 = vmatmul.mubr.msk.f32.vlgmr.msra.gmra.mxu1 %vm84_vm1, %v17362_v1 }
 0xcfe   :  { %20979 = vmatprep.mubr.msk.f32.mxu1 %vm84_vm1, %v17363_v51  ;;  %21075 = vmatpush3.msk.msra.mxu1 %vm175_vm0, %v25347_v24  ;;  %v17471_v51 = vld [vmem:[%s28721_s1 + $0x340] sm:$0xff] }
 0xcff   :  { %21076 = vmatprep.subr.mxu1 %v25369_v23 }
 0xd00   :  { %21077 = vmatpush3.msra.mxu1 %v25369_v23 }
 0xd01   :  { %20980 = vmatmul.mubr.msk.f32.gmra.mxu1 %vm84_vm1, %v17364_v25  ;;  %21078 = vmatprep.subr.mxu1 %v25388_v22 }
 0xd02   :  { %20982 = vmatprep.mubr.msk.f32.mxu1 %vm84_vm1, %v17365_v54  ;;  %21079 = vmatpush3.msra.mxu1 %v25388_v22  ;;  %v17472_v54 = vld [vmem:[%s28721_s1 + $0x348] sm:$0xff] }
 0xd03   :  { %21080 = vmatprep.subr.mxu1 %v25407_v14 }
 0xd04   :  { %21081 = vmatpush3.msra.mxu1 %v25407_v14 }
 0xd05   :  { %20983 = vmatmul.mubr.msk.f32.gmra.mxu1 %vm84_vm1, %v17366_v33  ;;  %21180 = vmatprep.subr.msk.mxu1 %vm175_vm0, %v25347_v24 }
 0xd06   :  { %20985 = vmatprep.mubr.msk.f32.mxu1 %vm84_vm1, %v17367_v59  ;;  %v17473_v59 = vld [vmem:[%s28721_s1 + $0x350] sm:$0xff] }
 0xd09   :  { %20986 = vmatmul.mubr.msk.f32.gmra.mxu1 %vm84_vm1, %v17368_v45 }
 0xd0a   :  { %20988 = vmatprep.mubr.msk.f32.mxu1 %vm84_vm1, %v17369_v36  ;;  %v17474_v36 = vld [vmem:[%s28721_s1 + $0x358] sm:$0xff] }
 0xd0d   :  { %20989 = vmatmul.mubr.msk.f32.gmra.mxu1 %vm84_vm1, %v17370_v21 }
 0xd0e   :  { %20991 = vmatprep.mubr.msk.f32.mxu1 %vm84_vm1, %v17371_v57 }
 0xd11   :  { %20992 = vmatmul.mubr.msk.f32.gmra.mxu1 %vm84_vm1, %v17372_v6  ;;  %v17475_v6 = vld [vmem:[%s28721_s1 + $0x360] sm:$0xff] }
 0xd12   :  { %20994 = vmatprep.mubr.msk.f32.mxu1 %vm84_vm1, %v17373_v19 }
 0xd15   :  { %20995 = vmatmul.mubr.msk.f32.gmra.mxu1 %vm84_vm1, %v17374_v43 }
 0xd16   :  { %20997 = vmatprep.mubr.msk.f32.mxu1 %vm84_vm1, %v17375_v7 }
 0xd19   :  { %20998 = vmatmul.mubr.msk.f32.gmra.mxu1 %vm84_vm1, %v17376_v12 }
 0xd1a   :  { %21000 = vmatprep.mubr.msk.f32.mxu1 %vm84_vm1, %v17377_v41  ;;  %v17476_v41 = vld [vmem:[%s28721_s1 + $0x368] sm:$0xff] }
 0xd1d   :  { %21001 = vmatmul.mubr.msk.f32.gmra.mxu1 %vm84_vm1, %v17378_v15 }
 0xd1e   :  { %21003 = vmatprep.mubr.msk.f32.mxu1 %vm84_vm1, %v17379_v37  ;;  %v17477_v37 = vld [vmem:[%s28721_s1 + $0x370] sm:$0xff] }
 0xd21   :  { %21004 = vmatmul.mubr.msk.f32.gmra.mxu1 %vm84_vm1, %v17380_v0 }
 0xd22   :  { %21006 = vmatprep.mubr.msk.f32.mxu1 %vm84_vm1, %v17381_v40  ;;  %v17478_v40 = vld [vmem:[%s28721_s1 + $0x378] sm:$0xff] }
 0xd25   :  { %21007 = vmatmul.mubr.msk.f32.gmra.mxu1 %vm84_vm1, %v17382_v3 }
 0xd26   :  { %21009 = vmatprep.mubr.msk.f32.mxu1 %vm84_vm1, %v17383_v8  ;;  %v17479_v8 = vld [vmem:[%s28721_s1 + $0x380] sm:$0xff] }
 0xd29   :  { %21010 = vmatmul.mubr.msk.f32.gmra.mxu1 %vm84_vm1, %v17384_v27 }
 0xd2a   :  { %21012 = vmatprep.mubr.msk.f32.mxu1 %vm84_vm1, %v17385_v20  ;;  %v17480_v20 = vld [vmem:[%s28721_s1 + $0x388] sm:$0xff] }
 0xd2d   :  { %21013 = vmatmul.mubr.msk.f32.gmra.mxu1 %vm84_vm1, %v17386_v49 }
 0xd2e   :  { %21015 = vmatprep.mubr.msk.f32.mxu1 %vm84_vm1, %v17387_v30  ;;  %v17481_v30 = vld [vmem:[%s28721_s1 + $0x390] sm:$0xff] }
 0xd31   :  { %21016 = vmatmul.mubr.msk.f32.gmra.mxu1 %vm84_vm1, %v17388_v35 }
 0xd32   :  { %21018 = vmatprep.mubr.msk.f32.mxu1 %vm84_vm1, %v17389_v60  ;;  %v17482_v60 = vld [vmem:[%s28721_s1 + $0x398] sm:$0xff] }
 0xd35   :  { %21019 = vmatmul.mubr.msk.f32.gmra.mxu1 %vm84_vm1, %v17390_v42 }
 0xd36   :  { %21082 = vmatprep.mubr.msk.f32.mxu1 %vm84_vm1, %v17457_v38  ;;  %v17483_v38 = vld [vmem:[%s28721_s1 + $0x3a0] sm:$0xff] }
 0xd39   :  { %21083 = vmatmul.mubr.msk.f32.vlgmr.msra.gmra.mxu1 %vm84_vm1, %v17458_v44 }
 0xd3a   :  { %21085 = vmatprep.mubr.msk.f32.mxu1 %vm84_vm1, %v17459_v4  ;;  %21181 = vmatpush3.msk.msra.mxu1 %vm175_vm0, %v25347_v24  ;;  %v17462_v24 = vld [vmem:[%s28721_s1 + $0x2f8] sm:$0xff] }
 0xd3b   :  { %21182 = vmatprep.subr.mxu1 %v25369_v23 }
 0xd3c   :  { %21183 = vmatpush3.msra.mxu1 %v25369_v23 }
 0xd3d   :  { %v8175_v10 = vpop.f32.mrf.mxu1  ;;  %21086 = vmatmul.mubr.msk.f32.gmra.mxu1 %vm84_vm1, %v17460_v47  ;;  %21184 = vmatprep.subr.mxu1 %v25388_v22 }
 0xd3e   :  { %v8176_v53 = vadd.f32 %v8175_v10, %v8100_v34  ;;  %21088 = vmatprep.mubr.msk.f32.mxu1 %vm84_vm1, %v17461_v13  ;;  %21185 = vmatpush3.msra.mxu1 %v25388_v22  ;;  %v17464_v22 = vld [vmem:[%s28721_s1 + $0x308] sm:$0xff]  ;;  %v17485_v10 = vld [vmem:[%s28721_s1 + $0x3b0] sm:$0xff] }
 0xd3f   :  { %v20755_v9 = vpop.f32.mrf.mxu1  ;;  %21186 = vmatprep.subr.mxu1 %v25407_v14  ;;  %v17484_v34 = vld [vmem:[%s28721_s1 + $0x3a8] sm:$0xff] }
 0xd40   :  { %v8180_v23 = vrot.slane %v8176_v53, 1  ;;  %21187 = vmatpush3.msra.mxu1 %v25407_v14 }
 0xd41   :  { %21089 = vmatmul.mubr.msk.f32.gmra.mxu1 %vm84_vm1, %v17462_v24  ;;  %12136 = vmatprep.subr.mxu1 %v28860_v56 }
 0xd42   :  { %v8182_v46 = vmax.f32 %v8176_v53, %v8180_v23  ;;  %21091 = vmatprep.mubr.msk.f32.mxu1 %vm84_vm1, %v17463_v62 }
 0xd44   :  { %v26046_v32 = vsub.f32 %v8176_v53, %v8182_v46  ;;  %v8185_v17 = vrot.slane %v8182_v46, 7  ;;  %v17486_v46 = vld [vmem:[%s28721_s1 + $0x3b8] sm:$0xff] }
 0xd45   :  { %v20766_v2 = vpop.f32.mrf.mxu1  ;;  %21092 = vmatmul.mubr.msk.f32.gmra.mxu1 %vm84_vm1, %v17464_v22 }
 0xd46   :  { %v26049_v14 = vsub.f32 %v8176_v53, %v8185_v17  ;;  %21094 = vmatprep.mubr.msk.f32.mxu1 %vm84_vm1, %v17465_v52  ;;  %v8188_v50 = vmul.f32 1.442695, %v26046_v32  ;;  %v17553_v52 = vld [vmem:[%s28721_s1 + $0x3c0] sm:$0xff] }
 0xd47   :  { %v8410_v18 = vpop.f32.mrf.mxu1 }
 0xd48   :  { %v8190_v61 = vmul.f32 1.442695, %v26049_v14  ;;  %20923 = vmatprep.mubr.msk.f32.mxu0 %vm84_vm1, %v8410_v18 }
 0xd49   :  { %v20769_v28 = vpop.f32.mrf.mxu1  ;;  %20924 = vmatmul.mubr.msk.f32.vlgmr.msra.gmra.mxu0 %vm84_vm1, %v20766_v2  ;;  %21095 = vmatmul.mubr.msk.f32.gmra.mxu1 %vm84_vm1, %v17466_v31  ;;  %v17554_v2 = vld [vmem:[%s28721_s1 + $0x3c8] sm:$0xff]  ;;  %v17555_v31 = vld [vmem:[%s28721_s1 + $0x3d0] sm:$0xff] }
 0xd4a   :  { %22013 = vpow2.f32 %v8190_v61  ;;  %21097 = vmatprep.mubr.msk.f32.mxu1 %vm84_vm1, %v17467_v26  ;;  %21022 = vmatpush3.msk.msra.mxu0 %vm175_vm0, %v25966_v48  ;;  %v26134_v48 = vld [vmem:[%s28722_s2 + $0x78] sm:$0xf]  ;;  %v17557_v61 = vld [vmem:[%s28721_s1 + $0x3e0] sm:$0xff] }
 0xd4b   :  { %v8420_v29 = vpop.f32.mrf.mxu1  ;;  %21023 = vmatprep.subr.mxu0 %v17424_v63  ;;  %22015 = vpow2.f32 %v8188_v50  ;;  %v17556_v26 = vld [vmem:[%s28721_s1 + $0x3d8] sm:$0xff] }
 0xd4c   :  { %20926 = vmatprep.mubr.msk.f32.mxu0 %vm84_vm1, %v8420_v29  ;;  %21024 = vmatpush3.msra.mxu0 %v17424_v63  ;;  %v17559_v29 = vld [vmem:[%s28721_s1 + $0x3f0] sm:$0xff] }
 0xd4d   :  { %v20772_v58 = vpop.f32.mrf.mxu1  ;;  %20927 = vmatmul.mubr.msk.f32.gmra.mxu0 %vm84_vm1, %v20769_v28  ;;  %21098 = vmatmul.mubr.msk.f32.gmra.mxu1 %vm84_vm1, %v17468_v55  ;;  %v17558_v28 = vld [vmem:[%s28721_s1 + $0x3e8] sm:$0xff] }
 0xd4e   :  { %21100 = vmatprep.mubr.msk.f32.mxu1 %vm84_vm1, %v17469_v16  ;;  %21025 = vmatprep.subr.mxu0 %v17423_v5 }
 0xd4f   :  { %v8430_v1 = vpop.f32.mrf.mxu1  ;;  %21026 = vmatpush3.msra.mxu0 %v17423_v5 }
 0xd50   :  { %20929 = vmatprep.mubr.msk.f32.mxu0 %vm84_vm1, %v8430_v1  ;;  %21027 = vmatprep.subr.mxu0 %v17422_v39  ;;  %v17561_v1 = vld [vmem:[%s28721_s1 + $0x400] sm:$0xff] }
 0xd51   :  { %v20775_v25 = vpop.f32.mrf.mxu1  ;;  %20930 = vmatmul.mubr.msk.f32.gmra.mxu0 %vm84_vm1, %v20772_v58  ;;  %21101 = vmatmul.mubr.msk.f32.gmra.mxu1 %vm84_vm1, %v17470_v11  ;;  %v17560_v58 = vld [vmem:[%s28721_s1 + $0x3f8] sm:$0xff] }
 0xd52   :  { %21103 = vmatprep.mubr.msk.f32.mxu1 %vm84_vm1, %v17471_v51  ;;  %21028 = vmatpush3.msra.mxu0 %v17422_v39 }
 0xd53   :  { %v8440_v33 = vpop.f32.mrf.mxu1  ;;  %21127 = vmatprep.subr.msk.mxu0 %vm175_vm0, %v26134_v48 }
 0xd54   :  { %20932 = vmatprep.mubr.msk.f32.mxu0 %vm84_vm1, %v8440_v33 }
 0xd55   :  { %v20778_v45 = vpop.f32.mrf.mxu1  ;;  %20933 = vmatmul.mubr.msk.f32.gmra.mxu0 %vm84_vm1, %v20775_v25  ;;  %21104 = vmatmul.mubr.msk.f32.gmra.mxu1 %vm84_vm1, %v17472_v54 }
 0xd56   :  { %21106 = vmatprep.mubr.msk.f32.mxu1 %vm84_vm1, %v17473_v59  ;;  %v17562_v59 = vld [vmem:[%s28721_s1 + $0x408] sm:$0xff] }
 0xd57   :  { %v22014_v21 = vpop.eup %22013  ;;  %v8450_v57 = vpop.f32.mrf.mxu1 }
 0xd58   :  { %v8193_v19 = vrot.slane %v22014_v21, 1  ;;  %20935 = vmatprep.mubr.msk.f32.mxu0 %vm84_vm1, %v8450_v57  ;;  %v22016_v43 = vpop.eup %22015 }
 0xd59   :  { %v20781_v7 = vpop.f32.mrf.mxu1  ;;  %20936 = vmatmul.mubr.msk.f32.gmra.mxu0 %vm84_vm1, %v20778_v45  ;;  %21107 = vmatmul.mubr.msk.f32.gmra.mxu1 %vm84_vm1, %v17474_v36  ;;  %v17563_v36 = vld [vmem:[%s28721_s1 + $0x410] sm:$0xff] }
 0xd5a   :  { %v8195_v12 = vadd.f32 %v22016_v43, %v8193_v19  ;;  %21109 = vmatprep.mubr.msk.f32.mxu1 %vm84_vm1, %v17475_v6  ;;  %v17564_v19 = vld [vmem:[%s28721_s1 + $0x418] sm:$0xff] }
 0xd5b   :  { %v8460_v15 = vpop.f32.mrf.mxu1 }
 0xd5c   :  { %22017 = vlog2.f32 %v8195_v12  ;;  %20938 = vmatprep.mubr.msk.f32.mxu0 %vm84_vm1, %v8460_v15 }
 0xd5d   :  { %v20784_v0 = vpop.f32.mrf.mxu1  ;;  %20939 = vmatmul.mubr.msk.f32.gmra.mxu0 %vm84_vm1, %v20781_v7  ;;  %21110 = vmatmul.mubr.msk.f32.gmra.mxu1 %vm84_vm1, %v17476_v41  ;;  %v17565_v7 = vld [vmem:[%s28721_s1 + $0x420] sm:$0xff]  ;;  %v17566_v41 = vld [vmem:[%s28721_s1 + $0x428] sm:$0xff] }
 0xd5e   :  { %21112 = vmatprep.mubr.msk.f32.mxu1 %vm84_vm1, %v17477_v37  ;;  %v17567_v37 = vld [vmem:[%s28721_s1 + $0x430] sm:$0xff] }
 0xd5f   :  { %v8470_v3 = vpop.f32.mrf.mxu1 }
 0xd60   :  { %20941 = vmatprep.mubr.msk.f32.mxu0 %vm84_vm1, %v8470_v3 }
 0xd61   :  { %v20787_v27 = vpop.f32.mrf.mxu1  ;;  %20942 = vmatmul.mubr.msk.f32.gmra.mxu0 %vm84_vm1, %v20784_v0  ;;  %21113 = vmatmul.mubr.msk.f32.gmra.mxu1 %vm84_vm1, %v17478_v40  ;;  %v17568_v40 = vld [vmem:[%s28721_s1 + $0x438] sm:$0xff] }
 0xd62   :  { %21115 = vmatprep.mubr.msk.f32.mxu1 %vm84_vm1, %v17479_v8  ;;  %v17569_v8 = vld [vmem:[%s28721_s1 + $0x440] sm:$0xff] }
 0xd63   :  { %v8480_v49 = vpop.f32.mrf.mxu1 }
 0xd64   :  { %20944 = vmatprep.mubr.msk.f32.mxu0 %vm84_vm1, %v8480_v49 }
 0xd65   :  { %v20790_v35 = vpop.f32.mrf.mxu1  ;;  %20945 = vmatmul.mubr.msk.f32.gmra.mxu0 %vm84_vm1, %v20787_v27  ;;  %21116 = vmatmul.mubr.msk.f32.gmra.mxu1 %vm84_vm1, %v17480_v20  ;;  %v17570_v20 = vld [vmem:[%s28721_s1 + $0x448] sm:$0xff] }
 0xd66   :  { %21118 = vmatprep.mubr.msk.f32.mxu1 %vm84_vm1, %v17481_v30  ;;  %v17571_v30 = vld [vmem:[%s28721_s1 + $0x450] sm:$0xff] }
 0xd67   :  { %v8490_v42 = vpop.f32.mrf.mxu1 }
 0xd68   :  { %20947 = vmatprep.mubr.msk.f32.mxu0 %vm84_vm1, %v8490_v42 }
 0xd69   :  { %v22018_v44 = vpop.eup %22017  ;;  %v20793_v4 = vpop.f32.mrf.mxu1  ;;  %20948 = vmatmul.mubr.msk.f32.gmra.mxu0 %vm84_vm1, %v20790_v35  ;;  %21119 = vmatmul.mubr.msk.f32.gmra.mxu1 %vm84_vm1, %v17482_v60  ;;  %v17572_v60 = vld [vmem:[%s28721_s1 + $0x458] sm:$0xff] }
 0xd6a   :  { %v8197_v47 = vmul.f32 0.6931472, %v22018_v44  ;;  %21121 = vmatprep.mubr.msk.f32.mxu1 %vm84_vm1, %v17483_v38  ;;  %v17573_v38 = vld [vmem:[%s28721_s1 + $0x460] sm:$0xff] }
 0xd6b   :  { %v8500_v13 = vpop.f32.mrf.mxu1 }
 0xd6c   :  { %v8198_v53 = vsub.f32 %v26046_v32, %v8197_v47  ;;  %v8200_v24 = vrot.slane %v8197_v47, 7  ;;  %20950 = vmatprep.mubr.msk.f32.mxu0 %vm84_vm1, %v8500_v13 }
 0xd6d   :  { %v20796_v9 = vpop.f32.mrf.mxu1  ;;  %20951 = vmatmul.mubr.msk.f32.gmra.mxu0 %vm84_vm1, %v20793_v4  ;;  %21122 = vmatmul.mubr.msk.f32.gmra.mxu1 %vm84_vm1, %v17484_v34  ;;  %v17574_v4 = vld [vmem:[%s28721_s1 + $0x468] sm:$0xff]  ;;  %v17575_v34 = vld [vmem:[%s28721_s1 + $0x470] sm:$0xff] }
 0xd6e   :  { %v8202_v62 = vsub.f32 %v26049_v14, %v8200_v24  ;;  %v8203_v23 = vmul.f32 1.442695, %v8198_v53  ;;  %21124 = vmatprep.mubr.msk.f32.mxu1 %vm84_vm1, %v17485_v10  ;;  %v17576_v10 = vld [vmem:[%s28721_s1 + $0x478] sm:$0xff]  ;;  %v17577_v24 = vld [vmem:[%s28721_s1 + $0x480] sm:$0xff] }
 0xd6f   :  { %v8510_v22 = vpop.f32.mrf.mxu1 }
 0xd70   :  { %v8206_v32 = vmul.f32 1.442695, %v8202_v62  ;;  %20953 = vmatprep.mubr.msk.f32.mxu0 %vm84_vm1, %v8510_v22  ;;  %22019 = vpow2.f32 %v8203_v23 }
 0xd71   :  { %v20799_v17 = vpop.f32.mrf.mxu1  ;;  %20954 = vmatmul.mubr.msk.f32.gmra.mxu0 %vm84_vm1, %v20796_v9  ;;  %21125 = vmatmul.mubr.msk.f32.gmra.mxu1 %vm84_vm1, %v17486_v46  ;;  %v17579_v46 = vld [vmem:[%s28721_s1 + $0x490] sm:$0xff] }
 0xd72   :  { %22021 = vpow2.f32 %v8206_v32  ;;  %21188 = vmatprep.mubr.msk.f32.mxu1 %vm84_vm1, %v17553_v52  ;;  %v17580_v52 = vld [vmem:[%s28721_s1 + $0x498] sm:$0xff] }
 0xd73   :  { %v8520_v14 = vpop.f32.mrf.mxu1 }
 0xd74   :  { %20956 = vmatprep.mubr.msk.f32.mxu0 %vm84_vm1, %v8520_v14  ;;  %v17582_v14 = vld [vmem:[%s28721_s1 + $0x4a8] sm:$0xff] }
 0xd75   :  { %v20802_v18 = vpop.f32.mrf.mxu1  ;;  %20957 = vmatmul.mubr.msk.f32.gmra.mxu0 %vm84_vm1, %v20799_v17  ;;  %21189 = vmatmul.mubr.msk.f32.vlgmr.msra.gmra.mxu1 %vm84_vm1, %v17554_v2  ;;  %v17581_v17 = vld [vmem:[%s28721_s1 + $0x4a0] sm:$0xff] }
 0xd76   :  { %21191 = vmatprep.mubr.msk.f32.mxu1 %vm84_vm1, %v17555_v31 }
 0xd77   :  { %v8530_v50 = vpop.f32.mrf.mxu1 }
 0xd78   :  { %20959 = vmatprep.mubr.msk.f32.mxu0 %vm84_vm1, %v8530_v50 }
 0xd79   :  { %v20805_v63 = vpop.f32.mrf.mxu1  ;;  %20960 = vmatmul.mubr.msk.f32.gmra.mxu0 %vm84_vm1, %v20802_v18  ;;  %21192 = vmatmul.mubr.msk.f32.gmra.mxu1 %vm84_vm1, %v17556_v26 }
 0xd7a   :  { %21194 = vmatprep.mubr.msk.f32.mxu1 %vm84_vm1, %v17557_v61 }
 0xd7b   :  { %v8540_v55 = vpop.f32.mrf.mxu1 }
 0xd7c   :  { %20962 = vmatprep.mubr.msk.f32.mxu0 %vm84_vm1, %v8540_v55 }
 0xd7d   :  { %v20808_v16 = vpop.f32.mrf.mxu1  ;;  %20963 = vmatmul.mubr.msk.f32.gmra.mxu0 %vm84_vm1, %v20805_v63  ;;  %21195 = vmatmul.mubr.msk.f32.gmra.mxu1 %vm84_vm1, %v17558_v28  ;;  %v22020_v5 = vpop.eup %22019 }
 0xd7e   :  { %21197 = vmatprep.mubr.msk.f32.mxu1 %vm84_vm1, %v17559_v29  ;;  %v8205_v54 = vmul.f32 %v22020_v5, %v8198_v53 }
 0xd7f   :  { %v22022_v39 = vpop.eup %22021  ;;  %v8550_v11 = vpop.f32.mrf.mxu1 }
 0xd80   :  { %v8208_v51 = vmul.f32 %v22022_v39, %v8202_v62  ;;  %20965 = vmatprep.mubr.msk.f32.mxu0 %vm84_vm1, %v8550_v11  ;;  %v17578_v62 = vld [vmem:[%s28721_s1 + $0x488] sm:$0xff] }
 0xd81   :  { %v26221_v25 = vpop.f32.mrf.mxu1  ;;  %20966 = vmatmul.mubr.msk.f32.gmra.mxu0 %vm84_vm1, %v20808_v16  ;;  %21198 = vmatmul.mubr.msk.f32.gmra.mxu1 %vm84_vm1, %v17560_v58  ;;  %v17520_v58 = vld [vmem:[%s28722_s2 + $0x70] sm:$0xff]  ;;  %v17519_v11 = vld [vmem:[%s28722_s2 + $0x68] sm:$0xff] }
 0xd82   :  { %v8210_v33 = vrot.slane %v8208_v51, 1  ;;  %21200 = vmatprep.mubr.msk.f32.mxu1 %vm84_vm1, %v17561_v1  ;;  %v17518_v51 = vld [vmem:[%s28722_s2 + $0x60] sm:$0xff] }
 0xd83   :  { %v26229_v45 = vpop.f32.mrf.mxu1 }
 0xd84   :  { %28861 = vst [vmem:[#allocation17_spill] sm:$0xff] %v26229_v45  ;;  %v8212_v21 = vadd.f32 %v8210_v33, %v8205_v54 }
 0xd85   :  { %v26234_v57 = vpop.f32.mrf.mxu1  ;;  %21201 = vmatmul.mubr.msk.f32.gmra.mxu1 %vm84_vm1, %v17562_v59 }
 0xd86   :  { %v8213_v6 = vsub.f32 0.0, %v8212_v21  ;;  %21203 = vmatprep.mubr.msk.f32.mxu1 %vm84_vm1, %v17563_v36 }
 0xd87   :  { %v26241_v43 = vpop.f32.mrf.mxu1 }
 0xd88   :  { %8215 = vst.msk [vmem:[%s28735_s15] sm:$0x1] %vm8214_vm13, %v8213_v6 }
 0xd89   :  { %v26250_v12 = vpop.f32.mrf.mxu1  ;;  %21204 = vmatmul.mubr.msk.f32.gmra.mxu1 %vm84_vm1, %v17564_v19 }
 0xd8a   :  { %21206 = vmatprep.mubr.msk.f32.mxu1 %vm84_vm1, %v17565_v7 }
 0xd8b   :  { %v26257_v15 = vpop.f32.mrf.mxu1 }
 0xd8d   :  { %v26262_v0 = vpop.f32.mrf.mxu1  ;;  %21207 = vmatmul.mubr.msk.f32.gmra.mxu1 %vm84_vm1, %v17566_v41 }
 0xd8e   :  { %21209 = vmatprep.mubr.msk.f32.mxu1 %vm84_vm1, %v17567_v37 }
 0xd8f   :  { %v26269_v3 = vpop.f32.mrf.mxu1 }
 0xd91   :  { %v26274_v27 = vpop.f32.mrf.mxu1  ;;  %21210 = vmatmul.mubr.msk.f32.gmra.mxu1 %vm84_vm1, %v17568_v40 }
 0xd92   :  { %21212 = vmatprep.mubr.msk.f32.mxu1 %vm84_vm1, %v17569_v8 }
 0xd93   :  { %v26281_v49 = vpop.f32.mrf.mxu1 }
 0xd95   :  { %v26286_v35 = vpop.f32.mrf.mxu1  ;;  %21213 = vmatmul.mubr.msk.f32.gmra.mxu1 %vm84_vm1, %v17570_v20 }
 0xd96   :  { %21215 = vmatprep.mubr.msk.f32.mxu1 %vm84_vm1, %v17571_v30 }
 0xd97   :  { %v26293_v42 = vpop.f32.mrf.mxu1 }
 0xd99   :  { %v26298_v44 = vpop.f32.mrf.mxu1  ;;  %21216 = vmatmul.mubr.msk.f32.gmra.mxu1 %vm84_vm1, %v17572_v60 }
 0xd9a   :  { %21218 = vmatprep.mubr.msk.f32.mxu1 %vm84_vm1, %v17573_v38 }
 0xd9b   :  { %v26305_v47 = vpop.f32.mrf.mxu1 }
 0xd9d   :  { %v26310_v13 = vpop.f32.mrf.mxu1  ;;  %21219 = vmatmul.mubr.msk.f32.gmra.mxu1 %vm84_vm1, %v17574_v4 }
 0xd9e   :  { %21221 = vmatprep.mubr.msk.f32.mxu1 %vm84_vm1, %v17575_v34 }
 0xd9f   :  { %v26317_v53 = vpop.f32.mrf.mxu1 }
 0xda1   :  { %v26322_v9 = vpop.f32.mrf.mxu1  ;;  %21222 = vmatmul.mubr.msk.f32.gmra.mxu1 %vm84_vm1, %v17576_v10 }
 0xda2   :  { %21224 = vmatprep.mubr.msk.f32.mxu1 %vm84_vm1, %v17577_v24 }
 0xda3   :  { %v26329_v23 = vpop.f32.mrf.mxu1 }
 0xda5   :  { %v26334_v22 = vpop.f32.mrf.mxu1  ;;  %21225 = vmatmul.mubr.msk.f32.gmra.mxu1 %vm84_vm1, %v17578_v62 }
 0xda6   :  { %21227 = vmatprep.mubr.msk.f32.mxu1 %vm84_vm1, %v17579_v46 }
 0xda7   :  { %v26341_v32 = vpop.f32.mrf.mxu1 }
 0xda8   :  { %28862 = vst [vmem:[#allocation6_spill] sm:$0xff] %v26341_v32 }
 0xda9   :  { %v26346_v2 = vpop.f32.mrf.mxu1  ;;  %21228 = vmatmul.mubr.msk.f32.gmra.mxu1 %vm84_vm1, %v17580_v52 }
 0xdaa   :  { %21230 = vmatprep.mubr.msk.f32.mxu1 %vm84_vm1, %v17581_v17 }
 0xdab   :  { %v26353_v31 = vpop.f32.mrf.mxu1 }
 0xdac   :  { %28863 = vst [vmem:[#allocation7_spill] sm:$0xff] %v26353_v31 }
 0xdad   :  { %v26355_v18 = vpop.f32.mrf.mxu1  ;;  %21231 = vmatmul.mubr.msk.f32.gmra.mxu1 %vm84_vm1, %v17582_v14 }
 0xdaf   :  { %v26358_v26 = vpop.f32.mrf.mxu1 }
 0xdb0   :  { %28864 = vst [vmem:[#allocation39_spill] sm:$0xff] %v26358_v26 }
 0xdb1   :  { %v26360_v50 = vpop.f32.mrf.mxu1 }
 0xdb3   :  { %v26362_v61 = vpop.f32.mrf.mxu1 }
 0xdb4   :  { %28865 = vst [vmem:[#allocation40_spill] sm:$0xff] %v26362_v61 }
 0xdb5   :  { %v26364_v63 = vpop.f32.mrf.mxu1 }
 0xdb7   :  { %v26366_v28 = vpop.f32.mrf.mxu1 }
 0xdb8   :  { %28866 = vst [vmem:[#allocation16_spill] sm:$0xff] %v26366_v28 }
 0xdb9   :  { %v26368_v55 = vpop.f32.mrf.mxu1 }
 0xdbb   :  { %v26370_v29 = vpop.f32.mrf.mxu1 }
 0xdbc   :  { %28867 = vst [vmem:[#allocation4_spill] sm:$0xff] %v26370_v29 }
 0xdbd   :  { %v20978_v16 = vpop.f32.mrf.mxu1 }
 0xdbf   :  { %v9704_v5 = vpop.f32.mrf.mxu1 }
 0xdc0   :  { %21029 = vmatprep.mubr.msk.f32.mxu0 %vm84_vm1, %v9704_v5 }
 0xdc1   :  { %v20981_v39 = vpop.f32.mrf.mxu1  ;;  %21030 = vmatmul.mubr.msk.f32.vlgmr.msra.gmra.mxu0 %vm84_vm1, %v20978_v16 }
 0xdc2   :  { %21128 = vmatpush3.msk.msra.mxu0 %vm175_vm0, %v26134_v48  ;;  %v17617_v48 = vld [vmem:[%s28722_s2 + $0x98] sm:$0xf] }
 0xdc3   :  { %v9714_v1 = vpop.f32.mrf.mxu1  ;;  %21129 = vmatprep.subr.mxu0 %v17520_v58 }
 0xdc4   :  { %21032 = vmatprep.mubr.msk.f32.mxu0 %vm84_vm1, %v9714_v1  ;;  %21130 = vmatpush3.msra.mxu0 %v17520_v58  ;;  %v17615_v1 = vld [vmem:[%s28722_s2 + $0x88] sm:$0xff] }
 0xdc5   :  { %v20984_v54 = vpop.f32.mrf.mxu1  ;;  %21033 = vmatmul.mubr.msk.f32.gmra.mxu0 %vm84_vm1, %v20981_v39  ;;  %21131 = vmatprep.subr.mxu0 %v17519_v11  ;;  %v17616_v39 = vld [vmem:[%s28722_s2 + $0x90] sm:$0xff] }
 0xdc6   :  { %21132 = vmatpush3.msra.mxu0 %v17519_v11 }
 0xdc7   :  { %v9724_v33 = vpop.f32.mrf.mxu1  ;;  %21133 = vmatprep.subr.mxu0 %v17518_v51 }
 0xdc8   :  { %21035 = vmatprep.mubr.msk.f32.mxu0 %vm84_vm1, %v9724_v33  ;;  %21134 = vmatpush3.msra.mxu0 %v17518_v51 }
 0xdc9   :  { %v20987_v59 = vpop.f32.mrf.mxu1  ;;  %21036 = vmatmul.mubr.msk.f32.gmra.mxu0 %vm84_vm1, %v20984_v54  ;;  %21233 = vmatprep.subr.msk.mxu0 %vm175_vm0, %v17617_v48  ;;  %v17614_v54 = vld [vmem:[%s28722_s2 + $0x80] sm:$0xff] }
 0xdcb   :  { %v9734_v36 = vpop.f32.mrf.mxu1 }
 0xdcc   :  { %21038 = vmatprep.mubr.msk.f32.mxu0 %vm84_vm1, %v9734_v36 }
 0xdcd   :  { %v20990_v21 = vpop.f32.mrf.mxu1  ;;  %21039 = vmatmul.mubr.msk.f32.gmra.mxu0 %vm84_vm1, %v20987_v59 }
 0xdcf   :  { %v9744_v6 = vpop.f32.mrf.mxu1 }
 0xdd0   :  { %21041 = vmatprep.mubr.msk.f32.mxu0 %vm84_vm1, %v9744_v6 }
 0xdd1   :  { %v20993_v19 = vpop.f32.mrf.mxu1  ;;  %21042 = vmatmul.mubr.msk.f32.gmra.mxu0 %vm84_vm1, %v20990_v21 }
 0xdd3   :  { %v9754_v7 = vpop.f32.mrf.mxu1 }
 0xdd4   :  { %21044 = vmatprep.mubr.msk.f32.mxu0 %vm84_vm1, %v9754_v7 }
 0xdd5   :  { %v20996_v41 = vpop.f32.mrf.mxu1  ;;  %21045 = vmatmul.mubr.msk.f32.gmra.mxu0 %vm84_vm1, %v20993_v19 }
 0xdd7   :  { %v9764_v37 = vpop.f32.mrf.mxu1 }
 0xdd8   :  { %21047 = vmatprep.mubr.msk.f32.mxu0 %vm84_vm1, %v9764_v37 }
 0xdd9   :  { %v20999_v40 = vpop.f32.mrf.mxu1  ;;  %21048 = vmatmul.mubr.msk.f32.gmra.mxu0 %vm84_vm1, %v20996_v41 }
 0xddb   :  { %v9774_v8 = vpop.f32.mrf.mxu1 }
 0xddc   :  { %21050 = vmatprep.mubr.msk.f32.mxu0 %vm84_vm1, %v9774_v8 }
 0xddd   :  { %v21002_v20 = vpop.f32.mrf.mxu1  ;;  %21051 = vmatmul.mubr.msk.f32.gmra.mxu0 %vm84_vm1, %v20999_v40 }
 0xddf   :  { %v9784_v30 = vpop.f32.mrf.mxu1 }
 0xde0   :  { %21053 = vmatprep.mubr.msk.f32.mxu0 %vm84_vm1, %v9784_v30 }
 0xde1   :  { %v21005_v60 = vpop.f32.mrf.mxu1  ;;  %21054 = vmatmul.mubr.msk.f32.gmra.mxu0 %vm84_vm1, %v21002_v20 }
 0xde3   :  { %v9794_v38 = vpop.f32.mrf.mxu1 }
 0xde4   :  { %21056 = vmatprep.mubr.msk.f32.mxu0 %vm84_vm1, %v9794_v38 }
 0xde5   :  { %v21008_v4 = vpop.f32.mrf.mxu1  ;;  %21057 = vmatmul.mubr.msk.f32.gmra.mxu0 %vm84_vm1, %v21005_v60 }
 0xde7   :  { %v9804_v34 = vpop.f32.mrf.mxu1 }
 0xde8   :  { %21059 = vmatprep.mubr.msk.f32.mxu0 %vm84_vm1, %v9804_v34 }
 0xde9   :  { %v21011_v10 = vpop.f32.mrf.mxu1  ;;  %21060 = vmatmul.mubr.msk.f32.gmra.mxu0 %vm84_vm1, %v21008_v4 }
 0xdeb   :  { %v9814_v24 = vpop.f32.mrf.mxu1 }
 0xdec   :  { %21062 = vmatprep.mubr.msk.f32.mxu0 %vm84_vm1, %v9814_v24 }
 0xded   :  { %v21014_v62 = vpop.f32.mrf.mxu1  ;;  %21063 = vmatmul.mubr.msk.f32.gmra.mxu0 %vm84_vm1, %v21011_v10 }
 0xdef   :  { %v9824_v46 = vpop.f32.mrf.mxu1 }
 0xdf0   :  { %21065 = vmatprep.mubr.msk.f32.mxu0 %vm84_vm1, %v9824_v46 }
 0xdf1   :  { %v21017_v52 = vpop.f32.mrf.mxu1  ;;  %21066 = vmatmul.mubr.msk.f32.gmra.mxu0 %vm84_vm1, %v21014_v62 }
 0xdf3   :  { %v9834_v17 = vpop.f32.mrf.mxu1 }
 0xdf4   :  { %21068 = vmatprep.mubr.msk.f32.mxu0 %vm84_vm1, %v9834_v17 }
 0xdf5   :  { %v21020_v14 = vpop.f32.mrf.mxu1  ;;  %21069 = vmatmul.mubr.msk.f32.gmra.mxu0 %vm84_vm1, %v21017_v52 }
 0xdf7   :  { %v9844_v16 = vpop.f32.mrf.mxu1 }
 0xdf8   :  { %21071 = vmatprep.mubr.msk.f32.mxu0 %vm84_vm1, %v9844_v16 }
 0xdf9   :  { %21072 = vmatmul.mubr.msk.f32.gmra.mxu0 %vm84_vm1, %v21020_v14  ;;  %v21084_v5 = vpop.f32.mrf.mxu1 }
 0xdfb   :  { %v10381_v58 = vpop.f32.mrf.mxu1 }
 0xdfc   :  { %21135 = vmatprep.mubr.msk.f32.mxu0 %vm84_vm1, %v10381_v58 }
 0xdfd   :  { %v21087_v11 = vpop.f32.mrf.mxu1  ;;  %21136 = vmatmul.mubr.msk.f32.vlgmr.msra.gmra.mxu0 %vm84_vm1, %v21084_v5 }
 0xdfe   :  { %21234 = vmatpush3.msk.msra.mxu0 %vm175_vm0, %v17617_v48 }
 0xdff   :  { %v10391_v51 = vpop.f32.mrf.mxu1  ;;  %21235 = vmatprep.subr.mxu0 %v17616_v39 }
 0xe00   :  { %21138 = vmatprep.mubr.msk.f32.mxu0 %vm84_vm1, %v10391_v51  ;;  %21236 = vmatpush3.msra.mxu0 %v17616_v39 }
 0xe01   :  { %v21090_v33 = vpop.f32.mrf.mxu1  ;;  %21139 = vmatmul.mubr.msk.f32.gmra.mxu0 %vm84_vm1, %v21087_v11  ;;  %21237 = vmatprep.subr.mxu0 %v17615_v1 }
 0xe02   :  { %21238 = vmatpush3.msra.mxu0 %v17615_v1 }
 0xe03   :  { %v10401_v59 = vpop.f32.mrf.mxu1  ;;  %21239 = vmatprep.subr.mxu0 %v17614_v54 }
 0xe04   :  { %21141 = vmatprep.mubr.msk.f32.mxu0 %vm84_vm1, %v10401_v59  ;;  %21240 = vmatpush3.msra.mxu0 %v17614_v54 }
 0xe05   :  { %v21093_v48 = vpop.f32.mrf.mxu1  ;;  %21142 = vmatmul.mubr.msk.f32.gmra.mxu0 %vm84_vm1, %v21090_v33  ;;  %21286 = vmatprep.subr.mxu0 %v28860_v56 }
 0xe07   :  { %v10411_v36 = vpop.f32.mrf.mxu1 }
 0xe08   :  { %21144 = vmatprep.mubr.msk.f32.mxu0 %vm84_vm1, %v10411_v36 }
 0xe09   :  { %v21096_v21 = vpop.f32.mrf.mxu1  ;;  %21145 = vmatmul.mubr.msk.f32.gmra.mxu0 %vm84_vm1, %v21093_v48  ;;  %v26436_v6 = vpop.f32.mrf.mxu0 }
 0xe0b   :  { %v10421_v19 = vpop.f32.mrf.mxu1  ;;  %v26440_v41 = vpop.f32.mrf.mxu0 }
 0xe0c   :  { %21147 = vmatprep.mubr.msk.f32.mxu0 %vm84_vm1, %v10421_v19  ;;  %28868 = vst [vmem:[#allocation5_spill] sm:$0xff] %v26440_v41 }
 0xe0d   :  { %v21099_v7 = vpop.f32.mrf.mxu1  ;;  %21148 = vmatmul.mubr.msk.f32.gmra.mxu0 %vm84_vm1, %v21096_v21  ;;  %v26444_v8 = vpop.f32.mrf.mxu0 }
 0xe0f   :  { %v10431_v37 = vpop.f32.mrf.mxu1  ;;  %v26448_v60 = vpop.f32.mrf.mxu0 }
 0xe10   :  { %21150 = vmatprep.mubr.msk.f32.mxu0 %vm84_vm1, %v10431_v37 }
 0xe11   :  { %v21102_v40 = vpop.f32.mrf.mxu1  ;;  %21151 = vmatmul.mubr.msk.f32.gmra.mxu0 %vm84_vm1, %v21099_v7  ;;  %v26452_v34 = vpop.f32.mrf.mxu0 }
 0xe13   :  { %v10441_v20 = vpop.f32.mrf.mxu1  ;;  %v26456_v62 = vpop.f32.mrf.mxu0 }
 0xe14   :  { %21153 = vmatprep.mubr.msk.f32.mxu0 %vm84_vm1, %v10441_v20 }
 0xe15   :  { %v21105_v30 = vpop.f32.mrf.mxu1  ;;  %21154 = vmatmul.mubr.msk.f32.gmra.mxu0 %vm84_vm1, %v21102_v40  ;;  %v26460_v17 = vpop.f32.mrf.mxu0 }
 0xe17   :  { %v10451_v38 = vpop.f32.mrf.mxu1  ;;  %v26464_v5 = vpop.f32.mrf.mxu0 }
 0xe18   :  { %21156 = vmatprep.mubr.msk.f32.mxu0 %vm84_vm1, %v10451_v38 }
 0xe19   :  { %v21108_v4 = vpop.f32.mrf.mxu1  ;;  %21157 = vmatmul.mubr.msk.f32.gmra.mxu0 %vm84_vm1, %v21105_v30  ;;  %v26468_v11 = vpop.f32.mrf.mxu0 }
 0xe1b   :  { %v10461_v10 = vpop.f32.mrf.mxu1  ;;  %v26472_v54 = vpop.f32.mrf.mxu0 }
 0xe1c   :  { %21159 = vmatprep.mubr.msk.f32.mxu0 %vm84_vm1, %v10461_v10 }
 0xe1d   :  { %v21111_v24 = vpop.f32.mrf.mxu1  ;;  %21160 = vmatmul.mubr.msk.f32.gmra.mxu0 %vm84_vm1, %v21108_v4  ;;  %v26476_v48 = vpop.f32.mrf.mxu0 }
 0xe1f   :  { %v10471_v46 = vpop.f32.mrf.mxu1  ;;  %v26480_v19 = vpop.f32.mrf.mxu0 }
 0xe20   :  { %21162 = vmatprep.mubr.msk.f32.mxu0 %vm84_vm1, %v10471_v46 }
 0xe21   :  { %v21114_v52 = vpop.f32.mrf.mxu1  ;;  %21163 = vmatmul.mubr.msk.f32.gmra.mxu0 %vm84_vm1, %v21111_v24  ;;  %v26484_v40 = vpop.f32.mrf.mxu0 }
 0xe23   :  { %v10481_v14 = vpop.f32.mrf.mxu1  ;;  %v26488_v38 = vpop.f32.mrf.mxu0 }
 0xe24   :  { %21165 = vmatprep.mubr.msk.f32.mxu0 %vm84_vm1, %v10481_v14  ;;  %v9430_v28 = vadd.f32 %v26488_v38, %v26305_v47 }
 0xe25   :  { %v21117_v16 = vpop.f32.mrf.mxu1  ;;  %21166 = vmatmul.mubr.msk.f32.gmra.mxu0 %vm84_vm1, %v21114_v52  ;;  %v26492_v24 = vpop.f32.mrf.mxu0 }
 0xe27   :  { %v10491_v58 = vpop.f32.mrf.mxu1  ;;  %v26496_v14 = vpop.f32.mrf.mxu0 }
 0xe28   :  { %21168 = vmatprep.mubr.msk.f32.mxu0 %vm84_vm1, %v10491_v58 }
 0xe29   :  { %v21120_v39 = vpop.f32.mrf.mxu1  ;;  %21169 = vmatmul.mubr.msk.f32.gmra.mxu0 %vm84_vm1, %v21117_v16 }
 0xe2b   :  { %v10501_v1 = vpop.f32.mrf.mxu1 }
 0xe2c   :  { %21171 = vmatprep.mubr.msk.f32.mxu0 %vm84_vm1, %v10501_v1 }
 0xe2d   :  { %v21123_v51 = vpop.f32.mrf.mxu1  ;;  %21172 = vmatmul.mubr.msk.f32.gmra.mxu0 %vm84_vm1, %v21120_v39  ;;  %v26500_v39 = vpop.f32.mrf.mxu0 }
 0xe2f   :  { %v10511_v33 = vpop.f32.mrf.mxu1 }
 0xe30   :  { %21174 = vmatprep.mubr.msk.f32.mxu0 %vm84_vm1, %v10511_v33  ;;  %v26504_v33 = vpop.f32.mrf.mxu0 }
 0xe31   :  { %v21126_v59 = vpop.f32.mrf.mxu1  ;;  %21175 = vmatmul.mubr.msk.f32.gmra.mxu0 %vm84_vm1, %v21123_v51 }
 0xe33   :  { %v10521_v36 = vpop.f32.mrf.mxu1 }
 0xe34   :  { %21177 = vmatprep.mubr.msk.f32.mxu0 %vm84_vm1, %v10521_v36 }
 0xe35   :  { %21178 = vmatmul.mubr.msk.f32.gmra.mxu0 %vm84_vm1, %v21126_v59  ;;  %v21190_v21 = vpop.f32.mrf.mxu1 }
 0xe37   :  { %v11058_v7 = vpop.f32.mrf.mxu1 }
 0xe38   :  { %21241 = vmatprep.mubr.msk.f32.mxu0 %vm84_vm1, %v11058_v7 }
 0xe39   :  { %v21193_v37 = vpop.f32.mrf.mxu1  ;;  %21242 = vmatmul.mubr.msk.f32.vlgmr.msra.gmra.mxu0 %vm84_vm1, %v21190_v21  ;;  %v26508_v21 = vpop.f32.mrf.mxu0 }
 0xe3b   :  { %v11068_v20 = vpop.f32.mrf.mxu1 }
 0xe3c   :  { %21244 = vmatprep.mubr.msk.f32.mxu0 %vm84_vm1, %v11068_v20  ;;  %v26512_v20 = vpop.f32.mrf.mxu0 }
 0xe3d   :  { %v21196_v30 = vpop.f32.mrf.mxu1  ;;  %21245 = vmatmul.mubr.msk.f32.gmra.mxu0 %vm84_vm1, %v21193_v37  ;;  %28869 = vst [vmem:[#allocation37_spill] sm:$0xff] %v26512_v20 }
 0xe3f   :  { %v11078_v4 = vpop.f32.mrf.mxu1 }
 0xe40   :  { %21247 = vmatprep.mubr.msk.f32.mxu0 %vm84_vm1, %v11078_v4 }
 0xe41   :  { %v21199_v10 = vpop.f32.mrf.mxu1  ;;  %21248 = vmatmul.mubr.msk.f32.gmra.mxu0 %vm84_vm1, %v21196_v30 }
 0xe43   :  { %v11088_v46 = vpop.f32.mrf.mxu1 }
 0xe44   :  { %21250 = vmatprep.mubr.msk.f32.mxu0 %vm84_vm1, %v11088_v46 }
 0xe45   :  { %v21202_v52 = vpop.f32.mrf.mxu1  ;;  %21251 = vmatmul.mubr.msk.f32.gmra.mxu0 %vm84_vm1, %v21199_v10  ;;  %v26516_v10 = vpop.f32.mrf.mxu0 }
 0xe47   :  { %v11098_v16 = vpop.f32.mrf.mxu1 }
 0xe48   :  { %21253 = vmatprep.mubr.msk.f32.mxu0 %vm84_vm1, %v11098_v16  ;;  %v26520_v16 = vpop.f32.mrf.mxu0 }
 0xe49   :  { %v21205_v58 = vpop.f32.mrf.mxu1  ;;  %21254 = vmatmul.mubr.msk.f32.gmra.mxu0 %vm84_vm1, %v21202_v52  ;;  %28870 = vst [vmem:[#allocation38_spill] sm:$0xff] %v26520_v16 }
 0xe4b   :  { %v11108_v1 = vpop.f32.mrf.mxu1 }
 0xe4c   :  { %21256 = vmatprep.mubr.msk.f32.mxu0 %vm84_vm1, %v11108_v1 }
 0xe4d   :  { %v21208_v51 = vpop.f32.mrf.mxu1  ;;  %21257 = vmatmul.mubr.msk.f32.gmra.mxu0 %vm84_vm1, %v21205_v58 }
 0xe4f   :  { %v11118_v59 = vpop.f32.mrf.mxu1 }
 0xe50   :  { %21259 = vmatprep.mubr.msk.f32.mxu0 %vm84_vm1, %v11118_v59 }
 0xe51   :  { %v21211_v36 = vpop.f32.mrf.mxu1  ;;  %21260 = vmatmul.mubr.msk.f32.gmra.mxu0 %vm84_vm1, %v21208_v51  ;;  %v26524_v51 = vpop.f32.mrf.mxu0 }
 0xe53   :  { %v11128_v7 = vpop.f32.mrf.mxu1 }
 0xe54   :  { %21262 = vmatprep.mubr.msk.f32.mxu0 %vm84_vm1, %v11128_v7  ;;  %v26528_v7 = vpop.f32.mrf.mxu0 }
 0xe55   :  { %v21214_v37 = vpop.f32.mrf.mxu1  ;;  %21263 = vmatmul.mubr.msk.f32.gmra.mxu0 %vm84_vm1, %v21211_v36  ;;  %28871 = vst [vmem:[#allocation15_spill] sm:$0xff] %v26528_v7 }
 0xe57   :  { %v11138_v30 = vpop.f32.mrf.mxu1 }
 0xe58   :  { %21265 = vmatprep.mubr.msk.f32.mxu0 %vm84_vm1, %v11138_v30 }
 0xe59   :  { %v21217_v4 = vpop.f32.mrf.mxu1  ;;  %21266 = vmatmul.mubr.msk.f32.gmra.mxu0 %vm84_vm1, %v21214_v37 }
 0xe5b   :  { %v11148_v46 = vpop.f32.mrf.mxu1 }
 0xe5c   :  { %21268 = vmatprep.mubr.msk.f32.mxu0 %vm84_vm1, %v11148_v46 }
 0xe5d   :  { %v21220_v52 = vpop.f32.mrf.mxu1  ;;  %21269 = vmatmul.mubr.msk.f32.gmra.mxu0 %vm84_vm1, %v21217_v4  ;;  %v20961_v4 = vpop.f32.mrf.mxu0 }
 0xe5f   :  { %v11158_v58 = vpop.f32.mrf.mxu1 }
 0xe60   :  { %21271 = vmatprep.mubr.msk.f32.mxu0 %vm84_vm1, %v11158_v58  ;;  %v26534_v58 = vpop.f32.mrf.mxu0 }
 0xe61   :  { %v21223_v1 = vpop.f32.mrf.mxu1  ;;  %21272 = vmatmul.mubr.msk.f32.gmra.mxu0 %vm84_vm1, %v21220_v52  ;;  %28872 = vst [vmem:[#allocation2_spill] sm:$0xff] %v26534_v58 }
 0xe63   :  { %v11168_v59 = vpop.f32.mrf.mxu1 }
 0xe64   :  { %21274 = vmatprep.mubr.msk.f32.mxu0 %vm84_vm1, %v11168_v59 }
 0xe65   :  { %v21226_v36 = vpop.f32.mrf.mxu1  ;;  %21275 = vmatmul.mubr.msk.f32.gmra.mxu0 %vm84_vm1, %v21223_v1  ;;  %v20964_v1 = vpop.f32.mrf.mxu0 }
 0xe67   :  { %v11178_v37 = vpop.f32.mrf.mxu1 }
 0xe68   :  { %21277 = vmatprep.mubr.msk.f32.mxu0 %vm84_vm1, %v11178_v37  ;;  %v26540_v37 = vpop.f32.mrf.mxu0 }
 0xe69   :  { %v21229_v30 = vpop.f32.mrf.mxu1  ;;  %21278 = vmatmul.mubr.msk.f32.gmra.mxu0 %vm84_vm1, %v21226_v36  ;;  %28873 = vst [vmem:[#allocation3_spill] sm:$0xff] %v26540_v37 }
 0xe6a   :  { %v20967_v36 = vpop.f32.mrf.mxu0 }
 0xe6b   :  { %v11188_v46 = vpop.f32.mrf.mxu1 }
 0xe6c   :  { %21280 = vmatprep.mubr.msk.f32.mxu0 %vm84_vm1, %v11188_v46  ;;  %v26542_v20 = vpop.f32.mrf.mxu0  ;;  %v9375_v46 = vadd.f32 %v26436_v6, %v26221_v25  ;;  %v9405_v25 = vadd.f32 %v26460_v17, %v26262_v0  ;;  %v9435_v0 = vadd.f32 %v26484_v40, %v26298_v44  ;;  %v9465_v44 = vadd.f32 %v26508_v21, %v26334_v22 }
 0xe6d   :  { %v21232_v52 = vpop.f32.mrf.mxu1  ;;  %21281 = vmatmul.mubr.msk.f32.gmra.mxu0 %vm84_vm1, %v21229_v30  ;;  %28874 = vst [vmem:[#allocation35_spill] sm:$0xff] %v26542_v20  ;;  %v9495_v22 = vadd.f32 %v20961_v4, %v26360_v50 }
 0xe6f   :  { %v11198_v59 = vpop.f32.mrf.mxu1 }
 0xe70   :  { %21283 = vmatprep.mubr.msk.f32.mxu0 %vm84_vm1, %v11198_v59  ;;  %v9385_v59 = vadd.f32 %v26444_v8, %v26234_v57  ;;  %v9415_v57 = vadd.f32 %v26468_v11, %v26274_v27  ;;  %v9445_v27 = vadd.f32 %v26492_v24, %v26310_v13  ;;  %v9475_v13 = vadd.f32 %v26516_v10, %v26346_v2 }
 0xe71   :  { %21284 = vmatmul.mubr.msk.f32.gmra.mxu0 %vm84_vm1, %v21232_v52 }
 0xe72   :  { %21292 = vmatprep.mubr.msk.f32.mxu0 %vm22036_vm4, %v28860_v56  ;;  %v9395_v56 = vadd.f32 %v26452_v34, %v26250_v12  ;;  %v9425_v12 = vadd.f32 %v26476_v48, %v26286_v35  ;;  %v9455_v35 = vadd.f32 %v26500_v39, %v26322_v9  ;;  %v9485_v9 = vadd.f32 %v26524_v51, %v26355_v18 }
 0xe81   :  { %v21031_v30 = vpop.f32.mrf.mxu0 }
 0xe82   :  { %v10166_v32 = vadd.f32 %v21031_v30, %v9375_v46 }
 0xe83   :  { %v26546_v16 = vpop.f32.mrf.mxu0 }
 0xe84   :  { %28875 = vst [vmem:[#allocation36_spill] sm:$0xff] %v26546_v16 }
 0xe85   :  { %v21034_v52 = vpop.f32.mrf.mxu0 }
 0xe86   :  { %v10168_v31 = vadd.f32 %v21034_v52, %v9385_v59 }
 0xe87   :  { %v26550_v7 = vpop.f32.mrf.mxu0 }
 0xe89   :  { %v21037_v26 = vpop.f32.mrf.mxu0 }
 0xe8a   :  { %v10170_v58 = vadd.f32 %v21037_v26, %v9395_v56 }
 0xe8b   :  { %v26554_v61 = vpop.f32.mrf.mxu0 }
 0xe8d   :  { %v21040_v6 = vpop.f32.mrf.mxu0 }
 0xe8e   :  { %v10172_v46 = vadd.f32 %v21040_v6, %v9405_v25 }
 0xe8f   :  { %v26558_v30 = vpop.f32.mrf.mxu0 }
 0xe91   :  { %v21043_v8 = vpop.f32.mrf.mxu0 }
 0xe92   :  { %v10174_v59 = vadd.f32 %v21043_v8, %v9415_v57 }
 0xe93   :  { %v26562_v52 = vpop.f32.mrf.mxu0 }
 0xe95   :  { %v21046_v56 = vpop.f32.mrf.mxu0 }
 0xe96   :  { %v10176_v26 = vadd.f32 %v21046_v56, %v9425_v12 }
 0xe97   :  { %v26566_v34 = vpop.f32.mrf.mxu0 }
 0xe99   :  { %v21049_v17 = vpop.f32.mrf.mxu0 }
 0xe9a   :  { %v10178_v25 = vadd.f32 %v21049_v17, %v9435_v0 }
 0xe9b   :  { %v26570_v6 = vpop.f32.mrf.mxu0 }
 0xe9d   :  { %v21052_v11 = vpop.f32.mrf.mxu0 }
 0xe9e   :  { %v26574_v57 = vadd.f32 %v21052_v11, %v9445_v27 }
 0xe9f   :  { %v26576_v8 = vpop.f32.mrf.mxu0 }
 0xea1   :  { %v21055_v48 = vpop.f32.mrf.mxu0 }
 0xea2   :  { %v10182_v12 = vadd.f32 %v21055_v48, %v9455_v35 }
 0xea3   :  { %v26580_v56 = vpop.f32.mrf.mxu0 }
 0xea5   :  { %v21058_v40 = vpop.f32.mrf.mxu0 }
 0xea6   :  { %v10184_v0 = vadd.f32 %v21058_v40, %v9465_v44 }
 0xea7   :  { %v26584_v17 = vpop.f32.mrf.mxu0 }
 0xea8   :  { %28876 = vst [vmem:[#allocation14_spill] sm:$0xff] %v26584_v17  ;;  %v9505_v17 = vadd.f32 %v20964_v1, %v26364_v63 }
 0xea9   :  { %v21061_v24 = vpop.f32.mrf.mxu0 }
 0xeaa   :  { %v10186_v27 = vadd.f32 %v21061_v24, %v9475_v13  ;;  %v9515_v24 = vadd.f32 %v20967_v36, %v26368_v55 }
 0xeab   :  { %v26588_v11 = vpop.f32.mrf.mxu0 }
 0xeac   :  { %28877 = vst [vmem:[#allocation32_spill] sm:$0xff] %v26588_v11 }
 0xead   :  { %v21064_v39 = vpop.f32.mrf.mxu0 }
 0xeae   :  { %v10188_v35 = vadd.f32 %v21064_v39, %v9485_v9 }
 0xeaf   :  { %v26592_v48 = vpop.f32.mrf.mxu0 }
 0xeb0   :  { %28878 = vst [vmem:[#allocation34_spill] sm:$0xff] %v26592_v48 }
 0xeb1   :  { %v21067_v21 = vpop.f32.mrf.mxu0 }
 0xeb2   :  { %v10190_v44 = vadd.f32 %v21067_v21, %v9495_v22 }
 0xeb3   :  { %v26595_v40 = vpop.f32.mrf.mxu0 }
 0xeb4   :  { %28879 = vst [vmem:[#allocation31_spill] sm:$0xff] %v26595_v40 }
 0xeb5   :  { %v21070_v2 = vpop.f32.mrf.mxu0 }
 0xeb6   :  { %v10192_v10 = vadd.f32 %v21070_v2, %v9505_v17 }
 0xeb7   :  { %v26598_v13 = vpop.f32.mrf.mxu0 }
 0xeb8   :  { %28880 = vst [vmem:[#allocation28_spill] sm:$0xff] %v26598_v13 }
 0xeb9   :  { %v21073_v11 = vpop.f32.mrf.mxu0 }
 0xeba   :  { %v10194_v18 = vadd.f32 %v21073_v11, %v9515_v24 }
 0xebb   :  { %v26601_v51 = vpop.f32.mrf.mxu0 }
 0xebc   :  { %28881 = vst [vmem:[#allocation41_spill] sm:$0xff] %v26601_v51 }
 0xebd   :  { %v21137_v9 = vpop.f32.mrf.mxu0 }
 0xebe   :  { %v26603_v39 = vadd.f32 %v21137_v9, %v10166_v32 }
 0xebf   :  { %v26605_v50 = vpop.f32.mrf.mxu0 }
 0xec0   :  { %28882 = vst [vmem:[#allocation21_spill] sm:$0xff] %v26603_v39  ;;  %28883 = vst [vmem:[#allocation29_spill] sm:$0xff] %v26605_v50 }
 0xec1   :  { %v21140_v4 = vpop.f32.mrf.mxu0 }
 0xec2   :  { %v26607_v22 = vadd.f32 %v21140_v4, %v10168_v31 }
 0xec3   :  { %v26609_v21 = vpop.f32.mrf.mxu0 }
 0xec4   :  { %28884 = vst [vmem:[#allocation33_spill] sm:$0xff] %v26607_v22  ;;  %28885 = vst [vmem:[#allocation30_spill] sm:$0xff] %v26609_v21  ;;  %v10177_v22 = vadd.f32 %v26570_v6, %v9430_v28  ;;  %v9410_v28 = vadd.f32 %v26472_v54, %v26281_v49 }
 0xec5   :  { %v21143_v63 = vpop.f32.mrf.mxu0 }
 0xec6   :  { %v26611_v1 = vadd.f32 %v21143_v63, %v10170_v58 }
 0xec7   :  { %v26613_v17 = vpop.f32.mrf.mxu0 }
 0xec8   :  { %28886 = vst [vmem:[#allocation9_spill] sm:$0xff] %v26611_v1 }
 0xec9   :  { %v21146_v55 = vpop.f32.mrf.mxu0 }
 0xeca   :  { %v26615_v36 = vadd.f32 %v21146_v55, %v10172_v46 }
 0xecb   :  { %v26617_v11 = vpop.f32.mrf.mxu0 }
 0xecd   :  { %v21149_v2 = vpop.f32.mrf.mxu0 }
 0xece   :  { %v26619_v32 = vadd.f32 %v21149_v2, %v10174_v59 }
 0xecf   :  { %v26621_v24 = vpop.f32.mrf.mxu0 }
 0xed1   :  { %v21152_v9 = vpop.f32.mrf.mxu0 }
 0xed2   :  { %v26623_v31 = vadd.f32 %v21152_v9, %v10176_v26 }
 0xed3   :  { %v10743_v4 = vpop.f32.mrf.mxu0 }
 0xed5   :  { %v21155_v48 = vpop.f32.mrf.mxu0 }
 0xed6   :  { %v26625_v40 = vadd.f32 %v21155_v48, %v10178_v25 }
 0xed7   :  { %v10753_v58 = vpop.f32.mrf.mxu0 }
 0xed8   :  { %v10854_v1 = vadd.f32 %v10753_v58, %v10177_v22 }
 0xed9   :  { %v21158_v63 = vpop.f32.mrf.mxu0 }
 0xeda   :  { %v10857_v38 = vadd.f32 %v21158_v63, %v26574_v57 }
 0xedb   :  { %v10763_v51 = vpop.f32.mrf.mxu0 }
 0xedd   :  { %v21161_v13 = vpop.f32.mrf.mxu0 }
 0xede   :  { %v26627_v46 = vadd.f32 %v21161_v13, %v10182_v12 }
 0xedf   :  { %v26629_v55 = vpop.f32.mrf.mxu0 }
 0xee0   :  { %28887 = vst [vmem:[#allocation22_spill] sm:$0xff] %v26627_v46 }
 0xee1   :  { %v21164_v20 = vpop.f32.mrf.mxu0 }
 0xee2   :  { %v26631_v59 = vadd.f32 %v21164_v20, %v10184_v0  ;;  %v11657_v0 = vpop.permute.xlu0 %11656 }
 0xee3   :  { %v26633_v2 = vpop.f32.mrf.mxu0 }
 0xee4   :  { %28888 = vst [vmem:[#allocation8_spill] sm:$0xff] %v26631_v59  ;;  %28889 = vst [vmem:[#allocation24_spill] sm:$0xff] %v26633_v2 }
 0xee5   :  { %v21167_v29 = vpop.f32.mrf.mxu0 }
 0xee6   :  { %v26635_v26 = vadd.f32 %v21167_v29, %v10186_v27 }
 0xee7   :  { %v26637_v9 = vpop.f32.mrf.mxu0 }
 0xee8   :  { %28890 = vst [vmem:[#allocation25_spill] sm:$0xff] %v26635_v26  ;;  %28891 = vst [vmem:[#allocation26_spill] sm:$0xff] %v26637_v9 }
 0xee9   :  { %v21170_v25 = vpop.f32.mrf.mxu0 }
 0xeea   :  { %v26639_v48 = vadd.f32 %v21170_v25, %v10188_v35  ;;  %v26655_v35 = vpop.permute.xlu1 %11661  ;;  %v11652_v25 = vpop.permute.xlu0 %11651 }
 0xeeb   :  { %v26641_v39 = vpop.f32.mrf.mxu0 }
 0xeec   :  { %28892 = vst [vmem:[#allocation23_spill] sm:$0xff] %v26639_v48  ;;  %28893 = vst [vmem:[#allocation19_spill] sm:$0xff] %v26641_v39 }
 0xeed   :  { %v21173_v37 = vpop.f32.mrf.mxu0 }
 0xeee   :  { %v26643_v12 = vadd.f32 %v21173_v37, %v10190_v44  ;;  %v11647_v48 = vpop.permute.xlu1 %11646 }
 0xeef   :  { %v26645_v13 = vpop.f32.mrf.mxu0 }
 0xef0   :  { %28894 = vst [vmem:[#allocation27_spill] sm:$0xff] %v26643_v12  ;;  %28895 = vst [vmem:[#allocation18_spill] sm:$0xff] %v26645_v13 }
 0xef1   :  { %v21176_v46 = vpop.f32.mrf.mxu0 }
 0xef2   :  { %v26647_v20 = vadd.f32 %v21176_v46, %v10192_v10  ;;  %v11642_v10 = vpop.permute.xlu0 %11641 }
 0xef3   :  { %v26649_v59 = vpop.f32.mrf.mxu0 }
 0xef4   :  { %28896 = vst [vmem:[#allocation12_spill] sm:$0xff] %v26647_v20  ;;  %28897 = vst [vmem:[#allocation20_spill] sm:$0xff] %v26649_v59 }
 0xef5   :  { %v21179_v29 = vpop.f32.mrf.mxu0 }
 0xef6   :  { %v26651_v27 = vadd.f32 %v21179_v29, %v10194_v18  ;;  %v11637_v18 = vpop.permute.xlu1 %11636  ;;  %v11632_v29 = vpop.permute.xlu0 %11631 }
 0xef7   :  { %v26653_v26 = vpop.f32.mrf.mxu0 }
 0xef8   :  { %28898 = vst [vmem:[#allocation13_spill] sm:$0xff] %v26651_v27  ;;  %28899 = vst [vmem:[#allocation11_spill] sm:$0xff] %v26653_v26 }
 0xef9   :  { %v26657_v2 = vpop.f32.mrf.mxu0 }
 0xefa   :  { %28900 = vst [vmem:[#allocation10_spill] sm:$0xff] %v26657_v2  ;;  %v26671_v27 = vpop.permute.xlu1 %11626  ;;  %v11622_v26 = vpop.permute.xlu0 %11621 }
 0xefb   :  { %v26659_v37 = vpop.f32.mrf.mxu0 }
 0xefc   :  { %28901 = vst [vmem:[#allocation42_spill] sm:$0xff] %v26659_v37 }
 0xefd   :  { %v26661_v44 = vpop.f32.mrf.mxu0 }
 0xefe   :  { %28902 = vst [vmem:[#allocation43_spill] sm:$0xff] %v26661_v44  ;;  %v26675_v44 = vpop.permute.xlu1 %11616  ;;  %v26678_v50 = vpop.permute.xlu0 %11611 }
 0xeff   :  { %v26663_v46 = vpop.f32.mrf.mxu0  ;;  %28905 = vst [vmem:[#allocation46_spill] sm:$0xff] %v26675_v44  ;;  %28906 = vst [vmem:[#allocation47_spill] sm:$0xff] %v26678_v50 }
 0xf00   :  { %28903 = vst [vmem:[#allocation44_spill] sm:$0xff] %v26663_v46  ;;  %v9420_v46 = vadd.f32 %v26480_v19, %v26293_v42  ;;  %v9450_v42 = vadd.f32 %v26504_v33, %v26329_v23 }
 0xf01   :  { %v26665_v9 = vpop.f32.mrf.mxu0 }
 0xf02   :  { %28904 = vst [vmem:[#allocation45_spill] sm:$0xff] %v26665_v9  ;;  %v9440_v9 = vadd.f32 %v26496_v14, %v26317_v53  ;;  %v10175_v21 = vadd.f32 %v26566_v34, %v9420_v46  ;;  %v26689_v50 = vpop.permute.xlu1 %11606  ;;  %v26694_v34 = vpop.permute.xlu0 %11601  ;;  %v10181_v22 = vadd.f32 %v26580_v56, %v9450_v42 }
 0xf03   :  { %v26667_v12 = vpop.f32.mrf.mxu0 }
 0xf04   :  { %v10179_v47 = vadd.f32 %v26576_v8, %v9440_v9  ;;  %v10852_v6 = vadd.f32 %v10743_v4, %v10175_v21  ;;  %v10173_v8 = vadd.f32 %v26562_v52, %v9410_v28 }
 0xf05   :  { %v26669_v39 = vpop.f32.mrf.mxu0 }
 0xf06   :  { %v10856_v53 = vadd.f32 %v10763_v51, %v10179_v47  ;;  %v10850_v23 = vadd.f32 %v26621_v24, %v10173_v8  ;;  %v26712_v63 = vpop.permute.xlu1 %11596 }
 0xf07   :  { %v11400_v20 = vpop.f32.mrf.mxu0 }
 0xf09   :  { %v21255_v13 = vpop.f32.mrf.mxu0 }
 0xf0b   :  { %v11410_v59 = vpop.f32.mrf.mxu0 }
 0xf0c   :  { %v11527_v51 = vadd.f32 %v11410_v59, %v10850_v23 }
 0xf0d   :  { %v21258_v2 = vpop.f32.mrf.mxu0 }
 0xf0f   :  { %v11420_v37 = vpop.f32.mrf.mxu0 }
 0xf10   :  { %v11529_v57 = vadd.f32 %v11420_v37, %v10852_v6 }
 0xf11   :  { %v21261_v16 = vpop.f32.mrf.mxu0 }
 0xf12   :  { %v11532_v19 = vadd.f32 %v21261_v16, %v26625_v40  ;;  %v11530_v16 = vadd.f32 %v21258_v2, %v26623_v31  ;;  %v26710_v4 = vadd.f32 %v11632_v29, %v11529_v57  ;;  %v9390_v31 = vadd.f32 %v26456_v62, %v26257_v15 }
 0xf13   :  { %v11430_v41 = vpop.f32.mrf.mxu0  ;;  %v26735_v62 = vadd.f32 %v11622_v26, %v11527_v51  ;;  %v11526_v26 = vadd.f32 %v26669_v39, %v26615_v36  ;;  %v28907_v39 = vld [vmem:[#allocation47_spill] sm:$0xff] }
 0xf14   :  { %v11531_v44 = vadd.f32 %v11430_v41, %v10854_v1  ;;  %v9400_v1 = vadd.f32 %v26464_v5, %v26269_v3  ;;  %v26707_v52 = vadd.f32 %v11647_v48, %v11532_v19  ;;  %v26723_v2 = vadd.f32 %v11637_v18, %v11530_v16 }
 0xf15   :  { %v21264_v45 = vpop.f32.mrf.mxu0  ;;  %v9380_v18 = vadd.f32 %v26448_v60, %v26241_v43 }
 0xf16   :  { %v11534_v14 = vadd.f32 %v21264_v45, %v10857_v38  ;;  %v26698_v49 = vadd.f32 %v11642_v10, %v11531_v44  ;;  %v10858_v45 = vadd.f32 %v26629_v55, %v10181_v22  ;;  %v10171_v56 = vadd.f32 %v26558_v30, %v9400_v1  ;;  %v28911_v22 = vld [vmem:[#allocation9_spill] sm:$0xff]  ;;  %v28913_v1 = vld [vmem:[#allocation46_spill] sm:$0xff] }
 0xf17   :  { %v11440_v41 = vpop.f32.mrf.mxu0  ;;  %v11528_v30 = vadd.f32 %v21255_v13, %v26619_v32  ;;  %v11814_v48 = vrot.slane %v26707_v52, 1  ;;  %v10169_v44 = vadd.f32 %v26554_v61, %v9390_v31  ;;  %v11810_v47 = vrot.slane %v26723_v2, 1 }
 0xf18   :  { %v11744_v54 = vadd.f32 %v11657_v0, %v11534_v14  ;;  %v11533_v21 = vadd.f32 %v11440_v41, %v10856_v53  ;;  %v11812_v3 = vrot.slane %v26698_v49, 1  ;;  %v26715_v0 = vpop.permute.xlu0 %11591  ;;  %v10848_v55 = vadd.f32 %v26617_v11, %v10171_v56  ;;  %v28910_v14 = vld [vmem:[#allocation30_spill] sm:$0xff] }
 0xf19   :  { %v26703_v33 = vpop.f32.mrf.mxu0  ;;  %v11808_v11 = vrot.slane %v26710_v4, 1  ;;  %v26752_v29 = vadd.f32 %v26671_v27, %v11528_v30  ;;  %v10167_v43 = vadd.f32 %v26550_v7, %v9380_v18  ;;  %v11804_v27 = vrot.slane %v26735_v62, 1  ;;  %v28908_v7 = vld [vmem:[#allocation17_spill] sm:$0xff] }
 0xf1a   :  { %v11743_v40 = vadd.f32 %v11652_v25, %v11533_v21  ;;  %v11818_v5 = vrot.slane %v11744_v54, 1  ;;  %v11525_v10 = vadd.f32 %v11400_v20, %v10848_v55  ;;  %v11815_v32 = vsel %vm3632_vm2, %v11812_v3, %v11814_v48  ;;  %v26747_v20 = vpop.permute.xlu1 %11586 }
 0xf1b   :  { %v11450_v58 = vpop.f32.mrf.mxu0  ;;  %v11811_v42 = vsel %vm3632_vm2, %v11808_v11, %v11810_v47  ;;  %v10844_v8 = vadd.f32 %v28910_v14, %v10167_v43  ;;  %v26783_v23 = vadd.f32 %v28913_v1, %v11526_v26 }
 0xf1c   :  { %v11816_v24 = vrot.slane %v11743_v40, 1  ;;  %v11535_v9 = vadd.f32 %v11450_v58, %v10858_v45  ;;  %v11582_v38 = vpop.permute.xlu0 %11581  ;;  %v26766_v36 = vadd.f32 %v28907_v39, %v11525_v10  ;;  %v28914_v45 = vld [vmem:[#allocation36_spill] sm:$0xff]  ;;  %v26791_v51 = vmax.f32 %v26710_v4, %v11811_v42  ;;  %v28917_v10 = vld [vmem:[#allocation33_spill] sm:$0xff]  ;;  %v28921_v42 = vld [vmem:[#allocation3_spill] sm:$0xff] }
 0xf1d   :  { %v26721_v59 = vpop.f32.mrf.mxu0  ;;  %v28920_v39 = vld [vmem:[#allocation16_spill] sm:$0xff] }
 0xf1e   :  { %v11819_v25 = vsel %vm3632_vm2, %v11816_v24, %v11818_v5  ;;  %v26728_v37 = vadd.f32 %v26655_v35, %v11535_v9  ;;  %v10846_v35 = vadd.f32 %v26613_v17, %v10169_v44  ;;  %v26758_v17 = vmax.f32 %v26698_v49, %v11815_v32  ;;  %v28912_v49 = vld [vmem:[#allocation45_spill] sm:$0xff] }
 0xf1f   :  { %v26731_v46 = vmax.f32 %v11743_v40, %v11819_v25  ;;  %v26733_v15 = vpop.f32.mrf.mxu0  ;;  %v11817_v41 = vsel %vm3632_vm2, %v11814_v48, %v11816_v24  ;;  %v11524_v21 = vadd.f32 %v28912_v49, %v28911_v22  ;;  %v28915_v40 = vld [vmem:[#allocation44_spill] sm:$0xff]  ;;  %v11800_v9 = vrot.slane %v26766_v36, 1  ;;  %v28916_v48 = vld [vmem:[#allocation29_spill] sm:$0xff]  ;;  %v28925_v22 = vld [vmem:[#allocation35_spill] sm:$0xff] }
 0xf20   :  { %v11820_v13 = vrot.slane %v26728_v37, 1  ;;  %v11523_v60 = vadd.f32 %v26667_v12, %v10846_v35  ;;  %v28909_v12 = vld [vmem:[#allocation5_spill] sm:$0xff]  ;;  %v11521_v56 = vadd.f32 %v28915_v40, %v10844_v8  ;;  %v26803_v55 = vmax.f32 %v26707_v52, %v11817_v41  ;;  %v11722_v30 = vpop.permute.xlu0 %11721  ;;  %v28919_v52 = vld [vmem:[#allocation42_spill] sm:$0xff]  ;;  %v28924_v41 = vld [vmem:[#allocation4_spill] sm:$0xff] }
 0xf21   :  { %11966 = vrot.lane.b32.xlu1 %v26731_v46, %s22035_s21  ;;  %v26745_v61 = vpop.f32.mrf.mxu0  ;;  %v9370_v19 = vadd.f32 %v28909_v12, %v28908_v7  ;;  %v11813_v44 = vsel %vm3632_vm2, %v11810_v47, %v11812_v3  ;;  %v26814_v18 = vadd.f32 %v26689_v50, %v11524_v21  ;;  %v11802_v35 = vrot.slane %v26783_v23, 1  ;;  %v28922_v12 = vld [vmem:[#allocation21_spill] sm:$0xff] }
 0xf22   :  { %v11821_v6 = vsel %vm3632_vm2, %v11818_v5, %v11820_v13  ;;  %v26795_v5 = vpop.permute.xlu1 %11726  ;;  %v26798_v24 = vadd.f32 %v26694_v34, %v11523_v60  ;;  %v28918_v34 = vld [vmem:[#allocation43_spill] sm:$0xff]  ;;  %v26829_v50 = vmax.f32 %v26723_v2, %v11813_v44  ;;  %v9500_v7 = vadd.f32 %v28921_v42, %v28920_v39  ;;  %v28928_v44 = vld [vmem:[#allocation40_spill] sm:$0xff] }
 0xf23   :  { %v26760_v28 = vpop.f32.mrf.mxu0  ;;  %v26770_v53 = vmax.f32 %v11744_v54, %v11821_v6  ;;  %v11806_v54 = vrot.slane %v26752_v29, 1  ;;  %v10165_v16 = vadd.f32 %v28914_v45, %v9370_v19  ;;  %v11522_v32 = vadd.f32 %v28918_v34, %v28917_v10  ;;  %v28923_v19 = vld [vmem:[#allocation10_spill] sm:$0xff]  ;;  %v28926_v45 = vld [vmem:[#allocation28_spill] sm:$0xff] }
 0xf24   :  { %v26824_v6 = vadd.f32 %v26715_v0, %v11521_v56  ;;  %v11796_v3 = vrot.slane %v26798_v24, 1  ;;  %v11803_v47 = vsel %vm3632_vm2, %v11800_v9, %v11802_v35  ;;  %v11520_v14 = vadd.f32 %v28923_v19, %v28922_v12  ;;  %v11712_v1 = vpop.permute.xlu0 %11711  ;;  %v28929_v10 = vld [vmem:[#allocation2_spill] sm:$0xff]  ;;  %v28933_v12 = vld [vmem:[#allocation31_spill] sm:$0xff] }
 0xf25   :  { %11962 = vrot.lane.b32.xlu1 %v26758_v17, %s22035_s21  ;;  %v26777_v57 = vpop.f32.mrf.mxu0  ;;  %11968 = vrot.lane.b32.xlu0 %v26770_v53, %s22035_s21  ;;  %v11807_v31 = vsel %vm3632_vm2, %v11804_v27, %v11806_v54  ;;  %v10842_v25 = vadd.f32 %v28916_v48, %v10165_v16  ;;  %v11809_v0 = vsel %vm3632_vm2, %v11806_v54, %v11808_v11  ;;  %v11798_v2 = vrot.slane %v26814_v18, 1  ;;  %v28927_v11 = vld [vmem:[#allocation41_spill] sm:$0xff] }
 0xf26   :  { %v26821_v43 = vmax.f32 %v26735_v62, %v11807_v31  ;;  %v11717_v8 = vpop.permute.xlu1 %11716  ;;  %v9510_v49 = vadd.f32 %v28925_v22, %v28924_v41  ;;  %v11732_v21 = vadd.f32 %v26712_v63, %v11522_v32  ;;  %v10191_v16 = vadd.f32 %v28926_v45, %v9500_v7 }
 0xf27   :  { %v26793_v58 = vpop.f32.mrf.mxu0  ;;  %v11519_v26 = vadd.f32 %v28919_v52, %v10842_v25  ;;  %v26846_v56 = vmax.f32 %v26766_v36, %v11803_v47  ;;  %v11792_v48 = vrot.slane %v26824_v6, 1  ;;  %v11799_v25 = vsel %vm3632_vm2, %v11796_v3, %v11798_v2  ;;  %v28930_v52 = vld [vmem:[#allocation20_spill] sm:$0xff]  ;;  %v28931_v47 = vld [vmem:[#allocation11_spill] sm:$0xff] }
 0xf28   :  { %v10193_v54 = vadd.f32 %v28927_v11, %v9510_v49  ;;  %v26852_v63 = vmax.f32 %v26752_v29, %v11809_v0  ;;  %v9490_v34 = vadd.f32 %v28929_v10, %v28928_v44  ;;  %v11730_v32 = vadd.f32 %v26747_v20, %v11520_v14  ;;  %v28932_v29 = vld [vmem:[#allocation13_spill] sm:$0xff]  ;;  %v11702_v45 = vpop.permute.xlu0 %11701  ;;  %v28935_v11 = vld [vmem:[#allocation15_spill] sm:$0xff] }
 0xf29   :  { %11958 = vrot.lane.b32.xlu1 %v26791_v51, %s22035_s21  ;;  %v26808_v4 = vpop.f32.mrf.mxu0  ;;  %11964 = vrot.lane.b32.xlu0 %v26803_v55, %s22035_s21  ;;  %v11729_v40 = vadd.f32 %v11582_v38, %v11519_v26  ;;  %v11805_v36 = vsel %vm3632_vm2, %v11802_v35, %v11804_v27  ;;  %v10868_v26 = vadd.f32 %v28930_v52, %v10191_v16  ;;  %v11794_v42 = vrot.slane %v11732_v21, 1  ;;  %v28934_v16 = vld [vmem:[#allocation39_spill] sm:$0xff] }
 0xf2a   :  { %v10870_v39 = vadd.f32 %v28931_v47, %v10193_v54  ;;  %v10189_v19 = vadd.f32 %v28933_v12, %v9490_v34  ;;  %v26867_v20 = vmax.f32 %v26798_v24, %v11799_v25  ;;  %v26871_v22 = vmax.f32 %v26783_v23, %v11805_v36  ;;  %v11707_v49 = vpop.permute.xlu1 %11706  ;;  %v28936_v25 = vld [vmem:[#allocation18_spill] sm:$0xff]  ;;  %v28937_v34 = vld [vmem:[#allocation12_spill] sm:$0xff]  ;;  %v28941_v12 = vld [vmem:[#allocation19_spill] sm:$0xff] }
 0xf2b   :  { %v11490_v60 = vpop.f32.mrf.mxu0  ;;  %v11789_v0 = vrot.slane %v11729_v40, 1  ;;  %v11795_v41 = vsel %vm3632_vm2, %v11792_v48, %v11794_v42  ;;  %v9480_v54 = vadd.f32 %v28935_v11, %v28934_v16  ;;  %v11790_v44 = vrot.slane %v11730_v32, 1  ;;  %v28938_v23 = vld [vmem:[#allocation34_spill] sm:$0xff] }
 0xf2c   :  { %v11801_v24 = vsel %vm3632_vm2, %v11798_v2, %v11800_v9  ;;  %v10866_v10 = vadd.f32 %v28936_v25, %v10189_v19  ;;  %v26886_v47 = vmax.f32 %v26824_v6, %v11795_v41 }
 0xf2d   :  { %11954 = vrot.lane.b32.xlu1 %v26821_v43, %s22035_s21  ;;  %v21282_v62 = vpop.f32.mrf.mxu0  ;;  %11960 = vrot.lane.b32.xlu0 %v26829_v50, %s22035_s21  ;;  %v10187_v36 = vadd.f32 %v28938_v23, %v9480_v54  ;;  %v28944_v54 = vld [vmem:[#allocation6_spill] sm:$0xff] }
 0xf2e   :  { %v11543_v9 = vadd.f32 %v11490_v60, %v10866_v10  ;;  %v11697_v60 = vpop.permute.xlu1 %11696  ;;  %v28946_v10 = vld [vmem:[#allocation26_spill] sm:$0xff] }
 0xf2f   :  { %v11500_v31 = vpop.f32.mrf.mxu0  ;;  %v10864_v19 = vadd.f32 %v28941_v12, %v10187_v36 }
 0xf30   :  { %v11545_v27 = vadd.f32 %v11500_v31, %v10868_v26  ;;  %v11791_v26 = vsel %vm3632_vm2, %v11789_v0, %v11790_v44  ;;  %v28942_v0 = vld [vmem:[#allocation27_spill] sm:$0xff]  ;;  %v11753_v11 = vadd.f32 %v11702_v45, %v11543_v9 }
 0xf31   :  { %11950 = vrot.lane.b32.xlu1 %v26846_v56, %s22035_s21  ;;  %v21285_v38 = vpop.f32.mrf.mxu0  ;;  %11956 = vrot.lane.b32.xlu0 %v26852_v63, %s22035_s21  ;;  %v11544_v6 = vadd.f32 %v26808_v4, %v28942_v0  ;;  %v26904_v41 = vmax.f32 %v11729_v40, %v11791_v26  ;;  %v11541_v16 = vadd.f32 %v26793_v58, %v10864_v19  ;;  %v28948_v58 = vld [vmem:[#allocation14_spill] sm:$0xff] }
 0xf32   :  { %v11548_v7 = vadd.f32 %v21285_v38, %v28932_v29  ;;  %v11546_v38 = vadd.f32 %v21282_v62, %v28937_v34  ;;  %v26889_v2 = vadd.f32 %v11712_v1, %v11545_v27  ;;  %v26892_v62 = vmax.f32 %v26814_v18, %v11801_v24  ;;  %v11692_v1 = vpop.permute.xlu0 %11691  ;;  %v28943_v18 = vld [vmem:[#allocation32_spill] sm:$0xff]  ;;  %v28945_v24 = vld [vmem:[#allocation37_spill] sm:$0xff]  ;;  %v28947_v34 = vld [vmem:[#allocation23_spill] sm:$0xff] }
 0xf33   :  { %v11510_v14 = vpop.f32.mrf.mxu0  ;;  %v9460_v25 = vadd.f32 %v28945_v24, %v28944_v54  ;;  %v11751_v26 = vadd.f32 %v11692_v1, %v11541_v16 }
 0xf34   :  { %v11547_v35 = vadd.f32 %v11510_v14, %v10870_v39  ;;  %v11758_v31 = vadd.f32 %v26795_v5, %v11548_v7  ;;  %v11797_v39 = vsel %vm3632_vm2, %v11794_v42, %v11796_v3  ;;  %v28939_v5 = vld [vmem:[#allocation7_spill] sm:$0xff]  ;;  %v11756_v14 = vadd.f32 %v11717_v8, %v11546_v38 }
 0xf35   :  { %11946 = vrot.lane.b32.xlu1 %v26867_v20, %s22035_s21  ;;  %11952 = vrot.lane.b32.xlu0 %v26871_v22, %s22035_s21  ;;  %v26906_v27 = vmax.f32 %v11732_v21, %v11797_v39  ;;  %v11840_v4 = vrot.slane %v26889_v2, 1  ;;  %v11542_v21 = vadd.f32 %v26777_v57, %v28947_v34  ;;  %v11754_v38 = vadd.f32 %v11707_v49, %v11544_v6  ;;  %v28949_v57 = vld [vmem:[#allocation24_spill] sm:$0xff] }
 0xf36   :  { %v11757_v52 = vadd.f32 %v11722_v30, %v11547_v35  ;;  %v28940_v30 = vld [vmem:[#allocation38_spill] sm:$0xff]  ;;  %v11846_v3 = vrot.slane %v11758_v31, 1  ;;  %v11793_v35 = vsel %vm3632_vm2, %v11790_v44, %v11792_v48  ;;  %v11842_v48 = vrot.slane %v11756_v14, 1 }
 0xf37   :  { %v9470_v7 = vadd.f32 %v28940_v30, %v28939_v5  ;;  %v10183_v45 = vadd.f32 %v28948_v58, %v9460_v25  ;;  %v26924_v23 = vmax.f32 %v11730_v32, %v11793_v35  ;;  %v11836_v39 = vrot.slane %v11753_v11, 1  ;;  %v11687_v5 = vpop.permute.xlu1 %11686  ;;  %v11682_v30 = vpop.permute.xlu0 %11681 }
 0xf38   :  { %v11844_v29 = vrot.slane %v11757_v52, 1  ;;  %v11843_v9 = vsel %vm3632_vm2, %v11840_v4, %v11842_v48  ;;  %v11838_v19 = vrot.slane %v11754_v38, 1  ;;  %v11832_v6 = vrot.slane %v11751_v26, 1 }
 0xf39   :  { %11942 = vrot.lane.b32.xlu1 %v26886_v47, %s22035_s21  ;;  %11948 = vrot.lane.b32.xlu0 %v26892_v62, %s22035_s21  ;;  %v10185_v42 = vadd.f32 %v28943_v18, %v9470_v7  ;;  %v10860_v49 = vadd.f32 %v28949_v57, %v10183_v45  ;;  %v28950_v7 = vld [vmem:[#allocation25_spill] sm:$0xff]  ;;  %v26937_v32 = vmax.f32 %v26889_v2, %v11843_v9  ;;  %v12059_v57 = vld [vmem:[%s28724_s4 + $0x8] sm:$0xff] }
 0xf3a   :  { %v11847_v8 = vsel %vm3632_vm2, %v11844_v29, %v11846_v3  ;;  %v11540_v12 = vadd.f32 %v26745_v61, %v28950_v7  ;;  %v11839_v1 = vsel %vm3632_vm2, %v11836_v39, %v11838_v19  ;;  %v26940_v18 = vmax.f32 %v11758_v31, %v11846_v3  ;;  %17650 = vmatprep.mubr.msk.f32.mxu1 %vm3932_vm3, %v12059_v57 }
 0xf3b   :  { %v10862_v40 = vadd.f32 %v28946_v10, %v10185_v42  ;;  %v26922_v44 = vmax.f32 %v11757_v52, %v11847_v8  ;;  %v11752_v52 = vadd.f32 %v11697_v60, %v11542_v21  ;;  %v11845_v61 = vsel %vm3632_vm2, %v11842_v48, %v11844_v29  ;;  %v28951_v60 = vld [vmem:[#allocation8_spill] sm:$0xff]  ;;  %v11672_v2 = vpop.permute.xlu0 %11671  ;;  %v28952_v29 = vld [vmem:[#allocation22_spill] sm:$0xff] }
 0xf3c   :  { %v11538_v42 = vadd.f32 %v26721_v59, %v28951_v60  ;;  %v11750_v35 = vadd.f32 %v11687_v5, %v11540_v12  ;;  %v26949_v8 = vmax.f32 %v11753_v11, %v11839_v1  ;;  %v26952_v24 = vmax.f32 %v11756_v14, %v11845_v61  ;;  %v14926_v1 = vld [vmem:[%s28725_s8 + $0x48] sm:$0xff]  ;;  %v14929_v61 = vld [vmem:[%s28725_s8 + $0x60] sm:$0xff]  ;;  %v14924_v60 = vld [vmem:[%s28725_s8 + $0x38] sm:$0xff] }
 0xf3d   :  { %11938 = vrot.lane.b32.xlu1 %v26904_v41, %s22035_s21  ;;  %11944 = vrot.lane.b32.xlu0 %v26906_v27, %s22035_s21  ;;  %v11539_v36 = vadd.f32 %v26760_v28, %v10862_v40  ;;  %v11537_v28 = vadd.f32 %v26733_v15, %v10860_v49  ;;  %v11834_v16 = vrot.slane %v11752_v52, 1  ;;  %v11677_v15 = vpop.permute.xlu1 %11676  ;;  %v11841_v59 = vsel %vm3632_vm2, %v11838_v19, %v11840_v4 }
 0xf3e   :  { %v11536_v25 = vadd.f32 %v26703_v33, %v28952_v29  ;;  %v11748_v10 = vadd.f32 %v11677_v15, %v11538_v42  ;;  %v11830_v40 = vrot.slane %v11750_v35, 1  ;;  %v26964_v14 = vmax.f32 %v11754_v38, %v11841_v59  ;;  %v14927_v42 = vld [vmem:[%s28725_s8 + $0x50] sm:$0xff]  ;;  %v14920_v15 = vld [vmem:[%s28725_s8 + $0x18] sm:$0xff]  ;;  %v14934_v29 = vld [vmem:[%s28725_s8 + $0x88] sm:$0xff] }
 0xf3f   :  { %v11749_v0 = vadd.f32 %v11682_v30, %v11539_v36  ;;  %v11747_v54 = vadd.f32 %v11672_v2, %v11537_v28  ;;  %v11835_v3 = vsel %vm3632_vm2, %v11832_v6, %v11834_v16  ;;  %v11837_v4 = vsel %vm3632_vm2, %v11834_v16, %v11836_v39  ;;  %v14932_v28 = vld [vmem:[%s28725_s8 + $0x78] sm:$0xff]  ;;  %v14925_v16 = vld [vmem:[%s28725_s8 + $0x40] sm:$0xff]  ;;  %v14923_v2 = vld [vmem:[%s28725_s8 + $0x30] sm:$0xff] }
 0xf40   :  { %v26961_v11 = vmax.f32 %v11751_v26, %v11835_v3  ;;  %v11826_v33 = vrot.slane %v11748_v10, 1  ;;  %v26974_v26 = vmax.f32 %v11752_v52, %v11837_v4  ;;  %v11833_v38 = vsel %vm3632_vm2, %v11830_v40, %v11832_v6  ;;  %v14933_v52 = vld [vmem:[%s28725_s8 + $0x80] sm:$0xff]  ;;  %v14931_v6 = vld [vmem:[%s28725_s8 + $0x70] sm:$0xff]  ;;  %v14936_v3 = vld [vmem:[%s28725_s8 + $0x98] sm:$0xff] }
 0xf41   :  { %11994 = vrot.lane.b32.xlu1 %v26922_v44, %s22035_s21  ;;  %11940 = vrot.lane.b32.xlu0 %v26924_v23, %s22035_s21  ;;  %v11828_v31 = vrot.slane %v11749_v0, 1  ;;  %v11824_v34 = vrot.slane %v11747_v54, 1  ;;  %v11667_v48 = vpop.permute.xlu1 %11666  ;;  %v26986_v30 = vmax.f32 %v11750_v35, %v11833_v38  ;;  %v14922_v35 = vld [vmem:[%s28725_s8 + $0x28] sm:$0xff]  ;;  %v14919_v59 = vld [vmem:[%s28725_s8 + $0x10] sm:$0xff] }
 0xf42   :  { %v11746_v58 = vadd.f32 %v11667_v48, %v11536_v25  ;;  %v14917_v25 = vld [vmem:[%s28725_s8] sm:$0xff] }
 0xf43   :  { %v11831_v21 = vsel %vm3632_vm2, %v11828_v31, %v11830_v40  ;;  %v11827_v36 = vsel %vm3632_vm2, %v11824_v34, %v11826_v33  ;;  %v11829_v49 = vsel %vm3632_vm2, %v11826_v33, %v11828_v31  ;;  %v14921_v31 = vld [vmem:[%s28725_s8 + $0x20] sm:$0xff]  ;;  %v12278_v40 = vld [vmem:[%s28726_s5 + $0x10] sm:$0x7f] }
 0xf44   :  { %v26971_v45 = vmax.f32 %v11749_v0, %v11831_v21  ;;  %v11822_v9 = vrot.slane %v11746_v58, 1  ;;  %v26981_v39 = vmax.f32 %v11747_v54, %v11827_v36  ;;  %v14928_v0 = vld [vmem:[%s28725_s8 + $0x58] sm:$0xff]  ;;  %v14918_v54 = vld [vmem:[%s28725_s8 + $0x8] sm:$0xff]  ;;  %21287 = vmatpush3.msk.msra.mxu0 %vm3632_vm2, %v12278_v40  ;;  %v28953_v21 = vmov 0.0  }
 0xf45   :  { %11990 = vrot.lane.b32.xlu1 %v26937_v32, %s22035_s21  ;;  %11996 = vrot.lane.b32.xlu0 %v26940_v18, %s22035_s21 }
 0xf46   :  { %v11823_v5 = vsel %vm3632_vm2, %v11820_v13, %v11822_v9  ;;  %v27000_v13 = vmax.f32 %v11748_v10, %v11829_v49  ;;  %v11825_v12 = vsel %vm3632_vm2, %v11822_v9, %v11824_v34  ;;  %v14935_v10 = vld [vmem:[%s28725_s8 + $0x90] sm:$0xff]  ;;  %v12277_v34 = vld [vmem:[%s28726_s5 + $0x8] sm:$0xff]  ;;  %21288 = vmatprep.subr.mxu0 %v28953_v21 }
 0xf47   :  { %v26998_v7 = vmax.f32 %v26728_v37, %v11823_v5  ;;  %v27010_v19 = vmax.f32 %v11746_v58, %v11825_v12  ;;  %v14930_v37 = vld [vmem:[%s28725_s8 + $0x68] sm:$0xff]  ;;  %21289 = vmatpush3.msra.mxu0 %v12277_v34 }
 0xf48   :  { %21290 = vmatprep.subr.mxu0 %v28953_v21 }
 0xf49   :  { %11986 = vrot.lane.b32.xlu1 %v26949_v8, %s22035_s21  ;;  %11992 = vrot.lane.b32.xlu0 %v26952_v24, %s22035_s21 }
 0xf4d   :  { %11982 = vrot.lane.b32.xlu1 %v26961_v11, %s22035_s21  ;;  %11988 = vrot.lane.b32.xlu0 %v26964_v14, %s22035_s21 }
 0xf51   :  { %11978 = vrot.lane.b32.xlu1 %v26971_v45, %s22035_s21  ;;  %11984 = vrot.lane.b32.xlu0 %v26974_v26, %s22035_s21 }
 0xf55   :  { %11974 = vrot.lane.b32.xlu1 %v26981_v39, %s22035_s21  ;;  %11980 = vrot.lane.b32.xlu0 %v26986_v30, %s22035_s21 }
 0xf59   :  { %11970 = vrot.lane.b32.xlu1 %v26998_v7, %s22035_s21  ;;  %11976 = vrot.lane.b32.xlu0 %v27000_v13, %s22035_s21 }
 0xf5d   :  { %15019 = vperm.xlu1 %22012, %v14933_v52   ;;  %11972 = vrot.lane.b32.xlu0 %v27010_v19, %s22035_s21 }
 0xf61   :  { %15004 = vperm.xlu1 %22012, %v14930_v37   ;;  %15014 = vperm.xlu0 %22011, %v14932_v28  }
 0xf65   :  { %14994 = vperm.xlu1 %22012, %v14928_v0   ;;  %15009 = vperm.xlu0 %22011, %v14931_v6  }
 0xf69   :  { %14984 = vperm.xlu1 %22012, %v14926_v1   ;;  %14999 = vperm.xlu0 %22011, %v14929_v61  }
 0xf6d   :  { %14974 = vperm.xlu1 %22012, %v14924_v60   ;;  %14989 = vperm.xlu0 %22011, %v14927_v42  }
 0xf71   :  { %14964 = vperm.xlu1 %22012, %v14922_v35   ;;  %14979 = vperm.xlu0 %22011, %v14925_v16  }
 0xf75   :  { %14954 = vperm.xlu1 %22012, %v14920_v15   ;;  %14969 = vperm.xlu0 %22011, %v14923_v2  }
 0xf79   :  { %14944 = vperm.xlu1 %22012, %v14918_v54   ;;  %14959 = vperm.xlu0 %22011, %v14921_v31  }
 0xf7d   :  { %15034 = vperm.xlu1 %22012, %v14936_v3   ;;  %14949 = vperm.xlu0 %22011, %v14919_v59  }
 0xf81   :  { %15024 = vperm.xlu1 %22012, %v14934_v29   ;;  %14939 = vperm.xlu0 %22011, %v14917_v25  }
 0xf85   :  { %15029 = vperm.xlu0 %22011, %v14935_v10  }
 0xf93   :  { %v11967_v48 = vpop.permute.xlu1 %11966 }
 0xf94   :  { %v12042_v36 = vmax.f32 %v26731_v46, %v11967_v48 }
 0xf97   :  { %v11963_v4 = vpop.permute.xlu1 %11962  ;;  %v11969_v58 = vpop.permute.xlu0 %11968 }
 0xf98   :  { %v12043_v33 = vmax.f32 %v26770_v53, %v11969_v58  ;;  %v12040_v57 = vmax.f32 %v26758_v17, %v11963_v4  ;;  %v12062_v4 = vld [vmem:[%s28724_s4 + $0x20] sm:$0xff]  ;;  %v12065_v58 = vld [vmem:[%s28724_s4 + $0x38] sm:$0xff] }
 0xf9a   :  { %12137 = vmatpush1.msra.mxu1 %v12043_v33  ;;  %v12064_v33 = vld [vmem:[%s28724_s4 + $0x30] sm:$0xff] }
 0xf9b   :  { %v11959_v38 = vpop.permute.xlu1 %11958  ;;  %12138 = vmatprep.subr.mxu1 %v28953_v21  ;;  %v11965_v9 = vpop.permute.xlu0 %11964 }
 0xf9c   :  { %v12041_v5 = vmax.f32 %v26803_v55, %v11965_v9  ;;  %12139 = vmatpush1.msra.mxu1 %v12042_v36  ;;  %v12038_v46 = vmax.f32 %v26791_v51, %v11959_v38  ;;  %v12067_v36 = vld [vmem:[%s28724_s4 + $0x48] sm:$0xff]  ;;  %v12066_v38 = vld [vmem:[%s28724_s4 + $0x40] sm:$0xff]  ;;  %v12069_v9 = vld [vmem:[%s28724_s4 + $0x58] sm:$0xff] }
 0xf9d   :  { %12140 = vmatprep.subr.mxu1 %v28953_v21 }
 0xf9e   :  { %12141 = vmatpush1.msra.mxu1 %v12041_v5  ;;  %v12068_v5 = vld [vmem:[%s28724_s4 + $0x50] sm:$0xff] }
 0xf9f   :  { %v11955_v49 = vpop.permute.xlu1 %11954  ;;  %12142 = vmatprep.subr.mxu1 %v28953_v21  ;;  %v11961_v12 = vpop.permute.xlu0 %11960 }
 0xfa0   :  { %v12039_v53 = vmax.f32 %v26829_v50, %v11961_v12  ;;  %12143 = vmatpush1.msra.mxu1 %v12040_v57  ;;  %v12036_v17 = vmax.f32 %v26821_v43, %v11955_v49  ;;  %v12071_v57 = vld [vmem:[%s28724_s4 + $0x68] sm:$0xff]  ;;  %v12070_v49 = vld [vmem:[%s28724_s4 + $0x60] sm:$0xff]  ;;  %v12073_v12 = vld [vmem:[%s28724_s4 + $0x78] sm:$0xff] }
 0xfa1   :  { %12144 = vmatprep.subr.mxu1 %v28953_v21 }
 0xfa2   :  { %12145 = vmatpush1.msra.mxu1 %v12039_v53  ;;  %v12072_v53 = vld [vmem:[%s28724_s4 + $0x70] sm:$0xff] }
 0xfa3   :  { %v11951_v52 = vpop.permute.xlu1 %11950  ;;  %12146 = vmatprep.subr.mxu1 %v28953_v21  ;;  %v11957_v55 = vpop.permute.xlu0 %11956 }
 0xfa4   :  { %v12037_v37 = vmax.f32 %v26852_v63, %v11957_v55  ;;  %12147 = vmatpush1.msra.mxu1 %v12038_v46  ;;  %v12034_v51 = vmax.f32 %v26846_v56, %v11951_v52  ;;  %v12075_v46 = vld [vmem:[%s28724_s4 + $0x88] sm:$0xff]  ;;  %v12074_v52 = vld [vmem:[%s28724_s4 + $0x80] sm:$0xff]  ;;  %v12077_v55 = vld [vmem:[%s28724_s4 + $0x98] sm:$0xff] }
 0xfa5   :  { %12148 = vmatprep.subr.mxu1 %v28953_v21 }
 0xfa6   :  { %12149 = vmatpush1.msra.mxu1 %v12037_v37  ;;  %v12076_v37 = vld [vmem:[%s28724_s4 + $0x90] sm:$0xff] }
 0xfa7   :  { %v11947_v28 = vpop.permute.xlu1 %11946  ;;  %12150 = vmatprep.subr.mxu1 %v28953_v21  ;;  %v11953_v50 = vpop.permute.xlu0 %11952 }
 0xfa8   :  { %v12035_v0 = vmax.f32 %v26871_v22, %v11953_v50  ;;  %12151 = vmatpush1.msra.mxu1 %v12036_v17  ;;  %v12032_v43 = vmax.f32 %v26867_v20, %v11947_v28  ;;  %v12079_v17 = vld [vmem:[%s28724_s4 + $0xa8] sm:$0xff]  ;;  %v12078_v28 = vld [vmem:[%s28724_s4 + $0xa0] sm:$0xff]  ;;  %v12081_v50 = vld [vmem:[%s28724_s4 + $0xb8] sm:$0xff] }
 0xfa9   :  { %12152 = vmatprep.subr.mxu1 %v28953_v21 }
 0xfaa   :  { %12153 = vmatpush1.msra.mxu1 %v12035_v0  ;;  %v12080_v0 = vld [vmem:[%s28724_s4 + $0xb0] sm:$0xff] }
 0xfab   :  { %v11943_v6 = vpop.permute.xlu1 %11942  ;;  %12154 = vmatprep.subr.mxu1 %v28953_v21  ;;  %v11949_v63 = vpop.permute.xlu0 %11948 }
 0xfac   :  { %v12033_v1 = vmax.f32 %v26892_v62, %v11949_v63  ;;  %12155 = vmatpush1.msra.mxu1 %v12034_v51  ;;  %v12030_v56 = vmax.f32 %v26886_v47, %v11943_v6  ;;  %v12083_v51 = vld [vmem:[%s28724_s4 + $0xc8] sm:$0xff]  ;;  %v12082_v6 = vld [vmem:[%s28724_s4 + $0xc0] sm:$0xff]  ;;  %v12085_v63 = vld [vmem:[%s28724_s4 + $0xd8] sm:$0xff] }
 0xfad   :  { %12156 = vmatprep.subr.mxu1 %v28953_v21 }
 0xfae   :  { %12157 = vmatpush1.msra.mxu1 %v12033_v1  ;;  %v12084_v1 = vld [vmem:[%s28724_s4 + $0xd0] sm:$0xff] }
 0xfaf   :  { %v11939_v61 = vpop.permute.xlu1 %11938  ;;  %12158 = vmatprep.subr.mxu1 %v28953_v21  ;;  %v11945_v22 = vpop.permute.xlu0 %11944 }
 0xfb0   :  { %v12031_v60 = vmax.f32 %v26906_v27, %v11945_v22  ;;  %12159 = vmatpush1.msra.mxu1 %v12032_v43  ;;  %v12028_v20 = vmax.f32 %v26904_v41, %v11939_v61  ;;  %v12087_v43 = vld [vmem:[%s28724_s4 + $0xe8] sm:$0xff]  ;;  %v12086_v61 = vld [vmem:[%s28724_s4 + $0xe0] sm:$0xff] }
 0xfb1   :  { %12160 = vmatprep.subr.mxu1 %v28953_v21  ;;  %v12276_v22 = vld [vmem:[%s28726_s5] sm:$0xff] }
 0xfb2   :  { %12161 = vmatpush1.msra.mxu1 %v12031_v60  ;;  %21291 = vmatpush3.msra.mxu0 %v12276_v22 }
 0xfb3   :  { %v11995_v42 = vpop.permute.xlu1 %11994  ;;  %12162 = vmatprep.subr.mxu1 %v28953_v21  ;;  %v11941_v62 = vpop.permute.xlu0 %11940 }
 0xfb4   :  { %v12029_v35 = vmax.f32 %v26924_v23, %v11941_v62  ;;  %12163 = vmatpush1.msra.mxu1 %v12030_v56  ;;  %v12056_v47 = vmax.f32 %v26922_v44, %v11995_v42 }
 0xfb5   :  { %12164 = vmatprep.subr.mxu1 %v28953_v21 }
 0xfb6   :  { %12165 = vmatpush1.msra.mxu1 %v12029_v35 }
 0xfb7   :  { %v11991_v16 = vpop.permute.xlu1 %11990  ;;  %12166 = vmatprep.subr.mxu1 %v28953_v21  ;;  %v11997_v27 = vpop.permute.xlu0 %11996 }
 0xfb8   :  { %v12057_v15 = vmax.f32 %v26940_v18, %v11997_v27  ;;  %12167 = vmatpush1.msra.mxu1 %v12028_v20  ;;  %v12054_v54 = vmax.f32 %v26937_v32, %v11991_v16 }
 0xfb9   :  { %12172 = vmatprep.subr.mxu1 %v28953_v21 }
 0xfba   :  { %17649 = vmatpush2.msk.msra.mxu1 %vm3632_vm2, %v12057_v15 }
 0xfbb   :  { %v11987_v23 = vpop.permute.xlu1 %11986  ;;  %12174 = vmatprep.subr.mxu1 %v28953_v21  ;;  %v11993_v2 = vpop.permute.xlu0 %11992 }
 0xfbc   :  { %v12055_v41 = vmax.f32 %v26952_v24, %v11993_v2  ;;  %12175 = vmatpush2.msra.mxu1 %v12056_v47  ;;  %v12052_v3 = vmax.f32 %v26949_v8, %v11987_v23 }
 0xfbd   :  { %12176 = vmatprep.subr.mxu1 %v28953_v21 }
 0xfbe   :  { %12177 = vmatpush2.msra.mxu1 %v12055_v41 }
 0xfbf   :  { %v11983_v18 = vpop.permute.xlu1 %11982  ;;  %12178 = vmatprep.subr.mxu1 %v28953_v21  ;;  %v11989_v31 = vpop.permute.xlu0 %11988 }
 0xfc0   :  { %v12053_v44 = vmax.f32 %v26964_v14, %v11989_v31  ;;  %12179 = vmatpush2.msra.mxu1 %v12054_v54  ;;  %v12050_v32 = vmax.f32 %v26961_v11, %v11983_v18 }
 0xfc1   :  { %12180 = vmatprep.subr.mxu1 %v28953_v21 }
 0xfc2   :  { %12181 = vmatpush2.msra.mxu1 %v12053_v44 }
 0xfc3   :  { %v11979_v59 = vpop.permute.xlu1 %11978  ;;  %12182 = vmatprep.subr.mxu1 %v28953_v21  ;;  %v11985_v24 = vpop.permute.xlu0 %11984 }
 0xfc4   :  { %v12051_v29 = vmax.f32 %v26974_v26, %v11985_v24  ;;  %12183 = vmatpush2.msra.mxu1 %v12052_v3  ;;  %v12048_v10 = vmax.f32 %v26971_v45, %v11979_v59 }
 0xfc5   :  { %12184 = vmatprep.subr.mxu1 %v28953_v21 }
 0xfc6   :  { %12185 = vmatpush2.msra.mxu1 %v12051_v29 }
 0xfc7   :  { %12186 = vmatprep.subr.mxu1 %v28953_v21  ;;  %v11981_v14 = vpop.permute.xlu0 %11980  ;;  %v11975_v8 = vpop.permute.xlu1 %11974 }
 0xfc8   :  { %v12049_v25 = vmax.f32 %v26986_v30, %v11981_v14  ;;  %12187 = vmatpush2.msra.mxu1 %v12050_v32  ;;  %v12046_v11 = vmax.f32 %v26981_v39, %v11975_v8  ;;  %v12061_v39 = vld [vmem:[%s28724_s4 + $0x18] sm:$0xff] }
 0xfc9   :  { %12188 = vmatprep.subr.mxu1 %v28953_v21 }
 0xfca   :  { %12189 = vmatpush2.msra.mxu1 %v12049_v25 }
 0xfcb   :  { %12190 = vmatprep.subr.mxu1 %v28953_v21  ;;  %v11977_v26 = vpop.permute.xlu0 %11976  ;;  %v11971_v34 = vpop.permute.xlu1 %11970 }
 0xfcc   :  { %v12047_v40 = vmax.f32 %v27000_v13, %v11977_v26  ;;  %12191 = vmatpush2.msra.mxu1 %v12048_v10  ;;  %v12044_v45 = vmax.f32 %v26998_v7, %v11971_v34  ;;  %v12058_v13 = vld [vmem:[%s28724_s4] sm:$0xff]  ;;  %v12063_v7 = vld [vmem:[%s28724_s4 + $0x28] sm:$0xff] }
 0xfcd   :  { %12192 = vmatprep.subr.mxu1 %v28953_v21 }
 0xfce   :  { %12193 = vmatpush2.msra.mxu1 %v12047_v40 }
 0xfcf   :  { %12194 = vmatprep.subr.mxu1 %v28953_v21  ;;  %v11973_v30 = vpop.permute.xlu0 %11972 }
 0xfd0   :  { %v12045_v48 = vmax.f32 %v27010_v19, %v11973_v30  ;;  %12195 = vmatpush2.msra.mxu1 %v12046_v11  ;;  %v12060_v19 = vld [vmem:[%s28724_s4 + $0x10] sm:$0xff]  ;;  %v17701_v30 = vld [vmem:[%s28727_s6 + $0xa0] sm:$0xff] }
 0xfd1   :  { %12196 = vmatprep.subr.mxu1 %v28953_v21 }
 0xfd2   :  { %12197 = vmatpush2.msra.mxu1 %v12045_v48  ;;  %v12482_v48 = vld [vmem:[%s28727_s6] sm:$0xff] }
 0xfd3   :  { %12198 = vmatprep.subr.mxu1 %v28953_v21 }
 0xfd4   :  { %12199 = vmatpush2.msra.mxu1 %v12044_v45 }
 0xfd5   :  { %12201 = vmatmul.mubr.f32.vlgmr.msra.gmra.mxu1 %v12058_v13 }
 0xfd6   :  { %17651 = vmatprep.mubr.msk.f32.mxu1 %vm3932_vm3, %v12061_v39 }
 0xfd9   :  { %12206 = vmatmul.mubr.f32.gmra.mxu1 %v12060_v19 }
 0xfda   :  { %17652 = vmatprep.mubr.msk.f32.mxu1 %vm3932_vm3, %v12063_v7 }
 0xfdd   :  { %12211 = vmatmul.mubr.f32.gmra.mxu1 %v12062_v4 }
 0xfde   :  { %17653 = vmatprep.mubr.msk.f32.mxu1 %vm3932_vm3, %v12065_v58 }
 0xfe1   :  { %12216 = vmatmul.mubr.f32.gmra.mxu1 %v12064_v33 }
 0xfe2   :  { %17654 = vmatprep.mubr.msk.f32.mxu1 %vm3932_vm3, %v12067_v36 }
 0xfe5   :  { %12221 = vmatmul.mubr.f32.gmra.mxu1 %v12066_v38 }
 0xfe6   :  { %17655 = vmatprep.mubr.msk.f32.mxu1 %vm3932_vm3, %v12069_v9 }
 0xfe9   :  { %12226 = vmatmul.mubr.f32.gmra.mxu1 %v12068_v5 }
 0xfea   :  { %17656 = vmatprep.mubr.msk.f32.mxu1 %vm3932_vm3, %v12071_v57 }
 0xfed   :  { %12231 = vmatmul.mubr.f32.gmra.mxu1 %v12070_v49 }
 0xfee   :  { %17657 = vmatprep.mubr.msk.f32.mxu1 %vm3932_vm3, %v12073_v12 }
 0xff1   :  { %12236 = vmatmul.mubr.f32.gmra.mxu1 %v12072_v53 }
 0xff2   :  { %17658 = vmatprep.mubr.msk.f32.mxu1 %vm3932_vm3, %v12075_v46 }
 0xff5   :  { %12241 = vmatmul.mubr.f32.gmra.mxu1 %v12074_v52 }
 0xff6   :  { %17659 = vmatprep.mubr.msk.f32.mxu1 %vm3932_vm3, %v12077_v55 }
 0xff9   :  { %12246 = vmatmul.mubr.f32.gmra.mxu1 %v12076_v37 }
 0xffa   :  { %17660 = vmatprep.mubr.msk.f32.mxu1 %vm3932_vm3, %v12079_v17 }
 0xffd   :  { %12251 = vmatmul.mubr.f32.gmra.mxu1 %v12078_v28 }
 0xffe   :  { %17661 = vmatprep.mubr.msk.f32.mxu1 %vm3932_vm3, %v12081_v50 }
0x1001   :  { %12256 = vmatmul.mubr.f32.gmra.mxu1 %v12080_v0 }
0x1002   :  { %17662 = vmatprep.mubr.msk.f32.mxu1 %vm3932_vm3, %v12083_v51 }
0x1005   :  { %12261 = vmatmul.mubr.f32.gmra.mxu1 %v12082_v6 }
0x1006   :  { %17663 = vmatprep.mubr.msk.f32.mxu1 %vm3932_vm3, %v12085_v63 }
0x1009   :  { %12266 = vmatmul.mubr.f32.gmra.mxu1 %v12084_v1 }
0x100a   :  { %17664 = vmatprep.mubr.msk.f32.mxu1 %vm3932_vm3, %v12087_v43 }
0x100d   :  { %12271 = vmatmul.mubr.f32.gmra.mxu1 %v12086_v61 }
0x100e   :  { %21367 = vmatprep.mubr.msk.f32.mxu1 %vm4348_vm6, %v12482_v48  ;;  %v12490_v48 = vld [vmem:[%s28727_s6 + $0x40] sm:$0xff] }
0x1095   :  { %v12202_v60 = vpop.f32.mrf.mxu1 }
0x1096   :  { %21293 = vmatmul.mubr.msk.f32.vlgmr.msra.gmra.mxu0 %vm4124_vm5, %v12202_v60 }
0x1097   :  { %v12204_v56 = vpop.f32.mrf.mxu1  ;;  %21295 = vmatprep.mubr.msk.f32.mxu0 %vm22036_vm4, %v28953_v21 }
0x1099   :  { %v12207_v42 = vpop.f32.mrf.mxu1 }
0x109a   :  { %21296 = vmatmul.mubr.msk.f32.gmra.mxu0 %vm4124_vm5, %v12207_v42 }
0x109b   :  { %v12209_v62 = vpop.f32.mrf.mxu1  ;;  %21298 = vmatprep.mubr.msk.f32.mxu0 %vm22036_vm4, %v28953_v21 }
0x109d   :  { %v12212_v35 = vpop.f32.mrf.mxu1 }
0x109e   :  { %21299 = vmatmul.mubr.msk.f32.gmra.mxu0 %vm4124_vm5, %v12212_v35 }
0x109f   :  { %v12214_v20 = vpop.f32.mrf.mxu1  ;;  %21301 = vmatprep.mubr.msk.f32.mxu0 %vm22036_vm4, %v28953_v21 }
0x10a1   :  { %v12217_v16 = vpop.f32.mrf.mxu1 }
0x10a2   :  { %21302 = vmatmul.mubr.msk.f32.gmra.mxu0 %vm4124_vm5, %v12217_v16 }
0x10a3   :  { %v12219_v27 = vpop.f32.mrf.mxu1  ;;  %21304 = vmatprep.mubr.msk.f32.mxu0 %vm22036_vm4, %v28953_v21 }
0x10a5   :  { %v12222_v15 = vpop.f32.mrf.mxu1 }
0x10a6   :  { %21305 = vmatmul.mubr.msk.f32.gmra.mxu0 %vm4124_vm5, %v12222_v15 }
0x10a7   :  { %v12224_v47 = vpop.f32.mrf.mxu1  ;;  %21307 = vmatprep.mubr.msk.f32.mxu0 %vm22036_vm4, %v28953_v21 }
0x10a9   :  { %v12227_v23 = vpop.f32.mrf.mxu1 }
0x10aa   :  { %21308 = vmatmul.mubr.msk.f32.gmra.mxu0 %vm4124_vm5, %v12227_v23 }
0x10ab   :  { %v12229_v2 = vpop.f32.mrf.mxu1  ;;  %21310 = vmatprep.mubr.msk.f32.mxu0 %vm22036_vm4, %v28953_v21 }
0x10ad   :  { %v12232_v41 = vpop.f32.mrf.mxu1 }
0x10ae   :  { %21311 = vmatmul.mubr.msk.f32.gmra.mxu0 %vm4124_vm5, %v12232_v41 }
0x10af   :  { %v12234_v54 = vpop.f32.mrf.mxu1  ;;  %21313 = vmatprep.mubr.msk.f32.mxu0 %vm22036_vm4, %v28953_v21 }
0x10b1   :  { %v12237_v18 = vpop.f32.mrf.mxu1 }
0x10b2   :  { %21314 = vmatmul.mubr.msk.f32.gmra.mxu0 %vm4124_vm5, %v12237_v18  ;;  %v17702_v18 = vld [vmem:[%s28727_s6 + $0xa8] sm:$0xff] }
0x10b3   :  { %v12239_v31 = vpop.f32.mrf.mxu1  ;;  %21316 = vmatprep.mubr.msk.f32.mxu0 %vm22036_vm4, %v28953_v21 }
0x10b4   :  { %v17742_v31 = vld [vmem:[%s28728_s7 + $0x18] sm:$0xf] }
0x10b5   :  { %v12242_v44 = vpop.f32.mrf.mxu1 }
0x10b6   :  { %21317 = vmatmul.mubr.msk.f32.gmra.mxu0 %vm4124_vm5, %v12242_v44  ;;  %v12483_v44 = vld [vmem:[%s28727_s6 + $0x8] sm:$0xff] }
0x10b7   :  { %v12244_v3 = vpop.f32.mrf.mxu1  ;;  %21319 = vmatprep.mubr.msk.f32.mxu0 %vm22036_vm4, %v28953_v21 }
0x10b8   :  { %v17703_v3 = vld [vmem:[%s28727_s6 + $0xb0] sm:$0xff] }
0x10b9   :  { %v12247_v59 = vpop.f32.mrf.mxu1 }
0x10ba   :  { %21320 = vmatmul.mubr.msk.f32.gmra.mxu0 %vm4124_vm5, %v12247_v59  ;;  %v12484_v59 = vld [vmem:[%s28727_s6 + $0x10] sm:$0xff] }
0x10bb   :  { %v12249_v24 = vpop.f32.mrf.mxu1  ;;  %21322 = vmatprep.mubr.msk.f32.mxu0 %vm22036_vm4, %v28953_v21 }
0x10bc   :  { %v17741_v24 = vld [vmem:[%s28728_s7 + $0x10] sm:$0xff] }
0x10bd   :  { %v12252_v29 = vpop.f32.mrf.mxu1 }
0x10be   :  { %21323 = vmatmul.mubr.msk.f32.gmra.mxu0 %vm4124_vm5, %v12252_v29  ;;  %v17704_v29 = vld [vmem:[%s28727_s6 + $0xb8] sm:$0xff] }
0x10bf   :  { %v12254_v32 = vpop.f32.mrf.mxu1  ;;  %21325 = vmatprep.mubr.msk.f32.mxu0 %vm22036_vm4, %v28953_v21 }
0x10c0   :  { %v17705_v32 = vld [vmem:[%s28727_s6 + $0xc0] sm:$0xff] }
0x10c1   :  { %v12257_v14 = vpop.f32.mrf.mxu1 }
0x10c2   :  { %21326 = vmatmul.mubr.msk.f32.gmra.mxu0 %vm4124_vm5, %v12257_v14  ;;  %v12485_v14 = vld [vmem:[%s28727_s6 + $0x18] sm:$0xff] }
0x10c3   :  { %v12259_v25 = vpop.f32.mrf.mxu1  ;;  %21328 = vmatprep.mubr.msk.f32.mxu0 %vm22036_vm4, %v28953_v21 }
0x10c4   :  { %v12486_v25 = vld [vmem:[%s28727_s6 + $0x20] sm:$0xff] }
0x10c5   :  { %v12262_v8 = vpop.f32.mrf.mxu1 }
0x10c6   :  { %21329 = vmatmul.mubr.msk.f32.gmra.mxu0 %vm4124_vm5, %v12262_v8  ;;  %v17706_v8 = vld [vmem:[%s28727_s6 + $0xc8] sm:$0xff] }
0x10c7   :  { %v12264_v10 = vpop.f32.mrf.mxu1  ;;  %21331 = vmatprep.mubr.msk.f32.mxu0 %vm22036_vm4, %v28953_v21 }
0x10c8   :  { %v17707_v10 = vld [vmem:[%s28727_s6 + $0xd0] sm:$0xff] }
0x10c9   :  { %v12267_v26 = vpop.f32.mrf.mxu1 }
0x10ca   :  { %21332 = vmatmul.mubr.msk.f32.gmra.mxu0 %vm4124_vm5, %v12267_v26  ;;  %v12487_v26 = vld [vmem:[%s28727_s6 + $0x28] sm:$0xff] }
0x10cb   :  { %v12269_v40 = vpop.f32.mrf.mxu1  ;;  %21334 = vmatprep.mubr.msk.f32.mxu0 %vm22036_vm4, %v28953_v21 }
0x10cc   :  { %v12488_v40 = vld [vmem:[%s28727_s6 + $0x30] sm:$0xff] }
0x10cd   :  { %v12272_v11 = vpop.f32.mrf.mxu1 }
0x10ce   :  { %21335 = vmatmul.mubr.msk.f32.gmra.mxu0 %vm4124_vm5, %v12272_v11  ;;  %v17708_v11 = vld [vmem:[%s28727_s6 + $0xd8] sm:$0xff] }
0x10cf   :  { %v12274_v34 = vpop.f32.mrf.mxu1  ;;  %21427 = vmatprep.mubr.msk.f32.mxu0 %vm4348_vm6, %v17701_v30  ;;  %v12489_v30 = vld [vmem:[%s28727_s6 + $0x38] sm:$0xff] }
0x10d0   :  { %v17709_v34 = vld [vmem:[%s28727_s6 + $0xe0] sm:$0xff] }
0x1156   :  { %v27295_v45 = vpop.f32.mrf.mxu0 }
0x1157   :  { %v27390_v54 = vmax.f32 %v27295_v45, 0.0  ;;  %v17710_v45 = vld [vmem:[%s28727_s6 + $0xe8] sm:$0xff] }
0x1158   :  { %v21294_v13 = vpop.f32.mrf.mxu0 }
0x1159   :  { %v17711_v13 = vld [vmem:[%s28727_s6 + $0xf0] sm:$0xff] }
0x115a   :  { %v27297_v39 = vpop.f32.mrf.mxu0 }
0x115b   :  { %v27383_v41 = vmax.f32 %v27297_v39, 0.0  ;;  %v12491_v39 = vld [vmem:[%s28727_s6 + $0x48] sm:$0xff] }
0x115c   :  { %v21297_v19 = vpop.f32.mrf.mxu0 }
0x115d   :  { %v12492_v19 = vld [vmem:[%s28727_s6 + $0x50] sm:$0xff] }
0x115e   :  { %v27299_v7 = vpop.f32.mrf.mxu0 }
0x115f   :  { %v27376_v2 = vmax.f32 %v27299_v7, 0.0  ;;  %v17712_v7 = vld [vmem:[%s28727_s6 + $0xf8] sm:$0xff] }
0x1160   :  { %v21300_v4 = vpop.f32.mrf.mxu0 }
0x1161   :  { %v17713_v4 = vld [vmem:[%s28727_s6 + $0x100] sm:$0xff] }
0x1162   :  { %v27301_v58 = vpop.f32.mrf.mxu0 }
0x1163   :  { %v27369_v23 = vmax.f32 %v27301_v58, 0.0  ;;  %v12493_v58 = vld [vmem:[%s28727_s6 + $0x58] sm:$0xff] }
0x1164   :  { %v21303_v33 = vpop.f32.mrf.mxu0 }
0x1165   :  { %v12494_v33 = vld [vmem:[%s28727_s6 + $0x60] sm:$0xff] }
0x1166   :  { %v27303_v36 = vpop.f32.mrf.mxu0 }
0x1167   :  { %v27362_v47 = vmax.f32 %v27303_v36, 0.0  ;;  %v17714_v36 = vld [vmem:[%s28727_s6 + $0x108] sm:$0xff] }
0x1168   :  { %v21306_v38 = vpop.f32.mrf.mxu0 }
0x1169   :  { %v17715_v38 = vld [vmem:[%s28727_s6 + $0x110] sm:$0xff] }
0x116a   :  { %v12418_v9 = vpop.f32.mrf.mxu0 }
0x116b   :  { %v27355_v15 = vmax.f32 %v12418_v9, 0.0  ;;  %v12495_v9 = vld [vmem:[%s28727_s6 + $0x68] sm:$0xff] }
0x116c   :  { %v21309_v5 = vpop.f32.mrf.mxu0 }
0x116d   :  { %v12496_v5 = vld [vmem:[%s28727_s6 + $0x70] sm:$0xff] }
0x116e   :  { %v12423_v57 = vpop.f32.mrf.mxu0 }
0x116f   :  { %v27349_v27 = vmax.f32 %v12423_v57, 0.0  ;;  %v17716_v57 = vld [vmem:[%s28727_s6 + $0x118] sm:$0xff] }
0x1170   :  { %v21312_v49 = vpop.f32.mrf.mxu0 }
0x1171   :  { %v17717_v49 = vld [vmem:[%s28727_s6 + $0x120] sm:$0xff] }
0x1172   :  { %v12428_v12 = vpop.f32.mrf.mxu0 }
0x1173   :  { %v27343_v16 = vmax.f32 %v12428_v12, 0.0  ;;  %v12497_v12 = vld [vmem:[%s28727_s6 + $0x78] sm:$0xff] }
0x1174   :  { %v21315_v53 = vpop.f32.mrf.mxu0 }
0x1175   :  { %v12498_v53 = vld [vmem:[%s28727_s6 + $0x80] sm:$0xff] }
0x1176   :  { %v12433_v46 = vpop.f32.mrf.mxu0 }
0x1177   :  { %v27337_v20 = vmax.f32 %v12433_v46, 0.0  ;;  %v17718_v46 = vld [vmem:[%s28727_s6 + $0x128] sm:$0xff] }
0x1178   :  { %v21318_v52 = vpop.f32.mrf.mxu0 }
0x1179   :  { %v17719_v52 = vld [vmem:[%s28727_s6 + $0x130] sm:$0xff] }
0x117a   :  { %v12438_v55 = vpop.f32.mrf.mxu0 }
0x117b   :  { %v27331_v35 = vmax.f32 %v12438_v55, 0.0  ;;  %v12499_v55 = vld [vmem:[%s28727_s6 + $0x88] sm:$0xff] }
0x117c   :  { %v21321_v37 = vpop.f32.mrf.mxu0 }
0x117d   :  { %v12500_v37 = vld [vmem:[%s28727_s6 + $0x90] sm:$0xff] }
0x117e   :  { %v12443_v17 = vpop.f32.mrf.mxu0 }
0x117f   :  { %v27325_v62 = vmax.f32 %v12443_v17, 0.0  ;;  %v17720_v17 = vld [vmem:[%s28727_s6 + $0x138] sm:$0xff] }
0x1180   :  { %v21324_v28 = vpop.f32.mrf.mxu0 }
0x1181   :  { %v12501_v28 = vld [vmem:[%s28727_s6 + $0x98] sm:$0xff] }
0x1182   :  { %v12448_v50 = vpop.f32.mrf.mxu0 }
0x1183   :  { %v27319_v42 = vmax.f32 %v12448_v50, 0.0  ;;  %v12728_v50 = vld [vmem:[%s28728_s7 + $0x8] sm:$0xf] }
0x1184   :  { %v21327_v0 = vpop.f32.mrf.mxu0 }
0x1185   :  { %v12727_v0 = vld [vmem:[%s28728_s7] sm:$0xff] }
0x1186   :  { %v12453_v51 = vpop.f32.mrf.mxu0 }
0x1187   :  { %v27313_v56 = vmax.f32 %v12453_v51, 0.0 }
0x1188   :  { %v21330_v6 = vpop.f32.mrf.mxu0 }
0x118a   :  { %v12458_v63 = vpop.f32.mrf.mxu0 }
0x118b   :  { %v27307_v60 = vmax.f32 %v12458_v63, 0.0 }
0x118c   :  { %v21333_v1 = vpop.f32.mrf.mxu0 }
0x118e   :  { %v12463_v43 = vpop.f32.mrf.mxu0 }
0x118f   :  { %v27305_v61 = vmax.f32 %v12463_v43, 0.0 }
0x1190   :  { %v21336_v22 = vpop.f32.mrf.mxu0 }
0x1191   :  { %21337 = vmatprep.subr.mxu1 %v27305_v61  ;;  %21397 = vmatprep.subr.mxu0 %v27305_v61 }
0x1192   :  { %21338 = vmatpush3.msra.mxu1 %v27305_v61  ;;  %21398 = vmatpush3.msra.mxu0 %v27305_v61 }
0x1193   :  { %21339 = vmatprep.subr.mxu1 %v27307_v60  ;;  %21399 = vmatprep.subr.mxu0 %v27307_v60 }
0x1194   :  { %21340 = vmatpush3.msra.mxu1 %v27307_v60  ;;  %21400 = vmatpush3.msra.mxu0 %v27307_v60 }
0x1195   :  { %21341 = vmatprep.subr.mxu1 %v27313_v56  ;;  %21401 = vmatprep.subr.mxu0 %v27313_v56 }
0x1196   :  { %21342 = vmatpush3.msra.mxu1 %v27313_v56  ;;  %21402 = vmatpush3.msra.mxu0 %v27313_v56 }
0x1197   :  { %21343 = vmatprep.subr.mxu1 %v27319_v42  ;;  %21403 = vmatprep.subr.mxu0 %v27319_v42 }
0x1198   :  { %21344 = vmatpush3.msra.mxu1 %v27319_v42  ;;  %21404 = vmatpush3.msra.mxu0 %v27319_v42 }
0x1199   :  { %21345 = vmatprep.subr.mxu1 %v27325_v62  ;;  %21405 = vmatprep.subr.mxu0 %v27325_v62 }
0x119a   :  { %21346 = vmatpush3.msra.mxu1 %v27325_v62  ;;  %21406 = vmatpush3.msra.mxu0 %v27325_v62 }
0x119b   :  { %21347 = vmatprep.subr.mxu1 %v27331_v35  ;;  %21407 = vmatprep.subr.mxu0 %v27331_v35 }
0x119c   :  { %21348 = vmatpush3.msra.mxu1 %v27331_v35  ;;  %21408 = vmatpush3.msra.mxu0 %v27331_v35 }
0x119d   :  { %21349 = vmatprep.subr.mxu1 %v27337_v20  ;;  %21409 = vmatprep.subr.mxu0 %v27337_v20 }
0x119e   :  { %21350 = vmatpush3.msra.mxu1 %v27337_v20  ;;  %21410 = vmatpush3.msra.mxu0 %v27337_v20 }
0x119f   :  { %21351 = vmatprep.subr.mxu1 %v27343_v16  ;;  %21411 = vmatprep.subr.mxu0 %v27343_v16 }
0x11a0   :  { %21352 = vmatpush3.msra.mxu1 %v27343_v16  ;;  %21412 = vmatpush3.msra.mxu0 %v27343_v16 }
0x11a1   :  { %21353 = vmatprep.subr.mxu1 %v27349_v27  ;;  %21413 = vmatprep.subr.mxu0 %v27349_v27 }
0x11a2   :  { %21354 = vmatpush3.msra.mxu1 %v27349_v27  ;;  %21414 = vmatpush3.msra.mxu0 %v27349_v27 }
0x11a3   :  { %21355 = vmatprep.subr.mxu1 %v27355_v15  ;;  %21415 = vmatprep.subr.mxu0 %v27355_v15 }
0x11a4   :  { %21356 = vmatpush3.msra.mxu1 %v27355_v15  ;;  %21416 = vmatpush3.msra.mxu0 %v27355_v15 }
0x11a5   :  { %21357 = vmatprep.subr.mxu1 %v27362_v47  ;;  %21417 = vmatprep.subr.mxu0 %v27362_v47 }
0x11a6   :  { %21358 = vmatpush3.msra.mxu1 %v27362_v47  ;;  %21418 = vmatpush3.msra.mxu0 %v27362_v47 }
0x11a7   :  { %21359 = vmatprep.subr.mxu1 %v27369_v23  ;;  %21419 = vmatprep.subr.mxu0 %v27369_v23 }
0x11a8   :  { %21360 = vmatpush3.msra.mxu1 %v27369_v23  ;;  %21420 = vmatpush3.msra.mxu0 %v27369_v23 }
0x11a9   :  { %21361 = vmatprep.subr.mxu1 %v27376_v2  ;;  %21421 = vmatprep.subr.mxu0 %v27376_v2 }
0x11aa   :  { %21362 = vmatpush3.msra.mxu1 %v27376_v2  ;;  %21422 = vmatpush3.msra.mxu0 %v27376_v2 }
0x11ab   :  { %21363 = vmatprep.subr.mxu1 %v27383_v41  ;;  %21423 = vmatprep.subr.mxu0 %v27383_v41 }
0x11ac   :  { %21364 = vmatpush3.msra.mxu1 %v27383_v41  ;;  %21424 = vmatpush3.msra.mxu0 %v27383_v41 }
0x11ad   :  { %21365 = vmatprep.subr.mxu1 %v27390_v54  ;;  %21425 = vmatprep.subr.mxu0 %v27390_v54 }
0x11ae   :  { %21366 = vmatpush3.msra.mxu1 %v27390_v54  ;;  %21426 = vmatpush3.msra.mxu0 %v27390_v54 }
0x11af   :  { %21428 = vmatmul.mubr.msk.f32.vlgmr.msra.gmra.mxu0 %vm4348_vm6, %v17702_v18  ;;  %21457 = vmatprep.subr.msk.mxu1 %vm175_vm0, %v17742_v31 }
0x11b0   :  { %21368 = vmatmul.mubr.msk.f32.vlgmr.msra.gmra.mxu1 %vm4348_vm6, %v12483_v44  ;;  %21430 = vmatprep.mubr.msk.f32.mxu0 %vm4348_vm6, %v17703_v3 }
0x11b1   :  { %21458 = vmatpush3.msk.msra.mxu1 %vm175_vm0, %v17742_v31  ;;  %21370 = vmatprep.mubr.msk.f32.mxu1 %vm4348_vm6, %v12484_v59 }
0x11b2   :  { %21459 = vmatprep.subr.mxu1 %v17741_v24  ;;  %21491 = vmatprep.subr.msk.mxu0 %vm175_vm0, %v12728_v50 }
0x11b3   :  { %21460 = vmatpush3.msra.mxu1 %v17741_v24  ;;  %21431 = vmatmul.mubr.msk.f32.gmra.mxu0 %vm4348_vm6, %v17704_v29 }
0x11b4   :  { %21525 = vmatprep.subr.mxu1 %v27305_v61  ;;  %21433 = vmatprep.mubr.msk.f32.mxu0 %vm4348_vm6, %v17705_v32 }
0x11b5   :  { %21371 = vmatmul.mubr.msk.f32.gmra.mxu1 %vm4348_vm6, %v12485_v14  ;;  %21492 = vmatpush3.msk.msra.mxu0 %vm175_vm0, %v12728_v50  ;;  %v17791_v50 = vld [vmem:[%s28727_s6 + $0x170] sm:$0xff] }
0x11b6   :  { %21373 = vmatprep.mubr.msk.f32.mxu1 %vm4348_vm6, %v12486_v25  ;;  %21493 = vmatprep.subr.mxu0 %v12727_v0 }
0x11b7   :  { %21434 = vmatmul.mubr.msk.f32.gmra.mxu0 %vm4348_vm6, %v17706_v8 }
0x11b8   :  { %21436 = vmatprep.mubr.msk.f32.mxu0 %vm4348_vm6, %v17707_v10  ;;  %21494 = vmatpush3.msra.mxu0 %v12727_v0  ;;  %v17792_v0 = vld [vmem:[%s28727_s6 + $0x178] sm:$0xff] }
0x11b9   :  { %21374 = vmatmul.mubr.msk.f32.gmra.mxu1 %vm4348_vm6, %v12487_v26 }
0x11ba   :  { %21376 = vmatprep.mubr.msk.f32.mxu1 %vm4348_vm6, %v12488_v40 }
0x11bb   :  { %21437 = vmatmul.mubr.msk.f32.gmra.mxu0 %vm4348_vm6, %v17708_v11 }
0x11bc   :  { %21439 = vmatprep.mubr.msk.f32.mxu0 %vm4348_vm6, %v17709_v34 }
0x11bd   :  { %21377 = vmatmul.mubr.msk.f32.gmra.mxu1 %vm4348_vm6, %v12489_v30 }
0x11be   :  { %21379 = vmatprep.mubr.msk.f32.mxu1 %vm4348_vm6, %v12490_v48 }
0x11bf   :  { %21440 = vmatmul.mubr.msk.f32.gmra.mxu0 %vm4348_vm6, %v17710_v45 }
0x11c0   :  { %21442 = vmatprep.mubr.msk.f32.mxu0 %vm4348_vm6, %v17711_v13 }
0x11c1   :  { %21380 = vmatmul.mubr.msk.f32.gmra.mxu1 %vm4348_vm6, %v12491_v39 }
0x11c2   :  { %21382 = vmatprep.mubr.msk.f32.mxu1 %vm4348_vm6, %v12492_v19 }
0x11c3   :  { %21443 = vmatmul.mubr.msk.f32.gmra.mxu0 %vm4348_vm6, %v17712_v7 }
0x11c4   :  { %21445 = vmatprep.mubr.msk.f32.mxu0 %vm4348_vm6, %v17713_v4 }
0x11c5   :  { %21383 = vmatmul.mubr.msk.f32.gmra.mxu1 %vm4348_vm6, %v12493_v58 }
0x11c6   :  { %21385 = vmatprep.mubr.msk.f32.mxu1 %vm4348_vm6, %v12494_v33 }
0x11c7   :  { %21446 = vmatmul.mubr.msk.f32.gmra.mxu0 %vm4348_vm6, %v17714_v36 }
0x11c8   :  { %21448 = vmatprep.mubr.msk.f32.mxu0 %vm4348_vm6, %v17715_v38 }
0x11c9   :  { %21386 = vmatmul.mubr.msk.f32.gmra.mxu1 %vm4348_vm6, %v12495_v9 }
0x11ca   :  { %21388 = vmatprep.mubr.msk.f32.mxu1 %vm4348_vm6, %v12496_v5 }
0x11cb   :  { %21449 = vmatmul.mubr.msk.f32.gmra.mxu0 %vm4348_vm6, %v17716_v57 }
0x11cc   :  { %21451 = vmatprep.mubr.msk.f32.mxu0 %vm4348_vm6, %v17717_v49 }
0x11cd   :  { %21389 = vmatmul.mubr.msk.f32.gmra.mxu1 %vm4348_vm6, %v12497_v12 }
0x11ce   :  { %21391 = vmatprep.mubr.msk.f32.mxu1 %vm4348_vm6, %v12498_v53  ;;  %v17785_v53 = vld [vmem:[%s28727_s6 + $0x140] sm:$0xff] }
0x11cf   :  { %21452 = vmatmul.mubr.msk.f32.gmra.mxu0 %vm4348_vm6, %v17718_v46 }
0x11d0   :  { %21454 = vmatprep.mubr.msk.f32.mxu0 %vm4348_vm6, %v17719_v52  ;;  %v17786_v52 = vld [vmem:[%s28727_s6 + $0x148] sm:$0xff] }
0x11d1   :  { %21392 = vmatmul.mubr.msk.f32.gmra.mxu1 %vm4348_vm6, %v12499_v55  ;;  %v17787_v55 = vld [vmem:[%s28727_s6 + $0x150] sm:$0xff] }
0x11d2   :  { %21394 = vmatprep.mubr.msk.f32.mxu1 %vm4348_vm6, %v12500_v37  ;;  %v17788_v37 = vld [vmem:[%s28727_s6 + $0x158] sm:$0xff] }
0x11d3   :  { %21455 = vmatmul.mubr.msk.f32.gmra.mxu0 %vm4348_vm6, %v17720_v17  ;;  %v17789_v17 = vld [vmem:[%s28727_s6 + $0x160] sm:$0xff] }
0x11d5   :  { %21395 = vmatmul.mubr.msk.f32.gmra.mxu1 %vm4348_vm6, %v12501_v28  ;;  %v17790_v28 = vld [vmem:[%s28727_s6 + $0x168] sm:$0xff] }
0x126f   :  { %v21429_v51 = vpop.f32.mrf.mxu0 }
0x1270   :  { %v21369_v6 = vpop.f32.mrf.mxu1 }
0x1271   :  { %v12875_v63 = vpop.f32.mrf.mxu0 }
0x1272   :  { %21461 = vmatprep.mubr.msk.f32.mxu1 %vm4825_vm7, %v12875_v63  ;;  %v12628_v1 = vpop.f32.mrf.mxu1  ;;  %v17795_v63 = vld [vmem:[%s28727_s6 + $0x190] sm:$0xff] }
0x1273   :  { %v21432_v43 = vpop.f32.mrf.mxu0  ;;  %21462 = vmatmul.mubr.msk.f32.vlgmr.msra.gmra.mxu1 %vm4825_vm7, %v21429_v51  ;;  %21495 = vmatprep.mubr.msk.f32.mxu0 %vm4825_vm7, %v12628_v1  ;;  %v17793_v51 = vld [vmem:[%s28727_s6 + $0x180] sm:$0xff]  ;;  %v17796_v1 = vld [vmem:[%s28727_s6 + $0x198] sm:$0xff] }
0x1274   :  { %21526 = vmatpush3.msra.mxu1 %v27305_v61  ;;  %21496 = vmatmul.mubr.msk.f32.vlgmr.msra.gmra.mxu0 %vm4825_vm7, %v21369_v6  ;;  %v17794_v6 = vld [vmem:[%s28727_s6 + $0x188] sm:$0xff] }
0x1275   :  { %21527 = vmatprep.subr.mxu1 %v27307_v60  ;;  %v12885_v22 = vpop.f32.mrf.mxu0  ;;  %v21372_v18 = vpop.f32.mrf.mxu1 }
0x1276   :  { %21528 = vmatpush3.msra.mxu1 %v27307_v60  ;;  %21464 = vmatprep.mubr.msk.f32.mxu1 %vm4825_vm7, %v12885_v22  ;;  %v17798_v22 = vld [vmem:[%s28727_s6 + $0x1a8] sm:$0xff] }
0x1277   :  { %21529 = vmatprep.subr.mxu1 %v27313_v56  ;;  %v21435_v31 = vpop.f32.mrf.mxu0  ;;  %21465 = vmatmul.mubr.msk.f32.gmra.mxu1 %vm4825_vm7, %v21432_v43  ;;  %v12638_v44 = vpop.f32.mrf.mxu1  ;;  %v17797_v43 = vld [vmem:[%s28727_s6 + $0x1a0] sm:$0xff] }
0x1278   :  { %21530 = vmatpush3.msra.mxu1 %v27313_v56  ;;  %21498 = vmatprep.mubr.msk.f32.mxu0 %vm4825_vm7, %v12638_v44  ;;  %v17801_v44 = vld [vmem:[%s28727_s6 + $0x1c0] sm:$0xff] }
0x1279   :  { %21531 = vmatprep.subr.mxu1 %v27319_v42  ;;  %v12895_v3 = vpop.f32.mrf.mxu0  ;;  %v21375_v59 = vpop.f32.mrf.mxu1  ;;  %21499 = vmatmul.mubr.msk.f32.gmra.mxu0 %vm4825_vm7, %v21372_v18  ;;  %v17799_v18 = vld [vmem:[%s28727_s6 + $0x1b0] sm:$0xff] }
0x127a   :  { %21532 = vmatpush3.msra.mxu1 %v27319_v42  ;;  %21467 = vmatprep.mubr.msk.f32.mxu1 %vm4825_vm7, %v12895_v3  ;;  %v17802_v3 = vld [vmem:[%s28727_s6 + $0x1c8] sm:$0xff] }
0x127b   :  { %21533 = vmatprep.subr.mxu1 %v27325_v62  ;;  %v21438_v24 = vpop.f32.mrf.mxu0  ;;  %21468 = vmatmul.mubr.msk.f32.gmra.mxu1 %vm4825_vm7, %v21435_v31  ;;  %v12648_v29 = vpop.f32.mrf.mxu1  ;;  %v17800_v31 = vld [vmem:[%s28727_s6 + $0x1b8] sm:$0xff] }
0x127c   :  { %21534 = vmatpush3.msra.mxu1 %v27325_v62  ;;  %21501 = vmatprep.mubr.msk.f32.mxu0 %vm4825_vm7, %v12648_v29  ;;  %v17848_v29 = vld [vmem:[%s28727_s6 + $0x1e0] sm:$0xff] }
0x127d   :  { %21535 = vmatprep.subr.mxu1 %v27331_v35  ;;  %v12905_v32 = vpop.f32.mrf.mxu0  ;;  %v21378_v14 = vpop.f32.mrf.mxu1  ;;  %21502 = vmatmul.mubr.msk.f32.gmra.mxu0 %vm4825_vm7, %v21375_v59  ;;  %v17803_v59 = vld [vmem:[%s28727_s6 + $0x1d0] sm:$0xff] }
0x127e   :  { %21536 = vmatpush3.msra.mxu1 %v27331_v35  ;;  %21470 = vmatprep.mubr.msk.f32.mxu1 %vm4825_vm7, %v12905_v32  ;;  %v17849_v32 = vld [vmem:[%s28727_s6 + $0x1e8] sm:$0xff] }
0x127f   :  { %21537 = vmatprep.subr.mxu1 %v27337_v20  ;;  %v21441_v25 = vpop.f32.mrf.mxu0  ;;  %21471 = vmatmul.mubr.msk.f32.gmra.mxu1 %vm4825_vm7, %v21438_v24  ;;  %v12658_v8 = vpop.f32.mrf.mxu1  ;;  %v17804_v24 = vld [vmem:[%s28727_s6 + $0x1d8] sm:$0xff] }
0x1280   :  { %21538 = vmatpush3.msra.mxu1 %v27337_v20  ;;  %21504 = vmatprep.mubr.msk.f32.mxu0 %vm4825_vm7, %v12658_v8  ;;  %v17852_v8 = vld [vmem:[%s28727_s6 + $0x200] sm:$0xff] }
0x1281   :  { %21539 = vmatprep.subr.mxu1 %v27343_v16  ;;  %v12915_v10 = vpop.f32.mrf.mxu0  ;;  %v21381_v26 = vpop.f32.mrf.mxu1  ;;  %21505 = vmatmul.mubr.msk.f32.gmra.mxu0 %vm4825_vm7, %v21378_v14  ;;  %v17850_v14 = vld [vmem:[%s28727_s6 + $0x1f0] sm:$0xff] }
0x1282   :  { %21540 = vmatpush3.msra.mxu1 %v27343_v16  ;;  %21473 = vmatprep.mubr.msk.f32.mxu1 %vm4825_vm7, %v12915_v10  ;;  %v17854_v10 = vld [vmem:[%s28727_s6 + $0x210] sm:$0xff] }
0x1283   :  { %21541 = vmatprep.subr.mxu1 %v27349_v27  ;;  %v21444_v40 = vpop.f32.mrf.mxu0  ;;  %21474 = vmatmul.mubr.msk.f32.gmra.mxu1 %vm4825_vm7, %v21441_v25  ;;  %v12668_v11 = vpop.f32.mrf.mxu1  ;;  %v17851_v25 = vld [vmem:[%s28727_s6 + $0x1f8] sm:$0xff] }
0x1284   :  { %21542 = vmatpush3.msra.mxu1 %v27349_v27  ;;  %21507 = vmatprep.mubr.msk.f32.mxu0 %vm4825_vm7, %v12668_v11  ;;  %v17912_v11 = vld [vmem:[%s28727_s6 + $0x288] sm:$0xff] }
0x1285   :  { %21543 = vmatprep.subr.mxu1 %v27355_v15  ;;  %v12925_v34 = vpop.f32.mrf.mxu0  ;;  %v21384_v30 = vpop.f32.mrf.mxu1  ;;  %21508 = vmatmul.mubr.msk.f32.gmra.mxu0 %vm4825_vm7, %v21381_v26  ;;  %v17864_v26 = vld [vmem:[%s28727_s6 + $0x260] sm:$0xff] }
0x1286   :  { %21544 = vmatpush3.msra.mxu1 %v27355_v15  ;;  %21476 = vmatprep.mubr.msk.f32.mxu1 %vm4825_vm7, %v12925_v34  ;;  %v17913_v34 = vld [vmem:[%s28727_s6 + $0x290] sm:$0xff] }
0x1287   :  { %21545 = vmatprep.subr.mxu1 %v27362_v47  ;;  %v21447_v48 = vpop.f32.mrf.mxu0  ;;  %21477 = vmatmul.mubr.msk.f32.gmra.mxu1 %vm4825_vm7, %v21444_v40  ;;  %v12678_v45 = vpop.f32.mrf.mxu1  ;;  %v17866_v40 = vld [vmem:[%s28727_s6 + $0x270] sm:$0xff] }
0x1288   :  { %21546 = vmatpush3.msra.mxu1 %v27362_v47  ;;  %21510 = vmatprep.mubr.msk.f32.mxu0 %vm4825_vm7, %v12678_v45  ;;  %v17916_v45 = vld [vmem:[%s28727_s6 + $0x2a8] sm:$0xff] }
0x1289   :  { %21547 = vmatprep.subr.mxu1 %v27369_v23  ;;  %v12935_v13 = vpop.f32.mrf.mxu0  ;;  %v21387_v39 = vpop.f32.mrf.mxu1  ;;  %21511 = vmatmul.mubr.msk.f32.gmra.mxu0 %vm4825_vm7, %v21384_v30  ;;  %v17914_v30 = vld [vmem:[%s28727_s6 + $0x298] sm:$0xff] }
0x128a   :  { %21548 = vmatpush3.msra.mxu1 %v27369_v23  ;;  %21479 = vmatprep.mubr.msk.f32.mxu1 %vm4825_vm7, %v12935_v13  ;;  %v17917_v13 = vld [vmem:[%s28727_s6 + $0x2b0] sm:$0xff] }
0x128b   :  { %21549 = vmatprep.subr.mxu1 %v27376_v2  ;;  %v21450_v19 = vpop.f32.mrf.mxu0  ;;  %21480 = vmatmul.mubr.msk.f32.gmra.mxu1 %vm4825_vm7, %v21447_v48  ;;  %v12688_v7 = vpop.f32.mrf.mxu1  ;;  %v17915_v48 = vld [vmem:[%s28727_s6 + $0x2a0] sm:$0xff] }
0x128c   :  { %21550 = vmatpush3.msra.mxu1 %v27376_v2  ;;  %21513 = vmatprep.mubr.msk.f32.mxu0 %vm4825_vm7, %v12688_v7  ;;  %v17920_v7 = vld [vmem:[%s28727_s6 + $0x2c8] sm:$0xff] }
0x128d   :  { %21551 = vmatprep.subr.mxu1 %v27383_v41  ;;  %v12945_v4 = vpop.f32.mrf.mxu0  ;;  %v21390_v58 = vpop.f32.mrf.mxu1  ;;  %21514 = vmatmul.mubr.msk.f32.gmra.mxu0 %vm4825_vm7, %v21387_v39  ;;  %v17918_v39 = vld [vmem:[%s28727_s6 + $0x2b8] sm:$0xff] }
0x128e   :  { %21552 = vmatpush3.msra.mxu1 %v27383_v41  ;;  %21482 = vmatprep.mubr.msk.f32.mxu1 %vm4825_vm7, %v12945_v4  ;;  %v17921_v4 = vld [vmem:[%s28727_s6 + $0x2d0] sm:$0xff] }
0x128f   :  { %21553 = vmatprep.subr.mxu1 %v27390_v54  ;;  %v21453_v33 = vpop.f32.mrf.mxu0  ;;  %21483 = vmatmul.mubr.msk.f32.gmra.mxu1 %vm4825_vm7, %v21450_v19  ;;  %v12698_v36 = vpop.f32.mrf.mxu1  ;;  %v17919_v19 = vld [vmem:[%s28727_s6 + $0x2c0] sm:$0xff] }
0x1290   :  { %21554 = vmatpush3.msra.mxu1 %v27390_v54  ;;  %21516 = vmatprep.mubr.msk.f32.mxu0 %vm4825_vm7, %v12698_v36  ;;  %v27920_v36 = vld [vmem:[%s28728_s7 + $0x38] sm:$0xf] }
0x1291   :  { %21619 = vmatprep.subr.mxu1 %v27305_v61  ;;  %v12955_v38 = vpop.f32.mrf.mxu0  ;;  %v21393_v9 = vpop.f32.mrf.mxu1  ;;  %21517 = vmatmul.mubr.msk.f32.gmra.mxu0 %vm4825_vm7, %v21390_v58  ;;  %v17922_v58 = vld [vmem:[%s28727_s6 + $0x2d8] sm:$0xff] }
0x1292   :  { %21485 = vmatprep.mubr.msk.f32.mxu1 %vm4825_vm7, %v12955_v38  ;;  %v17924_v38 = vld [vmem:[%s28727_s6 + $0x2e8] sm:$0xff] }
0x1293   :  { %v21456_v5 = vpop.f32.mrf.mxu0  ;;  %21486 = vmatmul.mubr.msk.f32.gmra.mxu1 %vm4825_vm7, %v21453_v33  ;;  %v12708_v57 = vpop.f32.mrf.mxu1  ;;  %v17923_v33 = vld [vmem:[%s28727_s6 + $0x2e0] sm:$0xff] }
0x1294   :  { %21519 = vmatprep.mubr.msk.f32.mxu0 %vm4825_vm7, %v12708_v57  ;;  %v17927_v57 = vld [vmem:[%s28727_s6 + $0x300] sm:$0xff] }
0x1295   :  { %v12965_v49 = vpop.f32.mrf.mxu0  ;;  %v21396_v12 = vpop.f32.mrf.mxu1  ;;  %21520 = vmatmul.mubr.msk.f32.gmra.mxu0 %vm4825_vm7, %v21393_v9  ;;  %v17925_v9 = vld [vmem:[%s28727_s6 + $0x2f0] sm:$0xff] }
0x1296   :  { %21488 = vmatprep.mubr.msk.f32.mxu1 %vm4825_vm7, %v12965_v49  ;;  %v17928_v49 = vld [vmem:[%s28727_s6 + $0x308] sm:$0xff] }
0x1297   :  { %21489 = vmatmul.mubr.msk.f32.gmra.mxu1 %vm4825_vm7, %v21456_v5  ;;  %v12718_v46 = vpop.f32.mrf.mxu1  ;;  %v17926_v5 = vld [vmem:[%s28727_s6 + $0x2f8] sm:$0xff] }
0x1298   :  { %21555 = vmatprep.mubr.msk.f32.mxu1 %vm4348_vm6, %v17785_v53  ;;  %21522 = vmatprep.mubr.msk.f32.mxu0 %vm4825_vm7, %v12718_v46  ;;  %v17930_v53 = vld [vmem:[%s28727_s6 + $0x318] sm:$0xff] }
0x1299   :  { %21523 = vmatmul.mubr.msk.f32.gmra.mxu0 %vm4825_vm7, %v21396_v12  ;;  %v17929_v12 = vld [vmem:[%s28727_s6 + $0x310] sm:$0xff] }
0x129b   :  { %21556 = vmatmul.mubr.msk.f32.vlgmr.msra.gmra.mxu1 %vm4348_vm6, %v17786_v52 }
0x129c   :  { %21620 = vmatpush3.msra.mxu1 %v27305_v61  ;;  %21558 = vmatprep.mubr.msk.f32.mxu1 %vm4348_vm6, %v17787_v55 }
0x129d   :  { %21621 = vmatprep.subr.mxu1 %v27307_v60 }
0x129e   :  { %21622 = vmatpush3.msra.mxu1 %v27307_v60 }
0x129f   :  { %21623 = vmatprep.subr.mxu1 %v27313_v56  ;;  %21559 = vmatmul.mubr.msk.f32.gmra.mxu1 %vm4348_vm6, %v17788_v37 }
0x12a0   :  { %21624 = vmatpush3.msra.mxu1 %v27313_v56  ;;  %21561 = vmatprep.mubr.msk.f32.mxu1 %vm4348_vm6, %v17789_v17 }
0x12a1   :  { %21625 = vmatprep.subr.mxu1 %v27319_v42 }
0x12a2   :  { %21626 = vmatpush3.msra.mxu1 %v27319_v42 }
0x12a3   :  { %21627 = vmatprep.subr.mxu1 %v27325_v62  ;;  %21562 = vmatmul.mubr.msk.f32.gmra.mxu1 %vm4348_vm6, %v17790_v28 }
0x12a4   :  { %21628 = vmatpush3.msra.mxu1 %v27325_v62  ;;  %21564 = vmatprep.mubr.msk.f32.mxu1 %vm4348_vm6, %v17791_v50 }
0x12a5   :  { %21629 = vmatprep.subr.mxu1 %v27331_v35 }
0x12a6   :  { %21630 = vmatpush3.msra.mxu1 %v27331_v35 }
0x12a7   :  { %21631 = vmatprep.subr.mxu1 %v27337_v20  ;;  %21565 = vmatmul.mubr.msk.f32.gmra.mxu1 %vm4348_vm6, %v17792_v0 }
0x12a8   :  { %21632 = vmatpush3.msra.mxu1 %v27337_v20  ;;  %21567 = vmatprep.mubr.msk.f32.mxu1 %vm4348_vm6, %v17793_v51 }
0x12a9   :  { %21633 = vmatprep.subr.mxu1 %v27343_v16 }
0x12aa   :  { %21634 = vmatpush3.msra.mxu1 %v27343_v16 }
0x12ab   :  { %21635 = vmatprep.subr.mxu1 %v27349_v27  ;;  %21568 = vmatmul.mubr.msk.f32.gmra.mxu1 %vm4348_vm6, %v17794_v6 }
0x12ac   :  { %21636 = vmatpush3.msra.mxu1 %v27349_v27  ;;  %21570 = vmatprep.mubr.msk.f32.mxu1 %vm4348_vm6, %v17795_v63 }
0x12ad   :  { %21637 = vmatprep.subr.mxu1 %v27355_v15 }
0x12ae   :  { %21638 = vmatpush3.msra.mxu1 %v27355_v15 }
0x12af   :  { %21639 = vmatprep.subr.mxu1 %v27362_v47  ;;  %21571 = vmatmul.mubr.msk.f32.gmra.mxu1 %vm4348_vm6, %v17796_v1 }
0x12b0   :  { %21640 = vmatpush3.msra.mxu1 %v27362_v47  ;;  %21573 = vmatprep.mubr.msk.f32.mxu1 %vm4348_vm6, %v17797_v43 }
0x12b1   :  { %21641 = vmatprep.subr.mxu1 %v27369_v23 }
0x12b2   :  { %21642 = vmatpush3.msra.mxu1 %v27369_v23 }
0x12b3   :  { %21643 = vmatprep.subr.mxu1 %v27376_v2  ;;  %21574 = vmatmul.mubr.msk.f32.gmra.mxu1 %vm4348_vm6, %v17798_v22 }
0x12b4   :  { %21644 = vmatpush3.msra.mxu1 %v27376_v2  ;;  %21576 = vmatprep.mubr.msk.f32.mxu1 %vm4348_vm6, %v17799_v18 }
0x12b5   :  { %21645 = vmatprep.subr.mxu1 %v27383_v41 }
0x12b6   :  { %21646 = vmatpush3.msra.mxu1 %v27383_v41 }
0x12b7   :  { %21647 = vmatprep.subr.mxu1 %v27390_v54  ;;  %21577 = vmatmul.mubr.msk.f32.gmra.mxu1 %vm4348_vm6, %v17800_v31 }
0x12b8   :  { %21648 = vmatpush3.msra.mxu1 %v27390_v54  ;;  %21579 = vmatprep.mubr.msk.f32.mxu1 %vm4348_vm6, %v17801_v44 }
0x12b9   :  { %21713 = vmatprep.subr.mxu1 %v27305_v61 }
0x12bb   :  { %21580 = vmatmul.mubr.msk.f32.gmra.mxu1 %vm4348_vm6, %v17802_v3 }
0x12bc   :  { %21582 = vmatprep.mubr.msk.f32.mxu1 %vm4348_vm6, %v17803_v59 }
0x12bf   :  { %21583 = vmatmul.mubr.msk.f32.gmra.mxu1 %vm4348_vm6, %v17804_v24 }
0x12c0   :  { %21649 = vmatprep.mubr.msk.f32.mxu1 %vm4348_vm6, %v17848_v29 }
0x12c3   :  { %21650 = vmatmul.mubr.msk.f32.vlgmr.msra.gmra.mxu1 %vm4348_vm6, %v17849_v32 }
0x12c4   :  { %21714 = vmatpush3.msra.mxu1 %v27305_v61  ;;  %21652 = vmatprep.mubr.msk.f32.mxu1 %vm4348_vm6, %v17850_v14  ;;  %v17853_v61 = vld [vmem:[%s28727_s6 + $0x208] sm:$0xff] }
0x12c5   :  { %21715 = vmatprep.subr.mxu1 %v27307_v60 }
0x12c6   :  { %21716 = vmatpush3.msra.mxu1 %v27307_v60  ;;  %v17855_v60 = vld [vmem:[%s28727_s6 + $0x218] sm:$0xff] }
0x12c7   :  { %21717 = vmatprep.subr.mxu1 %v27313_v56  ;;  %21653 = vmatmul.mubr.msk.f32.gmra.mxu1 %vm4348_vm6, %v17851_v25 }
0x12c8   :  { %21718 = vmatpush3.msra.mxu1 %v27313_v56  ;;  %21655 = vmatprep.mubr.msk.f32.mxu1 %vm4348_vm6, %v17852_v8  ;;  %v17856_v56 = vld [vmem:[%s28727_s6 + $0x220] sm:$0xff] }
0x12c9   :  { %21719 = vmatprep.subr.mxu1 %v27319_v42 }
0x12ca   :  { %21720 = vmatpush3.msra.mxu1 %v27319_v42  ;;  %v17857_v42 = vld [vmem:[%s28727_s6 + $0x228] sm:$0xff] }
0x12cb   :  { %21721 = vmatprep.subr.mxu1 %v27325_v62  ;;  %21656 = vmatmul.mubr.msk.f32.gmra.mxu1 %vm4348_vm6, %v17853_v61 }
0x12cc   :  { %21722 = vmatpush3.msra.mxu1 %v27325_v62  ;;  %21658 = vmatprep.mubr.msk.f32.mxu1 %vm4348_vm6, %v17854_v10  ;;  %v17858_v62 = vld [vmem:[%s28727_s6 + $0x230] sm:$0xff] }
0x12cd   :  { %21723 = vmatprep.subr.mxu1 %v27331_v35 }
0x12ce   :  { %21724 = vmatpush3.msra.mxu1 %v27331_v35  ;;  %v17859_v35 = vld [vmem:[%s28727_s6 + $0x238] sm:$0xff] }
0x12cf   :  { %21725 = vmatprep.subr.mxu1 %v27337_v20  ;;  %21659 = vmatmul.mubr.msk.f32.gmra.mxu1 %vm4348_vm6, %v17855_v60 }
0x12d0   :  { %21726 = vmatpush3.msra.mxu1 %v27337_v20  ;;  %21661 = vmatprep.mubr.msk.f32.mxu1 %vm4348_vm6, %v17856_v56  ;;  %v17860_v20 = vld [vmem:[%s28727_s6 + $0x240] sm:$0xff] }
0x12d1   :  { %21727 = vmatprep.subr.mxu1 %v27343_v16 }
0x12d2   :  { %21728 = vmatpush3.msra.mxu1 %v27343_v16  ;;  %v17826_v16 = vld [vmem:[%s28728_s7 + $0x28] sm:$0xf] }
0x12d3   :  { %21729 = vmatprep.subr.mxu1 %v27349_v27  ;;  %21662 = vmatmul.mubr.msk.f32.gmra.mxu1 %vm4348_vm6, %v17857_v42 }
0x12d4   :  { %21730 = vmatpush3.msra.mxu1 %v27349_v27  ;;  %21664 = vmatprep.mubr.msk.f32.mxu1 %vm4348_vm6, %v17858_v62  ;;  %v17861_v27 = vld [vmem:[%s28727_s6 + $0x248] sm:$0xff] }
0x12d5   :  { %21731 = vmatprep.subr.mxu1 %v27355_v15  ;;  %21585 = vmatprep.subr.msk.mxu0 %vm175_vm0, %v17826_v16 }
0x12d6   :  { %21732 = vmatpush3.msra.mxu1 %v27355_v15  ;;  %v17862_v15 = vld [vmem:[%s28727_s6 + $0x250] sm:$0xff]  ;;  %21586 = vmatpush3.msk.msra.mxu0 %vm175_vm0, %v17826_v16 }
0x12d7   :  { %21733 = vmatprep.subr.mxu1 %v27362_v47  ;;  %21665 = vmatmul.mubr.msk.f32.gmra.mxu1 %vm4348_vm6, %v17859_v35 }
0x12d8   :  { %21734 = vmatpush3.msra.mxu1 %v27362_v47  ;;  %21667 = vmatprep.mubr.msk.f32.mxu1 %vm4348_vm6, %v17860_v20  ;;  %v17863_v47 = vld [vmem:[%s28727_s6 + $0x258] sm:$0xff] }
0x12d9   :  { %21735 = vmatprep.subr.mxu1 %v27369_v23 }
0x12da   :  { %21736 = vmatpush3.msra.mxu1 %v27369_v23  ;;  %v17825_v23 = vld [vmem:[%s28728_s7 + $0x20] sm:$0xff] }
0x12db   :  { %21737 = vmatprep.subr.mxu1 %v27376_v2  ;;  %21668 = vmatmul.mubr.msk.f32.gmra.mxu1 %vm4348_vm6, %v17861_v27 }
0x12dc   :  { %21738 = vmatpush3.msra.mxu1 %v27376_v2  ;;  %21670 = vmatprep.mubr.msk.f32.mxu1 %vm4348_vm6, %v17862_v15  ;;  %v17865_v2 = vld [vmem:[%s28727_s6 + $0x268] sm:$0xff] }
0x12dd   :  { %21739 = vmatprep.subr.mxu1 %v27383_v41  ;;  %21587 = vmatprep.subr.mxu0 %v17825_v23 }
0x12de   :  { %21740 = vmatpush3.msra.mxu1 %v27383_v41  ;;  %21588 = vmatpush3.msra.mxu0 %v17825_v23  ;;  %v17867_v41 = vld [vmem:[%s28727_s6 + $0x278] sm:$0xff] }
0x12df   :  { %21741 = vmatprep.subr.mxu1 %v27390_v54  ;;  %21671 = vmatmul.mubr.msk.f32.gmra.mxu1 %vm4348_vm6, %v17863_v47 }
0x12e0   :  { %21742 = vmatpush3.msra.mxu1 %v27390_v54  ;;  %21673 = vmatprep.mubr.msk.f32.mxu1 %vm4348_vm6, %v17864_v26  ;;  %v17911_v54 = vld [vmem:[%s28727_s6 + $0x280] sm:$0xff] }
0x12e1   :  { %15309 = vmatprep.subr.mxu1 %v28953_v21  ;;  %21679 = vmatprep.subr.msk.mxu0 %vm175_vm0, %v27920_v36 }
0x12e3   :  { %21674 = vmatmul.mubr.msk.f32.gmra.mxu1 %vm4348_vm6, %v17865_v2 }
0x12e4   :  { %21676 = vmatprep.mubr.msk.f32.mxu1 %vm4348_vm6, %v17866_v40 }
0x12e7   :  { %21677 = vmatmul.mubr.msk.f32.gmra.mxu1 %vm4348_vm6, %v17867_v41 }
0x12e8   :  { %21743 = vmatprep.mubr.msk.f32.mxu1 %vm4348_vm6, %v17911_v54 }
0x12eb   :  { %21744 = vmatmul.mubr.msk.f32.vlgmr.msra.gmra.mxu1 %vm4348_vm6, %v17912_v11 }
0x12ec   :  { %21746 = vmatprep.mubr.msk.f32.mxu1 %vm4348_vm6, %v17913_v34 }
0x12ef   :  { %21747 = vmatmul.mubr.msk.f32.gmra.mxu1 %vm4348_vm6, %v17914_v30 }
0x12f0   :  { %21749 = vmatprep.mubr.msk.f32.mxu1 %vm4348_vm6, %v17915_v48 }
0x12f3   :  { %21750 = vmatmul.mubr.msk.f32.gmra.mxu1 %vm4348_vm6, %v17916_v45 }
0x12f4   :  { %21752 = vmatprep.mubr.msk.f32.mxu1 %vm4348_vm6, %v17917_v13 }
0x12f7   :  { %21753 = vmatmul.mubr.msk.f32.gmra.mxu1 %vm4348_vm6, %v17918_v39 }
0x12f8   :  { %21755 = vmatprep.mubr.msk.f32.mxu1 %vm4348_vm6, %v17919_v19 }
0x12fb   :  { %21756 = vmatmul.mubr.msk.f32.gmra.mxu1 %vm4348_vm6, %v17920_v7 }
0x12fc   :  { %21758 = vmatprep.mubr.msk.f32.mxu1 %vm4348_vm6, %v17921_v4  ;;  %v17888_v4 = vld [vmem:[%s28728_s7 + $0x30] sm:$0xff] }
0x12ff   :  { %21759 = vmatmul.mubr.msk.f32.gmra.mxu1 %vm4348_vm6, %v17922_v58 }
0x1300   :  { %21761 = vmatprep.mubr.msk.f32.mxu1 %vm4348_vm6, %v17923_v33  ;;  %v17952_v33 = vld [vmem:[%s28728_s7 + $0x48] sm:$0xf] }
0x1303   :  { %21762 = vmatmul.mubr.msk.f32.gmra.mxu1 %vm4348_vm6, %v17924_v38 }
0x1304   :  { %21764 = vmatprep.mubr.msk.f32.mxu1 %vm4348_vm6, %v17925_v9 }
0x1307   :  { %21765 = vmatmul.mubr.msk.f32.gmra.mxu1 %vm4348_vm6, %v17926_v5 }
0x1308   :  { %21767 = vmatprep.mubr.msk.f32.mxu1 %vm4348_vm6, %v17927_v57 }
0x130b   :  { %21768 = vmatmul.mubr.msk.f32.gmra.mxu1 %vm4348_vm6, %v17928_v49 }
0x130c   :  { %21770 = vmatprep.mubr.msk.f32.mxu1 %vm4348_vm6, %v17929_v12 }
0x130f   :  { %21771 = vmatmul.mubr.msk.f32.gmra.mxu1 %vm4348_vm6, %v17930_v53 }
0x1333   :  { %v21463_v46 = vpop.f32.mrf.mxu1 }
0x1334   :  { %v21497_v52 = vpop.f32.mrf.mxu0 }
0x1335   :  { %v27954_v55 = vpop.f32.mrf.mxu1  ;;  %v27956_v37 = vadd.f32 %v21497_v52, %v21463_v46 }
0x1336   :  { %v27958_v17 = vpop.f32.mrf.mxu0 }
0x1337   :  { %v21466_v28 = vpop.f32.mrf.mxu1 }
0x1339   :  { %v27960_v50 = vpop.f32.mrf.mxu1  ;;  %v21500_v0 = vpop.f32.mrf.mxu0 }
0x133a   :  { %v27962_v51 = vadd.f32 %v21500_v0, %v21466_v28 }
0x133b   :  { %v21469_v6 = vpop.f32.mrf.mxu1  ;;  %v27964_v63 = vpop.f32.mrf.mxu0 }
0x133d   :  { %v27966_v1 = vpop.f32.mrf.mxu1  ;;  %v21503_v43 = vpop.f32.mrf.mxu0 }
0x133e   :  { %v27968_v22 = vadd.f32 %v21503_v43, %v21469_v6 }
0x133f   :  { %v21472_v18 = vpop.f32.mrf.mxu1  ;;  %v27970_v31 = vpop.f32.mrf.mxu0 }
0x1341   :  { %v27972_v44 = vpop.f32.mrf.mxu1  ;;  %v21506_v3 = vpop.f32.mrf.mxu0 }
0x1342   :  { %v27974_v59 = vadd.f32 %v21506_v3, %v21472_v18 }
0x1343   :  { %v21475_v24 = vpop.f32.mrf.mxu1  ;;  %v27976_v29 = vpop.f32.mrf.mxu0 }
0x1345   :  { %v27978_v32 = vpop.f32.mrf.mxu1  ;;  %v21509_v14 = vpop.f32.mrf.mxu0 }
0x1346   :  { %v27980_v25 = vadd.f32 %v21509_v14, %v21475_v24 }
0x1347   :  { %v21478_v8 = vpop.f32.mrf.mxu1  ;;  %v27982_v61 = vpop.f32.mrf.mxu0 }
0x1349   :  { %v27984_v10 = vpop.f32.mrf.mxu1  ;;  %v21512_v60 = vpop.f32.mrf.mxu0 }
0x134a   :  { %v27986_v56 = vadd.f32 %v21512_v60, %v21478_v8  ;;  %v17951_v60 = vld [vmem:[%s28728_s7 + $0x40] sm:$0xff] }
0x134b   :  { %v21481_v42 = vpop.f32.mrf.mxu1  ;;  %v27988_v62 = vpop.f32.mrf.mxu0 }
0x134d   :  { %v27990_v35 = vpop.f32.mrf.mxu1  ;;  %v21515_v20 = vpop.f32.mrf.mxu0 }
0x134e   :  { %v27992_v16 = vadd.f32 %v21515_v20, %v21481_v42 }
0x134f   :  { %v21484_v27 = vpop.f32.mrf.mxu1  ;;  %v27994_v15 = vpop.f32.mrf.mxu0 }
0x1351   :  { %v27996_v47 = vpop.f32.mrf.mxu1  ;;  %v21518_v26 = vpop.f32.mrf.mxu0 }
0x1352   :  { %v27998_v23 = vadd.f32 %v21518_v26, %v21484_v27 }
0x1353   :  { %v21487_v2 = vpop.f32.mrf.mxu1  ;;  %v28000_v40 = vpop.f32.mrf.mxu0 }
0x1355   :  { %v13185_v41 = vpop.f32.mrf.mxu1  ;;  %v21521_v54 = vpop.f32.mrf.mxu0 }
0x1356   :  { %v28002_v11 = vadd.f32 %v21521_v54, %v21487_v2 }
0x1357   :  { %v21490_v34 = vpop.f32.mrf.mxu1  ;;  %v13413_v30 = vpop.f32.mrf.mxu0 }
0x1358   :  { %v28004_v48 = vadd.f32 %v13413_v30, %v13185_v41 }
0x1359   :  { %v28006_v45 = vpop.f32.mrf.mxu1  ;;  %v21524_v13 = vpop.f32.mrf.mxu0 }
0x135a   :  { %v28008_v39 = vadd.f32 %v21524_v13, %v21490_v34 }
0x135b   :  { %v21557_v19 = vpop.f32.mrf.mxu1 }
0x135d   :  { %v13578_v7 = vpop.f32.mrf.mxu1 }
0x135e   :  { %21589 = vmatprep.mubr.msk.f32.mxu0 %vm4825_vm7, %v13578_v7 }
0x135f   :  { %v21560_v58 = vpop.f32.mrf.mxu1  ;;  %21590 = vmatmul.mubr.msk.f32.vlgmr.msra.gmra.mxu0 %vm4825_vm7, %v21557_v19 }
0x1360   :  { %21680 = vmatpush3.msk.msra.mxu0 %vm175_vm0, %v27920_v36 }
0x1361   :  { %v13588_v38 = vpop.f32.mrf.mxu1  ;;  %21681 = vmatprep.subr.mxu0 %v17888_v4 }
0x1362   :  { %21592 = vmatprep.mubr.msk.f32.mxu0 %vm4825_vm7, %v13588_v38  ;;  %21682 = vmatpush3.msra.mxu0 %v17888_v4 }
0x1363   :  { %v21563_v9 = vpop.f32.mrf.mxu1  ;;  %21593 = vmatmul.mubr.msk.f32.gmra.mxu0 %vm4825_vm7, %v21560_v58  ;;  %21773 = vmatprep.subr.msk.mxu0 %vm175_vm0, %v17952_v33 }
0x1365   :  { %v13598_v5 = vpop.f32.mrf.mxu1 }
0x1366   :  { %21595 = vmatprep.mubr.msk.f32.mxu0 %vm4825_vm7, %v13598_v5 }
0x1367   :  { %v21566_v57 = vpop.f32.mrf.mxu1  ;;  %21596 = vmatmul.mubr.msk.f32.gmra.mxu0 %vm4825_vm7, %v21563_v9 }
0x1369   :  { %v13608_v36 = vpop.f32.mrf.mxu1 }
0x136a   :  { %21598 = vmatprep.mubr.msk.f32.mxu0 %vm4825_vm7, %v13608_v36 }
0x136b   :  { %v21569_v49 = vpop.f32.mrf.mxu1  ;;  %21599 = vmatmul.mubr.msk.f32.gmra.mxu0 %vm4825_vm7, %v21566_v57 }
0x136d   :  { %v13618_v12 = vpop.f32.mrf.mxu1 }
0x136e   :  { %21601 = vmatprep.mubr.msk.f32.mxu0 %vm4825_vm7, %v13618_v12 }
0x136f   :  { %v21572_v53 = vpop.f32.mrf.mxu1  ;;  %21602 = vmatmul.mubr.msk.f32.gmra.mxu0 %vm4825_vm7, %v21569_v49 }
0x1371   :  { %v13628_v46 = vpop.f32.mrf.mxu1 }
0x1372   :  { %21604 = vmatprep.mubr.msk.f32.mxu0 %vm4825_vm7, %v13628_v46 }
0x1373   :  { %v21575_v52 = vpop.f32.mrf.mxu1  ;;  %21605 = vmatmul.mubr.msk.f32.gmra.mxu0 %vm4825_vm7, %v21572_v53 }
0x1375   :  { %v13638_v28 = vpop.f32.mrf.mxu1 }
0x1376   :  { %21607 = vmatprep.mubr.msk.f32.mxu0 %vm4825_vm7, %v13638_v28 }
0x1377   :  { %v21578_v0 = vpop.f32.mrf.mxu1  ;;  %21608 = vmatmul.mubr.msk.f32.gmra.mxu0 %vm4825_vm7, %v21575_v52 }
0x1379   :  { %v13648_v6 = vpop.f32.mrf.mxu1 }
0x137a   :  { %21610 = vmatprep.mubr.msk.f32.mxu0 %vm4825_vm7, %v13648_v6 }
0x137b   :  { %v21581_v43 = vpop.f32.mrf.mxu1  ;;  %21611 = vmatmul.mubr.msk.f32.gmra.mxu0 %vm4825_vm7, %v21578_v0 }
0x137d   :  { %v13658_v18 = vpop.f32.mrf.mxu1 }
0x137e   :  { %21613 = vmatprep.mubr.msk.f32.mxu0 %vm4825_vm7, %v13658_v18 }
0x137f   :  { %v21584_v3 = vpop.f32.mrf.mxu1  ;;  %21614 = vmatmul.mubr.msk.f32.gmra.mxu0 %vm4825_vm7, %v21581_v43 }
0x1381   :  { %v13668_v24 = vpop.f32.mrf.mxu1 }
0x1382   :  { %21616 = vmatprep.mubr.msk.f32.mxu0 %vm4825_vm7, %v13668_v24 }
0x1383   :  { %21617 = vmatmul.mubr.msk.f32.gmra.mxu0 %vm4825_vm7, %v21584_v3  ;;  %v21651_v14 = vpop.f32.mrf.mxu1 }
0x1385   :  { %v14073_v8 = vpop.f32.mrf.mxu1 }
0x1386   :  { %21683 = vmatprep.mubr.msk.f32.mxu0 %vm4825_vm7, %v14073_v8 }
0x1387   :  { %v21654_v42 = vpop.f32.mrf.mxu1  ;;  %21684 = vmatmul.mubr.msk.f32.vlgmr.msra.gmra.mxu0 %vm4825_vm7, %v21651_v14 }
0x1388   :  { %21774 = vmatpush3.msk.msra.mxu0 %vm175_vm0, %v17952_v33 }
0x1389   :  { %v14083_v20 = vpop.f32.mrf.mxu1  ;;  %21775 = vmatprep.subr.mxu0 %v17951_v60 }
0x138a   :  { %21686 = vmatprep.mubr.msk.f32.mxu0 %vm4825_vm7, %v14083_v20  ;;  %21776 = vmatpush3.msra.mxu0 %v17951_v60 }
0x138b   :  { %v21657_v27 = vpop.f32.mrf.mxu1  ;;  %21687 = vmatmul.mubr.msk.f32.gmra.mxu0 %vm4825_vm7, %v21654_v42 }
0x138d   :  { %v14093_v26 = vpop.f32.mrf.mxu1 }
0x138e   :  { %21689 = vmatprep.mubr.msk.f32.mxu0 %vm4825_vm7, %v14093_v26  ;;  %v13423_v26 = vpop.f32.mrf.mxu0 }
0x138f   :  { %v21660_v2 = vpop.f32.mrf.mxu1  ;;  %21690 = vmatmul.mubr.msk.f32.gmra.mxu0 %vm4825_vm7, %v21657_v27 }
0x1391   :  { %v14103_v41 = vpop.f32.mrf.mxu1 }
0x1392   :  { %21692 = vmatprep.mubr.msk.f32.mxu0 %vm4825_vm7, %v14103_v41 }
0x1393   :  { %v21663_v54 = vpop.f32.mrf.mxu1  ;;  %21693 = vmatmul.mubr.msk.f32.gmra.mxu0 %vm4825_vm7, %v21660_v2 }
0x1395   :  { %v14113_v34 = vpop.f32.mrf.mxu1 }
0x1396   :  { %21695 = vmatprep.mubr.msk.f32.mxu0 %vm4825_vm7, %v14113_v34 }
0x1397   :  { %v21666_v30 = vpop.f32.mrf.mxu1  ;;  %21696 = vmatmul.mubr.msk.f32.gmra.mxu0 %vm4825_vm7, %v21663_v54 }
0x1399   :  { %v14123_v13 = vpop.f32.mrf.mxu1 }
0x139a   :  { %21698 = vmatprep.mubr.msk.f32.mxu0 %vm4825_vm7, %v14123_v13 }
0x139b   :  { %v21669_v19 = vpop.f32.mrf.mxu1  ;;  %21699 = vmatmul.mubr.msk.f32.gmra.mxu0 %vm4825_vm7, %v21666_v30 }
0x139d   :  { %v14133_v7 = vpop.f32.mrf.mxu1 }
0x139e   :  { %21701 = vmatprep.mubr.msk.f32.mxu0 %vm4825_vm7, %v14133_v7 }
0x139f   :  { %v21672_v4 = vpop.f32.mrf.mxu1  ;;  %21702 = vmatmul.mubr.msk.f32.gmra.mxu0 %vm4825_vm7, %v21669_v19 }
0x13a1   :  { %v14143_v58 = vpop.f32.mrf.mxu1 }
0x13a2   :  { %21704 = vmatprep.mubr.msk.f32.mxu0 %vm4825_vm7, %v14143_v58 }
0x13a3   :  { %v21675_v33 = vpop.f32.mrf.mxu1  ;;  %21705 = vmatmul.mubr.msk.f32.gmra.mxu0 %vm4825_vm7, %v21672_v4 }
0x13a5   :  { %v14153_v38 = vpop.f32.mrf.mxu1 }
0x13a6   :  { %21707 = vmatprep.mubr.msk.f32.mxu0 %vm4825_vm7, %v14153_v38 }
0x13a7   :  { %v21678_v9 = vpop.f32.mrf.mxu1  ;;  %21708 = vmatmul.mubr.msk.f32.gmra.mxu0 %vm4825_vm7, %v21675_v33 }
0x13a9   :  { %v14163_v5 = vpop.f32.mrf.mxu1 }
0x13aa   :  { %21710 = vmatprep.mubr.msk.f32.mxu0 %vm4825_vm7, %v14163_v5  ;;  %v13374_v5 = vadd.f32 %v27982_v61, %v27978_v32 }
0x13ab   :  { %21711 = vmatmul.mubr.msk.f32.gmra.mxu0 %vm4825_vm7, %v21678_v9  ;;  %v21745_v57 = vpop.f32.mrf.mxu1 }
0x13ad   :  { %v14568_v36 = vpop.f32.mrf.mxu1 }
0x13ae   :  { %21777 = vmatprep.mubr.msk.f32.mxu0 %vm4825_vm7, %v14568_v36 }
0x13af   :  { %v21748_v49 = vpop.f32.mrf.mxu1  ;;  %21778 = vmatmul.mubr.msk.f32.vlgmr.msra.gmra.mxu0 %vm4825_vm7, %v21745_v57 }
0x13b1   :  { %v14578_v12 = vpop.f32.mrf.mxu1 }
0x13b2   :  { %21780 = vmatprep.mubr.msk.f32.mxu0 %vm4825_vm7, %v14578_v12 }
0x13b3   :  { %v21751_v53 = vpop.f32.mrf.mxu1  ;;  %21781 = vmatmul.mubr.msk.f32.gmra.mxu0 %vm4825_vm7, %v21748_v49 }
0x13b5   :  { %v14588_v46 = vpop.f32.mrf.mxu1 }
0x13b6   :  { %21783 = vmatprep.mubr.msk.f32.mxu0 %vm4825_vm7, %v14588_v46  ;;  %v13394_v46 = vadd.f32 %v27994_v15, %v27990_v35  ;;  %v28117_v15 = vpop.permute.xlu0 %15014 }
0x13b7   :  { %v21754_v52 = vpop.f32.mrf.mxu1  ;;  %21784 = vmatmul.mubr.msk.f32.gmra.mxu0 %vm4825_vm7, %v21751_v53 }
0x13b9   :  { %v14598_v28 = vpop.f32.mrf.mxu1 }
0x13ba   :  { %21786 = vmatprep.mubr.msk.f32.mxu0 %vm4825_vm7, %v14598_v28 }
0x13bb   :  { %v21757_v0 = vpop.f32.mrf.mxu1  ;;  %21787 = vmatmul.mubr.msk.f32.gmra.mxu0 %vm4825_vm7, %v21754_v52 }
0x13bd   :  { %v14608_v6 = vpop.f32.mrf.mxu1 }
0x13be   :  { %21789 = vmatprep.mubr.msk.f32.mxu0 %vm4825_vm7, %v14608_v6 }
0x13bf   :  { %v21760_v43 = vpop.f32.mrf.mxu1  ;;  %21790 = vmatmul.mubr.msk.f32.gmra.mxu0 %vm4825_vm7, %v21757_v0 }
0x13c1   :  { %v14618_v18 = vpop.f32.mrf.mxu1 }
0x13c2   :  { %21792 = vmatprep.mubr.msk.f32.mxu0 %vm4825_vm7, %v14618_v18  ;;  %v13424_v18 = vadd.f32 %v13423_v26, %v28006_v45 }
0x13c3   :  { %v21763_v3 = vpop.f32.mrf.mxu1  ;;  %21793 = vmatmul.mubr.msk.f32.gmra.mxu0 %vm4825_vm7, %v21760_v43 }
0x13c5   :  { %v14628_v24 = vpop.f32.mrf.mxu1 }
0x13c6   :  { %21795 = vmatprep.mubr.msk.f32.mxu0 %vm4825_vm7, %v14628_v24  ;;  %v28125_v24 = vpop.permute.xlu1 %15019 }
0x13c7   :  { %v21766_v14 = vpop.f32.mrf.mxu1  ;;  %21796 = vmatmul.mubr.msk.f32.gmra.mxu0 %vm4825_vm7, %v21763_v3 }
0x13c9   :  { %v14638_v8 = vpop.f32.mrf.mxu1 }
0x13ca   :  { %21798 = vmatprep.mubr.msk.f32.mxu0 %vm4825_vm7, %v14638_v8  ;;  %v28131_v26 = vpop.permute.xlu1 %15004 }
0x13cb   :  { %v21769_v60 = vpop.f32.mrf.mxu1  ;;  %21799 = vmatmul.mubr.msk.f32.gmra.mxu0 %vm4825_vm7, %v21766_v14 }
0x13cd   :  { %v14648_v42 = vpop.f32.mrf.mxu1 }
0x13ce   :  { %21801 = vmatprep.mubr.msk.f32.mxu0 %vm4825_vm7, %v14648_v42  ;;  %v13344_v42 = vadd.f32 %v27964_v63, %v27960_v50  ;;  %v13364_v50 = vadd.f32 %v27976_v29, %v27972_v44 }
0x13cf   :  { %v21772_v20 = vpop.f32.mrf.mxu1  ;;  %21802 = vmatmul.mubr.msk.f32.gmra.mxu0 %vm4825_vm7, %v21769_v60 }
0x13d1   :  { %v14658_v27 = vpop.f32.mrf.mxu1 }
0x13d2   :  { %21804 = vmatprep.mubr.msk.f32.mxu0 %vm4825_vm7, %v14658_v27 }
0x13d3   :  { %21805 = vmatmul.mubr.msk.f32.gmra.mxu0 %vm4825_vm7, %v21772_v20 }
0x141f   :  { %v21591_v2 = vpop.f32.mrf.mxu0 }
0x1420   :  { %v13908_v41 = vadd.f32 %v21591_v2, %v27956_v37 }
0x1421   :  { %v13808_v54 = vpop.f32.mrf.mxu0 }
0x1423   :  { %v21594_v34 = vpop.f32.mrf.mxu0 }
0x1424   :  { %v13910_v30 = vadd.f32 %v21594_v34, %v27962_v51  ;;  %v13384_v51 = vadd.f32 %v27988_v62, %v27984_v10  ;;  %v13404_v10 = vadd.f32 %v28000_v40, %v27996_v47 }
0x1425   :  { %v13818_v13 = vpop.f32.mrf.mxu0 }
0x1427   :  { %v21597_v19 = vpop.f32.mrf.mxu0 }
0x1428   :  { %v13912_v7 = vadd.f32 %v21597_v19, %v27968_v22 }
0x1429   :  { %v13828_v4 = vpop.f32.mrf.mxu0 }
0x142b   :  { %v21600_v58 = vpop.f32.mrf.mxu0 }
0x142c   :  { %v13914_v33 = vadd.f32 %v21600_v58, %v27974_v59 }
0x142d   :  { %v13838_v38 = vpop.f32.mrf.mxu0 }
0x142f   :  { %v21603_v9 = vpop.f32.mrf.mxu0 }
0x1430   :  { %v13916_v57 = vadd.f32 %v21603_v9, %v27980_v25  ;;  %v28139_v9 = vpop.permute.xlu1 %14994 }
0x1431   :  { %v13848_v37 = vpop.f32.mrf.mxu0 }
0x1432   :  { %v28090_v36 = vadd.f32 %v13848_v37, %v13374_v5 }
0x1433   :  { %v21606_v49 = vpop.f32.mrf.mxu0 }
0x1434   :  { %v28095_v22 = vadd.f32 %v21606_v49, %v27986_v56 }
0x1435   :  { %v13858_v12 = vpop.f32.mrf.mxu0 }
0x1436   :  { %v28097_v53 = vadd.f32 %v13858_v12, %v13384_v51  ;;  %v28145_v12 = vpop.permute.xlu1 %14984 }
0x1437   :  { %v21609_v59 = vpop.f32.mrf.mxu0 }
0x1438   :  { %v28102_v32 = vadd.f32 %v21609_v59, %v27992_v16 }
0x1439   :  { %v13868_v25 = vpop.f32.mrf.mxu0 }
0x143a   :  { %v28104_v61 = vadd.f32 %v13868_v25, %v13394_v46  ;;  %v14975_v29 = vpop.permute.xlu1 %14974 }
0x143b   :  { %v21612_v52 = vpop.f32.mrf.mxu0 }
0x143c   :  { %v28109_v56 = vadd.f32 %v21612_v52, %v27998_v23  ;;  %v13334_v23 = vadd.f32 %v27958_v17, %v27954_v55  ;;  %v13354_v17 = vadd.f32 %v27970_v31, %v27966_v1 }
0x143d   :  { %v13878_v62 = vpop.f32.mrf.mxu0 }
0x143e   :  { %v28111_v28 = vadd.f32 %v13878_v62, %v13404_v10  ;;  %v13907_v14 = vadd.f32 %v13808_v54, %v13334_v23  ;;  %v13911_v54 = vadd.f32 %v13828_v4, %v13354_v17  ;;  %v14965_v52 = vpop.permute.xlu1 %14964 }
0x143f   :  { %v21615_v0 = vpop.f32.mrf.mxu0 }
0x1440   :  { %v13924_v6 = vadd.f32 %v21615_v0, %v28002_v11 }
0x1441   :  { %v13888_v35 = vpop.f32.mrf.mxu0 }
0x1442   :  { %v28115_v16 = vadd.f32 %v13888_v35, %v28004_v48  ;;  %v28127_v48 = vpop.permute.xlu0 %15009 }
0x1443   :  { %v21618_v43 = vpop.f32.mrf.mxu0 }
0x1444   :  { %v13926_v47 = vadd.f32 %v21618_v43, %v28008_v39  ;;  %v13909_v39 = vadd.f32 %v13818_v13, %v13344_v42  ;;  %v13913_v13 = vadd.f32 %v13838_v38, %v13364_v50  ;;  %v14955_v43 = vpop.permute.xlu1 %14954 }
0x1445   :  { %v13898_v40 = vpop.f32.mrf.mxu0 }
0x1446   :  { %v28123_v3 = vadd.f32 %v13898_v40, %v13424_v18  ;;  %v28135_v34 = vpop.permute.xlu0 %14999 }
0x1447   :  { %v21685_v11 = vpop.f32.mrf.mxu0 }
0x1448   :  { %v14403_v8 = vadd.f32 %v21685_v11, %v13908_v41  ;;  %v14945_v42 = vpop.permute.xlu1 %14944 }
0x1449   :  { %v14303_v60 = vpop.f32.mrf.mxu0 }
0x144a   :  { %v14402_v45 = vadd.f32 %v14303_v60, %v13907_v14  ;;  %v28141_v37 = vpop.permute.xlu0 %14989 }
0x144b   :  { %v21688_v20 = vpop.f32.mrf.mxu0 }
0x144c   :  { %v14405_v27 = vadd.f32 %v21688_v20, %v13910_v30 }
0x144d   :  { %v14313_v55 = vpop.f32.mrf.mxu0 }
0x144e   :  { %v14404_v2 = vadd.f32 %v14313_v55, %v13909_v39  ;;  %v28147_v4 = vpop.permute.xlu0 %14979 }
0x144f   :  { %v21691_v41 = vpop.f32.mrf.mxu0 }
0x1450   :  { %v14407_v19 = vadd.f32 %v21691_v41, %v13912_v7 }
0x1451   :  { %v14323_v58 = vpop.f32.mrf.mxu0 }
0x1452   :  { %v14406_v63 = vadd.f32 %v14323_v58, %v13911_v54  ;;  %v14970_v38 = vpop.permute.xlu0 %14969 }
0x1453   :  { %v21694_v30 = vpop.f32.mrf.mxu0 }
0x1454   :  { %v14409_v5 = vadd.f32 %v21694_v30, %v13914_v33 }
0x1455   :  { %v14333_v49 = vpop.f32.mrf.mxu0 }
0x1456   :  { %v14408_v1 = vadd.f32 %v14333_v49, %v13913_v13 }
0x1457   :  { %v21697_v31 = vpop.f32.mrf.mxu0 }
0x1458   :  { %v28143_v51 = vadd.f32 %v21697_v31, %v13916_v57  ;;  %v14960_v57 = vpop.permute.xlu0 %14959 }
0x1459   :  { %v14343_v7 = vpop.f32.mrf.mxu0 }
0x145b   :  { %v21700_v59 = vpop.f32.mrf.mxu0 }
0x145c   :  { %v14950_v23 = vpop.permute.xlu0 %14949 }
0x145d   :  { %v28149_v44 = vpop.f32.mrf.mxu0 }
0x145f   :  { %v28151_v46 = vpop.f32.mrf.mxu0 }
0x1460   :  { %v14940_v17 = vpop.permute.xlu0 %14939 }
0x1461   :  { %v28153_v33 = vpop.f32.mrf.mxu0 }
0x1463   :  { %v28155_v25 = vpop.f32.mrf.mxu0 }
0x1465   :  { %v28157_v10 = vpop.f32.mrf.mxu0 }
0x1467   :  { %v21709_v62 = vpop.f32.mrf.mxu0 }
0x1468   :  { %v28159_v0 = vadd.f32 %v21709_v62, %v13924_v6 }
0x1469   :  { %v28161_v35 = vpop.f32.mrf.mxu0 }
0x146b   :  { %v21712_v18 = vpop.f32.mrf.mxu0 }
0x146c   :  { %v28163_v40 = vadd.f32 %v21712_v18, %v13926_v47 }
0x146d   :  { %v28165_v11 = vpop.f32.mrf.mxu0 }
0x146f   :  { %v21779_v14 = vpop.f32.mrf.mxu0 }
0x1470   :  { %v14898_v60 = vadd.f32 %v21779_v14, %v14403_v8 }
0x1471   :  { %v14798_v20 = vpop.f32.mrf.mxu0 }
0x1472   :  { %v15038_v39 = vadd.f32 %v14945_v42, %v14898_v60  ;;  %v14897_v55 = vadd.f32 %v14798_v20, %v14402_v45 }
0x1473   :  { %v21782_v41 = vpop.f32.mrf.mxu0 }
0x1474   :  { %v15037_v54 = vadd.f32 %v14940_v17, %v14897_v55  ;;  %v14900_v6 = vadd.f32 %v21782_v41, %v14405_v27  ;;  %v15078_v50 = vrot.slane %v15038_v39, 1 }
0x1475   :  { %v14808_v58 = vpop.f32.mrf.mxu0 }
0x1476   :  { %v15077_v30 = vrot.slane %v15037_v54, 1  ;;  %v15040_v13 = vadd.f32 %v14955_v43, %v14900_v6  ;;  %v14899_v49 = vadd.f32 %v14808_v58, %v14404_v2 }
0x1477   :  { %v21785_v47 = vpop.f32.mrf.mxu0 }
0x1478   :  { %v15079_v31 = vsel %vm3632_vm2, %v15077_v30, %v15078_v50  ;;  %v15039_v62 = vadd.f32 %v14950_v23, %v14899_v49  ;;  %v14902_v18 = vadd.f32 %v21785_v47, %v14407_v19  ;;  %v15082_v14 = vrot.slane %v15040_v13, 1 }
0x1479   :  { %v28168_v21 = vmax.f32 %v15037_v54, %v15079_v31  ;;  %v14818_v8 = vpop.f32.mrf.mxu0 }
0x147a   :  { %v15080_v60 = vrot.slane %v15039_v62, 1  ;;  %v15042_v45 = vadd.f32 %v14965_v52, %v14902_v18  ;;  %v14901_v42 = vadd.f32 %v14818_v8, %v14406_v63  ;;  %v14410_v52 = vadd.f32 %v14343_v7, %v28090_v36 }
0x147b   :  { %v21788_v20 = vpop.f32.mrf.mxu0  ;;  %v14412_v7 = vadd.f32 %v28149_v44, %v28097_v53 }
0x147c   :  { %v15083_v27 = vsel %vm3632_vm2, %v15080_v60, %v15082_v14  ;;  %v15041_v55 = vadd.f32 %v14960_v57, %v14901_v42  ;;  %v14904_v17 = vadd.f32 %v21788_v20, %v14409_v5  ;;  %v15086_v2 = vrot.slane %v15042_v45, 1 }
0x147d   :  { %v28171_v41 = vmax.f32 %v15039_v62, %v15083_v27  ;;  %v14828_v43 = vpop.f32.mrf.mxu0  ;;  %v15081_v6 = vsel %vm3632_vm2, %v15078_v50, %v15080_v60  ;;  %v14413_v5 = vadd.f32 %v21700_v59, %v28095_v22 }
0x147e   :  { %v15084_v23 = vrot.slane %v15041_v55, 1  ;;  %v15044_v19 = vadd.f32 %v14975_v29, %v14904_v17  ;;  %v14903_v54 = vadd.f32 %v14828_v43, %v14408_v1  ;;  %v28174_v58 = vmax.f32 %v15038_v39, %v15081_v6 }
0x147f   :  { %v21791_v30 = vpop.f32.mrf.mxu0 }
0x1480   :  { %v15087_v63 = vsel %vm3632_vm2, %v15084_v23, %v15086_v2  ;;  %v15043_v49 = vadd.f32 %v14970_v38, %v14903_v54  ;;  %v14906_v57 = vadd.f32 %v21791_v30, %v28143_v51  ;;  %v15090_v31 = vrot.slane %v15044_v19, 1 }
0x1481   :  { %v28180_v47 = vmax.f32 %v15041_v55, %v15087_v63  ;;  %v14838_v62 = vpop.f32.mrf.mxu0  ;;  %v15085_v50 = vsel %vm3632_vm2, %v15082_v14, %v15084_v23  ;;  %v14415_v38 = vadd.f32 %v28151_v46, %v28102_v32  ;;  %v14417_v55 = vadd.f32 %v28155_v25, %v28109_v56 }
0x1482   :  { %v15088_v29 = vrot.slane %v15043_v49, 1  ;;  %v15046_v1 = vadd.f32 %v28145_v12, %v14906_v57  ;;  %v14905_v39 = vadd.f32 %v14838_v62, %v14410_v52  ;;  %v28184_v18 = vmax.f32 %v15040_v13, %v15085_v50 }
0x1483   :  { %v21794_v36 = vpop.f32.mrf.mxu0 }
0x1484   :  { %v15091_v51 = vsel %vm3632_vm2, %v15088_v29, %v15090_v31  ;;  %v15045_v22 = vadd.f32 %v28147_v4, %v14905_v39  ;;  %v14908_v59 = vadd.f32 %v21794_v36, %v14413_v5  ;;  %v15094_v14 = vrot.slane %v15046_v1, 1 }
0x1485   :  { %v28192_v8 = vmax.f32 %v15043_v49, %v15091_v51  ;;  %v14848_v60 = vpop.f32.mrf.mxu0  ;;  %v15089_v12 = vsel %vm3632_vm2, %v15086_v2, %v15088_v29  ;;  %v14414_v4 = vadd.f32 %v28153_v33, %v28104_v61  ;;  %v15035_v61 = vpop.permute.xlu1 %15034 }
0x1486   :  { %v15092_v13 = vrot.slane %v15045_v22, 1  ;;  %v15048_v42 = vadd.f32 %v28139_v9, %v14908_v59  ;;  %v14907_v20 = vadd.f32 %v14848_v60, %v14412_v7  ;;  %v28196_v27 = vmax.f32 %v15042_v45, %v15089_v12 }
0x1487   :  { %v21797_v53 = vpop.f32.mrf.mxu0 }
0x1488   :  { %v15095_v44 = vsel %vm3632_vm2, %v15092_v13, %v15094_v14  ;;  %v15047_v32 = vadd.f32 %v28141_v37, %v14907_v20  ;;  %v14910_v46 = vadd.f32 %v21797_v53, %v14415_v38  ;;  %v15098_v2 = vrot.slane %v15048_v42, 1 }
0x1489   :  { %v28204_v17 = vmax.f32 %v15045_v22, %v15095_v44  ;;  %v14858_v43 = vpop.f32.mrf.mxu0  ;;  %v15093_v9 = vsel %vm3632_vm2, %v15090_v31, %v15092_v13  ;;  %v14416_v37 = vadd.f32 %v28157_v10, %v28111_v28  ;;  %v14418_v28 = vadd.f32 %v28161_v35, %v28115_v16  ;;  %v15025_v29 = vpop.permute.xlu1 %15024 }
0x148a   :  { %v15096_v45 = vrot.slane %v15047_v32, 1  ;;  %v15050_v6 = vadd.f32 %v28131_v26, %v14910_v46  ;;  %v14909_v23 = vadd.f32 %v14858_v43, %v14414_v4  ;;  %v28208_v54 = vmax.f32 %v15044_v19, %v15093_v9  ;;  %v15030_v44 = vpop.permute.xlu0 %15029 }
0x148b   :  { %v21800_v33 = vpop.f32.mrf.mxu0  ;;  %v14420_v16 = vadd.f32 %v28165_v11, %v28123_v3 }
0x148c   :  { %v15099_v30 = vsel %vm3632_vm2, %v15096_v45, %v15098_v2  ;;  %v15049_v56 = vadd.f32 %v28135_v34, %v14909_v23  ;;  %v14912_v25 = vadd.f32 %v21800_v33, %v14417_v55  ;;  %v15102_v63 = vrot.slane %v15050_v6, 1 }
0x148d   :  { %v28214_v52 = vmax.f32 %v15047_v32, %v15099_v30  ;;  %v14868_v49 = vpop.f32.mrf.mxu0  ;;  %v15097_v57 = vsel %vm3632_vm2, %v15094_v14, %v15096_v45 }
0x148e   :  { %v15100_v26 = vrot.slane %v15049_v56, 1  ;;  %v15052_v19 = vadd.f32 %v28117_v15, %v14912_v25  ;;  %v14911_v5 = vadd.f32 %v14868_v49, %v14416_v37  ;;  %v28218_v31 = vmax.f32 %v15046_v1, %v15097_v57 }
0x148f   :  { %v21803_v62 = vpop.f32.mrf.mxu0 }
0x1490   :  { %v15103_v10 = vsel %vm3632_vm2, %v15100_v26, %v15102_v63  ;;  %v15051_v34 = vadd.f32 %v28127_v48, %v14911_v5  ;;  %v14914_v50 = vadd.f32 %v21803_v62, %v28159_v0  ;;  %v15106_v36 = vrot.slane %v15052_v19, 1 }
0x1491   :  { %v28225_v39 = vmax.f32 %v15049_v56, %v15103_v10  ;;  %v14878_v7 = vpop.f32.mrf.mxu0  ;;  %v15101_v15 = vsel %vm3632_vm2, %v15098_v2, %v15100_v26 }
0x1492   :  { %v15104_v51 = vrot.slane %v15051_v34, 1  ;;  %v15054_v1 = vadd.f32 %v15025_v29, %v14914_v50  ;;  %v14913_v22 = vadd.f32 %v14878_v7, %v14418_v28  ;;  %v28228_v59 = vmax.f32 %v15048_v42, %v15101_v15 }
0x1493   :  { %v21806_v38 = vpop.f32.mrf.mxu0 }
0x1494   :  { %v15107_v48 = vsel %vm3632_vm2, %v15104_v51, %v15106_v36  ;;  %v15053_v0 = vadd.f32 %v28125_v24, %v14913_v22  ;;  %v14916_v35 = vadd.f32 %v21806_v38, %v28163_v40  ;;  %v15110_v60 = vrot.slane %v15054_v1, 1 }
0x1495   :  { %v15150_v14 = vmax.f32 %v15051_v34, %v15107_v48  ;;  %v14888_v12 = vpop.f32.mrf.mxu0  ;;  %v15105_v13 = vsel %vm3632_vm2, %v15102_v63, %v15104_v51  ;;  %v28954_v63 = vmov 0.0  }
0x1496   :  { %v15108_v20 = vrot.slane %v15053_v0, 1  ;;  %v15056_v53 = vadd.f32 %v15035_v61, %v14916_v35  ;;  %v14915_v4 = vadd.f32 %v14888_v12, %v14420_v16  ;;  %v15149_v42 = vmax.f32 %v15050_v6, %v15105_v13  ;;  %v15257_v6 = vld [vmem:[%s28729_s9 + $0x8] sm:$0xff]  ;;  %v15256_v35 = vld [vmem:[%s28729_s9] sm:$0xff] }
0x1497   :  { %15204 = vrot.lane.b32.xlu1 %v15150_v14, %s22035_s21  ;;  %17975 = vmatprep.mubr.msk.f32.mxu1 %vm7132_vm8, %v15257_v6  ;;  %v15261_v12 = vld [vmem:[%s28729_s9 + $0x28] sm:$0xff]  ;;  %v15260_v13 = vld [vmem:[%s28729_s9 + $0x20] sm:$0xff] }
0x1498   :  { %v15111_v3 = vsel %vm3632_vm2, %v15108_v20, %v15110_v60  ;;  %v15055_v11 = vadd.f32 %v15030_v44, %v14915_v4  ;;  %v15109_v32 = vsel %vm3632_vm2, %v15106_v36, %v15108_v20  ;;  %v15114_v46 = vrot.slane %v15056_v53, 1  ;;  %v15263_v20 = vld [vmem:[%s28729_s9 + $0x38] sm:$0xff]  ;;  %v15265_v4 = vld [vmem:[%s28729_s9 + $0x48] sm:$0xff] }
0x1499   :  { %v28239_v24 = vmax.f32 %v15053_v0, %v15111_v3  ;;  %v15151_v40 = vmax.f32 %v15052_v19, %v15109_v32  ;;  %v15267_v44 = vld [vmem:[%s28729_s9 + $0x58] sm:$0xff]  ;;  %v15266_v3 = vld [vmem:[%s28729_s9 + $0x50] sm:$0xff]  ;;  %v15268_v32 = vld [vmem:[%s28729_s9 + $0x60] sm:$0xff] }
0x149a   :  { %v15112_v55 = vrot.slane %v15055_v11, 1  ;;  %v28281_v23 = vmax.f32 %v15056_v53, %v15114_v46  ;;  %v15262_v53 = vld [vmem:[%s28729_s9 + $0x30] sm:$0xff] }
0x149b   :  { %15206 = vrot.lane.b32.xlu0 %v15151_v40, %s22035_s21  ;;  %15200 = vrot.lane.b32.xlu1 %v28225_v39, %s22035_s21 }
0x149c   :  { %v15115_v2 = vsel %vm3632_vm2, %v15112_v55, %v15114_v46  ;;  %v15113_v43 = vsel %vm3632_vm2, %v15110_v60, %v15112_v55  ;;  %v15258_v60 = vld [vmem:[%s28729_s9 + $0x10] sm:$0xff]  ;;  %v15273_v46 = vld [vmem:[%s28729_s9 + $0x88] sm:$0xff]  ;;  %v15272_v55 = vld [vmem:[%s28729_s9 + $0x80] sm:$0xff] }
0x149d   :  { %v28246_v9 = vmax.f32 %v15055_v11, %v15115_v2  ;;  %v28248_v45 = vmax.f32 %v15054_v1, %v15113_v43  ;;  %v15269_v11 = vld [vmem:[%s28729_s9 + $0x68] sm:$0xff]  ;;  %v15275_v2 = vld [vmem:[%s28729_s9 + $0x98] sm:$0xff]  ;;  %v15274_v43 = vld [vmem:[%s28729_s9 + $0x90] sm:$0xff] }
0x149f   :  { %15202 = vrot.lane.b32.xlu0 %v15149_v42, %s22035_s21  ;;  %15196 = vrot.lane.b32.xlu1 %v28214_v52, %s22035_s21 }
0x14a3   :  { %15198 = vrot.lane.b32.xlu0 %v28228_v59, %s22035_s21  ;;  %15192 = vrot.lane.b32.xlu1 %v28204_v17, %s22035_s21 }
0x14a7   :  { %15194 = vrot.lane.b32.xlu0 %v28218_v31, %s22035_s21  ;;  %15188 = vrot.lane.b32.xlu1 %v28192_v8, %s22035_s21 }
0x14ab   :  { %15190 = vrot.lane.b32.xlu0 %v28208_v54, %s22035_s21  ;;  %15184 = vrot.lane.b32.xlu1 %v28180_v47, %s22035_s21 }
0x14af   :  { %15186 = vrot.lane.b32.xlu0 %v28196_v27, %s22035_s21  ;;  %15180 = vrot.lane.b32.xlu1 %v28171_v41, %s22035_s21 }
0x14b3   :  { %15182 = vrot.lane.b32.xlu0 %v28184_v18, %s22035_s21  ;;  %15176 = vrot.lane.b32.xlu1 %v28168_v21, %s22035_s21 }
0x14b7   :  { %15178 = vrot.lane.b32.xlu0 %v28174_v58, %s22035_s21  ;;  %15212 = vrot.lane.b32.xlu1 %v28246_v9, %s22035_s21 }
0x14bb   :  { %15214 = vrot.lane.b32.xlu0 %v28281_v23, %s22035_s21  ;;  %15208 = vrot.lane.b32.xlu1 %v28239_v24, %s22035_s21 }
0x14bf   :  { %15210 = vrot.lane.b32.xlu0 %v28248_v45, %s22035_s21 }
0x1509   :  { %v15205_v61 = vpop.permute.xlu1 %15204 }
0x150a   :  { %v15250_v56 = vmax.f32 %v15150_v14, %v15205_v61  ;;  %v15259_v14 = vld [vmem:[%s28729_s9 + $0x18] sm:$0xff] }
0x150d   :  { %v15201_v33 = vpop.permute.xlu1 %15200  ;;  %v15207_v37 = vpop.permute.xlu0 %15206 }
0x150e   :  { %v15251_v30 = vmax.f32 %v15151_v40, %v15207_v37  ;;  %v15248_v26 = vmax.f32 %v28225_v39, %v15201_v33  ;;  %v15270_v40 = vld [vmem:[%s28729_s9 + $0x70] sm:$0xff] }
0x1510   :  { %15310 = vmatpush1.msra.mxu1 %v15251_v30 }
0x1511   :  { %v15197_v25 = vpop.permute.xlu1 %15196  ;;  %15311 = vmatprep.subr.mxu1 %v28954_v63  ;;  %v15203_v49 = vpop.permute.xlu0 %15202 }
0x1512   :  { %v15249_v57 = vmax.f32 %v15149_v42, %v15203_v49  ;;  %15312 = vmatpush1.msra.mxu1 %v15250_v56  ;;  %v15246_v28 = vmax.f32 %v28214_v52, %v15197_v25  ;;  %v15264_v42 = vld [vmem:[%s28729_s9 + $0x40] sm:$0xff] }
0x1513   :  { %15313 = vmatprep.subr.mxu1 %v28954_v63 }
0x1514   :  { %15314 = vmatpush1.msra.mxu1 %v15249_v57 }
0x1515   :  { %v15193_v19 = vpop.permute.xlu1 %15192  ;;  %15315 = vmatprep.subr.mxu1 %v28954_v63  ;;  %v15199_v5 = vpop.permute.xlu0 %15198 }
0x1516   :  { %v15247_v62 = vmax.f32 %v28228_v59, %v15199_v5  ;;  %15316 = vmatpush1.msra.mxu1 %v15248_v26  ;;  %v15244_v29 = vmax.f32 %v28204_v17, %v15193_v19 }
0x1517   :  { %15317 = vmatprep.subr.mxu1 %v28954_v63 }
0x1518   :  { %15318 = vmatpush1.msra.mxu1 %v15247_v62 }
0x1519   :  { %v15189_v10 = vpop.permute.xlu1 %15188  ;;  %15319 = vmatprep.subr.mxu1 %v28954_v63  ;;  %v15195_v34 = vpop.permute.xlu0 %15194 }
0x151a   :  { %v15245_v50 = vmax.f32 %v28218_v31, %v15195_v34  ;;  %15320 = vmatpush1.msra.mxu1 %v15246_v28  ;;  %v15242_v52 = vmax.f32 %v28192_v8, %v15189_v10 }
0x151b   :  { %15321 = vmatprep.subr.mxu1 %v28954_v63 }
0x151c   :  { %15322 = vmatpush1.msra.mxu1 %v15245_v50 }
0x151d   :  { %v15185_v39 = vpop.permute.xlu1 %15184  ;;  %15323 = vmatprep.subr.mxu1 %v28954_v63  ;;  %v15191_v36 = vpop.permute.xlu0 %15190 }
0x151e   :  { %v15243_v7 = vmax.f32 %v28208_v54, %v15191_v36  ;;  %15324 = vmatpush1.msra.mxu1 %v15244_v29  ;;  %v15240_v17 = vmax.f32 %v28180_v47, %v15185_v39 }
0x151f   :  { %15325 = vmatprep.subr.mxu1 %v28954_v63 }
0x1520   :  { %15326 = vmatpush1.msra.mxu1 %v15243_v7 }
0x1521   :  { %v15181_v15 = vpop.permute.xlu1 %15180  ;;  %15327 = vmatprep.subr.mxu1 %v28954_v63  ;;  %v15187_v31 = vpop.permute.xlu0 %15186 }
0x1522   :  { %v15241_v51 = vmax.f32 %v28196_v27, %v15187_v31  ;;  %15328 = vmatpush1.msra.mxu1 %v15242_v52  ;;  %v15238_v8 = vmax.f32 %v28171_v41, %v15181_v15 }
0x1523   :  { %15329 = vmatprep.subr.mxu1 %v28954_v63 }
0x1524   :  { %15330 = vmatpush1.msra.mxu1 %v15241_v51 }
0x1525   :  { %v15177_v1 = vpop.permute.xlu1 %15176  ;;  %15331 = vmatprep.subr.mxu1 %v28954_v63  ;;  %v15183_v54 = vpop.permute.xlu0 %15182 }
0x1526   :  { %v15239_v22 = vmax.f32 %v28184_v18, %v15183_v54  ;;  %15332 = vmatpush1.msra.mxu1 %v15240_v17  ;;  %v15236_v38 = vmax.f32 %v28168_v21, %v15177_v1 }
0x1527   :  { %15333 = vmatprep.subr.mxu1 %v28954_v63 }
0x1528   :  { %15334 = vmatpush1.msra.mxu1 %v15239_v22 }
0x1529   :  { %15335 = vmatprep.subr.mxu1 %v28954_v63  ;;  %v15179_v27 = vpop.permute.xlu0 %15178  ;;  %v15213_v47 = vpop.permute.xlu1 %15212 }
0x152a   :  { %v15237_v59 = vmax.f32 %v28174_v58, %v15179_v27  ;;  %15336 = vmatpush1.msra.mxu1 %v15238_v8  ;;  %v15254_v41 = vmax.f32 %v28246_v9, %v15213_v47  ;;  %v15424_v9 = vld [vmem:[%s28730_s10] sm:$0x7f] }
0x152b   :  { %15337 = vmatprep.subr.mxu1 %v28954_v63  ;;  %21807 = vmatprep.subr.msk.mxu0 %vm3632_vm2, %v15424_v9 }
0x152c   :  { %15338 = vmatpush1.msra.mxu1 %v15237_v59  ;;  %21808 = vmatpush3.msk.msra.mxu0 %vm3632_vm2, %v15424_v9  ;;  %v18003_v9 = vld [vmem:[%s28731_s11 + $0x38] sm:$0xff] }
0x152d   :  { %15339 = vmatprep.subr.mxu1 %v28954_v63  ;;  %v15215_v18 = vpop.permute.xlu0 %15214  ;;  %v15209_v58 = vpop.permute.xlu1 %15208  ;;  %21824 = vmatprep.subr.mxu0 %v28954_v63 }
0x152e   :  { %v15255_v16 = vmax.f32 %v28281_v23, %v15215_v18  ;;  %15340 = vmatpush1.msra.mxu1 %v15236_v38  ;;  %v15252_v21 = vmax.f32 %v28239_v24, %v15209_v58  ;;  %v15271_v24 = vld [vmem:[%s28729_s9 + $0x78] sm:$0xff] }
0x152f   :  { %15365 = vmatprep.subr.mxu1 %v28954_v63 }
0x1530   :  { %17974 = vmatpush2.msk.msra.mxu1 %vm3632_vm2, %v15255_v16 }
0x1531   :  { %15367 = vmatprep.subr.mxu1 %v28954_v63  ;;  %v15211_v48 = vpop.permute.xlu0 %15210 }
0x1532   :  { %v15253_v0 = vmax.f32 %v28248_v45, %v15211_v48  ;;  %15368 = vmatpush2.msra.mxu1 %v15254_v41  ;;  %v15590_v48 = vld [vmem:[%s28731_s11] sm:$0xff] }
0x1533   :  { %15369 = vmatprep.subr.mxu1 %v28954_v63 }
0x1534   :  { %15370 = vmatpush2.msra.mxu1 %v15253_v0  ;;  %v15591_v0 = vld [vmem:[%s28731_s11 + $0x8] sm:$0xff] }
0x1535   :  { %15371 = vmatprep.subr.mxu1 %v28954_v63 }
0x1536   :  { %15372 = vmatpush2.msra.mxu1 %v15252_v21  ;;  %v15592_v21 = vld [vmem:[%s28731_s11 + $0x10] sm:$0xff] }
0x1537   :  { %15374 = vmatmul.mubr.f32.vlgmr.msra.gmra.mxu1 %v15256_v35  ;;  %21865 = vmatprep.subr.mxu1 %v28954_v63  ;;  %v15593_v35 = vld [vmem:[%s28731_s11 + $0x18] sm:$0xff] }
0x1538   :  { %17976 = vmatprep.mubr.msk.f32.mxu1 %vm7132_vm8, %v15259_v14  ;;  %v15594_v14 = vld [vmem:[%s28731_s11 + $0x20] sm:$0xff] }
0x153b   :  { %15379 = vmatmul.mubr.f32.gmra.mxu1 %v15258_v60  ;;  %v15595_v60 = vld [vmem:[%s28731_s11 + $0x28] sm:$0xff] }
0x153c   :  { %17977 = vmatprep.mubr.msk.f32.mxu1 %vm7132_vm8, %v15261_v12  ;;  %v15596_v12 = vld [vmem:[%s28731_s11 + $0x30] sm:$0x3] }
0x153f   :  { %15384 = vmatmul.mubr.f32.gmra.mxu1 %v15260_v13 }
0x1540   :  { %17978 = vmatprep.mubr.msk.f32.mxu1 %vm7132_vm8, %v15263_v20 }
0x1543   :  { %15389 = vmatmul.mubr.f32.gmra.mxu1 %v15262_v53 }
0x1544   :  { %17979 = vmatprep.mubr.msk.f32.mxu1 %vm7132_vm8, %v15265_v4 }
0x1547   :  { %15394 = vmatmul.mubr.f32.gmra.mxu1 %v15264_v42 }
0x1548   :  { %17980 = vmatprep.mubr.msk.f32.mxu1 %vm7132_vm8, %v15267_v44 }
0x154b   :  { %15399 = vmatmul.mubr.f32.gmra.mxu1 %v15266_v3 }
0x154c   :  { %17981 = vmatprep.mubr.msk.f32.mxu1 %vm7132_vm8, %v15269_v11 }
0x154f   :  { %15404 = vmatmul.mubr.f32.gmra.mxu1 %v15268_v32 }
0x1550   :  { %17982 = vmatprep.mubr.msk.f32.mxu1 %vm7132_vm8, %v15271_v24 }
0x1553   :  { %15409 = vmatmul.mubr.f32.gmra.mxu1 %v15270_v40 }
0x1554   :  { %17983 = vmatprep.mubr.msk.f32.mxu1 %vm7132_vm8, %v15273_v46 }
0x1557   :  { %15414 = vmatmul.mubr.f32.gmra.mxu1 %v15272_v55 }
0x1558   :  { %17984 = vmatprep.mubr.msk.f32.mxu1 %vm7132_vm8, %v15275_v2 }
0x155b   :  { %15419 = vmatmul.mubr.f32.gmra.mxu1 %v15274_v43 }
0x155c   :  { %21885 = vmatprep.mubr.msk.f32.mxu1 %vm22036_vm4, %v28954_v63 }
0x15f7   :  { %v15375_v45 = vpop.f32.mrf.mxu1 }
0x15f8   :  { %21809 = vmatprep.mubr.msk.f32.mxu0 %vm7282_vm9, %v15375_v45 }
0x15f9   :  { %v15377_v6 = vpop.f32.mrf.mxu1 }
0x15fb   :  { %v15380_v23 = vpop.f32.mrf.mxu1 }
0x15fc   :  { %21810 = vmatmul.mubr.msk.f32.vlgmr.msra.gmra.mxu0 %vm7282_vm9, %v15380_v23  ;;  %v18004_v23 = vld [vmem:[%s28731_s11 + $0x40] sm:$0xff] }
0x15fd   :  { %v15382_v61 = vpop.f32.mrf.mxu1 }
0x15ff   :  { %v15385_v33 = vpop.f32.mrf.mxu1 }
0x1600   :  { %21812 = vmatprep.mubr.msk.f32.mxu0 %vm7282_vm9, %v15385_v33 }
0x1601   :  { %v15387_v37 = vpop.f32.mrf.mxu1 }
0x1602   :  { %v18005_v37 = vld [vmem:[%s28731_s11 + $0x48] sm:$0xff] }
0x1603   :  { %v15390_v30 = vpop.f32.mrf.mxu1 }
0x1604   :  { %21813 = vmatmul.mubr.msk.f32.gmra.mxu0 %vm7282_vm9, %v15390_v30 }
0x1605   :  { %v15392_v56 = vpop.f32.mrf.mxu1 }
0x1607   :  { %v15395_v25 = vpop.f32.mrf.mxu1 }
0x1608   :  { %21815 = vmatprep.mubr.msk.f32.mxu0 %vm7282_vm9, %v15395_v25 }
0x1609   :  { %v15397_v49 = vpop.f32.mrf.mxu1 }
0x160a   :  { %v18006_v49 = vld [vmem:[%s28731_s11 + $0x50] sm:$0xff] }
0x160b   :  { %v15400_v57 = vpop.f32.mrf.mxu1 }
0x160c   :  { %21816 = vmatmul.mubr.msk.f32.gmra.mxu0 %vm7282_vm9, %v15400_v57 }
0x160d   :  { %v15402_v26 = vpop.f32.mrf.mxu1 }
0x160f   :  { %v15405_v19 = vpop.f32.mrf.mxu1 }
0x1610   :  { %21818 = vmatprep.mubr.msk.f32.mxu0 %vm7282_vm9, %v15405_v19  ;;  %v18007_v19 = vld [vmem:[%s28731_s11 + $0x58] sm:$0xff] }
0x1611   :  { %v15407_v5 = vpop.f32.mrf.mxu1 }
0x1613   :  { %v15410_v62 = vpop.f32.mrf.mxu1 }
0x1614   :  { %21819 = vmatmul.mubr.msk.f32.gmra.mxu0 %vm7282_vm9, %v15410_v62 }
0x1615   :  { %v15412_v28 = vpop.f32.mrf.mxu1 }
0x1617   :  { %v15415_v10 = vpop.f32.mrf.mxu1 }
0x1618   :  { %21821 = vmatprep.mubr.msk.f32.mxu0 %vm7282_vm9, %v15415_v10  ;;  %v18008_v10 = vld [vmem:[%s28731_s11 + $0x60] sm:$0xff] }
0x1619   :  { %v15417_v34 = vpop.f32.mrf.mxu1 }
0x161b   :  { %v15420_v50 = vpop.f32.mrf.mxu1 }
0x161c   :  { %21822 = vmatmul.mubr.msk.f32.gmra.mxu0 %vm7282_vm9, %v15420_v50  ;;  %v18009_v50 = vld [vmem:[%s28731_s11 + $0x68] sm:$0x3] }
0x161d   :  { %v15422_v29 = vpop.f32.mrf.mxu1  ;;  %21844 = vmatprep.mubr.msk.f32.mxu0 %vm22036_vm4, %v28954_v63 }
0x161e   :  { %v18017_v29 = vld [vmem:[%s28731_s11 + $0x70] sm:$0xff] }
0x16bc   :  { %v21811_v39 = vpop.f32.mrf.mxu0 }
0x16bd   :  { %v15574_v41 = vmax.f32 %v21811_v39, 0.0 }
0x16be   :  { %v15524_v36 = vpop.f32.mrf.mxu0 }
0x16bf   :  { %v15573_v58 = vmax.f32 %v15524_v36, 0.0 }
0x16c4   :  { %v21814_v7 = vpop.f32.mrf.mxu0 }
0x16c5   :  { %v28413_v52 = vmax.f32 %v21814_v7, 0.0  ;;  %v18018_v7 = vld [vmem:[%s28731_s11 + $0x78] sm:$0xff] }
0x16c6   :  { %v15534_v15 = vpop.f32.mrf.mxu0 }
0x16c7   :  { %v28415_v31 = vmax.f32 %v15534_v15, 0.0  ;;  %15748 = vrot.lane.b32.xlu0 %v28413_v52, %s22035_s21  ;;  %v18019_v15 = vld [vmem:[%s28731_s11 + $0x80] sm:$0xff] }
0x16c9   :  { %15746 = vrot.lane.b32.xlu1 %v28415_v31, %s22035_s21 }
0x16cc   :  { %v21817_v51 = vpop.f32.mrf.mxu0 }
0x16cd   :  { %v15578_v17 = vmax.f32 %v21817_v51, 0.0  ;;  %v18020_v51 = vld [vmem:[%s28731_s11 + $0x88] sm:$0xff] }
0x16ce   :  { %v15544_v1 = vpop.f32.mrf.mxu0 }
0x16cf   :  { %v15577_v54 = vmax.f32 %v15544_v1, 0.0  ;;  %15752 = vrot.lane.b32.xlu0 %v15578_v17, %s22035_s21  ;;  %v18021_v1 = vld [vmem:[%s28731_s11 + $0x90] sm:$0xff] }
0x16d1   :  { %15750 = vrot.lane.b32.xlu1 %v15577_v54, %s22035_s21 }
0x16d4   :  { %v21820_v22 = vpop.f32.mrf.mxu0 }
0x16d5   :  { %v15580_v8 = vmax.f32 %v21820_v22, 0.0  ;;  %v18022_v22 = vld [vmem:[%s28731_s11 + $0x98] sm:$0xff] }
0x16d6   :  { %v15554_v27 = vpop.f32.mrf.mxu0 }
0x16d7   :  { %v15579_v59 = vmax.f32 %v15554_v27, 0.0  ;;  %15756 = vrot.lane.b32.xlu0 %v15580_v8, %s22035_s21  ;;  %v18023_v27 = vld [vmem:[%s28731_s11 + $0xa0] sm:$0x3] }
0x16d9   :  { %15754 = vrot.lane.b32.xlu1 %v15579_v59, %s22035_s21 }
0x16dc   :  { %v21823_v47 = vpop.f32.mrf.mxu0 }
0x16dd   :  { %v15582_v38 = vmax.f32 %v21823_v47, 0.0  ;;  %v18037_v47 = vld [vmem:[%s28731_s11 + $0xd8] sm:$0x3] }
0x16de   :  { %v15564_v18 = vpop.f32.mrf.mxu0 }
0x16df   :  { %v15581_v16 = vmax.f32 %v15564_v18, 0.0  ;;  %15760 = vrot.lane.b32.xlu0 %v15582_v38, %s22035_s21  ;;  %21825 = vmatpush3.msra.mxu0 %v15582_v38 }
0x16e0   :  { %21826 = vmatprep.subr.mxu0 %v28954_v63 }
0x16e1   :  { %15758 = vrot.lane.b32.xlu1 %v15581_v16, %s22035_s21  ;;  %21827 = vmatpush3.msra.mxu0 %v15581_v16 }
0x16e2   :  { %21828 = vmatprep.subr.mxu0 %v28954_v63 }
0x16e3   :  { %15744 = vrot.lane.b32.xlu0 %v15574_v41, %s22035_s21  ;;  %21829 = vmatpush3.msra.mxu0 %v15580_v8 }
0x16e4   :  { %21830 = vmatprep.subr.mxu0 %v28954_v63 }
0x16e5   :  { %15742 = vrot.lane.b32.xlu1 %v15573_v58, %s22035_s21  ;;  %21831 = vmatpush3.msra.mxu0 %v15579_v59 }
0x16e6   :  { %21832 = vmatprep.subr.mxu0 %v28954_v63 }
0x16e7   :  { %15925 = vrot.lane.b32.xlu0 %v15582_v38, %s22037_s26  ;;  %21833 = vmatpush3.msra.mxu0 %v15578_v17 }
0x16e8   :  { %21834 = vmatprep.subr.mxu0 %v28954_v63 }
0x16e9   :  { %15921 = vrot.lane.b32.xlu1 %v15580_v8, %s22037_s26  ;;  %21835 = vmatpush3.msra.mxu0 %v15577_v54 }
0x16ea   :  { %21836 = vmatprep.subr.mxu0 %v28954_v63 }
0x16eb   :  { %16090 = vrot.lane.b32.xlu0 %v15582_v38, %s22038_s27  ;;  %21837 = vmatpush3.msra.mxu0 %v28413_v52 }
0x16ec   :  { %21838 = vmatprep.subr.mxu0 %v28954_v63 }
0x16ed   :  { %15919 = vrot.lane.b32.xlu1 %v15579_v59, %s22037_s26  ;;  %21839 = vmatpush3.msra.mxu0 %v28415_v31 }
0x16ee   :  { %21840 = vmatprep.subr.mxu0 %v28954_v63 }
0x16ef   :  { %16086 = vrot.lane.b32.xlu0 %v15580_v8, %s22038_s27  ;;  %21841 = vmatpush3.msra.mxu0 %v15574_v41  ;;  %v18035_v8 = vld [vmem:[%s28731_s11 + $0xc8] sm:$0xff] }
0x16f0   :  { %21842 = vmatprep.subr.mxu0 %v28954_v63 }
0x16f1   :  { %15917 = vrot.lane.b32.xlu1 %v15578_v17, %s22037_s26  ;;  %21843 = vmatpush3.msra.mxu0 %v15573_v58 }
0x16f2   :  { %21906 = vmatprep.subr.mxu0 %v28954_v63  ;;  %21845 = vmatmul.mubr.msk.f32.vlgmr.msra.gmra.mxu0 %vm7455_vm10, %v15590_v48 }
0x16f3   :  { %16084 = vrot.lane.b32.xlu0 %v15579_v59, %s22038_s27  ;;  %21847 = vmatprep.mubr.msk.f32.mxu0 %vm22036_vm4, %v28954_v63  ;;  %v18036_v59 = vld [vmem:[%s28731_s11 + $0xd0] sm:$0xff] }
0x16f5   :  { %15915 = vrot.lane.b32.xlu1 %v15577_v54, %s22037_s26 }
0x16f6   :  { %21848 = vmatmul.mubr.msk.f32.gmra.mxu0 %vm7455_vm10, %v15591_v0 }
0x16f7   :  { %16082 = vrot.lane.b32.xlu0 %v15578_v17, %s22038_s27  ;;  %21850 = vmatprep.mubr.msk.f32.mxu0 %vm22036_vm4, %v28954_v63  ;;  %v18033_v17 = vld [vmem:[%s28731_s11 + $0xb8] sm:$0xff] }
0x16f9   :  { %15923 = vrot.lane.b32.xlu1 %v15581_v16, %s22037_s26 }
0x16fa   :  { %21851 = vmatmul.mubr.msk.f32.gmra.mxu0 %vm7455_vm10, %v15592_v21 }
0x16fb   :  { %16088 = vrot.lane.b32.xlu0 %v15581_v16, %s22038_s27  ;;  %21853 = vmatprep.mubr.msk.f32.mxu0 %vm22036_vm4, %v28954_v63 }
0x16fd   :  { %15913 = vrot.lane.b32.xlu1 %v28413_v52, %s22037_s26 }
0x16fe   :  { %21854 = vmatmul.mubr.msk.f32.gmra.mxu0 %vm7455_vm10, %v15593_v35 }
0x16ff   :  { %16080 = vrot.lane.b32.xlu0 %v15577_v54, %s22038_s27  ;;  %21856 = vmatprep.mubr.msk.f32.mxu0 %vm22036_vm4, %v28954_v63  ;;  %v18034_v54 = vld [vmem:[%s28731_s11 + $0xc0] sm:$0xff] }
0x1701   :  { %15911 = vrot.lane.b32.xlu1 %v28415_v31, %s22037_s26 }
0x1702   :  { %21857 = vmatmul.mubr.msk.f32.gmra.mxu0 %vm7455_vm10, %v15594_v14 }
0x1703   :  { %16078 = vrot.lane.b32.xlu0 %v28413_v52, %s22038_s27  ;;  %21859 = vmatprep.mubr.msk.f32.mxu0 %vm22036_vm4, %v28954_v63  ;;  %v18031_v52 = vld [vmem:[%s28731_s11 + $0xa8] sm:$0xff] }
0x1705   :  { %15909 = vrot.lane.b32.xlu1 %v15574_v41, %s22037_s26 }
0x1706   :  { %21860 = vmatmul.mubr.msk.f32.gmra.mxu0 %vm7455_vm10, %v15595_v60 }
0x1707   :  { %16076 = vrot.lane.b32.xlu0 %v28415_v31, %s22038_s27  ;;  %21862 = vmatprep.mubr.msk.f32.mxu0 %vm22036_vm4, %v28954_v63  ;;  %v18032_v31 = vld [vmem:[%s28731_s11 + $0xb0] sm:$0xff] }
0x1709   :  { %15907 = vrot.lane.b32.xlu1 %v15573_v58, %s22037_s26 }
0x170a   :  { %21863 = vmatmul.mubr.msk.f32.gmra.mxu0 %vm7455_vm10, %v15596_v12 }
0x170b   :  { %16074 = vrot.lane.b32.xlu0 %v15574_v41, %s22038_s27  ;;  %21926 = vmatprep.mubr.msk.f32.mxu0 %vm22036_vm4, %v28954_v63 }
0x170d   :  { %16072 = vrot.lane.b32.xlu1 %v15573_v58, %s22038_s27 }
0x1739   :  { %v15749_v13 = vpop.permute.xlu0 %15748 }
0x173b   :  { %v15747_v20 = vpop.permute.xlu1 %15746 }
0x1741   :  { %v15753_v53 = vpop.permute.xlu0 %15752 }
0x1743   :  { %v15751_v4 = vpop.permute.xlu1 %15750 }
0x1749   :  { %v15757_v42 = vpop.permute.xlu0 %15756 }
0x174b   :  { %v15755_v44 = vpop.permute.xlu1 %15754 }
0x1751   :  { %v15761_v3 = vpop.permute.xlu0 %15760 }
0x1752   :  { %21866 = vmatpush3.msra.mxu1 %v15761_v3 }
0x1753   :  { %21867 = vmatprep.subr.mxu1 %v28954_v63  ;;  %v15759_v11 = vpop.permute.xlu1 %15758 }
0x1754   :  { %21868 = vmatpush3.msra.mxu1 %v15759_v11 }
0x1755   :  { %v15745_v32 = vpop.permute.xlu0 %15744  ;;  %21869 = vmatprep.subr.mxu1 %v28954_v63 }
0x1756   :  { %21870 = vmatpush3.msra.mxu1 %v15757_v42 }
0x1757   :  { %21871 = vmatprep.subr.mxu1 %v28954_v63  ;;  %v15743_v24 = vpop.permute.xlu1 %15742 }
0x1758   :  { %21872 = vmatpush3.msra.mxu1 %v15755_v44 }
0x1759   :  { %v15926_v40 = vpop.permute.xlu0 %15925  ;;  %21873 = vmatprep.subr.mxu1 %v28954_v63 }
0x175a   :  { %21874 = vmatpush3.msra.mxu1 %v15753_v53  ;;  %21907 = vmatpush3.msra.mxu0 %v15926_v40 }
0x175b   :  { %21875 = vmatprep.subr.mxu1 %v28954_v63  ;;  %v15922_v46 = vpop.permute.xlu1 %15921  ;;  %21908 = vmatprep.subr.mxu0 %v28954_v63 }
0x175c   :  { %21876 = vmatpush3.msra.mxu1 %v15751_v4 }
0x175d   :  { %v16091_v55 = vpop.permute.xlu0 %16090  ;;  %21877 = vmatprep.subr.mxu1 %v28954_v63 }
0x175e   :  { %21878 = vmatpush3.msra.mxu1 %v15749_v13 }
0x175f   :  { %21879 = vmatprep.subr.mxu1 %v28954_v63  ;;  %v15920_v2 = vpop.permute.xlu1 %15919 }
0x1760   :  { %21880 = vmatpush3.msra.mxu1 %v15747_v20 }
0x1761   :  { %v16087_v43 = vpop.permute.xlu0 %16086  ;;  %21881 = vmatprep.subr.mxu1 %v28954_v63 }
0x1762   :  { %21882 = vmatpush3.msra.mxu1 %v15745_v32 }
0x1763   :  { %21883 = vmatprep.subr.mxu1 %v28954_v63  ;;  %v15918_v45 = vpop.permute.xlu1 %15917 }
0x1764   :  { %21884 = vmatpush3.msra.mxu1 %v15743_v24 }
0x1765   :  { %v16085_v6 = vpop.permute.xlu0 %16084  ;;  %21886 = vmatmul.mubr.msk.f32.vlgmr.msra.gmra.mxu1 %vm7455_vm10, %v18003_v9  ;;  %21947 = vmatprep.subr.mxu1 %v28954_v63 }
0x1766   :  { %21948 = vmatpush3.msra.mxu1 %v16091_v55  ;;  %21888 = vmatprep.mubr.msk.f32.mxu1 %vm22036_vm4, %v28954_v63 }
0x1767   :  { %v15916_v61 = vpop.permute.xlu1 %15915  ;;  %21949 = vmatprep.subr.mxu1 %v28954_v63 }
0x1769   :  { %v16083_v33 = vpop.permute.xlu0 %16082  ;;  %21889 = vmatmul.mubr.msk.f32.gmra.mxu1 %vm7455_vm10, %v18004_v23 }
0x176a   :  { %21891 = vmatprep.mubr.msk.f32.mxu1 %vm22036_vm4, %v28954_v63 }
0x176b   :  { %v15924_v30 = vpop.permute.xlu1 %15923 }
0x176c   :  { %21909 = vmatpush3.msra.mxu0 %v15924_v30 }
0x176d   :  { %v16089_v56 = vpop.permute.xlu0 %16088  ;;  %21892 = vmatmul.mubr.msk.f32.gmra.mxu1 %vm7455_vm10, %v18005_v37  ;;  %21910 = vmatprep.subr.mxu0 %v28954_v63 }
0x176e   :  { %21911 = vmatpush3.msra.mxu0 %v15922_v46  ;;  %21950 = vmatpush3.msra.mxu1 %v16089_v56 }
0x176f   :  { %21951 = vmatprep.subr.mxu1 %v28954_v63  ;;  %v15914_v25 = vpop.permute.xlu1 %15913  ;;  %21912 = vmatprep.subr.mxu0 %v28954_v63 }
0x1770   :  { %21894 = vmatprep.mubr.msk.f32.mxu1 %vm22036_vm4, %v28954_v63  ;;  %21913 = vmatpush3.msra.mxu0 %v15920_v2 }
0x1771   :  { %21952 = vmatpush3.msra.mxu1 %v16087_v43  ;;  %v16081_v57 = vpop.permute.xlu0 %16080  ;;  %21914 = vmatprep.subr.mxu0 %v28954_v63 }
0x1772   :  { %21895 = vmatmul.mubr.msk.f32.gmra.mxu1 %vm7455_vm10, %v18006_v49  ;;  %21953 = vmatprep.subr.mxu1 %v28954_v63 }
0x1773   :  { %21915 = vmatpush3.msra.mxu0 %v15918_v45  ;;  %21954 = vmatpush3.msra.mxu1 %v16085_v6  ;;  %v15912_v26 = vpop.permute.xlu1 %15911 }
0x1774   :  { %21955 = vmatprep.subr.mxu1 %v28954_v63  ;;  %21916 = vmatprep.subr.mxu0 %v28954_v63 }
0x1775   :  { %21897 = vmatprep.mubr.msk.f32.mxu1 %vm22036_vm4, %v28954_v63  ;;  %21917 = vmatpush3.msra.mxu0 %v15916_v61  ;;  %v16079_v5 = vpop.permute.xlu0 %16078 }
0x1776   :  { %21956 = vmatpush3.msra.mxu1 %v16083_v33  ;;  %21918 = vmatprep.subr.mxu0 %v28954_v63 }
0x1777   :  { %21898 = vmatmul.mubr.msk.f32.gmra.mxu1 %vm7455_vm10, %v18007_v19  ;;  %21957 = vmatprep.subr.mxu1 %v28954_v63  ;;  %v15910_v62 = vpop.permute.xlu1 %15909 }
0x1778   :  { %21919 = vmatpush3.msra.mxu0 %v15914_v25  ;;  %21958 = vmatpush3.msra.mxu1 %v16081_v57 }
0x1779   :  { %21959 = vmatprep.subr.mxu1 %v28954_v63  ;;  %21920 = vmatprep.subr.mxu0 %v28954_v63  ;;  %v16077_v28 = vpop.permute.xlu0 %16076 }
0x177a   :  { %21900 = vmatprep.mubr.msk.f32.mxu1 %vm22036_vm4, %v28954_v63  ;;  %21921 = vmatpush3.msra.mxu0 %v15912_v26 }
0x177b   :  { %21960 = vmatpush3.msra.mxu1 %v16079_v5  ;;  %21922 = vmatprep.subr.mxu0 %v28954_v63  ;;  %v15908_v34 = vpop.permute.xlu1 %15907 }
0x177c   :  { %21901 = vmatmul.mubr.msk.f32.gmra.mxu1 %vm7455_vm10, %v18008_v10  ;;  %21961 = vmatprep.subr.mxu1 %v28954_v63  ;;  %v15588_v10 = vld [vmem:[%s28732_s12 + $0x28] sm:$0xff] }
0x177d   :  { %21923 = vmatpush3.msra.mxu0 %v15910_v62  ;;  %21962 = vmatpush3.msra.mxu1 %v16077_v28  ;;  %v16075_v39 = vpop.permute.xlu0 %16074 }
0x177e   :  { %21924 = vmatprep.subr.mxu0 %v28954_v63  ;;  %21903 = vmatprep.mubr.msk.f32.mxu1 %vm22036_vm4, %v28954_v63 }
0x177f   :  { %21925 = vmatpush3.msra.mxu0 %v15908_v34  ;;  %21963 = vmatprep.subr.mxu1 %v28954_v63  ;;  %v16073_v36 = vpop.permute.xlu1 %16072  ;;  %v15589_v34 = vld [vmem:[%s28732_s12 + $0x30] sm:$0x3] }
0x1780   :  { %21904 = vmatmul.mubr.msk.f32.gmra.mxu1 %vm7455_vm10, %v18009_v50  ;;  %21927 = vmatmul.mubr.msk.f32.vlgmr.msra.gmra.mxu0 %vm7455_vm10, %v18017_v29 }
0x1781   :  { %21964 = vmatpush3.msra.mxu1 %v16075_v39  ;;  %21929 = vmatprep.mubr.msk.f32.mxu0 %vm22036_vm4, %v28954_v63  ;;  %v15587_v39 = vld [vmem:[%s28732_s12 + $0x20] sm:$0xff] }
0x1782   :  { %21965 = vmatprep.subr.mxu1 %v28954_v63  ;;  %21967 = vmatprep.mubr.msk.f32.mxu1 %vm22036_vm4, %v28954_v63 }
0x1783   :  { %21966 = vmatpush3.msra.mxu1 %v16073_v36  ;;  %21988 = vmatprep.subr.mxu0 %v28954_v63 }
0x1784   :  { %21930 = vmatmul.mubr.msk.f32.gmra.mxu0 %vm7455_vm10, %v18018_v7  ;;  %21968 = vmatmul.mubr.msk.f32.vlgmr.msra.gmra.mxu1 %vm7455_vm10, %v18031_v52 }
0x1785   :  { %21932 = vmatprep.mubr.msk.f32.mxu0 %vm22036_vm4, %v28954_v63  ;;  %21970 = vmatprep.mubr.msk.f32.mxu1 %vm22036_vm4, %v28954_v63 }
0x1788   :  { %21933 = vmatmul.mubr.msk.f32.gmra.mxu0 %vm7455_vm10, %v18019_v15  ;;  %21971 = vmatmul.mubr.msk.f32.gmra.mxu1 %vm7455_vm10, %v18032_v31  ;;  %v15586_v31 = vld [vmem:[%s28732_s12 + $0x18] sm:$0xff] }
0x1789   :  { %21935 = vmatprep.mubr.msk.f32.mxu0 %vm22036_vm4, %v28954_v63  ;;  %21973 = vmatprep.mubr.msk.f32.mxu1 %vm22036_vm4, %v28954_v63 }
0x178c   :  { %21936 = vmatmul.mubr.msk.f32.gmra.mxu0 %vm7455_vm10, %v18020_v51  ;;  %21974 = vmatmul.mubr.msk.f32.gmra.mxu1 %vm7455_vm10, %v18033_v17 }
0x178d   :  { %21938 = vmatprep.mubr.msk.f32.mxu0 %vm22036_vm4, %v28954_v63  ;;  %21976 = vmatprep.mubr.msk.f32.mxu1 %vm22036_vm4, %v28954_v63 }
0x1790   :  { %21939 = vmatmul.mubr.msk.f32.gmra.mxu0 %vm7455_vm10, %v18021_v1  ;;  %21977 = vmatmul.mubr.msk.f32.gmra.mxu1 %vm7455_vm10, %v18034_v54  ;;  %v15585_v54 = vld [vmem:[%s28732_s12 + $0x10] sm:$0xff] }
0x1791   :  { %21941 = vmatprep.mubr.msk.f32.mxu0 %vm22036_vm4, %v28954_v63  ;;  %21979 = vmatprep.mubr.msk.f32.mxu1 %vm22036_vm4, %v28954_v63 }
0x1794   :  { %21942 = vmatmul.mubr.msk.f32.gmra.mxu0 %vm7455_vm10, %v18022_v22  ;;  %21980 = vmatmul.mubr.msk.f32.gmra.mxu1 %vm7455_vm10, %v18035_v8 }
0x1795   :  { %21944 = vmatprep.mubr.msk.f32.mxu0 %vm22036_vm4, %v28954_v63  ;;  %21982 = vmatprep.mubr.msk.f32.mxu1 %vm22036_vm4, %v28954_v63 }
0x1798   :  { %21945 = vmatmul.mubr.msk.f32.gmra.mxu0 %vm7455_vm10, %v18023_v27  ;;  %21983 = vmatmul.mubr.msk.f32.gmra.mxu1 %vm7455_vm10, %v18036_v59  ;;  %v15584_v27 = vld [vmem:[%s28732_s12 + $0x8] sm:$0xff] }
0x1799   :  { %21985 = vmatprep.mubr.msk.f32.mxu1 %vm22036_vm4, %v28954_v63  ;;  %22002 = vmatprep.mubr.msk.f32.mxu0 %vm22036_vm4, %v28954_v63 }
0x179c   :  { %21986 = vmatmul.mubr.msk.f32.gmra.mxu1 %vm7455_vm10, %v18037_v47 }
0x17b2   :  { %v28660_v38 = vpop.f32.mrf.mxu0 }
0x17b4   :  { %v21846_v18 = vpop.f32.mrf.mxu0 }
0x17b6   :  { %v28662_v16 = vpop.f32.mrf.mxu0 }
0x17b8   :  { %v21849_v41 = vpop.f32.mrf.mxu0 }
0x17ba   :  { %v28664_v58 = vpop.f32.mrf.mxu0 }
0x17bc   :  { %v21852_v48 = vpop.f32.mrf.mxu0 }
0x17be   :  { %v15699_v0 = vpop.f32.mrf.mxu0 }
0x17bf   :  { %v15721_v59 = vadd.f32 %v15699_v0, %v15586_v31 }
0x17c0   :  { %v21855_v21 = vpop.f32.mrf.mxu0 }
0x17c1   :  { %v15583_v21 = vld [vmem:[%s28732_s12] sm:$0xff] }
0x17c2   :  { %v15704_v35 = vpop.f32.mrf.mxu0 }
0x17c3   :  { %v15722_v1 = vadd.f32 %v15704_v35, %v15587_v39  ;;  %v15720_v35 = vadd.f32 %v28664_v58, %v15585_v54 }
0x17c4   :  { %v21858_v14 = vpop.f32.mrf.mxu0 }
0x17c6   :  { %v15709_v60 = vpop.f32.mrf.mxu0 }
0x17c7   :  { %v15723_v52 = vadd.f32 %v15709_v60, %v15588_v10 }
0x17c8   :  { %v21861_v12 = vpop.f32.mrf.mxu0 }
0x17ca   :  { %v15714_v13 = vpop.f32.mrf.mxu0 }
0x17cb   :  { %v15724_v15 = vadd.f32 %v15714_v13, %v15589_v34  ;;  %v15719_v13 = vadd.f32 %v28662_v16, %v15584_v27 }
0x17cc   :  { %v21864_v20 = vpop.f32.mrf.mxu0 }
0x1825   :  { %v28666_v53 = vpop.f32.mrf.mxu1 }
0x1827   :  { %v21887_v4 = vpop.f32.mrf.mxu1 }
0x1829   :  { %v28668_v42 = vpop.f32.mrf.mxu1 }
0x182b   :  { %v21890_v44 = vpop.f32.mrf.mxu1 }
0x182d   :  { %v15869_v3 = vpop.f32.mrf.mxu1 }
0x182f   :  { %v21893_v11 = vpop.f32.mrf.mxu1 }
0x1832   :  { %v15874_v32 = vpop.f32.mrf.mxu1 }
0x1833   :  { %v15896_v4 = vadd.f32 %v15874_v32, %v15721_v59 }
0x1834   :  { %v21896_v24 = vpop.f32.mrf.mxu1 }
0x1835   :  { %v15718_v24 = vadd.f32 %v28660_v38, %v15583_v21 }
0x1837   :  { %v15879_v40 = vpop.f32.mrf.mxu1  ;;  %v15893_v16 = vadd.f32 %v28666_v53, %v15718_v24 }
0x1838   :  { %v15897_v14 = vadd.f32 %v15879_v40, %v15722_v1 }
0x1839   :  { %v21899_v46 = vpop.f32.mrf.mxu1 }
0x183c   :  { %v15884_v55 = vpop.f32.mrf.mxu1 }
0x183d   :  { %v15898_v47 = vadd.f32 %v15884_v55, %v15723_v52  ;;  %v15895_v55 = vadd.f32 %v15869_v3, %v15720_v35 }
0x183e   :  { %v21902_v2 = vpop.f32.mrf.mxu1 }
0x1840   :  { %v15889_v43 = vpop.f32.mrf.mxu1  ;;  %v28670_v9 = vpop.f32.mrf.mxu0 }
0x1841   :  { %v15899_v18 = vadd.f32 %v15889_v43, %v15724_v15  ;;  %v16058_v38 = vadd.f32 %v28670_v9, %v15893_v16  ;;  %v16237_v9 = vld [vmem:[%s28733_s13] sm:$0x3] }
0x1842   :  { %v21905_v45 = vpop.f32.mrf.mxu1  ;;  %v21928_v6 = vpop.f32.mrf.mxu0 }
0x1843   :  { %v15894_v6 = vadd.f32 %v28668_v42, %v15719_v13 }
0x1844   :  { %v16029_v23 = vpop.f32.mrf.mxu0  ;;  %v28672_v61 = vpop.f32.mrf.mxu1 }
0x1845   :  { %v16059_v32 = vadd.f32 %v16029_v23, %v15894_v6  ;;  %v16223_v42 = vadd.f32 %v28672_v61, %v16058_v38  ;;  %v16238_v61 = vld [vmem:[%s28734_s14] sm:$0x3] }
0x1846   :  { %v21931_v33 = vpop.f32.mrf.mxu0  ;;  %v21969_v37 = vpop.f32.mrf.mxu1 }
0x1847   :  { %v16230_v23 = vmax.f32 %v16223_v42, 0.0 }
0x1848   :  { %v16034_v30 = vpop.f32.mrf.mxu0  ;;  %v16194_v56 = vpop.f32.mrf.mxu1 }
0x1849   :  { %v16060_v58 = vadd.f32 %v16034_v30, %v15895_v55  ;;  %v16224_v3 = vadd.f32 %v16194_v56, %v16059_v32 }
0x184a   :  { %v21934_v25 = vpop.f32.mrf.mxu0  ;;  %v21972_v49 = vpop.f32.mrf.mxu1 }
0x184b   :  { %v16231_v53 = vmax.f32 %v16224_v3, 0.0 }
0x184c   :  { %v16039_v57 = vpop.f32.mrf.mxu0  ;;  %v16199_v26 = vpop.f32.mrf.mxu1 }
0x184d   :  { %v16061_v2 = vadd.f32 %v16039_v57, %v15896_v4  ;;  %v16225_v37 = vadd.f32 %v16199_v26, %v16060_v58 }
0x184e   :  { %v21937_v19 = vpop.f32.mrf.mxu0  ;;  %v21975_v5 = vpop.f32.mrf.mxu1 }
0x184f   :  { %v16232_v30 = vmax.f32 %v16225_v37, 0.0 }
0x1850   :  { %v16044_v62 = vpop.f32.mrf.mxu0  ;;  %v16204_v28 = vpop.f32.mrf.mxu1 }
0x1851   :  { %v16062_v44 = vadd.f32 %v16044_v62, %v15897_v14  ;;  %v16226_v40 = vadd.f32 %v16204_v28, %v16061_v2 }
0x1852   :  { %v21940_v50 = vpop.f32.mrf.mxu0  ;;  %v21978_v29 = vpop.f32.mrf.mxu1 }
0x1853   :  { %v16233_v49 = vmax.f32 %v16226_v40, 0.0 }
0x1854   :  { %v16049_v36 = vpop.f32.mrf.mxu0  ;;  %v16209_v7 = vpop.f32.mrf.mxu1 }
0x1855   :  { %v16063_v60 = vadd.f32 %v16049_v36, %v15898_v47  ;;  %v16227_v43 = vadd.f32 %v16209_v7, %v16062_v44 }
0x1856   :  { %v21943_v51 = vpop.f32.mrf.mxu0  ;;  %v21981_v17 = vpop.f32.mrf.mxu1 }
0x1857   :  { %v16234_v25 = vmax.f32 %v16227_v43, 0.0 }
0x1858   :  { %v16054_v22 = vpop.f32.mrf.mxu0  ;;  %v16214_v8 = vpop.f32.mrf.mxu1 }
0x1859   :  { %v16064_v12 = vadd.f32 %v16054_v22, %v15899_v18  ;;  %v16228_v11 = vadd.f32 %v16214_v8, %v16063_v60 }
0x185a   :  { %v21984_v41 = vpop.f32.mrf.mxu1  ;;  %v21946_v48 = vpop.f32.mrf.mxu0 }
0x185b   :  { %v16235_v33 = vmax.f32 %v16228_v11, 0.0 }
0x185c   :  { %v16219_v20 = vpop.f32.mrf.mxu1 }
0x185d   :  { %v16229_v0 = vadd.f32 %v16219_v20, %v16064_v12 }
0x185e   :  { %v21987_v46 = vpop.f32.mrf.mxu1 }
0x185f   :  { %v16236_v45 = vmax.f32 %v16229_v0, 0.0 }
0x1861   :  { %21989 = vmatpush3.msk.msra.mxu0 %vm8105_vm11, %v16236_v45 }
0x1862   :  { %21990 = vmatprep.subr.mxu0 %v28954_v63 }
0x1863   :  { %21991 = vmatpush3.msra.mxu0 %v16235_v33 }
0x1864   :  { %21992 = vmatprep.subr.mxu0 %v28954_v63 }
0x1865   :  { %21993 = vmatpush3.msra.mxu0 %v16234_v25 }
0x1866   :  { %21994 = vmatprep.subr.mxu0 %v28954_v63 }
0x1867   :  { %21995 = vmatpush3.msra.mxu0 %v16233_v49 }
0x1868   :  { %21996 = vmatprep.subr.mxu0 %v28954_v63 }
0x1869   :  { %21997 = vmatpush3.msra.mxu0 %v16232_v30 }
0x186a   :  { %21998 = vmatprep.subr.mxu0 %v28954_v63 }
0x186b   :  { %21999 = vmatpush3.msra.mxu0 %v16231_v53 }
0x186c   :  { %22000 = vmatprep.subr.mxu0 %v28954_v63 }
0x186d   :  { %22001 = vmatpush3.msra.mxu0 %v16230_v23 }
0x186e   :  { %22003 = vmatmul.mubr.msk.f32.vlgmr.msra.gmra.mxu0 %vm8101_vm12, %v16237_v9 }
0x192e   :  { %v16311_v56 = vpop.f32.mrf.mxu0 }
0x192f   :  { %v16312_v57 = vadd.f32 %v16311_v56, %v16238_v61 }
0x1930   :  { %v22004_v26 = vpop.f32.mrf.mxu0 }
0x1931   :  { %v16316_v19 = vrot.slane %v16312_v57, 1 }
0x1933   :  { %v16318_v5 = vmax.f32 %v16312_v57, %v16316_v19 }
0x1935   :  { %v16319_v62 = vsub.f32 %v16312_v57, %v16318_v5  ;;  %v16321_v28 = vrot.slane %v16318_v5, 7 }
0x1937   :  { %v16323_v10 = vsub.f32 %v16312_v57, %v16321_v28  ;;  %v16324_v34 = vmul.f32 1.442695, %v16319_v62 }
0x1939   :  { %v16326_v50 = vmul.f32 1.442695, %v16323_v10 }
0x193b   :  { %22023 = vpow2.f32 %v16326_v50 }
0x193c   :  { %22025 = vpow2.f32 %v16324_v34 }
0x1948   :  { %v22024_v63 = vpop.eup %22023 }
0x1949   :  { %v16329_v29 = vrot.slane %v22024_v63, 1  ;;  %v22026_v39 = vpop.eup %22025 }
0x194b   :  { %v16331_v36 = vadd.f32 %v22026_v39, %v16329_v29 }
0x194d   :  { %22027 = vlog2.f32 %v16331_v36 }
0x195a   :  { %v22028_v7 = vpop.eup %22027 }
0x195b   :  { %v16333_v52 = vmul.f32 0.6931472, %v22028_v7 }
0x195d   :  { %v16334_v15 = vsub.f32 %v16319_v62, %v16333_v52  ;;  %v16336_v31 = vrot.slane %v16333_v52, 7 }
0x195f   :  { %v16338_v51 = vsub.f32 %v16323_v10, %v16336_v31  ;;  %v16339_v17 = vmul.f32 1.442695, %v16334_v15 }
0x1961   :  { %v16342_v1 = vmul.f32 1.442695, %v16338_v51  ;;  %22029 = vpow2.f32 %v16339_v17 }
0x1963   :  { %22031 = vpow2.f32 %v16342_v1 }
0x196e   :  { %v22030_v54 = vpop.eup %22029 }
0x196f   :  { %v16341_v27 = vmul.f32 %v22030_v54, %v16334_v15 }
0x1970   :  { %v22032_v22 = vpop.eup %22031 }
0x1971   :  { %v16344_v8 = vmul.f32 %v22032_v22, %v16338_v51 }
0x1973   :  { %v16346_v59 = vrot.slane %v16344_v8, 1 }
0x1975   :  { %v16348_v47 = vadd.f32 %v16346_v59, %v16341_v27 }
0x1977   :  { %v16349_v18 = vsub.f32 0.0, %v16348_v47 }
0x1979   :  { %16350 = vst.msk [vmem:[%s28735_s15 + $0x1] sm:$0x1] %vm8214_vm13, %v16349_v18 }

</bundles_post_ra>
